<compile_context>
chip_gen: v6e
topology: v6e:2x2x1
jax: 0.10.0
libtpu: 0.0.40
codegen_flags: <defaults>
</compile_context>

<pallas_src>
from functools import partial

import numpy as np
import jax
import jax.numpy as jnp
from jax.experimental import pallas as pl
from jax.experimental.pallas import tpu as pltpu

K = 4          # kernel size
STRIDE = 2
PAD = 1


# ----------------------------- Pallas kernel --------------------------------
def _apply_act(y, act):
    if act == "relu":
        return jnp.maximum(y, 0.0)
    if act == "sigmoid":
        return jax.nn.sigmoid(y)
    return y


def _phase_deconv_kernel(x_ref, w_ref, b_ref, o_ref, col_ref, *,
                         tr, wdim, cin, cout, act, fold_b):
    """One (batch, row-tile) step of ConvTranspose2d(k=4, s=2, p=1) + bias + act.

    x_ref  : (1, H+2, W+2, Cin)        zero-padded (by 1) input image of this batch
    w_ref  : fold_b=False -> (2, 2, 2, 2, Cin, Cout)   taps indexed [a, b, dh, dw]
             fold_b=True  -> (2, 3, 2, Cin, 2*Cout)    taps indexed [a, e, dh]
    b_ref  : (1, 2*Cout)               bias tiled over the two column phases
    o_ref  : (1, TR, 2, W, 2*Cout)     exact NHWC memory layout of the output rows
    col_ref: (3, TR+2, W, Cin)         scratch: column-shifted copies of the row band
    """
    row0 = pl.program_id(1) * tr

    # Column im2col: build the 3 shifted views of this row band once per step and
    # reuse them for every tap matmul.
    for e in range(3):
        col_ref[e] = x_ref[0, pl.ds(row0, tr + 2), e:e + wdim, :]

    bias = b_ref[...]                                        # (1, 2*Cout)

    for a in range(2):                                       # output row phase
        if fold_b:
            # Column phase folded into the matmul N dim (used when Cout is narrow).
            acc = jnp.zeros((tr * wdim, 2 * cout), jnp.float32)
            for dh in range(2):
                for e in range(3):
                    lhs = col_ref[e, a + dh:a + dh + tr].reshape(tr * wdim, cin)
                    acc = acc + jax.lax.dot_general(
                        lhs, w_ref[a, e, dh],
                        dimension_numbers=(((1,), (0,)), ((), ())),
                        preferred_element_type=jnp.float32)
            y = acc
        else:
            halves = []
            for b in range(2):                               # output column phase
                acc = jnp.zeros((tr * wdim, cout), jnp.float32)
                for dh in range(2):
                    for dw in range(2):
                        lhs = col_ref[b + dw, a + dh:a + dh + tr].reshape(tr * wdim, cin)
                        acc = acc + jax.lax.dot_general(
                            lhs, w_ref[a, b, dh, dw],
                            dimension_numbers=(((1,), (0,)), ((), ())),
                            preferred_element_type=jnp.float32)
                halves.append(acc)
            # Lane-aligned concat: only taken when Cout % 128 == 0.
            y = jnp.concatenate(halves, axis=-1)
        y = _apply_act(y + bias, act)
        o_ref[0, :, a, :, :] = y.reshape(tr, wdim, 2 * cout).astype(o_ref.dtype)


# --------------------------- weight preparation ------------------------------
def _phase_weights(w_t):
    """PyTorch ConvTranspose2d weight (Cin, Cout, K, K) -> (2, 2, 2, 2, Cin, Cout)
    phase taps indexed [a, b, dh, dw] with kh = 3-2dh-a, kw = 3-2dw-b."""
    A, B, DH, DW = np.meshgrid(*([np.arange(2)] * 4), indexing="ij")
    kh = 3 - 2 * DH - A
    kw = 3 - 2 * DW - B
    g = w_t[:, :, kh, kw]                                    # (Cin, Cout, 2, 2, 2, 2)
    return jnp.transpose(g, (2, 3, 4, 5, 0, 1))


def _phase_weights_folded(w_t):
    """(Cin, Cout, K, K) -> (2, 3, 2, Cin, 2*Cout): column phase folded into the
    matmul N dim (zero-padded taps); used when Cout is lane-narrow (last layer)."""
    cin, cout = w_t.shape[0], w_t.shape[1]
    wf = jnp.zeros((2, 3, 2, cin, 2 * cout), w_t.dtype)
    for a in range(2):
        for dh in range(2):
            kh = 3 - 2 * dh - a
            for b in range(2):
                for dw in range(2):
                    kw = 3 - 2 * dw - b
                    wf = wf.at[a, b + dw, dh, :, b * cout:(b + 1) * cout].set(
                        w_t[:, :, kh, kw])
    return wf


def _flip_weight(w_t):
    """(Cin, Cout, K, K) -> conv weight (K, K, Cin, Cout) (reference path only)."""
    return jnp.transpose(w_t[:, :, ::-1, ::-1], (2, 3, 0, 1))


# ------------------------------ layer wrapper -------------------------------
def deconv_layer(x_nhwc, w_t, bias, act):
    """ConvTranspose2d(k=4, s=2, p=1) + activation, NHWC in / NHWC out."""
    n, h, w, cin = x_nhwc.shape
    cout = w_t.shape[1]
    tr = next(c for c in (4, 2, 1) if h % c == 0)            # row tile of the input
    t_tiles = h // tr
    fold_b = (cout % 128) != 0

    xp = jnp.pad(x_nhwc, ((0, 0), (1, 1), (1, 1), (0, 0)))   # 1-pixel halo only
    wk = _phase_weights_folded(w_t) if fold_b else _phase_weights(w_t)
    b2 = jnp.concatenate([bias, bias]).reshape(1, 2 * cout)

    kern = partial(_phase_deconv_kernel, tr=tr, wdim=w, cin=cin, cout=cout,
                   act=act, fold_b=fold_b)

    out_v = pl.pallas_call(
        kern,
        out_shape=jax.ShapeDtypeStruct((n, h, 2, w, 2 * cout), x_nhwc.dtype),
        grid_spec=pltpu.PrefetchScalarGridSpec(
            num_scalar_prefetch=0,
            grid=(n, t_tiles),
            in_specs=[
                pl.BlockSpec((1, h + 2, w + 2, cin), lambda i, t: (i, 0, 0, 0)),
                pl.BlockSpec(wk.shape, lambda i, t: (0,) * wk.ndim),
                pl.BlockSpec((1, 2 * cout), lambda i, t: (0, 0)),
            ],
            out_specs=pl.BlockSpec((1, tr, 2, w, 2 * cout),
                                   lambda i, t: (i, t, 0, 0, 0)),
            scratch_shapes=[pltpu.VMEM((3, tr + 2, w, cin), x_nhwc.dtype)],
        ),
        compiler_params=pltpu.CompilerParams(
            dimension_semantics=("parallel", "parallel"),
            vmem_limit_bytes=32 * 1024 * 1024,
        ),
    )(xp, wk, b2)

    # (N, H, 2, W, 2*Cout) is the exact memory layout of NHWC (N, 2H, 2W, Cout),
    # so this reshape is a free bitcast.
    return out_v.reshape(n, 2 * h, 2 * w, cout)


# ------------------------------- full model ---------------------------------
def init_params(key, input_channels, output_channels):
    """Deterministic synthetic init mirroring the PyTorch module's shapes.

    ConvTranspose2d weight layout: (in_channels, out_channels, K, K).
    """
    chans = [(input_channels, 256), (256, 128), (128, output_channels)]
    params = []
    for (cin, cout) in chans:
        key, kw_, kb = jax.random.split(key, 3)
        bound = 1.0 / np.sqrt(cin * K * K)
        wgt = jax.random.uniform(kw_, (cin, cout, K, K), jnp.float32, -bound, bound)
        b = jax.random.uniform(kb, (cout,), jnp.float32, -bound, bound)
        params.append((wgt, b))
    return params


def deconvnet_forward(x_nchw, params):
    """Forward pass matching DeconvNet.forward; NCHW in / NCHW out."""
    x = jnp.transpose(x_nchw, (0, 2, 3, 1))                  # NCHW -> NHWC
    acts = ("relu", "relu", "sigmoid")
    for (wgt, b), act in zip(params, acts):
        x = deconv_layer(x, wgt, b, act)
    return jnp.transpose(x, (0, 3, 1, 2))                    # NHWC -> NCHW


# --------------------------- pure-JAX reference ------------------------------
def _ref_forward(x_nchw, params):
    x = jnp.transpose(x_nchw, (0, 2, 3, 1))
    acts = ("relu", "relu", "sigmoid")
    for (wgt, b), act in zip(params, acts):
        wf = _flip_weight(wgt)
        y = jax.lax.conv_general_dilated(
            x, wf, window_strides=(1, 1), padding=((2, 2), (2, 2)),
            lhs_dilation=(2, 2),
            dimension_numbers=("NHWC", "HWIO", "NHWC"))
        y = y + b
        x = jnp.maximum(y, 0.0) if act == "relu" else jax.nn.sigmoid(y)
    return jnp.transpose(x, (0, 3, 1, 2))


# ----------------------------------- main ------------------------------------
if __name__ == "__main__":
    key = jax.random.PRNGKey(0)
    k_in, k_par = jax.random.split(key)

    batch, in_ch, out_ch, spatial = 2, 4, 3, 8
    x = jax.random.normal(k_in, (batch, in_ch, spatial, spatial), jnp.float32)
    params = init_params(k_par, in_ch, out_ch)

    fwd = jax.jit(deconvnet_forward)
    out = jax.block_until_ready(fwd(x, params))
    assert out.shape == (batch, out_ch, spatial * 8, spatial * 8), out.shape

    ref = jax.block_until_ready(_ref_forward(x, params))
    np.testing.assert_allclose(np.asarray(out), np.asarray(ref),
                               rtol=2e-3, atol=2e-3)

    print("KERNEL_OK")
</pallas_src>

<mosaic_0001>
module attributes {stable_mosaic.version = 11 : i64} {
  func.func @_phase_deconv_kernel(%arg0: i32, %arg1: i32, %arg2: memref<1x10x10x4xf32, #tpu.memory_space<vmem>>, %arg3: memref<2x2x2x2x4x256xf32, #tpu.memory_space<vmem>>, %arg4: memref<1x512xf32, #tpu.memory_space<vmem>>, %arg5: memref<1x4x2x8x512xf32, #tpu.memory_space<vmem>>, %arg6: memref<3x6x8x4xf32, #tpu.memory_space<vmem>>) attributes {dimension_semantics = [#tpu.dimension_semantics<parallel>, #tpu.dimension_semantics<parallel>], iteration_bounds = array<i64: 2, 2>, scalar_prefetch = 0 : i64, scratch_operands = 1 : i64, tpu.core_type = #tpu.core_type<tc>, window_params = [{transform_indices = @transform_0, window_bounds = array<i64: 1, 10, 10, 4>}, {pipeline_mode = #tpu.pipeline_mode<synchronous>, transform_indices = @transform_1, window_bounds = array<i64: 2, 2, 2, 2, 4, 256>}, {pipeline_mode = #tpu.pipeline_mode<synchronous>, transform_indices = @transform_2, window_bounds = array<i64: 1, 512>}, {transform_indices = @transform_3, window_bounds = array<i64: 1, 4, 2, 8, 512>}]} {
    %c4_i32 = arith.constant 4 : i32
    %0 = arith.muli %arg1, %c4_i32 : i32
    %c0 = arith.constant 0 : index
    %1 = arith.index_cast %0 : i32 to index
    %c0_0 = arith.constant 0 : index
    %c0_1 = arith.constant 0 : index
    %2 = vector.load %arg2[%c0, %1, %c0_0, %c0_1] : memref<1x10x10x4xf32, #tpu.memory_space<vmem>>, vector<1x6x8x4xf32>
    %3 = vector.shape_cast %2 : vector<1x6x8x4xf32> to vector<6x8x4xf32>
    %c0_2 = arith.constant 0 : index
    %c0_3 = arith.constant 0 : index
    %c0_4 = arith.constant 0 : index
    %c0_5 = arith.constant 0 : index
    %4 = vector.load %arg6[%c0_2, %c0_3, %c0_4, %c0_5] : memref<3x6x8x4xf32, #tpu.memory_space<vmem>>, vector<1x6x8x4xf32>
    %5 = vector.shape_cast %4 : vector<1x6x8x4xf32> to vector<6x8x4xf32>
    %6 = vector.shape_cast %3 : vector<6x8x4xf32> to vector<1x6x8x4xf32>
    tpu.vector_store %arg6[%c0_2, %c0_3, %c0_4, %c0_5], %6 {strides = array<i32>} : memref<3x6x8x4xf32, #tpu.memory_space<vmem>>, vector<1x6x8x4xf32>,
    %c0_6 = arith.constant 0 : index
    %7 = arith.index_cast %0 : i32 to index
    %c1 = arith.constant 1 : index
    %c0_7 = arith.constant 0 : index
    %8 = vector.load %arg2[%c0_6, %7, %c1, %c0_7] : memref<1x10x10x4xf32, #tpu.memory_space<vmem>>, vector<1x6x8x4xf32>
    %9 = vector.shape_cast %8 : vector<1x6x8x4xf32> to vector<6x8x4xf32>
    %c1_8 = arith.constant 1 : index
    %c0_9 = arith.constant 0 : index
    %c0_10 = arith.constant 0 : index
    %c0_11 = arith.constant 0 : index
    %10 = vector.load %arg6[%c1_8, %c0_9, %c0_10, %c0_11] : memref<3x6x8x4xf32, #tpu.memory_space<vmem>>, vector<1x6x8x4xf32>
    %11 = vector.shape_cast %10 : vector<1x6x8x4xf32> to vector<6x8x4xf32>
    %12 = vector.shape_cast %9 : vector<6x8x4xf32> to vector<1x6x8x4xf32>
    tpu.vector_store %arg6[%c1_8, %c0_9, %c0_10, %c0_11], %12 {strides = array<i32>} : memref<3x6x8x4xf32, #tpu.memory_space<vmem>>, vector<1x6x8x4xf32>,
    %c0_12 = arith.constant 0 : index
    %13 = arith.index_cast %0 : i32 to index
    %c2 = arith.constant 2 : index
    %c0_13 = arith.constant 0 : index
    %14 = vector.load %arg2[%c0_12, %13, %c2, %c0_13] : memref<1x10x10x4xf32, #tpu.memory_space<vmem>>, vector<1x6x8x4xf32>
    %15 = vector.shape_cast %14 : vector<1x6x8x4xf32> to vector<6x8x4xf32>
    %c2_14 = arith.constant 2 : index
    %c0_15 = arith.constant 0 : index
    %c0_16 = arith.constant 0 : index
    %c0_17 = arith.constant 0 : index
    %16 = vector.load %arg6[%c2_14, %c0_15, %c0_16, %c0_17] : memref<3x6x8x4xf32, #tpu.memory_space<vmem>>, vector<1x6x8x4xf32>
    %17 = vector.shape_cast %16 : vector<1x6x8x4xf32> to vector<6x8x4xf32>
    %18 = vector.shape_cast %15 : vector<6x8x4xf32> to vector<1x6x8x4xf32>
    tpu.vector_store %arg6[%c2_14, %c0_15, %c0_16, %c0_17], %18 {strides = array<i32>} : memref<3x6x8x4xf32, #tpu.memory_space<vmem>>, vector<1x6x8x4xf32>,
    %c0_18 = arith.constant 0 : index
    %c0_19 = arith.constant 0 : index
    %19 = vector.load %arg4[%c0_18, %c0_19] : memref<1x512xf32, #tpu.memory_space<vmem>>, vector<1x512xf32>
    %cst = arith.constant 0.000000e+00 : f32
    %20 = vector.broadcast %cst : f32 to vector<32x256xf32>
    %c0_20 = arith.constant 0 : index
    %c0_21 = arith.constant 0 : index
    %c0_22 = arith.constant 0 : index
    %c0_23 = arith.constant 0 : index
    %21 = vector.load %arg6[%c0_20, %c0_21, %c0_22, %c0_23] : memref<3x6x8x4xf32, #tpu.memory_space<vmem>>, vector<1x4x8x4xf32>
    %22 = vector.shape_cast %21 : vector<1x4x8x4xf32> to vector<4x8x4xf32>
    %23 = vector.shape_cast %22 : vector<4x8x4xf32> to vector<32x4xf32>
    %c0_24 = arith.constant 0 : index
    %c0_25 = arith.constant 0 : index
    %c0_26 = arith.constant 0 : index
    %c0_27 = arith.constant 0 : index
    %c0_28 = arith.constant 0 : index
    %c0_29 = arith.constant 0 : index
    %24 = vector.load %arg3[%c0_24, %c0_25, %c0_26, %c0_27, %c0_28, %c0_29] : memref<2x2x2x2x4x256xf32, #tpu.memory_space<vmem>>, vector<1x1x1x1x4x256xf32>
    %25 = vector.shape_cast %24 : vector<1x1x1x1x4x256xf32> to vector<4x256xf32>
    %cst_30 = arith.constant dense<0.000000e+00> : vector<32x256xf32>
    %26 = tpu.matmul %23, %25, %cst_30 {dimension_numbers = #tpu.dot_dimension_numbers<[1], [0], [0], [1], [0, 0, 1, 1], [], []>} : vector<32x4xf32>, vector<4x256xf32>, vector<32x256xf32> -> vector<32x256xf32>
    %27 = arith.addf %20, %26 : vector<32x256xf32>
    %c1_31 = arith.constant 1 : index
    %c0_32 = arith.constant 0 : index
    %c0_33 = arith.constant 0 : index
    %c0_34 = arith.constant 0 : index
    %28 = vector.load %arg6[%c1_31, %c0_32, %c0_33, %c0_34] : memref<3x6x8x4xf32, #tpu.memory_space<vmem>>, vector<1x4x8x4xf32>
    %29 = vector.shape_cast %28 : vector<1x4x8x4xf32> to vector<4x8x4xf32>
    %30 = vector.shape_cast %29 : vector<4x8x4xf32> to vector<32x4xf32>
    %c0_35 = arith.constant 0 : index
    %c0_36 = arith.constant 0 : index
    %c0_37 = arith.constant 0 : index
    %c1_38 = arith.constant 1 : index
    %c0_39 = arith.constant 0 : index
    %c0_40 = arith.constant 0 : index
    %31 = vector.load %arg3[%c0_35, %c0_36, %c0_37, %c1_38, %c0_39, %c0_40] : memref<2x2x2x2x4x256xf32, #tpu.memory_space<vmem>>, vector<1x1x1x1x4x256xf32>
    %32 = vector.shape_cast %31 : vector<1x1x1x1x4x256xf32> to vector<4x256xf32>
    %cst_41 = arith.constant dense<0.000000e+00> : vector<32x256xf32>
    %33 = tpu.matmul %30, %32, %cst_41 {dimension_numbers = #tpu.dot_dimension_numbers<[1], [0], [0], [1], [0, 0, 1, 1], [], []>} : vector<32x4xf32>, vector<4x256xf32>, vector<32x256xf32> -> vector<32x256xf32>
    %34 = arith.addf %27, %33 : vector<32x256xf32>
    %c0_42 = arith.constant 0 : index
    %c1_43 = arith.constant 1 : index
    %c0_44 = arith.constant 0 : index
    %c0_45 = arith.constant 0 : index
    %35 = vector.load %arg6[%c0_42, %c1_43, %c0_44, %c0_45] : memref<3x6x8x4xf32, #tpu.memory_space<vmem>>, vector<1x4x8x4xf32>
    %36 = vector.shape_cast %35 : vector<1x4x8x4xf32> to vector<4x8x4xf32>
    %37 = vector.shape_cast %36 : vector<4x8x4xf32> to vector<32x4xf32>
    %c0_46 = arith.constant 0 : index
    %c0_47 = arith.constant 0 : index
    %c1_48 = arith.constant 1 : index
    %c0_49 = arith.constant 0 : index
    %c0_50 = arith.constant 0 : index
    %c0_51 = arith.constant 0 : index
    %38 = vector.load %arg3[%c0_46, %c0_47, %c1_48, %c0_49, %c0_50, %c0_51] : memref<2x2x2x2x4x256xf32, #tpu.memory_space<vmem>>, vector<1x1x1x1x4x256xf32>
    %39 = vector.shape_cast %38 : vector<1x1x1x1x4x256xf32> to vector<4x256xf32>
    %cst_52 = arith.constant dense<0.000000e+00> : vector<32x256xf32>
    %40 = tpu.matmul %37, %39, %cst_52 {dimension_numbers = #tpu.dot_dimension_numbers<[1], [0], [0], [1], [0, 0, 1, 1], [], []>} : vector<32x4xf32>, vector<4x256xf32>, vector<32x256xf32> -> vector<32x256xf32>
    %41 = arith.addf %34, %40 : vector<32x256xf32>
    %c1_53 = arith.constant 1 : index
    %c1_54 = arith.constant 1 : index
    %c0_55 = arith.constant 0 : index
    %c0_56 = arith.constant 0 : index
    %42 = vector.load %arg6[%c1_53, %c1_54, %c0_55, %c0_56] : memref<3x6x8x4xf32, #tpu.memory_space<vmem>>, vector<1x4x8x4xf32>
    %43 = vector.shape_cast %42 : vector<1x4x8x4xf32> to vector<4x8x4xf32>
    %44 = vector.shape_cast %43 : vector<4x8x4xf32> to vector<32x4xf32>
    %c0_57 = arith.constant 0 : index
    %c0_58 = arith.constant 0 : index
    %c1_59 = arith.constant 1 : index
    %c1_60 = arith.constant 1 : index
    %c0_61 = arith.constant 0 : index
    %c0_62 = arith.constant 0 : index
    %45 = vector.load %arg3[%c0_57, %c0_58, %c1_59, %c1_60, %c0_61, %c0_62] : memref<2x2x2x2x4x256xf32, #tpu.memory_space<vmem>>, vector<1x1x1x1x4x256xf32>
    %46 = vector.shape_cast %45 : vector<1x1x1x1x4x256xf32> to vector<4x256xf32>
    %cst_63 = arith.constant dense<0.000000e+00> : vector<32x256xf32>
    %47 = tpu.matmul %44, %46, %cst_63 {dimension_numbers = #tpu.dot_dimension_numbers<[1], [0], [0], [1], [0, 0, 1, 1], [], []>} : vector<32x4xf32>, vector<4x256xf32>, vector<32x256xf32> -> vector<32x256xf32>
    %48 = arith.addf %41, %47 : vector<32x256xf32>
    %cst_64 = arith.constant 0.000000e+00 : f32
    %49 = vector.broadcast %cst_64 : f32 to vector<32x256xf32>
    %c1_65 = arith.constant 1 : index
    %c0_66 = arith.constant 0 : index
    %c0_67 = arith.constant 0 : index
    %c0_68 = arith.constant 0 : index
    %50 = vector.load %arg6[%c1_65, %c0_66, %c0_67, %c0_68] : memref<3x6x8x4xf32, #tpu.memory_space<vmem>>, vector<1x4x8x4xf32>
    %51 = vector.shape_cast %50 : vector<1x4x8x4xf32> to vector<4x8x4xf32>
    %52 = vector.shape_cast %51 : vector<4x8x4xf32> to vector<32x4xf32>
    %c0_69 = arith.constant 0 : index
    %c1_70 = arith.constant 1 : index
    %c0_71 = arith.constant 0 : index
    %c0_72 = arith.constant 0 : index
    %c0_73 = arith.constant 0 : index
    %c0_74 = arith.constant 0 : index
    %53 = vector.load %arg3[%c0_69, %c1_70, %c0_71, %c0_72, %c0_73, %c0_74] : memref<2x2x2x2x4x256xf32, #tpu.memory_space<vmem>>, vector<1x1x1x1x4x256xf32>
    %54 = vector.shape_cast %53 : vector<1x1x1x1x4x256xf32> to vector<4x256xf32>
    %cst_75 = arith.constant dense<0.000000e+00> : vector<32x256xf32>
    %55 = tpu.matmul %52, %54, %cst_75 {dimension_numbers = #tpu.dot_dimension_numbers<[1], [0], [0], [1], [0, 0, 1, 1], [], []>} : vector<32x4xf32>, vector<4x256xf32>, vector<32x256xf32> -> vector<32x256xf32>
    %56 = arith.addf %49, %55 : vector<32x256xf32>
    %c2_76 = arith.constant 2 : index
    %c0_77 = arith.constant 0 : index
    %c0_78 = arith.constant 0 : index
    %c0_79 = arith.constant 0 : index
    %57 = vector.load %arg6[%c2_76, %c0_77, %c0_78, %c0_79] : memref<3x6x8x4xf32, #tpu.memory_space<vmem>>, vector<1x4x8x4xf32>
    %58 = vector.shape_cast %57 : vector<1x4x8x4xf32> to vector<4x8x4xf32>
    %59 = vector.shape_cast %58 : vector<4x8x4xf32> to vector<32x4xf32>
    %c0_80 = arith.constant 0 : index
    %c1_81 = arith.constant 1 : index
    %c0_82 = arith.constant 0 : index
    %c1_83 = arith.constant 1 : index
    %c0_84 = arith.constant 0 : index
    %c0_85 = arith.constant 0 : index
    %60 = vector.load %arg3[%c0_80, %c1_81, %c0_82, %c1_83, %c0_84, %c0_85] : memref<2x2x2x2x4x256xf32, #tpu.memory_space<vmem>>, vector<1x1x1x1x4x256xf32>
    %61 = vector.shape_cast %60 : vector<1x1x1x1x4x256xf32> to vector<4x256xf32>
    %cst_86 = arith.constant dense<0.000000e+00> : vector<32x256xf32>
    %62 = tpu.matmul %59, %61, %cst_86 {dimension_numbers = #tpu.dot_dimension_numbers<[1], [0], [0], [1], [0, 0, 1, 1], [], []>} : vector<32x4xf32>, vector<4x256xf32>, vector<32x256xf32> -> vector<32x256xf32>
    %63 = arith.addf %56, %62 : vector<32x256xf32>
    %c1_87 = arith.constant 1 : index
    %c1_88 = arith.constant 1 : index
    %c0_89 = arith.constant 0 : index
    %c0_90 = arith.constant 0 : index
    %64 = vector.load %arg6[%c1_87, %c1_88, %c0_89, %c0_90] : memref<3x6x8x4xf32, #tpu.memory_space<vmem>>, vector<1x4x8x4xf32>
    %65 = vector.shape_cast %64 : vector<1x4x8x4xf32> to vector<4x8x4xf32>
    %66 = vector.shape_cast %65 : vector<4x8x4xf32> to vector<32x4xf32>
    %c0_91 = arith.constant 0 : index
    %c1_92 = arith.constant 1 : index
    %c1_93 = arith.constant 1 : index
    %c0_94 = arith.constant 0 : index
    %c0_95 = arith.constant 0 : index
    %c0_96 = arith.constant 0 : index
    %67 = vector.load %arg3[%c0_91, %c1_92, %c1_93, %c0_94, %c0_95, %c0_96] : memref<2x2x2x2x4x256xf32, #tpu.memory_space<vmem>>, vector<1x1x1x1x4x256xf32>
    %68 = vector.shape_cast %67 : vector<1x1x1x1x4x256xf32> to vector<4x256xf32>
    %cst_97 = arith.constant dense<0.000000e+00> : vector<32x256xf32>
    %69 = tpu.matmul %66, %68, %cst_97 {dimension_numbers = #tpu.dot_dimension_numbers<[1], [0], [0], [1], [0, 0, 1, 1], [], []>} : vector<32x4xf32>, vector<4x256xf32>, vector<32x256xf32> -> vector<32x256xf32>
    %70 = arith.addf %63, %69 : vector<32x256xf32>
    %c2_98 = arith.constant 2 : index
    %c1_99 = arith.constant 1 : index
    %c0_100 = arith.constant 0 : index
    %c0_101 = arith.constant 0 : index
    %71 = vector.load %arg6[%c2_98, %c1_99, %c0_100, %c0_101] : memref<3x6x8x4xf32, #tpu.memory_space<vmem>>, vector<1x4x8x4xf32>
    %72 = vector.shape_cast %71 : vector<1x4x8x4xf32> to vector<4x8x4xf32>
    %73 = vector.shape_cast %72 : vector<4x8x4xf32> to vector<32x4xf32>
    %c0_102 = arith.constant 0 : index
    %c1_103 = arith.constant 1 : index
    %c1_104 = arith.constant 1 : index
    %c1_105 = arith.constant 1 : index
    %c0_106 = arith.constant 0 : index
    %c0_107 = arith.constant 0 : index
    %74 = vector.load %arg3[%c0_102, %c1_103, %c1_104, %c1_105, %c0_106, %c0_107] : memref<2x2x2x2x4x256xf32, #tpu.memory_space<vmem>>, vector<1x1x1x1x4x256xf32>
    %75 = vector.shape_cast %74 : vector<1x1x1x1x4x256xf32> to vector<4x256xf32>
    %cst_108 = arith.constant dense<0.000000e+00> : vector<32x256xf32>
    %76 = tpu.matmul %73, %75, %cst_108 {dimension_numbers = #tpu.dot_dimension_numbers<[1], [0], [0], [1], [0, 0, 1, 1], [], []>} : vector<32x4xf32>, vector<4x256xf32>, vector<32x256xf32> -> vector<32x256xf32>
    %77 = arith.addf %70, %76 : vector<32x256xf32>
    %78 = tpu.concatenate %48, %77 in 1 : vector<32x256xf32>, vector<32x256xf32> -> vector<32x512xf32>
    %79 = vector.broadcast %19 : vector<1x512xf32> to vector<32x512xf32>
    %80 = arith.addf %78, %79 : vector<32x512xf32>
    %cst_109 = arith.constant 0.000000e+00 : f32
    %81 = vector.broadcast %cst_109 : f32 to vector<32x512xf32>
    %82 = arith.maximumf %80, %81 : vector<32x512xf32>
    %83 = vector.shape_cast %82 : vector<32x512xf32> to vector<4x8x512xf32>
    %c0_110 = arith.constant 0 : index
    %c0_111 = arith.constant 0 : index
    %c0_112 = arith.constant 0 : index
    %c0_113 = arith.constant 0 : index
    %c0_114 = arith.constant 0 : index
    %84 = vector.load %arg5[%c0_110, %c0_111, %c0_112, %c0_113, %c0_114] : memref<1x4x2x8x512xf32, #tpu.memory_space<vmem>>, vector<1x4x1x8x512xf32>
    %85 = vector.shape_cast %84 : vector<1x4x1x8x512xf32> to vector<4x8x512xf32>
    %86 = vector.shape_cast %83 : vector<4x8x512xf32> to vector<1x4x1x8x512xf32>
    tpu.vector_store %arg5[%c0_110, %c0_111, %c0_112, %c0_113, %c0_114], %86 {strides = array<i32>} : memref<1x4x2x8x512xf32, #tpu.memory_space<vmem>>, vector<1x4x1x8x512xf32>,
    %cst_115 = arith.constant 0.000000e+00 : f32
    %87 = vector.broadcast %cst_115 : f32 to vector<32x256xf32>
    %c0_116 = arith.constant 0 : index
    %c1_117 = arith.constant 1 : index
    %c0_118 = arith.constant 0 : index
    %c0_119 = arith.constant 0 : index
    %88 = vector.load %arg6[%c0_116, %c1_117, %c0_118, %c0_119] : memref<3x6x8x4xf32, #tpu.memory_space<vmem>>, vector<1x4x8x4xf32>
    %89 = vector.shape_cast %88 : vector<1x4x8x4xf32> to vector<4x8x4xf32>
    %90 = vector.shape_cast %89 : vector<4x8x4xf32> to vector<32x4xf32>
    %c1_120 = arith.constant 1 : index
    %c0_121 = arith.constant 0 : index
    %c0_122 = arith.constant 0 : index
    %c0_123 = arith.constant 0 : index
    %c0_124 = arith.constant 0 : index
    %c0_125 = arith.constant 0 : index
    %91 = vector.load %arg3[%c1_120, %c0_121, %c0_122, %c0_123, %c0_124, %c0_125] : memref<2x2x2x2x4x256xf32, #tpu.memory_space<vmem>>, vector<1x1x1x1x4x256xf32>
    %92 = vector.shape_cast %91 : vector<1x1x1x1x4x256xf32> to vector<4x256xf32>
    %cst_126 = arith.constant dense<0.000000e+00> : vector<32x256xf32>
    %93 = tpu.matmul %90, %92, %cst_126 {dimension_numbers = #tpu.dot_dimension_numbers<[1], [0], [0], [1], [0, 0, 1, 1], [], []>} : vector<32x4xf32>, vector<4x256xf32>, vector<32x256xf32> -> vector<32x256xf32>
    %94 = arith.addf %87, %93 : vector<32x256xf32>
    %c1_127 = arith.constant 1 : index
    %c1_128 = arith.constant 1 : index
    %c0_129 = arith.constant 0 : index
    %c0_130 = arith.constant 0 : index
    %95 = vector.load %arg6[%c1_127, %c1_128, %c0_129, %c0_130] : memref<3x6x8x4xf32, #tpu.memory_space<vmem>>, vector<1x4x8x4xf32>
    %96 = vector.shape_cast %95 : vector<1x4x8x4xf32> to vector<4x8x4xf32>
    %97 = vector.shape_cast %96 : vector<4x8x4xf32> to vector<32x4xf32>
    %c1_131 = arith.constant 1 : index
    %c0_132 = arith.constant 0 : index
    %c0_133 = arith.constant 0 : index
    %c1_134 = arith.constant 1 : index
    %c0_135 = arith.constant 0 : index
    %c0_136 = arith.constant 0 : index
    %98 = vector.load %arg3[%c1_131, %c0_132, %c0_133, %c1_134, %c0_135, %c0_136] : memref<2x2x2x2x4x256xf32, #tpu.memory_space<vmem>>, vector<1x1x1x1x4x256xf32>
    %99 = vector.shape_cast %98 : vector<1x1x1x1x4x256xf32> to vector<4x256xf32>
    %cst_137 = arith.constant dense<0.000000e+00> : vector<32x256xf32>
    %100 = tpu.matmul %97, %99, %cst_137 {dimension_numbers = #tpu.dot_dimension_numbers<[1], [0], [0], [1], [0, 0, 1, 1], [], []>} : vector<32x4xf32>, vector<4x256xf32>, vector<32x256xf32> -> vector<32x256xf32>
    %101 = arith.addf %94, %100 : vector<32x256xf32>
    %c0_138 = arith.constant 0 : index
    %c2_139 = arith.constant 2 : index
    %c0_140 = arith.constant 0 : index
    %c0_141 = arith.constant 0 : index
    %102 = vector.load %arg6[%c0_138, %c2_139, %c0_140, %c0_141] : memref<3x6x8x4xf32, #tpu.memory_space<vmem>>, vector<1x4x8x4xf32>
    %103 = vector.shape_cast %102 : vector<1x4x8x4xf32> to vector<4x8x4xf32>
    %104 = vector.shape_cast %103 : vector<4x8x4xf32> to vector<32x4xf32>
    %c1_142 = arith.constant 1 : index
    %c0_143 = arith.constant 0 : index
    %c1_144 = arith.constant 1 : index
    %c0_145 = arith.constant 0 : index
    %c0_146 = arith.constant 0 : index
    %c0_147 = arith.constant 0 : index
    %105 = vector.load %arg3[%c1_142, %c0_143, %c1_144, %c0_145, %c0_146, %c0_147] : memref<2x2x2x2x4x256xf32, #tpu.memory_space<vmem>>, vector<1x1x1x1x4x256xf32>
    %106 = vector.shape_cast %105 : vector<1x1x1x1x4x256xf32> to vector<4x256xf32>
    %cst_148 = arith.constant dense<0.000000e+00> : vector<32x256xf32>
    %107 = tpu.matmul %104, %106, %cst_148 {dimension_numbers = #tpu.dot_dimension_numbers<[1], [0], [0], [1], [0, 0, 1, 1], [], []>} : vector<32x4xf32>, vector<4x256xf32>, vector<32x256xf32> -> vector<32x256xf32>
    %108 = arith.addf %101, %107 : vector<32x256xf32>
    %c1_149 = arith.constant 1 : index
    %c2_150 = arith.constant 2 : index
    %c0_151 = arith.constant 0 : index
    %c0_152 = arith.constant 0 : index
    %109 = vector.load %arg6[%c1_149, %c2_150, %c0_151, %c0_152] : memref<3x6x8x4xf32, #tpu.memory_space<vmem>>, vector<1x4x8x4xf32>
    %110 = vector.shape_cast %109 : vector<1x4x8x4xf32> to vector<4x8x4xf32>
    %111 = vector.shape_cast %110 : vector<4x8x4xf32> to vector<32x4xf32>
    %c1_153 = arith.constant 1 : index
    %c0_154 = arith.constant 0 : index
    %c1_155 = arith.constant 1 : index
    %c1_156 = arith.constant 1 : index
    %c0_157 = arith.constant 0 : index
    %c0_158 = arith.constant 0 : index
    %112 = vector.load %arg3[%c1_153, %c0_154, %c1_155, %c1_156, %c0_157, %c0_158] : memref<2x2x2x2x4x256xf32, #tpu.memory_space<vmem>>, vector<1x1x1x1x4x256xf32>
    %113 = vector.shape_cast %112 : vector<1x1x1x1x4x256xf32> to vector<4x256xf32>
    %cst_159 = arith.constant dense<0.000000e+00> : vector<32x256xf32>
    %114 = tpu.matmul %111, %113, %cst_159 {dimension_numbers = #tpu.dot_dimension_numbers<[1], [0], [0], [1], [0, 0, 1, 1], [], []>} : vector<32x4xf32>, vector<4x256xf32>, vector<32x256xf32> -> vector<32x256xf32>
    %115 = arith.addf %108, %114 : vector<32x256xf32>
    %cst_160 = arith.constant 0.000000e+00 : f32
    %116 = vector.broadcast %cst_160 : f32 to vector<32x256xf32>
    %c1_161 = arith.constant 1 : index
    %c1_162 = arith.constant 1 : index
    %c0_163 = arith.constant 0 : index
    %c0_164 = arith.constant 0 : index
    %117 = vector.load %arg6[%c1_161, %c1_162, %c0_163, %c0_164] : memref<3x6x8x4xf32, #tpu.memory_space<vmem>>, vector<1x4x8x4xf32>
    %118 = vector.shape_cast %117 : vector<1x4x8x4xf32> to vector<4x8x4xf32>
    %119 = vector.shape_cast %118 : vector<4x8x4xf32> to vector<32x4xf32>
    %c1_165 = arith.constant 1 : index
    %c1_166 = arith.constant 1 : index
    %c0_167 = arith.constant 0 : index
    %c0_168 = arith.constant 0 : index
    %c0_169 = arith.constant 0 : index
    %c0_170 = arith.constant 0 : index
    %120 = vector.load %arg3[%c1_165, %c1_166, %c0_167, %c0_168, %c0_169, %c0_170] : memref<2x2x2x2x4x256xf32, #tpu.memory_space<vmem>>, vector<1x1x1x1x4x256xf32>
    %121 = vector.shape_cast %120 : vector<1x1x1x1x4x256xf32> to vector<4x256xf32>
    %cst_171 = arith.constant dense<0.000000e+00> : vector<32x256xf32>
    %122 = tpu.matmul %119, %121, %cst_171 {dimension_numbers = #tpu.dot_dimension_numbers<[1], [0], [0], [1], [0, 0, 1, 1], [], []>} : vector<32x4xf32>, vector<4x256xf32>, vector<32x256xf32> -> vector<32x256xf32>
    %123 = arith.addf %116, %122 : vector<32x256xf32>
    %c2_172 = arith.constant 2 : index
    %c1_173 = arith.constant 1 : index
    %c0_174 = arith.constant 0 : index
    %c0_175 = arith.constant 0 : index
    %124 = vector.load %arg6[%c2_172, %c1_173, %c0_174, %c0_175] : memref<3x6x8x4xf32, #tpu.memory_space<vmem>>, vector<1x4x8x4xf32>
    %125 = vector.shape_cast %124 : vector<1x4x8x4xf32> to vector<4x8x4xf32>
    %126 = vector.shape_cast %125 : vector<4x8x4xf32> to vector<32x4xf32>
    %c1_176 = arith.constant 1 : index
    %c1_177 = arith.constant 1 : index
    %c0_178 = arith.constant 0 : index
    %c1_179 = arith.constant 1 : index
    %c0_180 = arith.constant 0 : index
    %c0_181 = arith.constant 0 : index
    %127 = vector.load %arg3[%c1_176, %c1_177, %c0_178, %c1_179, %c0_180, %c0_181] : memref<2x2x2x2x4x256xf32, #tpu.memory_space<vmem>>, vector<1x1x1x1x4x256xf32>
    %128 = vector.shape_cast %127 : vector<1x1x1x1x4x256xf32> to vector<4x256xf32>
    %cst_182 = arith.constant dense<0.000000e+00> : vector<32x256xf32>
    %129 = tpu.matmul %126, %128, %cst_182 {dimension_numbers = #tpu.dot_dimension_numbers<[1], [0], [0], [1], [0, 0, 1, 1], [], []>} : vector<32x4xf32>, vector<4x256xf32>, vector<32x256xf32> -> vector<32x256xf32>
    %130 = arith.addf %123, %129 : vector<32x256xf32>
    %c1_183 = arith.constant 1 : index
    %c2_184 = arith.constant 2 : index
    %c0_185 = arith.constant 0 : index
    %c0_186 = arith.constant 0 : index
    %131 = vector.load %arg6[%c1_183, %c2_184, %c0_185, %c0_186] : memref<3x6x8x4xf32, #tpu.memory_space<vmem>>, vector<1x4x8x4xf32>
    %132 = vector.shape_cast %131 : vector<1x4x8x4xf32> to vector<4x8x4xf32>
    %133 = vector.shape_cast %132 : vector<4x8x4xf32> to vector<32x4xf32>
    %c1_187 = arith.constant 1 : index
    %c1_188 = arith.constant 1 : index
    %c1_189 = arith.constant 1 : index
    %c0_190 = arith.constant 0 : index
    %c0_191 = arith.constant 0 : index
    %c0_192 = arith.constant 0 : index
    %134 = vector.load %arg3[%c1_187, %c1_188, %c1_189, %c0_190, %c0_191, %c0_192] : memref<2x2x2x2x4x256xf32, #tpu.memory_space<vmem>>, vector<1x1x1x1x4x256xf32>
    %135 = vector.shape_cast %134 : vector<1x1x1x1x4x256xf32> to vector<4x256xf32>
    %cst_193 = arith.constant dense<0.000000e+00> : vector<32x256xf32>
    %136 = tpu.matmul %133, %135, %cst_193 {dimension_numbers = #tpu.dot_dimension_numbers<[1], [0], [0], [1], [0, 0, 1, 1], [], []>} : vector<32x4xf32>, vector<4x256xf32>, vector<32x256xf32> -> vector<32x256xf32>
    %137 = arith.addf %130, %136 : vector<32x256xf32>
    %c2_194 = arith.constant 2 : index
    %c2_195 = arith.constant 2 : index
    %c0_196 = arith.constant 0 : index
    %c0_197 = arith.constant 0 : index
    %138 = vector.load %arg6[%c2_194, %c2_195, %c0_196, %c0_197] : memref<3x6x8x4xf32, #tpu.memory_space<vmem>>, vector<1x4x8x4xf32>
    %139 = vector.shape_cast %138 : vector<1x4x8x4xf32> to vector<4x8x4xf32>
    %140 = vector.shape_cast %139 : vector<4x8x4xf32> to vector<32x4xf32>
    %c1_198 = arith.constant 1 : index
    %c1_199 = arith.constant 1 : index
    %c1_200 = arith.constant 1 : index
    %c1_201 = arith.constant 1 : index
    %c0_202 = arith.constant 0 : index
    %c0_203 = arith.constant 0 : index
    %141 = vector.load %arg3[%c1_198, %c1_199, %c1_200, %c1_201, %c0_202, %c0_203] : memref<2x2x2x2x4x256xf32, #tpu.memory_space<vmem>>, vector<1x1x1x1x4x256xf32>
    %142 = vector.shape_cast %141 : vector<1x1x1x1x4x256xf32> to vector<4x256xf32>
    %cst_204 = arith.constant dense<0.000000e+00> : vector<32x256xf32>
    %143 = tpu.matmul %140, %142, %cst_204 {dimension_numbers = #tpu.dot_dimension_numbers<[1], [0], [0], [1], [0, 0, 1, 1], [], []>} : vector<32x4xf32>, vector<4x256xf32>, vector<32x256xf32> -> vector<32x256xf32>
    %144 = arith.addf %137, %143 : vector<32x256xf32>
    %145 = tpu.concatenate %115, %144 in 1 : vector<32x256xf32>, vector<32x256xf32> -> vector<32x512xf32>
    %146 = vector.broadcast %19 : vector<1x512xf32> to vector<32x512xf32>
    %147 = arith.addf %145, %146 : vector<32x512xf32>
    %cst_205 = arith.constant 0.000000e+00 : f32
    %148 = vector.broadcast %cst_205 : f32 to vector<32x512xf32>
    %149 = arith.maximumf %147, %148 : vector<32x512xf32>
    %150 = vector.shape_cast %149 : vector<32x512xf32> to vector<4x8x512xf32>
    %c0_206 = arith.constant 0 : index
    %c0_207 = arith.constant 0 : index
    %c1_208 = arith.constant 1 : index
    %c0_209 = arith.constant 0 : index
    %c0_210 = arith.constant 0 : index
    %151 = vector.load %arg5[%c0_206, %c0_207, %c1_208, %c0_209, %c0_210] : memref<1x4x2x8x512xf32, #tpu.memory_space<vmem>>, vector<1x4x1x8x512xf32>
    %152 = vector.shape_cast %151 : vector<1x4x1x8x512xf32> to vector<4x8x512xf32>
    %153 = vector.shape_cast %150 : vector<4x8x512xf32> to vector<1x4x1x8x512xf32>
    tpu.vector_store %arg5[%c0_206, %c0_207, %c1_208, %c0_209, %c0_210], %153 {strides = array<i32>} : memref<1x4x2x8x512xf32, #tpu.memory_space<vmem>>, vector<1x4x1x8x512xf32>,
    return
  }
  func.func @transform_0(%arg0: i32, %arg1: i32) -> (i32, i32, i32, i32) {
    %c0_i32 = arith.constant 0 : i32
    %c0_i32_0 = arith.constant 0 : i32
    %c0_i32_1 = arith.constant 0 : i32
    %c0_i32_2 = arith.constant 0 : i32
    return %arg0, %c0_i32, %c0_i32_0, %c0_i32_1 : i32, i32, i32, i32
  }
  func.func @transform_1(%arg0: i32, %arg1: i32) -> (i32, i32, i32, i32, i32, i32) {
    %c0_i32 = arith.constant 0 : i32
    %c0_i32_0 = arith.constant 0 : i32
    %c0_i32_1 = arith.constant 0 : i32
    %c0_i32_2 = arith.constant 0 : i32
    %c0_i32_3 = arith.constant 0 : i32
    %c0_i32_4 = arith.constant 0 : i32
    %c0_i32_5 = arith.constant 0 : i32
    return %c0_i32, %c0_i32_0, %c0_i32_1, %c0_i32_2, %c0_i32_3, %c0_i32_4 : i32, i32, i32, i32, i32, i32
  }
  func.func @transform_2(%arg0: i32, %arg1: i32) -> (i32, i32) {
    %c0_i32 = arith.constant 0 : i32
    %c0_i32_0 = arith.constant 0 : i32
    %c0_i32_1 = arith.constant 0 : i32
    return %c0_i32, %c0_i32_0 : i32, i32
  }
  func.func @transform_3(%arg0: i32, %arg1: i32) -> (i32, i32, i32, i32, i32) {
    %c0_i32 = arith.constant 0 : i32
    %c0_i32_0 = arith.constant 0 : i32
    %c0_i32_1 = arith.constant 0 : i32
    %c0_i32_2 = arith.constant 0 : i32
    return %arg0, %arg1, %c0_i32, %c0_i32_0, %c0_i32_1 : i32, i32, i32, i32, i32
  }
}

module attributes {stable_mosaic.version = 11 : i64} {
  func.func @_phase_deconv_kernel(%arg0: i32, %arg1: i32, %arg2: memref<1x18x18x256xf32, #tpu.memory_space<vmem>>, %arg3: memref<2x2x2x2x256x128xf32, #tpu.memory_space<vmem>>, %arg4: memref<1x256xf32, #tpu.memory_space<vmem>>, %arg5: memref<1x4x2x16x256xf32, #tpu.memory_space<vmem>>, %arg6: memref<3x6x16x256xf32, #tpu.memory_space<vmem>>) attributes {dimension_semantics = [#tpu.dimension_semantics<parallel>, #tpu.dimension_semantics<parallel>], iteration_bounds = array<i64: 2, 4>, scalar_prefetch = 0 : i64, scratch_operands = 1 : i64, tpu.core_type = #tpu.core_type<tc>, window_params = [{transform_indices = @transform_0, window_bounds = array<i64: 1, 18, 18, 256>}, {pipeline_mode = #tpu.pipeline_mode<synchronous>, transform_indices = @transform_1, window_bounds = array<i64: 2, 2, 2, 2, 256, 128>}, {pipeline_mode = #tpu.pipeline_mode<synchronous>, transform_indices = @transform_2, window_bounds = array<i64: 1, 256>}, {transform_indices = @transform_3, window_bounds = array<i64: 1, 4, 2, 16, 256>}]} {
    %c4_i32 = arith.constant 4 : i32
    %0 = arith.muli %arg1, %c4_i32 : i32
    %c0 = arith.constant 0 : index
    %1 = arith.index_cast %0 : i32 to index
    %c0_0 = arith.constant 0 : index
    %c0_1 = arith.constant 0 : index
    %2 = vector.load %arg2[%c0, %1, %c0_0, %c0_1] : memref<1x18x18x256xf32, #tpu.memory_space<vmem>>, vector<1x6x16x256xf32>
    %3 = vector.shape_cast %2 : vector<1x6x16x256xf32> to vector<6x16x256xf32>
    %c0_2 = arith.constant 0 : index
    %c0_3 = arith.constant 0 : index
    %c0_4 = arith.constant 0 : index
    %c0_5 = arith.constant 0 : index
    %4 = vector.load %arg6[%c0_2, %c0_3, %c0_4, %c0_5] : memref<3x6x16x256xf32, #tpu.memory_space<vmem>>, vector<1x6x16x256xf32>
    %5 = vector.shape_cast %4 : vector<1x6x16x256xf32> to vector<6x16x256xf32>
    %6 = vector.shape_cast %3 : vector<6x16x256xf32> to vector<1x6x16x256xf32>
    tpu.vector_store %arg6[%c0_2, %c0_3, %c0_4, %c0_5], %6 {strides = array<i32>} : memref<3x6x16x256xf32, #tpu.memory_space<vmem>>, vector<1x6x16x256xf32>,
    %c0_6 = arith.constant 0 : index
    %7 = arith.index_cast %0 : i32 to index
    %c1 = arith.constant 1 : index
    %c0_7 = arith.constant 0 : index
    %8 = vector.load %arg2[%c0_6, %7, %c1, %c0_7] : memref<1x18x18x256xf32, #tpu.memory_space<vmem>>, vector<1x6x16x256xf32>
    %9 = vector.shape_cast %8 : vector<1x6x16x256xf32> to vector<6x16x256xf32>
    %c1_8 = arith.constant 1 : index
    %c0_9 = arith.constant 0 : index
    %c0_10 = arith.constant 0 : index
    %c0_11 = arith.constant 0 : index
    %10 = vector.load %arg6[%c1_8, %c0_9, %c0_10, %c0_11] : memref<3x6x16x256xf32, #tpu.memory_space<vmem>>, vector<1x6x16x256xf32>
    %11 = vector.shape_cast %10 : vector<1x6x16x256xf32> to vector<6x16x256xf32>
    %12 = vector.shape_cast %9 : vector<6x16x256xf32> to vector<1x6x16x256xf32>
    tpu.vector_store %arg6[%c1_8, %c0_9, %c0_10, %c0_11], %12 {strides = array<i32>} : memref<3x6x16x256xf32, #tpu.memory_space<vmem>>, vector<1x6x16x256xf32>,
    %c0_12 = arith.constant 0 : index
    %13 = arith.index_cast %0 : i32 to index
    %c2 = arith.constant 2 : index
    %c0_13 = arith.constant 0 : index
    %14 = vector.load %arg2[%c0_12, %13, %c2, %c0_13] : memref<1x18x18x256xf32, #tpu.memory_space<vmem>>, vector<1x6x16x256xf32>
    %15 = vector.shape_cast %14 : vector<1x6x16x256xf32> to vector<6x16x256xf32>
    %c2_14 = arith.constant 2 : index
    %c0_15 = arith.constant 0 : index
    %c0_16 = arith.constant 0 : index
    %c0_17 = arith.constant 0 : index
    %16 = vector.load %arg6[%c2_14, %c0_15, %c0_16, %c0_17] : memref<3x6x16x256xf32, #tpu.memory_space<vmem>>, vector<1x6x16x256xf32>
    %17 = vector.shape_cast %16 : vector<1x6x16x256xf32> to vector<6x16x256xf32>
    %18 = vector.shape_cast %15 : vector<6x16x256xf32> to vector<1x6x16x256xf32>
    tpu.vector_store %arg6[%c2_14, %c0_15, %c0_16, %c0_17], %18 {strides = array<i32>} : memref<3x6x16x256xf32, #tpu.memory_space<vmem>>, vector<1x6x16x256xf32>,
    %c0_18 = arith.constant 0 : index
    %c0_19 = arith.constant 0 : index
    %19 = vector.load %arg4[%c0_18, %c0_19] : memref<1x256xf32, #tpu.memory_space<vmem>>, vector<1x256xf32>
    %cst = arith.constant 0.000000e+00 : f32
    %20 = vector.broadcast %cst : f32 to vector<64x128xf32>
    %c0_20 = arith.constant 0 : index
    %c0_21 = arith.constant 0 : index
    %c0_22 = arith.constant 0 : index
    %c0_23 = arith.constant 0 : index
    %21 = vector.load %arg6[%c0_20, %c0_21, %c0_22, %c0_23] : memref<3x6x16x256xf32, #tpu.memory_space<vmem>>, vector<1x4x16x256xf32>
    %22 = vector.shape_cast %21 : vector<1x4x16x256xf32> to vector<4x16x256xf32>
    %23 = vector.shape_cast %22 : vector<4x16x256xf32> to vector<64x256xf32>
    %c0_24 = arith.constant 0 : index
    %c0_25 = arith.constant 0 : index
    %c0_26 = arith.constant 0 : index
    %c0_27 = arith.constant 0 : index
    %c0_28 = arith.constant 0 : index
    %c0_29 = arith.constant 0 : index
    %24 = vector.load %arg3[%c0_24, %c0_25, %c0_26, %c0_27, %c0_28, %c0_29] : memref<2x2x2x2x256x128xf32, #tpu.memory_space<vmem>>, vector<1x1x1x1x256x128xf32>
    %25 = vector.shape_cast %24 : vector<1x1x1x1x256x128xf32> to vector<256x128xf32>
    %cst_30 = arith.constant dense<0.000000e+00> : vector<64x128xf32>
    %26 = tpu.matmul %23, %25, %cst_30 {dimension_numbers = #tpu.dot_dimension_numbers<[1], [0], [0], [1], [0, 0, 1, 1], [], []>} : vector<64x256xf32>, vector<256x128xf32>, vector<64x128xf32> -> vector<64x128xf32>
    %27 = arith.addf %20, %26 : vector<64x128xf32>
    %c1_31 = arith.constant 1 : index
    %c0_32 = arith.constant 0 : index
    %c0_33 = arith.constant 0 : index
    %c0_34 = arith.constant 0 : index
    %28 = vector.load %arg6[%c1_31, %c0_32, %c0_33, %c0_34] : memref<3x6x16x256xf32, #tpu.memory_space<vmem>>, vector<1x4x16x256xf32>
    %29 = vector.shape_cast %28 : vector<1x4x16x256xf32> to vector<4x16x256xf32>
    %30 = vector.shape_cast %29 : vector<4x16x256xf32> to vector<64x256xf32>
    %c0_35 = arith.constant 0 : index
    %c0_36 = arith.constant 0 : index
    %c0_37 = arith.constant 0 : index
    %c1_38 = arith.constant 1 : index
    %c0_39 = arith.constant 0 : index
    %c0_40 = arith.constant 0 : index
    %31 = vector.load %arg3[%c0_35, %c0_36, %c0_37, %c1_38, %c0_39, %c0_40] : memref<2x2x2x2x256x128xf32, #tpu.memory_space<vmem>>, vector<1x1x1x1x256x128xf32>
    %32 = vector.shape_cast %31 : vector<1x1x1x1x256x128xf32> to vector<256x128xf32>
    %cst_41 = arith.constant dense<0.000000e+00> : vector<64x128xf32>
    %33 = tpu.matmul %30, %32, %cst_41 {dimension_numbers = #tpu.dot_dimension_numbers<[1], [0], [0], [1], [0, 0, 1, 1], [], []>} : vector<64x256xf32>, vector<256x128xf32>, vector<64x128xf32> -> vector<64x128xf32>
    %34 = arith.addf %27, %33 : vector<64x128xf32>
    %c0_42 = arith.constant 0 : index
    %c1_43 = arith.constant 1 : index
    %c0_44 = arith.constant 0 : index
    %c0_45 = arith.constant 0 : index
    %35 = vector.load %arg6[%c0_42, %c1_43, %c0_44, %c0_45] : memref<3x6x16x256xf32, #tpu.memory_space<vmem>>, vector<1x4x16x256xf32>
    %36 = vector.shape_cast %35 : vector<1x4x16x256xf32> to vector<4x16x256xf32>
    %37 = vector.shape_cast %36 : vector<4x16x256xf32> to vector<64x256xf32>
    %c0_46 = arith.constant 0 : index
    %c0_47 = arith.constant 0 : index
    %c1_48 = arith.constant 1 : index
    %c0_49 = arith.constant 0 : index
    %c0_50 = arith.constant 0 : index
    %c0_51 = arith.constant 0 : index
    %38 = vector.load %arg3[%c0_46, %c0_47, %c1_48, %c0_49, %c0_50, %c0_51] : memref<2x2x2x2x256x128xf32, #tpu.memory_space<vmem>>, vector<1x1x1x1x256x128xf32>
    %39 = vector.shape_cast %38 : vector<1x1x1x1x256x128xf32> to vector<256x128xf32>
    %cst_52 = arith.constant dense<0.000000e+00> : vector<64x128xf32>
    %40 = tpu.matmul %37, %39, %cst_52 {dimension_numbers = #tpu.dot_dimension_numbers<[1], [0], [0], [1], [0, 0, 1, 1], [], []>} : vector<64x256xf32>, vector<256x128xf32>, vector<64x128xf32> -> vector<64x128xf32>
    %41 = arith.addf %34, %40 : vector<64x128xf32>
    %c1_53 = arith.constant 1 : index
    %c1_54 = arith.constant 1 : index
    %c0_55 = arith.constant 0 : index
    %c0_56 = arith.constant 0 : index
    %42 = vector.load %arg6[%c1_53, %c1_54, %c0_55, %c0_56] : memref<3x6x16x256xf32, #tpu.memory_space<vmem>>, vector<1x4x16x256xf32>
    %43 = vector.shape_cast %42 : vector<1x4x16x256xf32> to vector<4x16x256xf32>
    %44 = vector.shape_cast %43 : vector<4x16x256xf32> to vector<64x256xf32>
    %c0_57 = arith.constant 0 : index
    %c0_58 = arith.constant 0 : index
    %c1_59 = arith.constant 1 : index
    %c1_60 = arith.constant 1 : index
    %c0_61 = arith.constant 0 : index
    %c0_62 = arith.constant 0 : index
    %45 = vector.load %arg3[%c0_57, %c0_58, %c1_59, %c1_60, %c0_61, %c0_62] : memref<2x2x2x2x256x128xf32, #tpu.memory_space<vmem>>, vector<1x1x1x1x256x128xf32>
    %46 = vector.shape_cast %45 : vector<1x1x1x1x256x128xf32> to vector<256x128xf32>
    %cst_63 = arith.constant dense<0.000000e+00> : vector<64x128xf32>
    %47 = tpu.matmul %44, %46, %cst_63 {dimension_numbers = #tpu.dot_dimension_numbers<[1], [0], [0], [1], [0, 0, 1, 1], [], []>} : vector<64x256xf32>, vector<256x128xf32>, vector<64x128xf32> -> vector<64x128xf32>
    %48 = arith.addf %41, %47 : vector<64x128xf32>
    %cst_64 = arith.constant 0.000000e+00 : f32
    %49 = vector.broadcast %cst_64 : f32 to vector<64x128xf32>
    %c1_65 = arith.constant 1 : index
    %c0_66 = arith.constant 0 : index
    %c0_67 = arith.constant 0 : index
    %c0_68 = arith.constant 0 : index
    %50 = vector.load %arg6[%c1_65, %c0_66, %c0_67, %c0_68] : memref<3x6x16x256xf32, #tpu.memory_space<vmem>>, vector<1x4x16x256xf32>
    %51 = vector.shape_cast %50 : vector<1x4x16x256xf32> to vector<4x16x256xf32>
    %52 = vector.shape_cast %51 : vector<4x16x256xf32> to vector<64x256xf32>
    %c0_69 = arith.constant 0 : index
    %c1_70 = arith.constant 1 : index
    %c0_71 = arith.constant 0 : index
    %c0_72 = arith.constant 0 : index
    %c0_73 = arith.constant 0 : index
    %c0_74 = arith.constant 0 : index
    %53 = vector.load %arg3[%c0_69, %c1_70, %c0_71, %c0_72, %c0_73, %c0_74] : memref<2x2x2x2x256x128xf32, #tpu.memory_space<vmem>>, vector<1x1x1x1x256x128xf32>
    %54 = vector.shape_cast %53 : vector<1x1x1x1x256x128xf32> to vector<256x128xf32>
    %cst_75 = arith.constant dense<0.000000e+00> : vector<64x128xf32>
    %55 = tpu.matmul %52, %54, %cst_75 {dimension_numbers = #tpu.dot_dimension_numbers<[1], [0], [0], [1], [0, 0, 1, 1], [], []>} : vector<64x256xf32>, vector<256x128xf32>, vector<64x128xf32> -> vector<64x128xf32>
    %56 = arith.addf %49, %55 : vector<64x128xf32>
    %c2_76 = arith.constant 2 : index
    %c0_77 = arith.constant 0 : index
    %c0_78 = arith.constant 0 : index
    %c0_79 = arith.constant 0 : index
    %57 = vector.load %arg6[%c2_76, %c0_77, %c0_78, %c0_79] : memref<3x6x16x256xf32, #tpu.memory_space<vmem>>, vector<1x4x16x256xf32>
    %58 = vector.shape_cast %57 : vector<1x4x16x256xf32> to vector<4x16x256xf32>
    %59 = vector.shape_cast %58 : vector<4x16x256xf32> to vector<64x256xf32>
    %c0_80 = arith.constant 0 : index
    %c1_81 = arith.constant 1 : index
    %c0_82 = arith.constant 0 : index
    %c1_83 = arith.constant 1 : index
    %c0_84 = arith.constant 0 : index
    %c0_85 = arith.constant 0 : index
    %60 = vector.load %arg3[%c0_80, %c1_81, %c0_82, %c1_83, %c0_84, %c0_85] : memref<2x2x2x2x256x128xf32, #tpu.memory_space<vmem>>, vector<1x1x1x1x256x128xf32>
    %61 = vector.shape_cast %60 : vector<1x1x1x1x256x128xf32> to vector<256x128xf32>
    %cst_86 = arith.constant dense<0.000000e+00> : vector<64x128xf32>
    %62 = tpu.matmul %59, %61, %cst_86 {dimension_numbers = #tpu.dot_dimension_numbers<[1], [0], [0], [1], [0, 0, 1, 1], [], []>} : vector<64x256xf32>, vector<256x128xf32>, vector<64x128xf32> -> vector<64x128xf32>
    %63 = arith.addf %56, %62 : vector<64x128xf32>
    %c1_87 = arith.constant 1 : index
    %c1_88 = arith.constant 1 : index
    %c0_89 = arith.constant 0 : index
    %c0_90 = arith.constant 0 : index
    %64 = vector.load %arg6[%c1_87, %c1_88, %c0_89, %c0_90] : memref<3x6x16x256xf32, #tpu.memory_space<vmem>>, vector<1x4x16x256xf32>
    %65 = vector.shape_cast %64 : vector<1x4x16x256xf32> to vector<4x16x256xf32>
    %66 = vector.shape_cast %65 : vector<4x16x256xf32> to vector<64x256xf32>
    %c0_91 = arith.constant 0 : index
    %c1_92 = arith.constant 1 : index
    %c1_93 = arith.constant 1 : index
    %c0_94 = arith.constant 0 : index
    %c0_95 = arith.constant 0 : index
    %c0_96 = arith.constant 0 : index
    %67 = vector.load %arg3[%c0_91, %c1_92, %c1_93, %c0_94, %c0_95, %c0_96] : memref<2x2x2x2x256x128xf32, #tpu.memory_space<vmem>>, vector<1x1x1x1x256x128xf32>
    %68 = vector.shape_cast %67 : vector<1x1x1x1x256x128xf32> to vector<256x128xf32>
    %cst_97 = arith.constant dense<0.000000e+00> : vector<64x128xf32>
    %69 = tpu.matmul %66, %68, %cst_97 {dimension_numbers = #tpu.dot_dimension_numbers<[1], [0], [0], [1], [0, 0, 1, 1], [], []>} : vector<64x256xf32>, vector<256x128xf32>, vector<64x128xf32> -> vector<64x128xf32>
    %70 = arith.addf %63, %69 : vector<64x128xf32>
    %c2_98 = arith.constant 2 : index
    %c1_99 = arith.constant 1 : index
    %c0_100 = arith.constant 0 : index
    %c0_101 = arith.constant 0 : index
    %71 = vector.load %arg6[%c2_98, %c1_99, %c0_100, %c0_101] : memref<3x6x16x256xf32, #tpu.memory_space<vmem>>, vector<1x4x16x256xf32>
    %72 = vector.shape_cast %71 : vector<1x4x16x256xf32> to vector<4x16x256xf32>
    %73 = vector.shape_cast %72 : vector<4x16x256xf32> to vector<64x256xf32>
    %c0_102 = arith.constant 0 : index
    %c1_103 = arith.constant 1 : index
    %c1_104 = arith.constant 1 : index
    %c1_105 = arith.constant 1 : index
    %c0_106 = arith.constant 0 : index
    %c0_107 = arith.constant 0 : index
    %74 = vector.load %arg3[%c0_102, %c1_103, %c1_104, %c1_105, %c0_106, %c0_107] : memref<2x2x2x2x256x128xf32, #tpu.memory_space<vmem>>, vector<1x1x1x1x256x128xf32>
    %75 = vector.shape_cast %74 : vector<1x1x1x1x256x128xf32> to vector<256x128xf32>
    %cst_108 = arith.constant dense<0.000000e+00> : vector<64x128xf32>
    %76 = tpu.matmul %73, %75, %cst_108 {dimension_numbers = #tpu.dot_dimension_numbers<[1], [0], [0], [1], [0, 0, 1, 1], [], []>} : vector<64x256xf32>, vector<256x128xf32>, vector<64x128xf32> -> vector<64x128xf32>
    %77 = arith.addf %70, %76 : vector<64x128xf32>
    %78 = tpu.concatenate %48, %77 in 1 : vector<64x128xf32>, vector<64x128xf32> -> vector<64x256xf32>
    %79 = vector.broadcast %19 : vector<1x256xf32> to vector<64x256xf32>
    %80 = arith.addf %78, %79 : vector<64x256xf32>
    %cst_109 = arith.constant 0.000000e+00 : f32
    %81 = vector.broadcast %cst_109 : f32 to vector<64x256xf32>
    %82 = arith.maximumf %80, %81 : vector<64x256xf32>
    %83 = vector.shape_cast %82 : vector<64x256xf32> to vector<4x16x256xf32>
    %c0_110 = arith.constant 0 : index
    %c0_111 = arith.constant 0 : index
    %c0_112 = arith.constant 0 : index
    %c0_113 = arith.constant 0 : index
    %c0_114 = arith.constant 0 : index
    %84 = vector.load %arg5[%c0_110, %c0_111, %c0_112, %c0_113, %c0_114] : memref<1x4x2x16x256xf32, #tpu.memory_space<vmem>>, vector<1x4x1x16x256xf32>
    %85 = vector.shape_cast %84 : vector<1x4x1x16x256xf32> to vector<4x16x256xf32>
    %86 = vector.shape_cast %83 : vector<4x16x256xf32> to vector<1x4x1x16x256xf32>
    tpu.vector_store %arg5[%c0_110, %c0_111, %c0_112, %c0_113, %c0_114], %86 {strides = array<i32>} : memref<1x4x2x16x256xf32, #tpu.memory_space<vmem>>, vector<1x4x1x16x256xf32>,
    %cst_115 = arith.constant 0.000000e+00 : f32
    %87 = vector.broadcast %cst_115 : f32 to vector<64x128xf32>
    %c0_116 = arith.constant 0 : index
    %c1_117 = arith.constant 1 : index
    %c0_118 = arith.constant 0 : index
    %c0_119 = arith.constant 0 : index
    %88 = vector.load %arg6[%c0_116, %c1_117, %c0_118, %c0_119] : memref<3x6x16x256xf32, #tpu.memory_space<vmem>>, vector<1x4x16x256xf32>
    %89 = vector.shape_cast %88 : vector<1x4x16x256xf32> to vector<4x16x256xf32>
    %90 = vector.shape_cast %89 : vector<4x16x256xf32> to vector<64x256xf32>
    %c1_120 = arith.constant 1 : index
    %c0_121 = arith.constant 0 : index
    %c0_122 = arith.constant 0 : index
    %c0_123 = arith.constant 0 : index
    %c0_124 = arith.constant 0 : index
    %c0_125 = arith.constant 0 : index
    %91 = vector.load %arg3[%c1_120, %c0_121, %c0_122, %c0_123, %c0_124, %c0_125] : memref<2x2x2x2x256x128xf32, #tpu.memory_space<vmem>>, vector<1x1x1x1x256x128xf32>
    %92 = vector.shape_cast %91 : vector<1x1x1x1x256x128xf32> to vector<256x128xf32>
    %cst_126 = arith.constant dense<0.000000e+00> : vector<64x128xf32>
    %93 = tpu.matmul %90, %92, %cst_126 {dimension_numbers = #tpu.dot_dimension_numbers<[1], [0], [0], [1], [0, 0, 1, 1], [], []>} : vector<64x256xf32>, vector<256x128xf32>, vector<64x128xf32> -> vector<64x128xf32>
    %94 = arith.addf %87, %93 : vector<64x128xf32>
    %c1_127 = arith.constant 1 : index
    %c1_128 = arith.constant 1 : index
    %c0_129 = arith.constant 0 : index
    %c0_130 = arith.constant 0 : index
    %95 = vector.load %arg6[%c1_127, %c1_128, %c0_129, %c0_130] : memref<3x6x16x256xf32, #tpu.memory_space<vmem>>, vector<1x4x16x256xf32>
    %96 = vector.shape_cast %95 : vector<1x4x16x256xf32> to vector<4x16x256xf32>
    %97 = vector.shape_cast %96 : vector<4x16x256xf32> to vector<64x256xf32>
    %c1_131 = arith.constant 1 : index
    %c0_132 = arith.constant 0 : index
    %c0_133 = arith.constant 0 : index
    %c1_134 = arith.constant 1 : index
    %c0_135 = arith.constant 0 : index
    %c0_136 = arith.constant 0 : index
    %98 = vector.load %arg3[%c1_131, %c0_132, %c0_133, %c1_134, %c0_135, %c0_136] : memref<2x2x2x2x256x128xf32, #tpu.memory_space<vmem>>, vector<1x1x1x1x256x128xf32>
    %99 = vector.shape_cast %98 : vector<1x1x1x1x256x128xf32> to vector<256x128xf32>
    %cst_137 = arith.constant dense<0.000000e+00> : vector<64x128xf32>
    %100 = tpu.matmul %97, %99, %cst_137 {dimension_numbers = #tpu.dot_dimension_numbers<[1], [0], [0], [1], [0, 0, 1, 1], [], []>} : vector<64x256xf32>, vector<256x128xf32>, vector<64x128xf32> -> vector<64x128xf32>
    %101 = arith.addf %94, %100 : vector<64x128xf32>
    %c0_138 = arith.constant 0 : index
    %c2_139 = arith.constant 2 : index
    %c0_140 = arith.constant 0 : index
    %c0_141 = arith.constant 0 : index
    %102 = vector.load %arg6[%c0_138, %c2_139, %c0_140, %c0_141] : memref<3x6x16x256xf32, #tpu.memory_space<vmem>>, vector<1x4x16x256xf32>
    %103 = vector.shape_cast %102 : vector<1x4x16x256xf32> to vector<4x16x256xf32>
    %104 = vector.shape_cast %103 : vector<4x16x256xf32> to vector<64x256xf32>
    %c1_142 = arith.constant 1 : index
    %c0_143 = arith.constant 0 : index
    %c1_144 = arith.constant 1 : index
    %c0_145 = arith.constant 0 : index
    %c0_146 = arith.constant 0 : index
    %c0_147 = arith.constant 0 : index
    %105 = vector.load %arg3[%c1_142, %c0_143, %c1_144, %c0_145, %c0_146, %c0_147] : memref<2x2x2x2x256x128xf32, #tpu.memory_space<vmem>>, vector<1x1x1x1x256x128xf32>
    %106 = vector.shape_cast %105 : vector<1x1x1x1x256x128xf32> to vector<256x128xf32>
    %cst_148 = arith.constant dense<0.000000e+00> : vector<64x128xf32>
    %107 = tpu.matmul %104, %106, %cst_148 {dimension_numbers = #tpu.dot_dimension_numbers<[1], [0], [0], [1], [0, 0, 1, 1], [], []>} : vector<64x256xf32>, vector<256x128xf32>, vector<64x128xf32> -> vector<64x128xf32>
    %108 = arith.addf %101, %107 : vector<64x128xf32>
    %c1_149 = arith.constant 1 : index
    %c2_150 = arith.constant 2 : index
    %c0_151 = arith.constant 0 : index
    %c0_152 = arith.constant 0 : index
    %109 = vector.load %arg6[%c1_149, %c2_150, %c0_151, %c0_152] : memref<3x6x16x256xf32, #tpu.memory_space<vmem>>, vector<1x4x16x256xf32>
    %110 = vector.shape_cast %109 : vector<1x4x16x256xf32> to vector<4x16x256xf32>
    %111 = vector.shape_cast %110 : vector<4x16x256xf32> to vector<64x256xf32>
    %c1_153 = arith.constant 1 : index
    %c0_154 = arith.constant 0 : index
    %c1_155 = arith.constant 1 : index
    %c1_156 = arith.constant 1 : index
    %c0_157 = arith.constant 0 : index
    %c0_158 = arith.constant 0 : index
    %112 = vector.load %arg3[%c1_153, %c0_154, %c1_155, %c1_156, %c0_157, %c0_158] : memref<2x2x2x2x256x128xf32, #tpu.memory_space<vmem>>, vector<1x1x1x1x256x128xf32>
    %113 = vector.shape_cast %112 : vector<1x1x1x1x256x128xf32> to vector<256x128xf32>
    %cst_159 = arith.constant dense<0.000000e+00> : vector<64x128xf32>
    %114 = tpu.matmul %111, %113, %cst_159 {dimension_numbers = #tpu.dot_dimension_numbers<[1], [0], [0], [1], [0, 0, 1, 1], [], []>} : vector<64x256xf32>, vector<256x128xf32>, vector<64x128xf32> -> vector<64x128xf32>
    %115 = arith.addf %108, %114 : vector<64x128xf32>
    %cst_160 = arith.constant 0.000000e+00 : f32
    %116 = vector.broadcast %cst_160 : f32 to vector<64x128xf32>
    %c1_161 = arith.constant 1 : index
    %c1_162 = arith.constant 1 : index
    %c0_163 = arith.constant 0 : index
    %c0_164 = arith.constant 0 : index
    %117 = vector.load %arg6[%c1_161, %c1_162, %c0_163, %c0_164] : memref<3x6x16x256xf32, #tpu.memory_space<vmem>>, vector<1x4x16x256xf32>
    %118 = vector.shape_cast %117 : vector<1x4x16x256xf32> to vector<4x16x256xf32>
    %119 = vector.shape_cast %118 : vector<4x16x256xf32> to vector<64x256xf32>
    %c1_165 = arith.constant 1 : index
    %c1_166 = arith.constant 1 : index
    %c0_167 = arith.constant 0 : index
    %c0_168 = arith.constant 0 : index
    %c0_169 = arith.constant 0 : index
    %c0_170 = arith.constant 0 : index
    %120 = vector.load %arg3[%c1_165, %c1_166, %c0_167, %c0_168, %c0_169, %c0_170] : memref<2x2x2x2x256x128xf32, #tpu.memory_space<vmem>>, vector<1x1x1x1x256x128xf32>
    %121 = vector.shape_cast %120 : vector<1x1x1x1x256x128xf32> to vector<256x128xf32>
    %cst_171 = arith.constant dense<0.000000e+00> : vector<64x128xf32>
    %122 = tpu.matmul %119, %121, %cst_171 {dimension_numbers = #tpu.dot_dimension_numbers<[1], [0], [0], [1], [0, 0, 1, 1], [], []>} : vector<64x256xf32>, vector<256x128xf32>, vector<64x128xf32> -> vector<64x128xf32>
    %123 = arith.addf %116, %122 : vector<64x128xf32>
    %c2_172 = arith.constant 2 : index
    %c1_173 = arith.constant 1 : index
    %c0_174 = arith.constant 0 : index
    %c0_175 = arith.constant 0 : index
    %124 = vector.load %arg6[%c2_172, %c1_173, %c0_174, %c0_175] : memref<3x6x16x256xf32, #tpu.memory_space<vmem>>, vector<1x4x16x256xf32>
    %125 = vector.shape_cast %124 : vector<1x4x16x256xf32> to vector<4x16x256xf32>
    %126 = vector.shape_cast %125 : vector<4x16x256xf32> to vector<64x256xf32>
    %c1_176 = arith.constant 1 : index
    %c1_177 = arith.constant 1 : index
    %c0_178 = arith.constant 0 : index
    %c1_179 = arith.constant 1 : index
    %c0_180 = arith.constant 0 : index
    %c0_181 = arith.constant 0 : index
    %127 = vector.load %arg3[%c1_176, %c1_177, %c0_178, %c1_179, %c0_180, %c0_181] : memref<2x2x2x2x256x128xf32, #tpu.memory_space<vmem>>, vector<1x1x1x1x256x128xf32>
    %128 = vector.shape_cast %127 : vector<1x1x1x1x256x128xf32> to vector<256x128xf32>
    %cst_182 = arith.constant dense<0.000000e+00> : vector<64x128xf32>
    %129 = tpu.matmul %126, %128, %cst_182 {dimension_numbers = #tpu.dot_dimension_numbers<[1], [0], [0], [1], [0, 0, 1, 1], [], []>} : vector<64x256xf32>, vector<256x128xf32>, vector<64x128xf32> -> vector<64x128xf32>
    %130 = arith.addf %123, %129 : vector<64x128xf32>
    %c1_183 = arith.constant 1 : index
    %c2_184 = arith.constant 2 : index
    %c0_185 = arith.constant 0 : index
    %c0_186 = arith.constant 0 : index
    %131 = vector.load %arg6[%c1_183, %c2_184, %c0_185, %c0_186] : memref<3x6x16x256xf32, #tpu.memory_space<vmem>>, vector<1x4x16x256xf32>
    %132 = vector.shape_cast %131 : vector<1x4x16x256xf32> to vector<4x16x256xf32>
    %133 = vector.shape_cast %132 : vector<4x16x256xf32> to vector<64x256xf32>
    %c1_187 = arith.constant 1 : index
    %c1_188 = arith.constant 1 : index
    %c1_189 = arith.constant 1 : index
    %c0_190 = arith.constant 0 : index
    %c0_191 = arith.constant 0 : index
    %c0_192 = arith.constant 0 : index
    %134 = vector.load %arg3[%c1_187, %c1_188, %c1_189, %c0_190, %c0_191, %c0_192] : memref<2x2x2x2x256x128xf32, #tpu.memory_space<vmem>>, vector<1x1x1x1x256x128xf32>
    %135 = vector.shape_cast %134 : vector<1x1x1x1x256x128xf32> to vector<256x128xf32>
    %cst_193 = arith.constant dense<0.000000e+00> : vector<64x128xf32>
    %136 = tpu.matmul %133, %135, %cst_193 {dimension_numbers = #tpu.dot_dimension_numbers<[1], [0], [0], [1], [0, 0, 1, 1], [], []>} : vector<64x256xf32>, vector<256x128xf32>, vector<64x128xf32> -> vector<64x128xf32>
    %137 = arith.addf %130, %136 : vector<64x128xf32>
    %c2_194 = arith.constant 2 : index
    %c2_195 = arith.constant 2 : index
    %c0_196 = arith.constant 0 : index
    %c0_197 = arith.constant 0 : index
    %138 = vector.load %arg6[%c2_194, %c2_195, %c0_196, %c0_197] : memref<3x6x16x256xf32, #tpu.memory_space<vmem>>, vector<1x4x16x256xf32>
    %139 = vector.shape_cast %138 : vector<1x4x16x256xf32> to vector<4x16x256xf32>
    %140 = vector.shape_cast %139 : vector<4x16x256xf32> to vector<64x256xf32>
    %c1_198 = arith.constant 1 : index
    %c1_199 = arith.constant 1 : index
    %c1_200 = arith.constant 1 : index
    %c1_201 = arith.constant 1 : index
    %c0_202 = arith.constant 0 : index
    %c0_203 = arith.constant 0 : index
    %141 = vector.load %arg3[%c1_198, %c1_199, %c1_200, %c1_201, %c0_202, %c0_203] : memref<2x2x2x2x256x128xf32, #tpu.memory_space<vmem>>, vector<1x1x1x1x256x128xf32>
    %142 = vector.shape_cast %141 : vector<1x1x1x1x256x128xf32> to vector<256x128xf32>
    %cst_204 = arith.constant dense<0.000000e+00> : vector<64x128xf32>
    %143 = tpu.matmul %140, %142, %cst_204 {dimension_numbers = #tpu.dot_dimension_numbers<[1], [0], [0], [1], [0, 0, 1, 1], [], []>} : vector<64x256xf32>, vector<256x128xf32>, vector<64x128xf32> -> vector<64x128xf32>
    %144 = arith.addf %137, %143 : vector<64x128xf32>
    %145 = tpu.concatenate %115, %144 in 1 : vector<64x128xf32>, vector<64x128xf32> -> vector<64x256xf32>
    %146 = vector.broadcast %19 : vector<1x256xf32> to vector<64x256xf32>
    %147 = arith.addf %145, %146 : vector<64x256xf32>
    %cst_205 = arith.constant 0.000000e+00 : f32
    %148 = vector.broadcast %cst_205 : f32 to vector<64x256xf32>
    %149 = arith.maximumf %147, %148 : vector<64x256xf32>
    %150 = vector.shape_cast %149 : vector<64x256xf32> to vector<4x16x256xf32>
    %c0_206 = arith.constant 0 : index
    %c0_207 = arith.constant 0 : index
    %c1_208 = arith.constant 1 : index
    %c0_209 = arith.constant 0 : index
    %c0_210 = arith.constant 0 : index
    %151 = vector.load %arg5[%c0_206, %c0_207, %c1_208, %c0_209, %c0_210] : memref<1x4x2x16x256xf32, #tpu.memory_space<vmem>>, vector<1x4x1x16x256xf32>
    %152 = vector.shape_cast %151 : vector<1x4x1x16x256xf32> to vector<4x16x256xf32>
    %153 = vector.shape_cast %150 : vector<4x16x256xf32> to vector<1x4x1x16x256xf32>
    tpu.vector_store %arg5[%c0_206, %c0_207, %c1_208, %c0_209, %c0_210], %153 {strides = array<i32>} : memref<1x4x2x16x256xf32, #tpu.memory_space<vmem>>, vector<1x4x1x16x256xf32>,
    return
  }
  func.func @transform_0(%arg0: i32, %arg1: i32) -> (i32, i32, i32, i32) {
    %c0_i32 = arith.constant 0 : i32
    %c0_i32_0 = arith.constant 0 : i32
    %c0_i32_1 = arith.constant 0 : i32
    %c0_i32_2 = arith.constant 0 : i32
    return %arg0, %c0_i32, %c0_i32_0, %c0_i32_1 : i32, i32, i32, i32
  }
  func.func @transform_1(%arg0: i32, %arg1: i32) -> (i32, i32, i32, i32, i32, i32) {
    %c0_i32 = arith.constant 0 : i32
    %c0_i32_0 = arith.constant 0 : i32
    %c0_i32_1 = arith.constant 0 : i32
    %c0_i32_2 = arith.constant 0 : i32
    %c0_i32_3 = arith.constant 0 : i32
    %c0_i32_4 = arith.constant 0 : i32
    %c0_i32_5 = arith.constant 0 : i32
    return %c0_i32, %c0_i32_0, %c0_i32_1, %c0_i32_2, %c0_i32_3, %c0_i32_4 : i32, i32, i32, i32, i32, i32
  }
  func.func @transform_2(%arg0: i32, %arg1: i32) -> (i32, i32) {
    %c0_i32 = arith.constant 0 : i32
    %c0_i32_0 = arith.constant 0 : i32
    %c0_i32_1 = arith.constant 0 : i32
    return %c0_i32, %c0_i32_0 : i32, i32
  }
  func.func @transform_3(%arg0: i32, %arg1: i32) -> (i32, i32, i32, i32, i32) {
    %c0_i32 = arith.constant 0 : i32
    %c0_i32_0 = arith.constant 0 : i32
    %c0_i32_1 = arith.constant 0 : i32
    %c0_i32_2 = arith.constant 0 : i32
    return %arg0, %arg1, %c0_i32, %c0_i32_0, %c0_i32_1 : i32, i32, i32, i32, i32
  }
}

module attributes {stable_mosaic.version = 11 : i64} {
  func.func @_phase_deconv_kernel(%arg0: i32, %arg1: i32, %arg2: memref<1x34x34x128xf32, #tpu.memory_space<vmem>>, %arg3: memref<2x3x2x128x6xf32, #tpu.memory_space<vmem>>, %arg4: memref<1x6xf32, #tpu.memory_space<vmem>>, %arg5: memref<1x4x2x32x6xf32, #tpu.memory_space<vmem>>, %arg6: memref<3x6x32x128xf32, #tpu.memory_space<vmem>>) attributes {dimension_semantics = [#tpu.dimension_semantics<parallel>, #tpu.dimension_semantics<parallel>], iteration_bounds = array<i64: 2, 8>, scalar_prefetch = 0 : i64, scratch_operands = 1 : i64, tpu.core_type = #tpu.core_type<tc>, window_params = [{transform_indices = @transform_0, window_bounds = array<i64: 1, 34, 34, 128>}, {pipeline_mode = #tpu.pipeline_mode<synchronous>, transform_indices = @transform_1, window_bounds = array<i64: 2, 3, 2, 128, 6>}, {pipeline_mode = #tpu.pipeline_mode<synchronous>, transform_indices = @transform_2, window_bounds = array<i64: 1, 6>}, {transform_indices = @transform_3, window_bounds = array<i64: 1, 4, 2, 32, 6>}]} {
    %c4_i32 = arith.constant 4 : i32
    %0 = arith.muli %arg1, %c4_i32 : i32
    %c0 = arith.constant 0 : index
    %1 = arith.index_cast %0 : i32 to index
    %c0_0 = arith.constant 0 : index
    %c0_1 = arith.constant 0 : index
    %2 = vector.load %arg2[%c0, %1, %c0_0, %c0_1] : memref<1x34x34x128xf32, #tpu.memory_space<vmem>>, vector<1x6x32x128xf32>
    %3 = vector.shape_cast %2 : vector<1x6x32x128xf32> to vector<6x32x128xf32>
    %c0_2 = arith.constant 0 : index
    %c0_3 = arith.constant 0 : index
    %c0_4 = arith.constant 0 : index
    %c0_5 = arith.constant 0 : index
    %4 = vector.load %arg6[%c0_2, %c0_3, %c0_4, %c0_5] : memref<3x6x32x128xf32, #tpu.memory_space<vmem>>, vector<1x6x32x128xf32>
    %5 = vector.shape_cast %4 : vector<1x6x32x128xf32> to vector<6x32x128xf32>
    %6 = vector.shape_cast %3 : vector<6x32x128xf32> to vector<1x6x32x128xf32>
    tpu.vector_store %arg6[%c0_2, %c0_3, %c0_4, %c0_5], %6 {strides = array<i32>} : memref<3x6x32x128xf32, #tpu.memory_space<vmem>>, vector<1x6x32x128xf32>,
    %c0_6 = arith.constant 0 : index
    %7 = arith.index_cast %0 : i32 to index
    %c1 = arith.constant 1 : index
    %c0_7 = arith.constant 0 : index
    %8 = vector.load %arg2[%c0_6, %7, %c1, %c0_7] : memref<1x34x34x128xf32, #tpu.memory_space<vmem>>, vector<1x6x32x128xf32>
    %9 = vector.shape_cast %8 : vector<1x6x32x128xf32> to vector<6x32x128xf32>
    %c1_8 = arith.constant 1 : index
    %c0_9 = arith.constant 0 : index
    %c0_10 = arith.constant 0 : index
    %c0_11 = arith.constant 0 : index
    %10 = vector.load %arg6[%c1_8, %c0_9, %c0_10, %c0_11] : memref<3x6x32x128xf32, #tpu.memory_space<vmem>>, vector<1x6x32x128xf32>
    %11 = vector.shape_cast %10 : vector<1x6x32x128xf32> to vector<6x32x128xf32>
    %12 = vector.shape_cast %9 : vector<6x32x128xf32> to vector<1x6x32x128xf32>
    tpu.vector_store %arg6[%c1_8, %c0_9, %c0_10, %c0_11], %12 {strides = array<i32>} : memref<3x6x32x128xf32, #tpu.memory_space<vmem>>, vector<1x6x32x128xf32>,
    %c0_12 = arith.constant 0 : index
    %13 = arith.index_cast %0 : i32 to index
    %c2 = arith.constant 2 : index
    %c0_13 = arith.constant 0 : index
    %14 = vector.load %arg2[%c0_12, %13, %c2, %c0_13] : memref<1x34x34x128xf32, #tpu.memory_space<vmem>>, vector<1x6x32x128xf32>
    %15 = vector.shape_cast %14 : vector<1x6x32x128xf32> to vector<6x32x128xf32>
    %c2_14 = arith.constant 2 : index
    %c0_15 = arith.constant 0 : index
    %c0_16 = arith.constant 0 : index
    %c0_17 = arith.constant 0 : index
    %16 = vector.load %arg6[%c2_14, %c0_15, %c0_16, %c0_17] : memref<3x6x32x128xf32, #tpu.memory_space<vmem>>, vector<1x6x32x128xf32>
    %17 = vector.shape_cast %16 : vector<1x6x32x128xf32> to vector<6x32x128xf32>
    %18 = vector.shape_cast %15 : vector<6x32x128xf32> to vector<1x6x32x128xf32>
    tpu.vector_store %arg6[%c2_14, %c0_15, %c0_16, %c0_17], %18 {strides = array<i32>} : memref<3x6x32x128xf32, #tpu.memory_space<vmem>>, vector<1x6x32x128xf32>,
    %c0_18 = arith.constant 0 : index
    %c0_19 = arith.constant 0 : index
    %19 = vector.load %arg4[%c0_18, %c0_19] : memref<1x6xf32, #tpu.memory_space<vmem>>, vector<1x6xf32>
    %cst = arith.constant 0.000000e+00 : f32
    %20 = vector.broadcast %cst : f32 to vector<128x6xf32>
    %c0_20 = arith.constant 0 : index
    %c0_21 = arith.constant 0 : index
    %c0_22 = arith.constant 0 : index
    %c0_23 = arith.constant 0 : index
    %21 = vector.load %arg6[%c0_20, %c0_21, %c0_22, %c0_23] : memref<3x6x32x128xf32, #tpu.memory_space<vmem>>, vector<1x4x32x128xf32>
    %22 = vector.shape_cast %21 : vector<1x4x32x128xf32> to vector<4x32x128xf32>
    %23 = vector.shape_cast %22 : vector<4x32x128xf32> to vector<128x128xf32>
    %c0_24 = arith.constant 0 : index
    %c0_25 = arith.constant 0 : index
    %c0_26 = arith.constant 0 : index
    %c0_27 = arith.constant 0 : index
    %c0_28 = arith.constant 0 : index
    %24 = vector.load %arg3[%c0_24, %c0_25, %c0_26, %c0_27, %c0_28] : memref<2x3x2x128x6xf32, #tpu.memory_space<vmem>>, vector<1x1x1x128x6xf32>
    %25 = vector.shape_cast %24 : vector<1x1x1x128x6xf32> to vector<128x6xf32>
    %cst_29 = arith.constant dense<0.000000e+00> : vector<128x6xf32>
    %26 = tpu.matmul %23, %25, %cst_29 {dimension_numbers = #tpu.dot_dimension_numbers<[1], [0], [0], [1], [0, 0, 1, 1], [], []>} : vector<128x128xf32>, vector<128x6xf32>, vector<128x6xf32> -> vector<128x6xf32>
    %27 = arith.addf %20, %26 : vector<128x6xf32>
    %c1_30 = arith.constant 1 : index
    %c0_31 = arith.constant 0 : index
    %c0_32 = arith.constant 0 : index
    %c0_33 = arith.constant 0 : index
    %28 = vector.load %arg6[%c1_30, %c0_31, %c0_32, %c0_33] : memref<3x6x32x128xf32, #tpu.memory_space<vmem>>, vector<1x4x32x128xf32>
    %29 = vector.shape_cast %28 : vector<1x4x32x128xf32> to vector<4x32x128xf32>
    %30 = vector.shape_cast %29 : vector<4x32x128xf32> to vector<128x128xf32>
    %c0_34 = arith.constant 0 : index
    %c1_35 = arith.constant 1 : index
    %c0_36 = arith.constant 0 : index
    %c0_37 = arith.constant 0 : index
    %c0_38 = arith.constant 0 : index
    %31 = vector.load %arg3[%c0_34, %c1_35, %c0_36, %c0_37, %c0_38] : memref<2x3x2x128x6xf32, #tpu.memory_space<vmem>>, vector<1x1x1x128x6xf32>
    %32 = vector.shape_cast %31 : vector<1x1x1x128x6xf32> to vector<128x6xf32>
    %cst_39 = arith.constant dense<0.000000e+00> : vector<128x6xf32>
    %33 = tpu.matmul %30, %32, %cst_39 {dimension_numbers = #tpu.dot_dimension_numbers<[1], [0], [0], [1], [0, 0, 1, 1], [], []>} : vector<128x128xf32>, vector<128x6xf32>, vector<128x6xf32> -> vector<128x6xf32>
    %34 = arith.addf %27, %33 : vector<128x6xf32>
    %c2_40 = arith.constant 2 : index
    %c0_41 = arith.constant 0 : index
    %c0_42 = arith.constant 0 : index
    %c0_43 = arith.constant 0 : index
    %35 = vector.load %arg6[%c2_40, %c0_41, %c0_42, %c0_43] : memref<3x6x32x128xf32, #tpu.memory_space<vmem>>, vector<1x4x32x128xf32>
    %36 = vector.shape_cast %35 : vector<1x4x32x128xf32> to vector<4x32x128xf32>
    %37 = vector.shape_cast %36 : vector<4x32x128xf32> to vector<128x128xf32>
    %c0_44 = arith.constant 0 : index
    %c2_45 = arith.constant 2 : index
    %c0_46 = arith.constant 0 : index
    %c0_47 = arith.constant 0 : index
    %c0_48 = arith.constant 0 : index
    %38 = vector.load %arg3[%c0_44, %c2_45, %c0_46, %c0_47, %c0_48] : memref<2x3x2x128x6xf32, #tpu.memory_space<vmem>>, vector<1x1x1x128x6xf32>
    %39 = vector.shape_cast %38 : vector<1x1x1x128x6xf32> to vector<128x6xf32>
    %cst_49 = arith.constant dense<0.000000e+00> : vector<128x6xf32>
    %40 = tpu.matmul %37, %39, %cst_49 {dimension_numbers = #tpu.dot_dimension_numbers<[1], [0], [0], [1], [0, 0, 1, 1], [], []>} : vector<128x128xf32>, vector<128x6xf32>, vector<128x6xf32> -> vector<128x6xf32>
    %41 = arith.addf %34, %40 : vector<128x6xf32>
    %c0_50 = arith.constant 0 : index
    %c1_51 = arith.constant 1 : index
    %c0_52 = arith.constant 0 : index
    %c0_53 = arith.constant 0 : index
    %42 = vector.load %arg6[%c0_50, %c1_51, %c0_52, %c0_53] : memref<3x6x32x128xf32, #tpu.memory_space<vmem>>, vector<1x4x32x128xf32>
    %43 = vector.shape_cast %42 : vector<1x4x32x128xf32> to vector<4x32x128xf32>
    %44 = vector.shape_cast %43 : vector<4x32x128xf32> to vector<128x128xf32>
    %c0_54 = arith.constant 0 : index
    %c0_55 = arith.constant 0 : index
    %c1_56 = arith.constant 1 : index
    %c0_57 = arith.constant 0 : index
    %c0_58 = arith.constant 0 : index
    %45 = vector.load %arg3[%c0_54, %c0_55, %c1_56, %c0_57, %c0_58] : memref<2x3x2x128x6xf32, #tpu.memory_space<vmem>>, vector<1x1x1x128x6xf32>
    %46 = vector.shape_cast %45 : vector<1x1x1x128x6xf32> to vector<128x6xf32>
    %cst_59 = arith.constant dense<0.000000e+00> : vector<128x6xf32>
    %47 = tpu.matmul %44, %46, %cst_59 {dimension_numbers = #tpu.dot_dimension_numbers<[1], [0], [0], [1], [0, 0, 1, 1], [], []>} : vector<128x128xf32>, vector<128x6xf32>, vector<128x6xf32> -> vector<128x6xf32>
    %48 = arith.addf %41, %47 : vector<128x6xf32>
    %c1_60 = arith.constant 1 : index
    %c1_61 = arith.constant 1 : index
    %c0_62 = arith.constant 0 : index
    %c0_63 = arith.constant 0 : index
    %49 = vector.load %arg6[%c1_60, %c1_61, %c0_62, %c0_63] : memref<3x6x32x128xf32, #tpu.memory_space<vmem>>, vector<1x4x32x128xf32>
    %50 = vector.shape_cast %49 : vector<1x4x32x128xf32> to vector<4x32x128xf32>
    %51 = vector.shape_cast %50 : vector<4x32x128xf32> to vector<128x128xf32>
    %c0_64 = arith.constant 0 : index
    %c1_65 = arith.constant 1 : index
    %c1_66 = arith.constant 1 : index
    %c0_67 = arith.constant 0 : index
    %c0_68 = arith.constant 0 : index
    %52 = vector.load %arg3[%c0_64, %c1_65, %c1_66, %c0_67, %c0_68] : memref<2x3x2x128x6xf32, #tpu.memory_space<vmem>>, vector<1x1x1x128x6xf32>
    %53 = vector.shape_cast %52 : vector<1x1x1x128x6xf32> to vector<128x6xf32>
    %cst_69 = arith.constant dense<0.000000e+00> : vector<128x6xf32>
    %54 = tpu.matmul %51, %53, %cst_69 {dimension_numbers = #tpu.dot_dimension_numbers<[1], [0], [0], [1], [0, 0, 1, 1], [], []>} : vector<128x128xf32>, vector<128x6xf32>, vector<128x6xf32> -> vector<128x6xf32>
    %55 = arith.addf %48, %54 : vector<128x6xf32>
    %c2_70 = arith.constant 2 : index
    %c1_71 = arith.constant 1 : index
    %c0_72 = arith.constant 0 : index
    %c0_73 = arith.constant 0 : index
    %56 = vector.load %arg6[%c2_70, %c1_71, %c0_72, %c0_73] : memref<3x6x32x128xf32, #tpu.memory_space<vmem>>, vector<1x4x32x128xf32>
    %57 = vector.shape_cast %56 : vector<1x4x32x128xf32> to vector<4x32x128xf32>
    %58 = vector.shape_cast %57 : vector<4x32x128xf32> to vector<128x128xf32>
    %c0_74 = arith.constant 0 : index
    %c2_75 = arith.constant 2 : index
    %c1_76 = arith.constant 1 : index
    %c0_77 = arith.constant 0 : index
    %c0_78 = arith.constant 0 : index
    %59 = vector.load %arg3[%c0_74, %c2_75, %c1_76, %c0_77, %c0_78] : memref<2x3x2x128x6xf32, #tpu.memory_space<vmem>>, vector<1x1x1x128x6xf32>
    %60 = vector.shape_cast %59 : vector<1x1x1x128x6xf32> to vector<128x6xf32>
    %cst_79 = arith.constant dense<0.000000e+00> : vector<128x6xf32>
    %61 = tpu.matmul %58, %60, %cst_79 {dimension_numbers = #tpu.dot_dimension_numbers<[1], [0], [0], [1], [0, 0, 1, 1], [], []>} : vector<128x128xf32>, vector<128x6xf32>, vector<128x6xf32> -> vector<128x6xf32>
    %62 = arith.addf %55, %61 : vector<128x6xf32>
    %63 = vector.broadcast %19 : vector<1x6xf32> to vector<128x6xf32>
    %64 = arith.addf %62, %63 : vector<128x6xf32>
    %65 = arith.negf %64 : vector<128x6xf32>
    %66 = math.exp %65 : vector<128x6xf32>
    %cst_80 = arith.constant 1.000000e+00 : f32
    %67 = vector.broadcast %cst_80 : f32 to vector<128x6xf32>
    %68 = arith.addf %67, %66 : vector<128x6xf32>
    %69 = arith.divf %67, %68 : vector<128x6xf32>
    %70 = vector.shape_cast %69 : vector<128x6xf32> to vector<4x32x6xf32>
    %c0_81 = arith.constant 0 : index
    %c0_82 = arith.constant 0 : index
    %c0_83 = arith.constant 0 : index
    %c0_84 = arith.constant 0 : index
    %c0_85 = arith.constant 0 : index
    %71 = vector.load %arg5[%c0_81, %c0_82, %c0_83, %c0_84, %c0_85] : memref<1x4x2x32x6xf32, #tpu.memory_space<vmem>>, vector<1x4x1x32x6xf32>
    %72 = vector.shape_cast %71 : vector<1x4x1x32x6xf32> to vector<4x32x6xf32>
    %73 = vector.shape_cast %70 : vector<4x32x6xf32> to vector<1x4x1x32x6xf32>
    tpu.vector_store %arg5[%c0_81, %c0_82, %c0_83, %c0_84, %c0_85], %73 {strides = array<i32>} : memref<1x4x2x32x6xf32, #tpu.memory_space<vmem>>, vector<1x4x1x32x6xf32>,
    %cst_86 = arith.constant 0.000000e+00 : f32
    %74 = vector.broadcast %cst_86 : f32 to vector<128x6xf32>
    %c0_87 = arith.constant 0 : index
    %c1_88 = arith.constant 1 : index
    %c0_89 = arith.constant 0 : index
    %c0_90 = arith.constant 0 : index
    %75 = vector.load %arg6[%c0_87, %c1_88, %c0_89, %c0_90] : memref<3x6x32x128xf32, #tpu.memory_space<vmem>>, vector<1x4x32x128xf32>
    %76 = vector.shape_cast %75 : vector<1x4x32x128xf32> to vector<4x32x128xf32>
    %77 = vector.shape_cast %76 : vector<4x32x128xf32> to vector<128x128xf32>
    %c1_91 = arith.constant 1 : index
    %c0_92 = arith.constant 0 : index
    %c0_93 = arith.constant 0 : index
    %c0_94 = arith.constant 0 : index
    %c0_95 = arith.constant 0 : index
    %78 = vector.load %arg3[%c1_91, %c0_92, %c0_93, %c0_94, %c0_95] : memref<2x3x2x128x6xf32, #tpu.memory_space<vmem>>, vector<1x1x1x128x6xf32>
    %79 = vector.shape_cast %78 : vector<1x1x1x128x6xf32> to vector<128x6xf32>
    %cst_96 = arith.constant dense<0.000000e+00> : vector<128x6xf32>
    %80 = tpu.matmul %77, %79, %cst_96 {dimension_numbers = #tpu.dot_dimension_numbers<[1], [0], [0], [1], [0, 0, 1, 1], [], []>} : vector<128x128xf32>, vector<128x6xf32>, vector<128x6xf32> -> vector<128x6xf32>
    %81 = arith.addf %74, %80 : vector<128x6xf32>
    %c1_97 = arith.constant 1 : index
    %c1_98 = arith.constant 1 : index
    %c0_99 = arith.constant 0 : index
    %c0_100 = arith.constant 0 : index
    %82 = vector.load %arg6[%c1_97, %c1_98, %c0_99, %c0_100] : memref<3x6x32x128xf32, #tpu.memory_space<vmem>>, vector<1x4x32x128xf32>
    %83 = vector.shape_cast %82 : vector<1x4x32x128xf32> to vector<4x32x128xf32>
    %84 = vector.shape_cast %83 : vector<4x32x128xf32> to vector<128x128xf32>
    %c1_101 = arith.constant 1 : index
    %c1_102 = arith.constant 1 : index
    %c0_103 = arith.constant 0 : index
    %c0_104 = arith.constant 0 : index
    %c0_105 = arith.constant 0 : index
    %85 = vector.load %arg3[%c1_101, %c1_102, %c0_103, %c0_104, %c0_105] : memref<2x3x2x128x6xf32, #tpu.memory_space<vmem>>, vector<1x1x1x128x6xf32>
    %86 = vector.shape_cast %85 : vector<1x1x1x128x6xf32> to vector<128x6xf32>
    %cst_106 = arith.constant dense<0.000000e+00> : vector<128x6xf32>
    %87 = tpu.matmul %84, %86, %cst_106 {dimension_numbers = #tpu.dot_dimension_numbers<[1], [0], [0], [1], [0, 0, 1, 1], [], []>} : vector<128x128xf32>, vector<128x6xf32>, vector<128x6xf32> -> vector<128x6xf32>
    %88 = arith.addf %81, %87 : vector<128x6xf32>
    %c2_107 = arith.constant 2 : index
    %c1_108 = arith.constant 1 : index
    %c0_109 = arith.constant 0 : index
    %c0_110 = arith.constant 0 : index
    %89 = vector.load %arg6[%c2_107, %c1_108, %c0_109, %c0_110] : memref<3x6x32x128xf32, #tpu.memory_space<vmem>>, vector<1x4x32x128xf32>
    %90 = vector.shape_cast %89 : vector<1x4x32x128xf32> to vector<4x32x128xf32>
    %91 = vector.shape_cast %90 : vector<4x32x128xf32> to vector<128x128xf32>
    %c1_111 = arith.constant 1 : index
    %c2_112 = arith.constant 2 : index
    %c0_113 = arith.constant 0 : index
    %c0_114 = arith.constant 0 : index
    %c0_115 = arith.constant 0 : index
    %92 = vector.load %arg3[%c1_111, %c2_112, %c0_113, %c0_114, %c0_115] : memref<2x3x2x128x6xf32, #tpu.memory_space<vmem>>, vector<1x1x1x128x6xf32>
    %93 = vector.shape_cast %92 : vector<1x1x1x128x6xf32> to vector<128x6xf32>
    %cst_116 = arith.constant dense<0.000000e+00> : vector<128x6xf32>
    %94 = tpu.matmul %91, %93, %cst_116 {dimension_numbers = #tpu.dot_dimension_numbers<[1], [0], [0], [1], [0, 0, 1, 1], [], []>} : vector<128x128xf32>, vector<128x6xf32>, vector<128x6xf32> -> vector<128x6xf32>
    %95 = arith.addf %88, %94 : vector<128x6xf32>
    %c0_117 = arith.constant 0 : index
    %c2_118 = arith.constant 2 : index
    %c0_119 = arith.constant 0 : index
    %c0_120 = arith.constant 0 : index
    %96 = vector.load %arg6[%c0_117, %c2_118, %c0_119, %c0_120] : memref<3x6x32x128xf32, #tpu.memory_space<vmem>>, vector<1x4x32x128xf32>
    %97 = vector.shape_cast %96 : vector<1x4x32x128xf32> to vector<4x32x128xf32>
    %98 = vector.shape_cast %97 : vector<4x32x128xf32> to vector<128x128xf32>
    %c1_121 = arith.constant 1 : index
    %c0_122 = arith.constant 0 : index
    %c1_123 = arith.constant 1 : index
    %c0_124 = arith.constant 0 : index
    %c0_125 = arith.constant 0 : index
    %99 = vector.load %arg3[%c1_121, %c0_122, %c1_123, %c0_124, %c0_125] : memref<2x3x2x128x6xf32, #tpu.memory_space<vmem>>, vector<1x1x1x128x6xf32>
    %100 = vector.shape_cast %99 : vector<1x1x1x128x6xf32> to vector<128x6xf32>
    %cst_126 = arith.constant dense<0.000000e+00> : vector<128x6xf32>
    %101 = tpu.matmul %98, %100, %cst_126 {dimension_numbers = #tpu.dot_dimension_numbers<[1], [0], [0], [1], [0, 0, 1, 1], [], []>} : vector<128x128xf32>, vector<128x6xf32>, vector<128x6xf32> -> vector<128x6xf32>
    %102 = arith.addf %95, %101 : vector<128x6xf32>
    %c1_127 = arith.constant 1 : index
    %c2_128 = arith.constant 2 : index
    %c0_129 = arith.constant 0 : index
    %c0_130 = arith.constant 0 : index
    %103 = vector.load %arg6[%c1_127, %c2_128, %c0_129, %c0_130] : memref<3x6x32x128xf32, #tpu.memory_space<vmem>>, vector<1x4x32x128xf32>
    %104 = vector.shape_cast %103 : vector<1x4x32x128xf32> to vector<4x32x128xf32>
    %105 = vector.shape_cast %104 : vector<4x32x128xf32> to vector<128x128xf32>
    %c1_131 = arith.constant 1 : index
    %c1_132 = arith.constant 1 : index
    %c1_133 = arith.constant 1 : index
    %c0_134 = arith.constant 0 : index
    %c0_135 = arith.constant 0 : index
    %106 = vector.load %arg3[%c1_131, %c1_132, %c1_133, %c0_134, %c0_135] : memref<2x3x2x128x6xf32, #tpu.memory_space<vmem>>, vector<1x1x1x128x6xf32>
    %107 = vector.shape_cast %106 : vector<1x1x1x128x6xf32> to vector<128x6xf32>
    %cst_136 = arith.constant dense<0.000000e+00> : vector<128x6xf32>
    %108 = tpu.matmul %105, %107, %cst_136 {dimension_numbers = #tpu.dot_dimension_numbers<[1], [0], [0], [1], [0, 0, 1, 1], [], []>} : vector<128x128xf32>, vector<128x6xf32>, vector<128x6xf32> -> vector<128x6xf32>
    %109 = arith.addf %102, %108 : vector<128x6xf32>
    %c2_137 = arith.constant 2 : index
    %c2_138 = arith.constant 2 : index
    %c0_139 = arith.constant 0 : index
    %c0_140 = arith.constant 0 : index
    %110 = vector.load %arg6[%c2_137, %c2_138, %c0_139, %c0_140] : memref<3x6x32x128xf32, #tpu.memory_space<vmem>>, vector<1x4x32x128xf32>
    %111 = vector.shape_cast %110 : vector<1x4x32x128xf32> to vector<4x32x128xf32>
    %112 = vector.shape_cast %111 : vector<4x32x128xf32> to vector<128x128xf32>
    %c1_141 = arith.constant 1 : index
    %c2_142 = arith.constant 2 : index
    %c1_143 = arith.constant 1 : index
    %c0_144 = arith.constant 0 : index
    %c0_145 = arith.constant 0 : index
    %113 = vector.load %arg3[%c1_141, %c2_142, %c1_143, %c0_144, %c0_145] : memref<2x3x2x128x6xf32, #tpu.memory_space<vmem>>, vector<1x1x1x128x6xf32>
    %114 = vector.shape_cast %113 : vector<1x1x1x128x6xf32> to vector<128x6xf32>
    %cst_146 = arith.constant dense<0.000000e+00> : vector<128x6xf32>
    %115 = tpu.matmul %112, %114, %cst_146 {dimension_numbers = #tpu.dot_dimension_numbers<[1], [0], [0], [1], [0, 0, 1, 1], [], []>} : vector<128x128xf32>, vector<128x6xf32>, vector<128x6xf32> -> vector<128x6xf32>
    %116 = arith.addf %109, %115 : vector<128x6xf32>
    %117 = vector.broadcast %19 : vector<1x6xf32> to vector<128x6xf32>
    %118 = arith.addf %116, %117 : vector<128x6xf32>
    %119 = arith.negf %118 : vector<128x6xf32>
    %120 = math.exp %119 : vector<128x6xf32>
    %cst_147 = arith.constant 1.000000e+00 : f32
    %121 = vector.broadcast %cst_147 : f32 to vector<128x6xf32>
    %122 = arith.addf %121, %120 : vector<128x6xf32>
    %123 = arith.divf %121, %122 : vector<128x6xf32>
    %124 = vector.shape_cast %123 : vector<128x6xf32> to vector<4x32x6xf32>
    %c0_148 = arith.constant 0 : index
    %c0_149 = arith.constant 0 : index
    %c1_150 = arith.constant 1 : index
    %c0_151 = arith.constant 0 : index
    %c0_152 = arith.constant 0 : index
    %125 = vector.load %arg5[%c0_148, %c0_149, %c1_150, %c0_151, %c0_152] : memref<1x4x2x32x6xf32, #tpu.memory_space<vmem>>, vector<1x4x1x32x6xf32>
    %126 = vector.shape_cast %125 : vector<1x4x1x32x6xf32> to vector<4x32x6xf32>
    %127 = vector.shape_cast %124 : vector<4x32x6xf32> to vector<1x4x1x32x6xf32>
    tpu.vector_store %arg5[%c0_148, %c0_149, %c1_150, %c0_151, %c0_152], %127 {strides = array<i32>} : memref<1x4x2x32x6xf32, #tpu.memory_space<vmem>>, vector<1x4x1x32x6xf32>,
    return
  }
  func.func @transform_0(%arg0: i32, %arg1: i32) -> (i32, i32, i32, i32) {
    %c0_i32 = arith.constant 0 : i32
    %c0_i32_0 = arith.constant 0 : i32
    %c0_i32_1 = arith.constant 0 : i32
    %c0_i32_2 = arith.constant 0 : i32
    return %arg0, %c0_i32, %c0_i32_0, %c0_i32_1 : i32, i32, i32, i32
  }
  func.func @transform_1(%arg0: i32, %arg1: i32) -> (i32, i32, i32, i32, i32) {
    %c0_i32 = arith.constant 0 : i32
    %c0_i32_0 = arith.constant 0 : i32
    %c0_i32_1 = arith.constant 0 : i32
    %c0_i32_2 = arith.constant 0 : i32
    %c0_i32_3 = arith.constant 0 : i32
    %c0_i32_4 = arith.constant 0 : i32
    return %c0_i32, %c0_i32_0, %c0_i32_1, %c0_i32_2, %c0_i32_3 : i32, i32, i32, i32, i32
  }
  func.func @transform_2(%arg0: i32, %arg1: i32) -> (i32, i32) {
    %c0_i32 = arith.constant 0 : i32
    %c0_i32_0 = arith.constant 0 : i32
    %c0_i32_1 = arith.constant 0 : i32
    return %c0_i32, %c0_i32_0 : i32, i32
  }
  func.func @transform_3(%arg0: i32, %arg1: i32) -> (i32, i32, i32, i32, i32) {
    %c0_i32 = arith.constant 0 : i32
    %c0_i32_0 = arith.constant 0 : i32
    %c0_i32_1 = arith.constant 0 : i32
    %c0_i32_2 = arith.constant 0 : i32
    return %arg0, %arg1, %c0_i32, %c0_i32_0, %c0_i32_1 : i32, i32, i32, i32, i32
  }
}

</mosaic_0001>

<bundles_post_ra>
// kernel: deconvnet_forward.3
= control target key start
LH: loop header
LB: loop body
LE: loop exit
PB: predicated region body
PF: predicated region fallthrough
CT: control target
= control target key end

     0   :  { %s2524_s12 = smov 0   ;;  %s2526_s13 = smov 0   ;;  %s3003_s0 = inlined_call_operand.vmem [shape: f32[2,10,10,4], index: 0, kind: input, shape index: {}]   ;;  %s3004_s1 = inlined_call_operand.vmem [shape: f32[2,2,2,2,4,256], index: 1, kind: input, shape index: {}]   ;;  %s3005_s2 = inlined_call_operand.vmem [shape: f32[1,512], index: 2, kind: input, shape index: {}]   ;;  %s3006_s3 = inlined_call_operand.vmem [shape: f32[2,8,2,8,512], index: 3, kind: output, shape index: {}]  }
   0x1   :  { %s2528_s14 = smov 0   ;;  %s2530_s15 = smov 0  }
   0x2   :  { %s2532_s16 = smov 0  }
   0x3 LB: > { %s22_s17 = sadd.s32 1, %s2493_s14  ;;  %s25_s18 = sadd.s32 1, %s2497_s15  ;;  %s2501_s16 = sphi %s2532_s16, %s13_s16   ;;  %s2497_s15 = sphi %s2530_s15, %s3010_s15   ;;  %s2493_s14 = sphi %s2528_s14, %s3009_s14   ;;  %s2489_s13 = sphi %s2526_s13, %s3008_s13   ;;  %s2485_s12 = sphi %s2524_s12, %s3007_s12  }
   0x4   : > { %p23_p0 = scmp.ge.s32.totalorder %s22_s17, 2  ;;  %p2267_p1 = scmp.ge.s32.totalorder %s2501_s16, 1 }
   0x5   : > { %p151_p2 = scmp.lt.s32.totalorder %s2501_s16, 5 }
   0x6   : > { %s3012_s17 = smov (%p23_p0, %s22_s17), 0  ;;  %s3014_s18 = smov (!%p23_p0, %s25_s18), %s2497_s15 }
   0x7   : > { %p152_p3 = pnand %p2267_p1, %p151_p2  ;;  %p27_p4 = scmp.ge.s32.totalorder %s3014_s18, 2 }
   0x8   : > { %p180_p5 = scmp.lt.s32.totalorder (!%p152_p3), %s2489_s13, 1  ;;  %s2404_s28 = sshll.u32 (!%p152_p3), %s2485_s12, 6 }
   0x9   : > { %s3016_s18 = smov (%p27_p4, %s3014_s18), 0  ;;  %155 = sbr.rel (%p152_p3) target bundleno = 357 (0x165), region = 32 }
   0xa   : > { %s2269_s10 = sshll.u32 (!%p152_p3), %s2485_s12, 2 }
   0xb   : > { %p188_p6 = scmp.lt.s32.totalorder (!%p152_p3), %s2269_s10, 7 }
   0xe   : > { %v2275_v0 = vld [vmem:[%s3004_s1 + $0x8] sm:$0xff]  ;;  %vm264_vm0 = vcmask 1043456   ;;  %v243_v1 = vld [vmem:[%s3004_s1] sm:$0xff]  ;;  %v2565_v2 = vld [vmem:[%s3004_s1 + $0x10] sm:$0xff]  ;;  %v2503_v5 = vmov 0.0   ;;  %s3018_s13 = smov (!%p180_p5, %s2489_s13), 1 }
   0xf   : > { %v251_v3 = vcombine.high %v2275_v0, %v2275_v0  ;;  %v359_v4 = vcombine.high %v243_v1, %v243_v1  ;;  %333 = vmatprep.mubr.f32.mxu0 %v2503_v5  ;;  %440 = vmatprep.mubr.f32.mxu1 %v2503_v5  ;;  %v473_v6 = vcombine.high %v2565_v2, %v2565_v2  ;;  %v2295_v7 = vld [vmem:[%s3004_s1 + $0x18] sm:$0xff]  ;;  %s2405_s27 = smul.u32 160, %s3018_s13  ;;  %vm205_vm1 = vcmask 31744   ;;  %v2303_v18 = vld [vmem:[%s3004_s1 + $0x28] sm:$0xff]  ;;  %v2302_v19 = vld [vmem:[%s3004_s1 + $0x20] sm:$0xff]  ;;  %s3020_s10 = smov (!%p188_p6, %s2269_s10), 7 }
  0x10   : > { %v595_v8 = vcombine.high %v2295_v7, %v2295_v7  ;;  %v718_v31 = vcombine.high %v2303_v18, %v2303_v18  ;;  %v825_v32 = vcombine.high %v2302_v19, %v2302_v19  ;;  %v2316_v39 = vld [vmem:[%s3004_s1 + $0x30] sm:$0xff]  ;;  %v2323_v40 = vld [vmem:[%s3004_s1 + $0x38] sm:$0xff]  ;;  %v2331_v45 = vld [vmem:[%s3004_s1 + $0x48] sm:$0xff]  ;;  %s2270_s11 = sshll.u32 %s3020_s10, 3  ;;  %s2271_s12 = sshll.u32 %s3018_s13, 6 }
  0x11   : > { %2276 = vmatprep.subr.msk.mxu0 %vm264_vm0, %v251_v3  ;;  %2282 = vmatprep.subr.msk.mxu1 %vm264_vm0, %v359_v4  ;;  %s184_s4 = scalar_lea.vmem %s3003_s0, %s2405_s27  ;;  %v922_v41 = vcombine.high %v2316_v39, %v2316_v39  ;;  %v1032_v42 = vcombine.high %v2323_v40, %v2323_v40  ;;  %v2330_v46 = vld [vmem:[%s3004_s1 + $0x40] sm:$0xff]  ;;  %v1228_v48 = vcombine.high %v2331_v45, %v2331_v45  ;;  %v2344_v53 = vld [vmem:[%s3004_s1 + $0x50] sm:$0xff]  ;;  %v2351_v54 = vld [vmem:[%s3004_s1 + $0x58] sm:$0xff]  ;;  %s192_s21 = sadd.s32 %s2271_s12, %s2270_s11 }
  0x12   : > { %2277 = vmatpush1.msk.msra.mxu0 %vm264_vm0, %v2275_v0  ;;  %2283 = vmatpush1.msk.msra.mxu1 %vm264_vm0, %v243_v1  ;;  %s2587_s5 = scalar_lea.vmem %s184_s4, %s2404_s28  ;;  %v1335_v49 = vcombine.high %v2330_v46, %v2330_v46  ;;  %v1449_v55 = vcombine.high %v2344_v53, %v2344_v53  ;;  %v1571_v56 = vcombine.high %v2351_v54, %v2351_v54  ;;  %v2359_v58 = vld [vmem:[%s3004_s1 + $0x68] sm:$0xff]  ;;  %v2358_v59 = vld [vmem:[%s3004_s1 + $0x60] sm:$0xff]  ;;  %v2372_v62 = vld [vmem:[%s3004_s1 + $0x70] sm:$0xff]  ;;  %s2272_s13 = sshll.u32 %s192_s21, 3 }
  0x13   : > { %2289 = vmatprep.subr.msk.mxu0 %vm264_vm0, %v473_v6  ;;  %2296 = vmatprep.subr.msk.mxu1 %vm264_vm0, %v595_v8  ;;  %v212_v9 = vld [vmem:[%s2587_s5 + $0x1] sm:$0xff]  ;;  %v213_v11 = vld [vmem:[%s2587_s5 + $0x11] sm:$0xff]  ;;  %v1694_v60 = vcombine.high %v2359_v58, %v2359_v58  ;;  %v1801_v61 = vcombine.high %v2358_v59, %v2358_v59  ;;  %v1898_v0 = vcombine.high %v2372_v62, %v2372_v62  ;;  %s2915_s24 = scalar_lea.vmem %s3006_s3, %s2272_s13 }
  0x14   : > { %v199_v10 = vld [vmem:[%s2587_s5] sm:$0xff]  ;;  %219 = vst.msk [vmem:[#allocation2 + $0x30] sm:$0xff] %vm205_vm1, %v212_v9  ;;  %220 = vst.msk [vmem:[#allocation2 + $0x38] sm:$0xff] %vm205_vm1, %v213_v11  ;;  %v200_v12 = vld [vmem:[%s2587_s5 + $0x10] sm:$0xff] }
  0x15   : > { %206 = vst.msk [vmem:[#allocation2] sm:$0xff] %vm205_vm1, %v199_v10  ;;  %v214_v13 = vld [vmem:[%s2587_s5 + $0x21] sm:$0xff]  ;;  %207 = vst.msk [vmem:[#allocation2 + $0x8] sm:$0xff] %vm205_vm1, %v200_v12  ;;  %v215_v15 = vld [vmem:[%s2587_s5 + $0x31] sm:$0xff]  ;;  %v1147_v12 = vlaneseq }
  0x16   : > { %v201_v14 = vld [vmem:[%s2587_s5 + $0x20] sm:$0xff]  ;;  %221 = vst.msk [vmem:[#allocation2 + $0x40] sm:$0xff] %vm205_vm1, %v214_v13  ;;  %v202_v16 = vld [vmem:[%s2587_s5 + $0x30] sm:$0xff]  ;;  %222 = vst.msk [vmem:[#allocation2 + $0x48] sm:$0xff] %vm205_vm1, %v215_v15 }
  0x17   : > { %208 = vst.msk [vmem:[#allocation2 + $0x10] sm:$0xff] %vm205_vm1, %v201_v14  ;;  %v203_v17 = vld [vmem:[%s2587_s5 + $0x40] sm:$0xff]  ;;  %209 = vst.msk [vmem:[#allocation2 + $0x18] sm:$0xff] %vm205_vm1, %v202_v16  ;;  %v226_v22 = vld [vmem:[%s2587_s5 + $0x12] sm:$0xff] }
  0x18   : > { %210 = vst.msk [vmem:[#allocation2 + $0x20] sm:$0xff] %vm205_vm1, %v203_v17  ;;  %v216_v20 = vld [vmem:[%s2587_s5 + $0x41] sm:$0xff]  ;;  %233 = vst.msk [vmem:[#allocation2 + $0x68] sm:$0xff] %vm205_vm1, %v226_v22  ;;  %v228_v24 = vld [vmem:[%s2587_s5 + $0x32] sm:$0xff] }
  0x19   : > { %v225_v21 = vld [vmem:[%s2587_s5 + $0x2] sm:$0xff]  ;;  %223 = vst.msk [vmem:[#allocation2 + $0x50] sm:$0xff] %vm205_vm1, %v216_v20  ;;  %235 = vst.msk [vmem:[#allocation2 + $0x78] sm:$0xff] %vm205_vm1, %v228_v24  ;;  %v204_v26 = vld [vmem:[%s2587_s5 + $0x50] sm:$0xff] }
  0x1a   : > { %232 = vst.msk [vmem:[#allocation2 + $0x60] sm:$0xff] %vm205_vm1, %v225_v21  ;;  %v227_v23 = vld [vmem:[%s2587_s5 + $0x22] sm:$0xff]  ;;  %v217_v27 = vld [vmem:[%s2587_s5 + $0x51] sm:$0xff]  ;;  %211 = vst.msk [vmem:[#allocation2 + $0x28] sm:$0xff] %vm205_vm1, %v204_v26 }
  0x1b   : > { %v229_v25 = vld [vmem:[%s2587_s5 + $0x42] sm:$0xff]  ;;  %234 = vst.msk [vmem:[#allocation2 + $0x70] sm:$0xff] %vm205_vm1, %v227_v23  ;;  %v230_v28 = vld [vmem:[%s2587_s5 + $0x52] sm:$0xff]  ;;  %224 = vst.msk [vmem:[#allocation2 + $0x58] sm:$0xff] %vm205_vm1, %v217_v27 }
  0x1c   : > { %236 = vst.msk [vmem:[#allocation2 + $0x80] sm:$0xff] %vm205_vm1, %v229_v25  ;;  %237 = vst.msk [vmem:[#allocation2 + $0x88] sm:$0xff] %vm205_vm1, %v230_v28  ;;  %v244_v29 = vld [vmem:[#allocation2 + $0x30] sm:$0xff]  ;;  %v239_v30 = vld [vmem:[#allocation2] sm:$0xff] }
  0x1d   : > { %2278 = vmatmul.mubr.msk.f32.vlgmr.msra.gmra.mxu0 %vm205_vm1, %v244_v29  ;;  %2284 = vmatmul.mubr.msk.f32.vlgmr.msra.gmra.mxu1 %vm205_vm1, %v239_v30  ;;  %v2636_v33 = vld [vmem:[#allocation2 + $0x38] sm:$0xff]  ;;  %v2638_v34 = vld [vmem:[#allocation2 + $0x8] sm:$0xff]  ;;  %v2650_v35 = vld [vmem:[#allocation2 + $0x40] sm:$0xff] }
  0x1e   : > { %2290 = vmatpush1.msk.msra.mxu0 %vm264_vm0, %v2565_v2  ;;  %2297 = vmatpush1.msk.msra.mxu1 %vm264_vm0, %v2295_v7  ;;  %v2652_v36 = vld [vmem:[#allocation2 + $0x10] sm:$0xff]  ;;  %v2660_v37 = vld [vmem:[#allocation2 + $0x48] sm:$0xff]  ;;  %v2662_v38 = vld [vmem:[#allocation2 + $0x18] sm:$0xff] }
  0x1f   : > { %339 = vmatprep.mubr.f32.mxu0 %v2503_v5  ;;  %446 = vmatprep.mubr.f32.mxu1 %v2503_v5  ;;  %v2698_v43 = vld [vmem:[#allocation2 + $0x20] sm:$0xff]  ;;  %v2718_v50 = vld [vmem:[#allocation2 + $0x68] sm:$0xff]  ;;  %v2379_v63 = vld [vmem:[%s3004_s1 + $0x78] sm:$0xff] }
  0x20   : > { %2304 = vmatprep.subr.msk.mxu0 %vm264_vm0, %v718_v31  ;;  %2310 = vmatprep.subr.msk.mxu1 %vm264_vm0, %v825_v32  ;;  %v2700_v44 = vld [vmem:[#allocation2 + $0x50] sm:$0xff]  ;;  %v2738_v52 = vld [vmem:[#allocation2 + $0x78] sm:$0xff]  ;;  %v2008_v1 = vcombine.high %v2379_v63, %v2379_v63  ;;  %v2902_v24 = vld [vmem:[%s3005_s2] sm:$0xf] }
  0x21   : > { %2279 = vmatmul.mubr.msk.f32.gmra.mxu0 %vm205_vm1, %v2636_v33  ;;  %2285 = vmatmul.mubr.msk.f32.gmra.mxu1 %vm205_vm1, %v2638_v34  ;;  %v711_v47 = vld [vmem:[#allocation2 + $0x60] sm:$0xff]  ;;  %v1445_v2 = vld [vmem:[#allocation2 + $0x28] sm:$0xff] }
  0x22   : > { %345 = vmatprep.mubr.f32.mxu0 %v2503_v5  ;;  %452 = vmatprep.mubr.f32.mxu1 %v2503_v5  ;;  %v2730_v51 = vld [vmem:[#allocation2 + $0x70] sm:$0xff]  ;;  %v1567_v3 = vld [vmem:[#allocation2 + $0x58] sm:$0xff] }
  0x23   : > { %v2774_v57 = vld [vmem:[#allocation2 + $0x80] sm:$0xff]  ;;  %v2004_v4 = vld [vmem:[#allocation2 + $0x88] sm:$0xff] }
  0x25   : > { %2280 = vmatmul.mubr.msk.f32.gmra.mxu0 %vm205_vm1, %v2650_v35  ;;  %2286 = vmatmul.mubr.msk.f32.gmra.mxu1 %vm205_vm1, %v2652_v36 }
  0x26   : > { %351 = vmatprep.mubr.f32.mxu0 %v2503_v5  ;;  %458 = vmatprep.mubr.f32.mxu1 %v2503_v5 }
  0x29   : > { %2281 = vmatmul.mubr.msk.f32.gmra.mxu0 %vm205_vm1, %v2660_v37  ;;  %2287 = vmatmul.mubr.msk.f32.gmra.mxu1 %vm205_vm1, %v2662_v38 }
  0x2a   : > { %554 = vmatprep.mubr.f32.mxu0 %v2503_v5  ;;  %676 = vmatprep.mubr.f32.mxu1 %v2503_v5 }
  0x2d   : > { %2291 = vmatmul.mubr.msk.f32.vlgmr.msra.gmra.mxu0 %vm205_vm1, %v2638_v34  ;;  %2298 = vmatmul.mubr.msk.f32.vlgmr.msra.gmra.mxu1 %vm205_vm1, %v2636_v33 }
  0x2e   : > { %2305 = vmatpush1.msk.msra.mxu0 %vm264_vm0, %v2303_v18  ;;  %2311 = vmatpush1.msk.msra.mxu1 %vm264_vm0, %v2302_v19 }
  0x2f   : > { %560 = vmatprep.mubr.f32.mxu0 %v2503_v5  ;;  %682 = vmatprep.mubr.f32.mxu1 %v2503_v5 }
  0x30   : > { %2317 = vmatprep.subr.msk.mxu0 %vm264_vm0, %v922_v41  ;;  %2324 = vmatprep.subr.msk.mxu1 %vm264_vm0, %v1032_v42 }
  0x31   : > { %2292 = vmatmul.mubr.msk.f32.gmra.mxu0 %vm205_vm1, %v2652_v36  ;;  %2299 = vmatmul.mubr.msk.f32.gmra.mxu1 %vm205_vm1, %v2650_v35 }
  0x32   : > { %566 = vmatprep.mubr.f32.mxu0 %v2503_v5  ;;  %688 = vmatprep.mubr.f32.mxu1 %v2503_v5 }
  0x35   : > { %2293 = vmatmul.mubr.msk.f32.gmra.mxu0 %vm205_vm1, %v2662_v38  ;;  %2300 = vmatmul.mubr.msk.f32.gmra.mxu1 %vm205_vm1, %v2660_v37 }
  0x36   : > { %572 = vmatprep.mubr.f32.mxu0 %v2503_v5  ;;  %694 = vmatprep.mubr.f32.mxu1 %v2503_v5 }
  0x39   : > { %2294 = vmatmul.mubr.msk.f32.gmra.mxu0 %vm205_vm1, %v2698_v43  ;;  %2301 = vmatmul.mubr.msk.f32.gmra.mxu1 %vm205_vm1, %v2700_v44 }
  0x3a   : > { %799 = vmatprep.mubr.f32.mxu0 %v2503_v5  ;;  %894 = vmatprep.mubr.f32.mxu1 %v2503_v5 }
  0x3d   : > { %2306 = vmatmul.mubr.msk.f32.vlgmr.msra.gmra.mxu0 %vm205_vm1, %v711_v47  ;;  %2312 = vmatmul.mubr.msk.f32.vlgmr.msra.gmra.mxu1 %vm205_vm1, %v244_v29 }
  0x3e   : > { %2318 = vmatpush1.msk.msra.mxu0 %vm264_vm0, %v2316_v39  ;;  %2325 = vmatpush1.msk.msra.mxu1 %vm264_vm0, %v2323_v40 }
  0x3f   : > { %805 = vmatprep.mubr.f32.mxu0 %v2503_v5  ;;  %900 = vmatprep.mubr.f32.mxu1 %v2503_v5 }
  0x40   : > { %2332 = vmatprep.subr.msk.mxu0 %vm264_vm0, %v1228_v48  ;;  %2338 = vmatprep.subr.msk.mxu1 %vm264_vm0, %v1335_v49 }
  0x41   : > { %2307 = vmatmul.mubr.msk.f32.gmra.mxu0 %vm205_vm1, %v2718_v50  ;;  %2313 = vmatmul.mubr.msk.f32.gmra.mxu1 %vm205_vm1, %v2636_v33 }
  0x42   : > { %811 = vmatprep.mubr.f32.mxu0 %v2503_v5  ;;  %906 = vmatprep.mubr.f32.mxu1 %v2503_v5 }
  0x45   : > { %2308 = vmatmul.mubr.msk.f32.gmra.mxu0 %vm205_vm1, %v2730_v51  ;;  %2314 = vmatmul.mubr.msk.f32.gmra.mxu1 %vm205_vm1, %v2650_v35 }
  0x46   : > { %817 = vmatprep.mubr.f32.mxu0 %v2503_v5  ;;  %912 = vmatprep.mubr.f32.mxu1 %v2503_v5 }
  0x49   : > { %2309 = vmatmul.mubr.msk.f32.gmra.mxu0 %vm205_vm1, %v2738_v52  ;;  %2315 = vmatmul.mubr.msk.f32.gmra.mxu1 %vm205_vm1, %v2660_v37 }
  0x4a   : > { %991 = vmatprep.mubr.f32.mxu0 %v2503_v5  ;;  %1113 = vmatprep.mubr.f32.mxu1 %v2503_v5 }
  0x4d   : > { %2319 = vmatmul.mubr.msk.f32.vlgmr.msra.gmra.mxu0 %vm205_vm1, %v2636_v33  ;;  %2326 = vmatmul.mubr.msk.f32.vlgmr.msra.gmra.mxu1 %vm205_vm1, %v2718_v50 }
  0x4e   : > { %2333 = vmatpush1.msk.msra.mxu0 %vm264_vm0, %v2331_v45  ;;  %2339 = vmatpush1.msk.msra.mxu1 %vm264_vm0, %v2330_v46 }
  0x4f   : > { %997 = vmatprep.mubr.f32.mxu0 %v2503_v5  ;;  %1119 = vmatprep.mubr.f32.mxu1 %v2503_v5 }
  0x50   : > { %2345 = vmatprep.subr.msk.mxu0 %vm264_vm0, %v1449_v55  ;;  %2352 = vmatprep.subr.msk.mxu1 %vm264_vm0, %v1571_v56 }
  0x51   : > { %2320 = vmatmul.mubr.msk.f32.gmra.mxu0 %vm205_vm1, %v2650_v35  ;;  %2327 = vmatmul.mubr.msk.f32.gmra.mxu1 %vm205_vm1, %v2730_v51 }
  0x52   : > { %1003 = vmatprep.mubr.f32.mxu0 %v2503_v5  ;;  %1125 = vmatprep.mubr.f32.mxu1 %v2503_v5 }
  0x55   : > { %2321 = vmatmul.mubr.msk.f32.gmra.mxu0 %vm205_vm1, %v2660_v37  ;;  %2328 = vmatmul.mubr.msk.f32.gmra.mxu1 %vm205_vm1, %v2738_v52 }
  0x56   : > { %1009 = vmatprep.mubr.f32.mxu0 %v2503_v5  ;;  %1131 = vmatprep.mubr.f32.mxu1 %v2503_v5 }
  0x59   : > { %2322 = vmatmul.mubr.msk.f32.gmra.mxu0 %vm205_vm1, %v2700_v44  ;;  %2329 = vmatmul.mubr.msk.f32.gmra.mxu1 %vm205_vm1, %v2774_v57 }
  0x5a   : > { %1309 = vmatprep.mubr.f32.mxu0 %v2503_v5  ;;  %1416 = vmatprep.mubr.f32.mxu1 %v2503_v5 }
  0x5d   : > { %2334 = vmatmul.mubr.msk.f32.vlgmr.msra.gmra.mxu0 %vm205_vm1, %v2636_v33  ;;  %2340 = vmatmul.mubr.msk.f32.vlgmr.msra.gmra.mxu1 %vm205_vm1, %v2638_v34 }
  0x5e   : > { %2346 = vmatpush1.msk.msra.mxu0 %vm264_vm0, %v2344_v53  ;;  %2353 = vmatpush1.msk.msra.mxu1 %vm264_vm0, %v2351_v54 }
  0x5f   : > { %1315 = vmatprep.mubr.f32.mxu0 %v2503_v5  ;;  %1422 = vmatprep.mubr.f32.mxu1 %v2503_v5 }
  0x60   : > { %2360 = vmatprep.subr.msk.mxu0 %vm264_vm0, %v1694_v60  ;;  %2366 = vmatprep.subr.msk.mxu1 %vm264_vm0, %v1801_v61 }
  0x61   : > { %2335 = vmatmul.mubr.msk.f32.gmra.mxu0 %vm205_vm1, %v2650_v35  ;;  %2341 = vmatmul.mubr.msk.f32.gmra.mxu1 %vm205_vm1, %v2652_v36 }
  0x62   : > { %1321 = vmatprep.mubr.f32.mxu0 %v2503_v5  ;;  %1428 = vmatprep.mubr.f32.mxu1 %v2503_v5 }
  0x65   : > { %2336 = vmatmul.mubr.msk.f32.gmra.mxu0 %vm205_vm1, %v2660_v37  ;;  %2342 = vmatmul.mubr.msk.f32.gmra.mxu1 %vm205_vm1, %v2662_v38 }
  0x66   : > { %1327 = vmatprep.mubr.f32.mxu0 %v2503_v5  ;;  %1434 = vmatprep.mubr.f32.mxu1 %v2503_v5 }
  0x69   : > { %2337 = vmatmul.mubr.msk.f32.gmra.mxu0 %vm205_vm1, %v2700_v44  ;;  %2343 = vmatmul.mubr.msk.f32.gmra.mxu1 %vm205_vm1, %v2698_v43 }
  0x6a   : > { %1530 = vmatprep.mubr.f32.mxu0 %v2503_v5  ;;  %1652 = vmatprep.mubr.f32.mxu1 %v2503_v5 }
  0x6d   : > { %2347 = vmatmul.mubr.msk.f32.vlgmr.msra.gmra.mxu0 %vm205_vm1, %v2652_v36  ;;  %2354 = vmatmul.mubr.msk.f32.vlgmr.msra.gmra.mxu1 %vm205_vm1, %v2650_v35 }
  0x6e   : > { %2361 = vmatpush1.msk.msra.mxu0 %vm264_vm0, %v2359_v58  ;;  %2367 = vmatpush1.msk.msra.mxu1 %vm264_vm0, %v2358_v59 }
  0x6f   : > { %1536 = vmatprep.mubr.f32.mxu0 %v2503_v5  ;;  %1658 = vmatprep.mubr.f32.mxu1 %v2503_v5 }
  0x70   : > { %2373 = vmatprep.subr.msk.mxu0 %vm264_vm0, %v1898_v0  ;;  %2380 = vmatprep.subr.msk.mxu1 %vm264_vm0, %v2008_v1 }
  0x71   : > { %2348 = vmatmul.mubr.msk.f32.gmra.mxu0 %vm205_vm1, %v2662_v38  ;;  %2355 = vmatmul.mubr.msk.f32.gmra.mxu1 %vm205_vm1, %v2660_v37 }
  0x72   : > { %1542 = vmatprep.mubr.f32.mxu0 %v2503_v5  ;;  %1664 = vmatprep.mubr.f32.mxu1 %v2503_v5 }
  0x75   : > { %2349 = vmatmul.mubr.msk.f32.gmra.mxu0 %vm205_vm1, %v2698_v43  ;;  %2356 = vmatmul.mubr.msk.f32.gmra.mxu1 %vm205_vm1, %v2700_v44 }
  0x76   : > { %1548 = vmatprep.mubr.f32.mxu0 %v2503_v5  ;;  %1670 = vmatprep.mubr.f32.mxu1 %v2503_v5 }
  0x79   : > { %2350 = vmatmul.mubr.msk.f32.gmra.mxu0 %vm205_vm1, %v1445_v2  ;;  %2357 = vmatmul.mubr.msk.f32.gmra.mxu1 %vm205_vm1, %v1567_v3 }
  0x7a   : > { %1775 = vmatprep.mubr.f32.mxu0 %v2503_v5  ;;  %1870 = vmatprep.mubr.f32.mxu1 %v2503_v5 }
  0x7d   : > { %2362 = vmatmul.mubr.msk.f32.vlgmr.msra.gmra.mxu0 %vm205_vm1, %v2718_v50  ;;  %2368 = vmatmul.mubr.msk.f32.vlgmr.msra.gmra.mxu1 %vm205_vm1, %v2636_v33 }
  0x7e   : > { %2374 = vmatpush1.msk.msra.mxu0 %vm264_vm0, %v2372_v62  ;;  %2381 = vmatpush1.msk.msra.mxu1 %vm264_vm0, %v2379_v63 }
  0x7f   : > { %1781 = vmatprep.mubr.f32.mxu0 %v2503_v5  ;;  %1876 = vmatprep.mubr.f32.mxu1 %v2503_v5 }
  0x81   : > { %2363 = vmatmul.mubr.msk.f32.gmra.mxu0 %vm205_vm1, %v2730_v51  ;;  %2369 = vmatmul.mubr.msk.f32.gmra.mxu1 %vm205_vm1, %v2650_v35 }
  0x82   : > { %1787 = vmatprep.mubr.f32.mxu0 %v2503_v5  ;;  %1882 = vmatprep.mubr.f32.mxu1 %v2503_v5 }
  0x85   : > { %2364 = vmatmul.mubr.msk.f32.gmra.mxu0 %vm205_vm1, %v2738_v52  ;;  %2370 = vmatmul.mubr.msk.f32.gmra.mxu1 %vm205_vm1, %v2660_v37 }
  0x86   : > { %1793 = vmatprep.mubr.f32.mxu0 %v2503_v5  ;;  %1888 = vmatprep.mubr.f32.mxu1 %v2503_v5 }
  0x89   : > { %2365 = vmatmul.mubr.msk.f32.gmra.mxu0 %vm205_vm1, %v2774_v57  ;;  %2371 = vmatmul.mubr.msk.f32.gmra.mxu1 %vm205_vm1, %v2700_v44 }
  0x8a   : > { %1967 = vmatprep.mubr.f32.mxu0 %v2503_v5  ;;  %2089 = vmatprep.mubr.f32.mxu1 %v2503_v5 }
  0x8d   : > { %2375 = vmatmul.mubr.msk.f32.vlgmr.msra.gmra.mxu0 %vm205_vm1, %v2650_v35  ;;  %2382 = vmatmul.mubr.msk.f32.vlgmr.msra.gmra.mxu1 %vm205_vm1, %v2730_v51 }
  0x8e   : > { %1973 = vmatprep.mubr.f32.mxu0 %v2503_v5  ;;  %2095 = vmatprep.mubr.f32.mxu1 %v2503_v5 }
  0x91   : > { %2376 = vmatmul.mubr.msk.f32.gmra.mxu0 %vm205_vm1, %v2660_v37  ;;  %2383 = vmatmul.mubr.msk.f32.gmra.mxu1 %vm205_vm1, %v2738_v52 }
  0x92   : > { %1979 = vmatprep.mubr.f32.mxu0 %v2503_v5  ;;  %2101 = vmatprep.mubr.f32.mxu1 %v2503_v5 }
  0x95   : > { %2377 = vmatmul.mubr.msk.f32.gmra.mxu0 %vm205_vm1, %v2700_v44  ;;  %2384 = vmatmul.mubr.msk.f32.gmra.mxu1 %vm205_vm1, %v2774_v57 }
  0x96   : > { %1985 = vmatprep.mubr.f32.mxu0 %v2503_v5  ;;  %2107 = vmatprep.mubr.f32.mxu1 %v2503_v5  ;;  %v2895_v5 = vshrl.u32 %v1147_v12, 7 }
  0x98   : > { %v1149_v21 = vsub.s32 0, %v2895_v5  ;;  %v1153_v26 = vsub.s32 1, %v2895_v5 }
  0x99   : > { %2378 = vmatmul.mubr.msk.f32.gmra.mxu0 %vm205_vm1, %v1567_v3  ;;  %2385 = vmatmul.mubr.msk.f32.gmra.mxu1 %vm205_vm1, %v2004_v4 }
  0x9a   : > { %v2906_v31 = vrot.slane %v2902_v24, %v1149_v21  ;;  %v2909_v37 = vrot.slane %v2902_v24, %v1153_v26 }
  0xdd   : > { %v335_v6 = vpop.f32.mrf.mxu0  ;;  %v442_v7 = vpop.f32.mrf.mxu1 }
  0xde   : > { %v443_v25 = vadd.f32 %v442_v7, %v335_v6 }
  0xdf   : > { %v337_v8 = vpop.f32.mrf.mxu0  ;;  %v444_v9 = vpop.f32.mrf.mxu1 }
  0xe0   : > { %v445_v29 = vadd.f32 %v444_v9, %v337_v8 }
  0xe1   : > { %v341_v10 = vpop.f32.mrf.mxu0  ;;  %v448_v11 = vpop.f32.mrf.mxu1 }
  0xe2   : > { %v449_v34 = vadd.f32 %v448_v11, %v341_v10 }
  0xe3   : > { %v343_v13 = vpop.f32.mrf.mxu0  ;;  %v450_v14 = vpop.f32.mrf.mxu1 }
  0xe4   : > { %v451_v40 = vadd.f32 %v450_v14, %v343_v13 }
  0xe5   : > { %v347_v15 = vpop.f32.mrf.mxu0  ;;  %v454_v16 = vpop.f32.mrf.mxu1 }
  0xe6   : > { %v455_v44 = vadd.f32 %v454_v16, %v347_v15 }
  0xe7   : > { %v349_v17 = vpop.f32.mrf.mxu0  ;;  %v456_v18 = vpop.f32.mrf.mxu1 }
  0xe8   : > { %v457_v51 = vadd.f32 %v456_v18, %v349_v17 }
  0xe9   : > { %v353_v19 = vpop.f32.mrf.mxu0  ;;  %v460_v20 = vpop.f32.mrf.mxu1 }
  0xea   : > { %v461_v58 = vadd.f32 %v460_v20, %v353_v19 }
  0xeb   : > { %v355_v22 = vpop.f32.mrf.mxu0  ;;  %v462_v23 = vpop.f32.mrf.mxu1 }
  0xec   : > { %v463_v1 = vadd.f32 %v462_v23, %v355_v22 }
  0xed   : > { %v556_v27 = vpop.f32.mrf.mxu0  ;;  %v678_v28 = vpop.f32.mrf.mxu1 }
  0xee   : > { %v579_v30 = vadd.f32 %v556_v27, %v443_v25 }
  0xef   : > { %v558_v32 = vpop.f32.mrf.mxu0  ;;  %v680_v33 = vpop.f32.mrf.mxu1 }
  0xf0   : > { %v701_v35 = vadd.f32 %v678_v28, %v579_v30  ;;  %v580_v36 = vadd.f32 %v558_v32, %v445_v29 }
  0xf1   : > { %v562_v38 = vpop.f32.mrf.mxu0  ;;  %v684_v39 = vpop.f32.mrf.mxu1 }
  0xf2   : > { %v1167_v41 = vadd.f32 %v2906_v31, %v701_v35  ;;  %v702_v42 = vadd.f32 %v680_v33, %v580_v36  ;;  %v581_v43 = vadd.f32 %v562_v38, %v449_v34  ;;  %v1157_v38 = vsub.s32 2, %v2895_v5 }
  0xf3   : > { %v564_v45 = vpop.f32.mrf.mxu0  ;;  %v686_v46 = vpop.f32.mrf.mxu1 }
  0xf4   : > { %v1183_v47 = vmax.f32 %v1167_v41, 0.0  ;;  %v1168_v48 = vadd.f32 %v2909_v37, %v702_v42  ;;  %v703_v49 = vadd.f32 %v684_v39, %v581_v43  ;;  %v582_v50 = vadd.f32 %v564_v45, %v451_v40 }
  0xf5   : > { %v568_v52 = vpop.f32.mrf.mxu0  ;;  %v690_v53 = vpop.f32.mrf.mxu1  ;;  %v1161_v42 = vsub.s32 3, %v2895_v5 }
  0xf6   : > { %1199 = vst [vmem:[%s2915_s24] sm:$0xff] %v1183_v47  ;;  %v1184_v54 = vmax.f32 %v1168_v48, 0.0  ;;  %v1171_v55 = vadd.f32 %v2906_v31, %v703_v49  ;;  %v704_v56 = vadd.f32 %v686_v46, %v582_v50  ;;  %v583_v57 = vadd.f32 %v568_v52, %v455_v44 }
  0xf7   : > { %v570_v59 = vpop.f32.mrf.mxu0  ;;  %v692_v60 = vpop.f32.mrf.mxu1  ;;  %v2935_v47 = vrot.slane %v2902_v24, %v1157_v38 }
  0xf8   : > { %1200 = vst [vmem:[%s2915_s24 + $0x8] sm:$0xff] %v1184_v54  ;;  %v1187_v61 = vmax.f32 %v1171_v55, 0.0  ;;  %v1172_v62 = vadd.f32 %v2909_v37, %v704_v56  ;;  %v705_v63 = vadd.f32 %v690_v53, %v583_v57  ;;  %v584_v0 = vadd.f32 %v570_v59, %v457_v51 }
  0xf9   : > { %v574_v2 = vpop.f32.mrf.mxu0  ;;  %v696_v3 = vpop.f32.mrf.mxu1  ;;  %v2938_v53 = vrot.slane %v2902_v24, %v1161_v42 }
  0xfa   : > { %1203 = vst [vmem:[%s2915_s24 + $0x40] sm:$0xff] %v1187_v61  ;;  %v1188_v4 = vmax.f32 %v1172_v62, 0.0  ;;  %v1175_v6 = vadd.f32 %v2906_v31, %v705_v63  ;;  %v706_v7 = vadd.f32 %v692_v60, %v584_v0  ;;  %v585_v8 = vadd.f32 %v574_v2, %v461_v58 }
  0xfb   : > { %v576_v9 = vpop.f32.mrf.mxu0  ;;  %v698_v10 = vpop.f32.mrf.mxu1 }
  0xfc   : > { %1204 = vst [vmem:[%s2915_s24 + $0x48] sm:$0xff] %v1188_v4  ;;  %v1191_v11 = vmax.f32 %v1175_v6, 0.0  ;;  %v1176_v12 = vadd.f32 %v2909_v37, %v706_v7  ;;  %v707_v13 = vadd.f32 %v696_v3, %v585_v8  ;;  %v586_v14 = vadd.f32 %v576_v9, %v463_v1 }
  0xfd   : > { %v801_v15 = vpop.f32.mrf.mxu0  ;;  %v896_v16 = vpop.f32.mrf.mxu1 }
  0xfe   : > { %1207 = vst [vmem:[%s2915_s24 + $0x80] sm:$0xff] %v1191_v11  ;;  %v1192_v17 = vmax.f32 %v1176_v12, 0.0  ;;  %v1179_v18 = vadd.f32 %v2906_v31, %v707_v13  ;;  %v708_v19 = vadd.f32 %v698_v10, %v586_v14  ;;  %v897_v41 = vadd.f32 %v896_v16, %v801_v15 }
  0xff   : > { %v803_v20 = vpop.f32.mrf.mxu0  ;;  %v898_v21 = vpop.f32.mrf.mxu1 }
 0x100   : > { %1208 = vst [vmem:[%s2915_s24 + $0x88] sm:$0xff] %v1192_v17  ;;  %v1195_v22 = vmax.f32 %v1179_v18, 0.0  ;;  %v1180_v23 = vadd.f32 %v2909_v37, %v708_v19  ;;  %v899_v45 = vadd.f32 %v898_v21, %v803_v20 }
 0x101   : > { %v807_v25 = vpop.f32.mrf.mxu0  ;;  %v902_v26 = vpop.f32.mrf.mxu1 }
 0x102   : > { %1211 = vst [vmem:[%s2915_s24 + $0xc0] sm:$0xff] %v1195_v22  ;;  %v1196_v27 = vmax.f32 %v1180_v23, 0.0  ;;  %v903_v50 = vadd.f32 %v902_v26, %v807_v25 }
 0x103   : > { %v809_v28 = vpop.f32.mrf.mxu0  ;;  %v904_v29 = vpop.f32.mrf.mxu1 }
 0x104   : > { %1212 = vst [vmem:[%s2915_s24 + $0xc8] sm:$0xff] %v1196_v27  ;;  %v905_v56 = vadd.f32 %v904_v29, %v809_v28 }
 0x105   : > { %v813_v30 = vpop.f32.mrf.mxu0  ;;  %v908_v32 = vpop.f32.mrf.mxu1 }
 0x106   : > { %v909_v59 = vadd.f32 %v908_v32, %v813_v30 }
 0x107   : > { %v815_v33 = vpop.f32.mrf.mxu0  ;;  %v910_v34 = vpop.f32.mrf.mxu1 }
 0x108   : > { %v911_v2 = vadd.f32 %v910_v34, %v815_v33 }
 0x109   : > { %v819_v35 = vpop.f32.mrf.mxu0  ;;  %v914_v36 = vpop.f32.mrf.mxu1 }
 0x10a   : > { %v915_v9 = vadd.f32 %v914_v36, %v819_v35 }
 0x10b   : > { %v821_v39 = vpop.f32.mrf.mxu0  ;;  %v916_v40 = vpop.f32.mrf.mxu1 }
 0x10c   : > { %v917_v16 = vadd.f32 %v916_v40, %v821_v39 }
 0x10d   : > { %v993_v43 = vpop.f32.mrf.mxu0  ;;  %v1115_v44 = vpop.f32.mrf.mxu1 }
 0x10e   : > { %v1016_v46 = vadd.f32 %v993_v43, %v897_v41 }
 0x10f   : > { %v995_v48 = vpop.f32.mrf.mxu0  ;;  %v1117_v49 = vpop.f32.mrf.mxu1 }
 0x110   : > { %v1138_v51 = vadd.f32 %v1115_v44, %v1016_v46  ;;  %v1017_v52 = vadd.f32 %v995_v48, %v899_v45 }
 0x111   : > { %v999_v54 = vpop.f32.mrf.mxu0  ;;  %v1121_v55 = vpop.f32.mrf.mxu1 }
 0x112   : > { %v1169_v5 = vadd.f32 %v2935_v47, %v1138_v51  ;;  %v1139_v57 = vadd.f32 %v1117_v49, %v1017_v52  ;;  %v1018_v58 = vadd.f32 %v999_v54, %v903_v50 }
 0x113   : > { %v1001_v60 = vpop.f32.mrf.mxu0  ;;  %v1123_v61 = vpop.f32.mrf.mxu1 }
 0x114   : > { %v1185_v62 = vmax.f32 %v1169_v5, 0.0  ;;  %v1170_v63 = vadd.f32 %v2938_v53, %v1139_v57  ;;  %v1140_v0 = vadd.f32 %v1121_v55, %v1018_v58  ;;  %v1019_v1 = vadd.f32 %v1001_v60, %v905_v56 }
 0x115   : > { %v1005_v24 = vpop.f32.mrf.mxu0  ;;  %v1127_v3 = vpop.f32.mrf.mxu1 }
 0x116   : > { %1201 = vst [vmem:[%s2915_s24 + $0x10] sm:$0xff] %v1185_v62  ;;  %v1186_v4 = vmax.f32 %v1170_v63, 0.0  ;;  %v1173_v6 = vadd.f32 %v2935_v47, %v1140_v0  ;;  %v1141_v7 = vadd.f32 %v1123_v61, %v1019_v1  ;;  %v1020_v8 = vadd.f32 %v1005_v24, %v909_v59 }
 0x117   : > { %v1007_v10 = vpop.f32.mrf.mxu0  ;;  %v1129_v11 = vpop.f32.mrf.mxu1 }
 0x118   : > { %1202 = vst [vmem:[%s2915_s24 + $0x18] sm:$0xff] %v1186_v4  ;;  %v1189_v12 = vmax.f32 %v1173_v6, 0.0  ;;  %v1174_v13 = vadd.f32 %v2938_v53, %v1141_v7  ;;  %v1142_v14 = vadd.f32 %v1127_v3, %v1020_v8  ;;  %v1021_v15 = vadd.f32 %v1007_v10, %v911_v2 }
 0x119   : > { %v1011_v17 = vpop.f32.mrf.mxu0  ;;  %v1133_v18 = vpop.f32.mrf.mxu1 }
 0x11a   : > { %1205 = vst [vmem:[%s2915_s24 + $0x50] sm:$0xff] %v1189_v12  ;;  %v1190_v19 = vmax.f32 %v1174_v13, 0.0  ;;  %v1177_v20 = vadd.f32 %v2935_v47, %v1142_v14  ;;  %v1143_v21 = vadd.f32 %v1129_v11, %v1021_v15  ;;  %v1022_v22 = vadd.f32 %v1011_v17, %v915_v9 }
 0x11b   : > { %v1013_v23 = vpop.f32.mrf.mxu0  ;;  %v1135_v25 = vpop.f32.mrf.mxu1 }
 0x11c   : > { %1206 = vst [vmem:[%s2915_s24 + $0x58] sm:$0xff] %v1190_v19  ;;  %v1193_v26 = vmax.f32 %v1177_v20, 0.0  ;;  %v1178_v27 = vadd.f32 %v2938_v53, %v1143_v21  ;;  %v1144_v28 = vadd.f32 %v1133_v18, %v1022_v22  ;;  %v1023_v29 = vadd.f32 %v1013_v23, %v917_v16 }
 0x11d   : > { %v1311_v30 = vpop.f32.mrf.mxu0  ;;  %v1418_v32 = vpop.f32.mrf.mxu1 }
 0x11e   : > { %1209 = vst [vmem:[%s2915_s24 + $0x90] sm:$0xff] %v1193_v26  ;;  %v1194_v33 = vmax.f32 %v1178_v27, 0.0  ;;  %v1181_v34 = vadd.f32 %v2935_v47, %v1144_v28  ;;  %v1145_v35 = vadd.f32 %v1135_v25, %v1023_v29  ;;  %v1419_v56 = vadd.f32 %v1418_v32, %v1311_v30 }
 0x11f   : > { %v1313_v36 = vpop.f32.mrf.mxu0  ;;  %v1420_v38 = vpop.f32.mrf.mxu1 }
 0x120   : > { %1210 = vst [vmem:[%s2915_s24 + $0x98] sm:$0xff] %v1194_v33  ;;  %v1197_v39 = vmax.f32 %v1181_v34, 0.0  ;;  %v1182_v40 = vadd.f32 %v2938_v53, %v1145_v35  ;;  %v1421_v58 = vadd.f32 %v1420_v38, %v1313_v36 }
 0x121   : > { %v1317_v41 = vpop.f32.mrf.mxu0  ;;  %v1424_v42 = vpop.f32.mrf.mxu1 }
 0x122   : > { %1213 = vst [vmem:[%s2915_s24 + $0xd0] sm:$0xff] %v1197_v39  ;;  %v1198_v43 = vmax.f32 %v1182_v40, 0.0  ;;  %v1425_v62 = vadd.f32 %v1424_v42, %v1317_v41 }
 0x123   : > { %v1319_v44 = vpop.f32.mrf.mxu0  ;;  %v1426_v45 = vpop.f32.mrf.mxu1 }
 0x124   : > { %1214 = vst [vmem:[%s2915_s24 + $0xd8] sm:$0xff] %v1198_v43  ;;  %v1427_v24 = vadd.f32 %v1426_v45, %v1319_v44 }
 0x125   : > { %v1323_v46 = vpop.f32.mrf.mxu0  ;;  %v1430_v48 = vpop.f32.mrf.mxu1 }
 0x126   : > { %v1431_v7 = vadd.f32 %v1430_v48, %v1323_v46 }
 0x127   : > { %v1325_v49 = vpop.f32.mrf.mxu0  ;;  %v1432_v50 = vpop.f32.mrf.mxu1 }
 0x128   : > { %v1433_v14 = vadd.f32 %v1432_v50, %v1325_v49 }
 0x129   : > { %v1329_v51 = vpop.f32.mrf.mxu0  ;;  %v1436_v52 = vpop.f32.mrf.mxu1 }
 0x12a   : > { %v1437_v21 = vadd.f32 %v1436_v52, %v1329_v51 }
 0x12b   : > { %v1331_v54 = vpop.f32.mrf.mxu0  ;;  %v1438_v55 = vpop.f32.mrf.mxu1 }
 0x12c   : > { %v1439_v29 = vadd.f32 %v1438_v55, %v1331_v54 }
 0x12d   : > { %v1532_v5 = vpop.f32.mrf.mxu0  ;;  %v1654_v57 = vpop.f32.mrf.mxu1 }
 0x12e   : > { %v1555_v59 = vadd.f32 %v1532_v5, %v1419_v56 }
 0x12f   : > { %v1534_v60 = vpop.f32.mrf.mxu0  ;;  %v1656_v61 = vpop.f32.mrf.mxu1 }
 0x130   : > { %v1677_v63 = vadd.f32 %v1654_v57, %v1555_v59  ;;  %v1556_v0 = vadd.f32 %v1534_v60, %v1421_v58 }
 0x131   : > { %v1538_v1 = vpop.f32.mrf.mxu0  ;;  %v1660_v2 = vpop.f32.mrf.mxu1 }
 0x132   : > { %v2122_v3 = vadd.f32 %v1677_v63, %v2906_v31  ;;  %v1678_v4 = vadd.f32 %v1656_v61, %v1556_v0  ;;  %v1557_v6 = vadd.f32 %v1538_v1, %v1425_v62 }
 0x133   : > { %v1540_v8 = vpop.f32.mrf.mxu0  ;;  %v1662_v9 = vpop.f32.mrf.mxu1 }
 0x134   : > { %v2138_v10 = vmax.f32 %v2122_v3, 0.0  ;;  %v2123_v11 = vadd.f32 %v1678_v4, %v2909_v37  ;;  %v1679_v12 = vadd.f32 %v1660_v2, %v1557_v6  ;;  %v1558_v13 = vadd.f32 %v1540_v8, %v1427_v24 }
 0x135   : > { %v1544_v15 = vpop.f32.mrf.mxu0  ;;  %v1666_v16 = vpop.f32.mrf.mxu1 }
 0x136   : > { %2386 = vst [vmem:[%s2915_s24 + $0x20] sm:$0xff] %v2138_v10  ;;  %v2139_v17 = vmax.f32 %v2123_v11, 0.0  ;;  %v2126_v18 = vadd.f32 %v1679_v12, %v2906_v31  ;;  %v1680_v19 = vadd.f32 %v1662_v9, %v1558_v13  ;;  %v1559_v20 = vadd.f32 %v1544_v15, %v1431_v7 }
 0x137   : > { %v1546_v22 = vpop.f32.mrf.mxu0  ;;  %v1668_v23 = vpop.f32.mrf.mxu1 }
 0x138   : > { %2387 = vst [vmem:[%s2915_s24 + $0x28] sm:$0xff] %v2139_v17  ;;  %v2142_v25 = vmax.f32 %v2126_v18, 0.0  ;;  %v2127_v26 = vadd.f32 %v1680_v19, %v2909_v37  ;;  %v1681_v27 = vadd.f32 %v1666_v16, %v1559_v20  ;;  %v1560_v28 = vadd.f32 %v1546_v22, %v1433_v14 }
 0x139   : > { %v1550_v30 = vpop.f32.mrf.mxu0  ;;  %v1672_v32 = vpop.f32.mrf.mxu1 }
 0x13a   : > { %2390 = vst [vmem:[%s2915_s24 + $0x60] sm:$0xff] %v2142_v25  ;;  %v2143_v33 = vmax.f32 %v2127_v26, 0.0  ;;  %v2130_v34 = vadd.f32 %v1681_v27, %v2906_v31  ;;  %v1682_v35 = vadd.f32 %v1668_v23, %v1560_v28  ;;  %v1561_v36 = vadd.f32 %v1550_v30, %v1437_v21 }
 0x13b   : > { %v1552_v38 = vpop.f32.mrf.mxu0  ;;  %v1674_v39 = vpop.f32.mrf.mxu1 }
 0x13c   : > { %2391 = vst [vmem:[%s2915_s24 + $0x68] sm:$0xff] %v2143_v33  ;;  %v2146_v40 = vmax.f32 %v2130_v34, 0.0  ;;  %v2131_v41 = vadd.f32 %v1682_v35, %v2909_v37  ;;  %v1683_v42 = vadd.f32 %v1672_v32, %v1561_v36  ;;  %v1562_v43 = vadd.f32 %v1552_v38, %v1439_v29 }
 0x13d   : > { %v1777_v44 = vpop.f32.mrf.mxu0  ;;  %v1872_v45 = vpop.f32.mrf.mxu1 }
 0x13e   : > { %2394 = vst [vmem:[%s2915_s24 + $0xa0] sm:$0xff] %v2146_v40  ;;  %v2147_v46 = vmax.f32 %v2131_v41, 0.0  ;;  %v2134_v48 = vadd.f32 %v1683_v42, %v2906_v31  ;;  %v1684_v49 = vadd.f32 %v1674_v39, %v1562_v43  ;;  %v1873_v2 = vadd.f32 %v1872_v45, %v1777_v44 }
 0x13f   : > { %v1779_v50 = vpop.f32.mrf.mxu0  ;;  %v1874_v51 = vpop.f32.mrf.mxu1 }
 0x140   : > { %2395 = vst [vmem:[%s2915_s24 + $0xa8] sm:$0xff] %v2147_v46  ;;  %v2150_v52 = vmax.f32 %v2134_v48, 0.0  ;;  %v2135_v54 = vadd.f32 %v1684_v49, %v2909_v37  ;;  %v1875_v4 = vadd.f32 %v1874_v51, %v1779_v50 }
 0x141   : > { %v1783_v55 = vpop.f32.mrf.mxu0  ;;  %v1878_v56 = vpop.f32.mrf.mxu1 }
 0x142   : > { %2398 = vst [vmem:[%s2915_s24 + $0xe0] sm:$0xff] %v2150_v52  ;;  %v2151_v5 = vmax.f32 %v2135_v54, 0.0  ;;  %v1879_v8 = vadd.f32 %v1878_v56, %v1783_v55 }
 0x143   : > { %v1785_v57 = vpop.f32.mrf.mxu0  ;;  %v1880_v58 = vpop.f32.mrf.mxu1 }
 0x144   : > { %2399 = vst [vmem:[%s2915_s24 + $0xe8] sm:$0xff] %v2151_v5  ;;  %v1881_v13 = vadd.f32 %v1880_v58, %v1785_v57 }
 0x145   : > { %v1789_v59 = vpop.f32.mrf.mxu0  ;;  %v1884_v60 = vpop.f32.mrf.mxu1 }
 0x146   : > { %v1885_v17 = vadd.f32 %v1884_v60, %v1789_v59 }
 0x147   : > { %v1791_v61 = vpop.f32.mrf.mxu0  ;;  %v1886_v62 = vpop.f32.mrf.mxu1 }
 0x148   : > { %v1887_v25 = vadd.f32 %v1886_v62, %v1791_v61 }
 0x149   : > { %v1795_v63 = vpop.f32.mrf.mxu0  ;;  %v1890_v31 = vpop.f32.mrf.mxu1 }
 0x14a   : > { %v1891_v33 = vadd.f32 %v1890_v31, %v1795_v63 }
 0x14b   : > { %v1797_v0 = vpop.f32.mrf.mxu0  ;;  %v1892_v1 = vpop.f32.mrf.mxu1 }
 0x14c   : > { %v1893_v41 = vadd.f32 %v1892_v1, %v1797_v0 }
 0x14d   : > { %v1969_v24 = vpop.f32.mrf.mxu0  ;;  %v2091_v3 = vpop.f32.mrf.mxu1 }
 0x14e   : > { %v1992_v37 = vadd.f32 %v1969_v24, %v1873_v2 }
 0x14f   : > { %v1971_v6 = vpop.f32.mrf.mxu0  ;;  %v2093_v7 = vpop.f32.mrf.mxu1 }
 0x150   : > { %v2114_v9 = vadd.f32 %v2091_v3, %v1992_v37  ;;  %v1993_v10 = vadd.f32 %v1971_v6, %v1875_v4 }
 0x151   : > { %v1975_v11 = vpop.f32.mrf.mxu0  ;;  %v2097_v12 = vpop.f32.mrf.mxu1 }
 0x152   : > { %v2124_v14 = vadd.f32 %v2114_v9, %v2935_v47  ;;  %v2115_v15 = vadd.f32 %v2093_v7, %v1993_v10  ;;  %v1994_v16 = vadd.f32 %v1975_v11, %v1879_v8 }
 0x153   : > { %v1977_v18 = vpop.f32.mrf.mxu0  ;;  %v2099_v19 = vpop.f32.mrf.mxu1 }
 0x154   : > { %v2140_v20 = vmax.f32 %v2124_v14, 0.0  ;;  %v2125_v21 = vadd.f32 %v2115_v15, %v2938_v53  ;;  %v2116_v22 = vadd.f32 %v2097_v12, %v1994_v16  ;;  %v1995_v23 = vadd.f32 %v1977_v18, %v1881_v13 }
 0x155   : > { %v1981_v26 = vpop.f32.mrf.mxu0  ;;  %v2103_v27 = vpop.f32.mrf.mxu1 }
 0x156   : > { %2388 = vst [vmem:[%s2915_s24 + $0x30] sm:$0xff] %v2140_v20  ;;  %v2141_v28 = vmax.f32 %v2125_v21, 0.0  ;;  %v2128_v29 = vadd.f32 %v2116_v22, %v2935_v47  ;;  %v2117_v30 = vadd.f32 %v2099_v19, %v1995_v23  ;;  %v1996_v32 = vadd.f32 %v1981_v26, %v1885_v17 }
 0x157   : > { %v1983_v34 = vpop.f32.mrf.mxu0  ;;  %v2105_v35 = vpop.f32.mrf.mxu1 }
 0x158   : > { %2389 = vst [vmem:[%s2915_s24 + $0x38] sm:$0xff] %v2141_v28  ;;  %v2144_v36 = vmax.f32 %v2128_v29, 0.0  ;;  %v2129_v38 = vadd.f32 %v2117_v30, %v2938_v53  ;;  %v2118_v39 = vadd.f32 %v2103_v27, %v1996_v32  ;;  %v1997_v40 = vadd.f32 %v1983_v34, %v1887_v25 }
 0x159   : > { %v1987_v42 = vpop.f32.mrf.mxu0  ;;  %v2109_v43 = vpop.f32.mrf.mxu1 }
 0x15a   : > { %2392 = vst [vmem:[%s2915_s24 + $0x70] sm:$0xff] %v2144_v36  ;;  %v2145_v44 = vmax.f32 %v2129_v38, 0.0  ;;  %v2132_v45 = vadd.f32 %v2118_v39, %v2935_v47  ;;  %v2119_v46 = vadd.f32 %v2105_v35, %v1997_v40  ;;  %v1998_v48 = vadd.f32 %v1987_v42, %v1891_v33 }
 0x15b   : > { %v1989_v49 = vpop.f32.mrf.mxu0  ;;  %v2111_v55 = vpop.f32.mrf.mxu1 }
 0x15c   : > { %2393 = vst [vmem:[%s2915_s24 + $0x78] sm:$0xff] %v2145_v44  ;;  %v2148_v50 = vmax.f32 %v2132_v45, 0.0  ;;  %v2133_v51 = vadd.f32 %v2119_v46, %v2938_v53  ;;  %v2120_v52 = vadd.f32 %v2109_v43, %v1998_v48  ;;  %v1999_v54 = vadd.f32 %v1989_v49, %v1893_v41 }
 0x15e   : > { %2396 = vst [vmem:[%s2915_s24 + $0xb0] sm:$0xff] %v2148_v50  ;;  %v2149_v56 = vmax.f32 %v2133_v51, 0.0  ;;  %v2136_v5 = vadd.f32 %v2120_v52, %v2935_v47  ;;  %v2121_v57 = vadd.f32 %v2111_v55, %v1999_v54 }
 0x160   : > { %2397 = vst [vmem:[%s2915_s24 + $0xb8] sm:$0xff] %v2149_v56  ;;  %v2152_v58 = vmax.f32 %v2136_v5, 0.0  ;;  %v2137_v59 = vadd.f32 %v2121_v57, %v2938_v53 }
 0x162   : > { %2400 = vst [vmem:[%s2915_s24 + $0xf0] sm:$0xff] %v2152_v58  ;;  %v2153_v60 = vmax.f32 %v2137_v59, 0.0 }
 0x164   : > { %2401 = vst [vmem:[%s2915_s24 + $0xf8] sm:$0xff] %v2153_v60 }
 0x165 PF: > { %s13_s16 = sadd.s32 1, %s2501_s16   ;;  %s3007_s12 = smov %s2493_s14 }
 0x166   : > { %p10_p7 = scmp.ge.s32.totalorder %s13_s16, 6   ;;  %s3008_s13 = smov %s2497_s15 }
 0x167   : > { %s3009_s14 = smov %s3012_s17  ;;  %s3010_s15 = smov %s3016_s18 }
 0x168   :  { %12 = sbr.rel (!%p10_p7) target bundleno = 3 (0x3), region = 87 }

// kernel: deconvnet_forward.4
= control target key start
LH: loop header
LB: loop body
LE: loop exit
PB: predicated region body
PF: predicated region fallthrough
CT: control target
= control target key end

     0   :  { %s4807_s12 = smov 0   ;;  %s4809_s13 = smov 0   ;;  %s7315_s0 = inlined_call_operand.vmem [shape: f32[2,18,18,256], index: 0, kind: input, shape index: {}]   ;;  %s7316_s1 = inlined_call_operand.vmem [shape: f32[2,2,2,2,256,128], index: 1, kind: input, shape index: {}]   ;;  %s7317_s2 = inlined_call_operand.vmem [shape: f32[1,256], index: 2, kind: input, shape index: {}]   ;;  %s7318_s3 = inlined_call_operand.vmem [shape: f32[2,16,2,16,256], index: 3, kind: output, shape index: {}]  }
   0x1   :  { %s4811_s14 = smov 0   ;;  %s4813_s15 = smov 0  }
   0x2   :  { %s4815_s16 = smov 0  }
   0x3 LB: > { %s22_s17 = sadd.s32 1, %s4777_s14  ;;  %s25_s18 = sadd.s32 1, %s4781_s15  ;;  %s4785_s16 = sphi %s4815_s16, %s13_s16   ;;  %s4781_s15 = sphi %s4813_s15, %s7425_s15   ;;  %s4777_s14 = sphi %s4811_s14, %s7424_s14   ;;  %s4773_s13 = sphi %s4809_s13, %s7423_s13   ;;  %s4769_s12 = sphi %s4807_s12, %s7422_s12  }
   0x4   : > { %p23_p0 = scmp.ge.s32.totalorder %s22_s17, 4  ;;  %p3286_p1 = scmp.ge.s32.totalorder %s4785_s16, 1 }
   0x5   : > { %p151_p2 = scmp.lt.s32.totalorder %s4785_s16, 9 }
   0x6   : > { %s7427_s17 = smov (%p23_p0, %s22_s17), 0  ;;  %s7429_s18 = smov (!%p23_p0, %s25_s18), %s4781_s15 }
   0x7   : > { %p152_p3 = pnand %p3286_p1, %p151_p2  ;;  %p27_p4 = scmp.ge.s32.totalorder %s7429_s18, 2 }
   0x9   : > { %s7431_s18 = smov (%p27_p4, %s7429_s18), 0  ;;  %155 = sbr.rel (%p152_p3) target bundleno = 618 (0x26a), region = 32 }
   0xe   : > { %v3326_v0 = vld [vmem:[%s7316_s1 + $0x1f8] sm:$0xff]  ;;  %v3325_v4 = vld [vmem:[%s7316_s1 + $0x1f0] sm:$0xff]  ;;  %v3324_v8 = vld [vmem:[%s7316_s1 + $0x1e8] sm:$0xff]  ;;  %p180_p5 = scmp.lt.s32.totalorder %s4773_s13, 1  ;;  %s3793_s5 = smul.u32 192, %s4769_s12  ;;  %vm320_vm0 = vcmask 1046528  }
   0xf   : > { %v660_v1 = vld [vmem:[%s7316_s1 + $0xf8] sm:$0xff]  ;;  %3794 = vmatprep.subr.mxu0 %v3326_v0  ;;  %v659_v5 = vld [vmem:[%s7316_s1 + $0xf0] sm:$0xff]  ;;  %v658_v9 = vld [vmem:[%s7316_s1 + $0xe8] sm:$0xff]  ;;  %vm502_vm1 = vcmask 1045504   ;;  %s3288_s4 = sshll.u32 %s4769_s12, 2 }
  0x10   : > { %v3310_v2 = vld [vmem:[%s7316_s1 + $0x178] sm:$0xff]  ;;  %3850 = vmatprep.subr.mxu1 %v660_v1  ;;  %v3309_v6 = vld [vmem:[%s7316_s1 + $0x170] sm:$0xff]  ;;  %v3308_v10 = vld [vmem:[%s7316_s1 + $0x168] sm:$0xff]  ;;  %s7433_s13 = smov (!%p180_p5, %s4773_s13), 1  ;;  %p6460_p6 = scmp.lt.s32.totalorder %s3288_s4, 15 }
  0x11   : > { %v644_v3 = vld [vmem:[%s7316_s1 + $0x78] sm:$0xff]  ;;  %3795 = vmatpush3.msra.mxu0 %v3310_v2  ;;  %v643_v7 = vld [vmem:[%s7316_s1 + $0x70] sm:$0xff]  ;;  %v642_v11 = vld [vmem:[%s7316_s1 + $0x68] sm:$0xff]  ;;  %s4690_s19 = smul.u32 864, %s7433_s13  ;;  %s3290_s27 = sshll.u32 %s7433_s13, 7 }
  0x12   : > { %3851 = vmatpush3.msra.mxu1 %v644_v3  ;;  %3796 = vmatprep.subr.mxu0 %v3325_v4  ;;  %v3323_v12 = vld [vmem:[%s7316_s1 + $0x1e0] sm:$0xff]  ;;  %v3322_v16 = vld [vmem:[%s7316_s1 + $0x1d8] sm:$0xff]  ;;  %v3321_v20 = vld [vmem:[%s7316_s1 + $0x1d0] sm:$0xff]  ;;  %s7435_s4 = smov (!%p6460_p6, %s3288_s4), 15 }
  0x13   : > { %3852 = vmatprep.subr.mxu1 %v659_v5  ;;  %3797 = vmatpush3.msra.mxu0 %v3309_v6  ;;  %v657_v13 = vld [vmem:[%s7316_s1 + $0xe0] sm:$0xff]  ;;  %v656_v17 = vld [vmem:[%s7316_s1 + $0xd8] sm:$0xff]  ;;  %v655_v21 = vld [vmem:[%s7316_s1 + $0xd0] sm:$0xff]  ;;  %s184_s20 = scalar_lea.vmem %s7315_s0, %s4690_s19  ;;  %s3289_s26 = sshll.u32 %s7435_s4, 3 }
  0x14   : > { %3853 = vmatpush3.msra.mxu1 %v643_v7  ;;  %3798 = vmatprep.subr.mxu0 %v3324_v8  ;;  %v3307_v14 = vld [vmem:[%s7316_s1 + $0x160] sm:$0xff]  ;;  %v3306_v18 = vld [vmem:[%s7316_s1 + $0x158] sm:$0xff]  ;;  %v3305_v22 = vld [vmem:[%s7316_s1 + $0x150] sm:$0xff]  ;;  %s4984_s6 = scalar_lea.vmem %s184_s20, %s3793_s5  ;;  %s6546_s9 = sadd.s32 %s3290_s27, %s3289_s26 }
  0x15   : > { %3854 = vmatprep.subr.mxu1 %v658_v9  ;;  %v641_v15 = vld [vmem:[%s7316_s1 + $0x60] sm:$0xff]  ;;  %3799 = vmatpush3.msra.mxu0 %v3308_v10  ;;  %v640_v19 = vld [vmem:[%s7316_s1 + $0x58] sm:$0xff]  ;;  %v639_v23 = vld [vmem:[%s7316_s1 + $0x50] sm:$0xff]  ;;  %s3291_s24 = sshll.u32 %s6546_s9, 3 }
  0x16   : > { %3855 = vmatpush3.msra.mxu1 %v642_v11  ;;  %3800 = vmatprep.subr.mxu0 %v3323_v12  ;;  %v3320_v24 = vld [vmem:[%s7316_s1 + $0x1c8] sm:$0xff]  ;;  %v3319_v28 = vld [vmem:[%s7316_s1 + $0x1c0] sm:$0xff]  ;;  %v3318_v32 = vld [vmem:[%s7316_s1 + $0x1b8] sm:$0xff]  ;;  %s6585_s8 = scalar_lea.vmem %s7318_s3, %s3291_s24 }
  0x17   : > { %3856 = vmatprep.subr.mxu1 %v657_v13  ;;  %3801 = vmatpush3.msra.mxu0 %v3307_v14  ;;  %v654_v25 = vld [vmem:[%s7316_s1 + $0xc8] sm:$0xff]  ;;  %v653_v29 = vld [vmem:[%s7316_s1 + $0xc0] sm:$0xff]  ;;  %v652_v33 = vld [vmem:[%s7316_s1 + $0xb8] sm:$0xff] }
  0x18   : > { %3857 = vmatpush3.msra.mxu1 %v641_v15  ;;  %3802 = vmatprep.subr.mxu0 %v3322_v16  ;;  %v3304_v26 = vld [vmem:[%s7316_s1 + $0x148] sm:$0xff]  ;;  %v3303_v30 = vld [vmem:[%s7316_s1 + $0x140] sm:$0xff]  ;;  %v3302_v34 = vld [vmem:[%s7316_s1 + $0x138] sm:$0xff] }
  0x19   : > { %3858 = vmatprep.subr.mxu1 %v656_v17  ;;  %3803 = vmatpush3.msra.mxu0 %v3306_v18  ;;  %v638_v27 = vld [vmem:[%s7316_s1 + $0x48] sm:$0xff]  ;;  %v637_v31 = vld [vmem:[%s7316_s1 + $0x40] sm:$0xff]  ;;  %v636_v35 = vld [vmem:[%s7316_s1 + $0x38] sm:$0xff] }
  0x1a   : > { %3859 = vmatpush3.msra.mxu1 %v640_v19  ;;  %3804 = vmatprep.subr.mxu0 %v3321_v20  ;;  %v3317_v36 = vld [vmem:[%s7316_s1 + $0x1b0] sm:$0xff]  ;;  %v3316_v40 = vld [vmem:[%s7316_s1 + $0x1a8] sm:$0xff]  ;;  %v3315_v44 = vld [vmem:[%s7316_s1 + $0x1a0] sm:$0xff] }
  0x1b   : > { %3860 = vmatprep.subr.mxu1 %v655_v21  ;;  %3805 = vmatpush3.msra.mxu0 %v3305_v22  ;;  %v651_v37 = vld [vmem:[%s7316_s1 + $0xb0] sm:$0xff]  ;;  %v650_v41 = vld [vmem:[%s7316_s1 + $0xa8] sm:$0xff]  ;;  %v649_v45 = vld [vmem:[%s7316_s1 + $0xa0] sm:$0xff] }
  0x1c   : > { %3861 = vmatpush3.msra.mxu1 %v639_v23  ;;  %3806 = vmatprep.subr.mxu0 %v3320_v24  ;;  %v3301_v38 = vld [vmem:[%s7316_s1 + $0x130] sm:$0xff]  ;;  %v3300_v42 = vld [vmem:[%s7316_s1 + $0x128] sm:$0xff]  ;;  %v3299_v46 = vld [vmem:[%s7316_s1 + $0x120] sm:$0xff] }
  0x1d   : > { %3862 = vmatprep.subr.mxu1 %v654_v25  ;;  %3807 = vmatpush3.msra.mxu0 %v3304_v26  ;;  %v635_v39 = vld [vmem:[%s7316_s1 + $0x30] sm:$0xff]  ;;  %v634_v43 = vld [vmem:[%s7316_s1 + $0x28] sm:$0xff]  ;;  %v633_v47 = vld [vmem:[%s7316_s1 + $0x20] sm:$0xff] }
  0x1e   : > { %3863 = vmatpush3.msra.mxu1 %v638_v27  ;;  %3808 = vmatprep.subr.mxu0 %v3319_v28  ;;  %v3314_v48 = vld [vmem:[%s7316_s1 + $0x198] sm:$0xff]  ;;  %v249_v50 = vld [vmem:[%s4984_s6 + $0x8] sm:$0xfe]  ;;  %v3313_v54 = vld [vmem:[%s7316_s1 + $0x190] sm:$0xff] }
  0x1f   : > { %3864 = vmatprep.subr.mxu1 %v653_v29  ;;  %3809 = vmatpush3.msra.mxu0 %v3303_v30  ;;  %v648_v49 = vld [vmem:[%s7316_s1 + $0x98] sm:$0xff]  ;;  %v647_v55 = vld [vmem:[%s7316_s1 + $0x90] sm:$0xff]  ;;  %v248_v56 = vld [vmem:[%s4984_s6] sm:$0xfe]  ;;  %v324_v60 = vrot.slane %v249_v50, 1 }
  0x20   : > { %3865 = vmatpush3.msra.mxu1 %v637_v31  ;;  %3810 = vmatprep.subr.mxu0 %v3318_v32  ;;  %v5006_v51 = vld [vmem:[%s4984_s6 + $0x18] sm:$0xff]  ;;  %v5022_v57 = vld [vmem:[%s4984_s6 + $0x10] sm:$0xff]  ;;  %v3312_v62 = vld [vmem:[%s7316_s1 + $0x188] sm:$0xff]  ;;  %v321_v2 = vrot.slane %v248_v56, 1 }
  0x21   : > { %3866 = vmatprep.subr.mxu1 %v652_v33  ;;  %3811 = vmatpush3.msra.mxu0 %v3302_v34  ;;  %v3298_v52 = vld [vmem:[%s7316_s1 + $0x118] sm:$0xff]  ;;  %v3297_v58 = vld [vmem:[%s7316_s1 + $0x110] sm:$0xff]  ;;  %v325_v61 = vrot.slane %v5006_v51, 1  ;;  %v646_v63 = vld [vmem:[%s7316_s1 + $0x88] sm:$0xff]  ;;  %v322_v3 = vrot.slane %v5022_v57, 1 }
  0x22   : > { %3867 = vmatpush3.msra.mxu1 %v636_v35  ;;  %3812 = vmatprep.subr.mxu0 %v3317_v36  ;;  %v632_v53 = vld [vmem:[%s7316_s1 + $0x18] sm:$0xff]  ;;  %v631_v59 = vld [vmem:[%s7316_s1 + $0x10] sm:$0xff]  ;;  %v3296_v0 = vld [vmem:[%s7316_s1 + $0x108] sm:$0xff] }
  0x23   : > { %3868 = vmatprep.subr.mxu1 %v651_v37  ;;  %3813 = vmatpush3.msra.mxu0 %v3301_v38  ;;  %v630_v1 = vld [vmem:[%s7316_s1 + $0x8] sm:$0xff]  ;;  %v3311_v4 = vld [vmem:[%s7316_s1 + $0x180] sm:$0xff]  ;;  %v5055_v8 = vsel %vm320_vm0, %v324_v60, %v325_v61  ;;  %v5063_v12 = vsel %vm320_vm0, %v321_v2, %v322_v3  ;;  %v3358_v15 = vld [vmem:[%s7316_s1 + $0x2f8] sm:$0xff] }
  0x24   : > { %3869 = vmatpush3.msra.mxu1 %v635_v39  ;;  %3814 = vmatprep.subr.mxu0 %v3316_v40  ;;  %v645_v5 = vld [vmem:[%s7316_s1 + $0x80] sm:$0xff]  ;;  %v253_v6 = vld [vmem:[%s4984_s6 + $0x28] sm:$0x1]  ;;  %v3390_v16 = vld [vmem:[%s7316_s1 + $0x3f8] sm:$0xff] }
  0x25   : > { %3870 = vmatprep.subr.mxu1 %v650_v41  ;;  %3815 = vmatpush3.msra.mxu0 %v3300_v42  ;;  %v3295_v7 = vld [vmem:[%s7316_s1 + $0x100] sm:$0xff]  ;;  %v201_v10 = vld [vmem:[%s4984_s6 + $0x8] sm:$0xff]  ;;  %v329_v14 = vrot.slane %v253_v6, 1  ;;  %v3342_v17 = vld [vmem:[%s7316_s1 + $0x278] sm:$0xff] }
  0x26   : > { %3871 = vmatpush3.msra.mxu1 %v634_v43  ;;  %3816 = vmatprep.subr.mxu0 %v3315_v44  ;;  %v629_v9 = vld [vmem:[%s7316_s1] sm:$0xff]  ;;  %v3374_v18 = vld [vmem:[%s7316_s1 + $0x378] sm:$0xff]  ;;  %v3357_v19 = vld [vmem:[%s7316_s1 + $0x2f0] sm:$0xff] }
  0x27   : > { %3872 = vmatprep.subr.mxu1 %v649_v45  ;;  %3817 = vmatpush3.msra.mxu0 %v3299_v46  ;;  %v252_v11 = vld [vmem:[%s4984_s6 + $0x20] sm:$0x1]  ;;  %v3389_v21 = vld [vmem:[%s7316_s1 + $0x3f0] sm:$0xff]  ;;  %v255_v22 = vld [vmem:[%s4984_s6 + $0x38] sm:$0xfe]  ;;  %v5091_v24 = vsel %vm320_vm0, %v325_v61, %v329_v14 }
  0x28   : > { %3873 = vmatpush3.msra.mxu1 %v633_v47  ;;  %3818 = vmatprep.subr.mxu0 %v3314_v48  ;;  %v200_v13 = vld [vmem:[%s4984_s6] sm:$0xff]  ;;  %v327_v20 = vrot.slane %v252_v11, 1  ;;  %v5088_v23 = vld [vmem:[%s4984_s6 + $0x48] sm:$0xff]  ;;  %v3341_v25 = vld [vmem:[%s7316_s1 + $0x270] sm:$0xff]  ;;  %v334_v30 = vrot.slane %v255_v22, 1 }
  0x29   : > { %3874 = vmatprep.subr.mxu1 %v648_v49  ;;  %3819 = vmatpush3.msra.mxu0 %v3298_v52  ;;  %v3373_v26 = vld [vmem:[%s7316_s1 + $0x370] sm:$0xff]  ;;  %v5101_v28 = vld [vmem:[%s4984_s6 + $0x40] sm:$0xff]  ;;  %v335_v31 = vrot.slane %v5088_v23, 1  ;;  %v3356_v32 = vld [vmem:[%s7316_s1 + $0x2e8] sm:$0xff] }
  0x2a   : > { %3875 = vmatpush3.msra.mxu1 %v632_v53  ;;  %3820 = vmatprep.subr.mxu0 %v3313_v54  ;;  %v254_v27 = vld [vmem:[%s4984_s6 + $0x30] sm:$0xfe]  ;;  %v5104_v29 = vsel %vm320_vm0, %v322_v3, %v327_v20  ;;  %v3388_v33 = vld [vmem:[%s7316_s1 + $0x3e8] sm:$0xff]  ;;  %v332_v37 = vrot.slane %v5101_v28, 1  ;;  %v3355_v38 = vld [vmem:[%s7316_s1 + $0x2e0] sm:$0xff] }
  0x2b   : > { %3876 = vmatprep.subr.mxu1 %v647_v55  ;;  %3821 = vmatpush3.msra.mxu0 %v3297_v58  ;;  %v3340_v34 = vld [vmem:[%s7316_s1 + $0x268] sm:$0xff]  ;;  %v331_v36 = vrot.slane %v254_v27, 1  ;;  %v3387_v39 = vld [vmem:[%s7316_s1 + $0x3e0] sm:$0xff]  ;;  %v259_v40 = vld [vmem:[%s4984_s6 + $0x58] sm:$0x1]  ;;  %v5132_v41 = vsel %vm320_vm0, %v334_v30, %v335_v31 }
  0x2c   : > { %3877 = vmatpush3.msra.mxu1 %v631_v59  ;;  %3822 = vmatprep.subr.mxu0 %v3312_v62  ;;  %v3372_v35 = vld [vmem:[%s7316_s1 + $0x368] sm:$0xff]  ;;  %7355 = vst [vmem:[#allocation3_spill] sm:$0xff] %v5132_v41  ;;  %v5135_v42 = vld [vmem:[%s4984_s6 + $0x38] sm:$0xff]  ;;  %v3339_v43 = vld [vmem:[%s7316_s1 + $0x260] sm:$0xff]  ;;  %v339_v48 = vrot.slane %v259_v40, 1 }
  0x2d   : > { %3878 = vmatprep.subr.mxu1 %v646_v63  ;;  %3823 = vmatpush3.msra.mxu0 %v3296_v0  ;;  %v3371_v44 = vld [vmem:[%s7316_s1 + $0x360] sm:$0xff]  ;;  %v258_v45 = vld [vmem:[%s4984_s6 + $0x50] sm:$0x1]  ;;  %v5145_v46 = vsel %vm320_vm0, %v331_v36, %v332_v37  ;;  %v3354_v49 = vld [vmem:[%s7316_s1 + $0x2d8] sm:$0xff] }
  0x2e   : > { %3879 = vmatpush3.msra.mxu1 %v630_v1  ;;  %3824 = vmatprep.subr.mxu0 %v3311_v4  ;;  %7356 = vst [vmem:[#allocation4_spill] sm:$0xff] %v5145_v46  ;;  %v5148_v47 = vld [vmem:[%s4984_s6 + $0x30] sm:$0xff]  ;;  %v3386_v50 = vld [vmem:[%s7316_s1 + $0x3d8] sm:$0xff]  ;;  %v337_v55 = vrot.slane %v258_v45, 1  ;;  %v261_v58 = vld [vmem:[%s4984_s6 + $0x68] sm:$0xfe]  ;;  %v5177_v60 = vsel %vm320_vm0, %v335_v31, %v339_v48 }
  0x2f   : > { %3880 = vmatprep.subr.mxu1 %v645_v5  ;;  %3825 = vmatpush3.msra.mxu0 %v3295_v7  ;;  %v3338_v52 = vld [vmem:[%s7316_s1 + $0x258] sm:$0xff]  ;;  %v3353_v54 = vld [vmem:[%s7316_s1 + $0x2d0] sm:$0xff]  ;;  %7357 = vst [vmem:[#allocation5_spill] sm:$0xff] %v5177_v60  ;;  %v260_v63 = vld [vmem:[%s4984_s6 + $0x60] sm:$0xfe]  ;;  %v344_v2 = vrot.slane %v261_v58, 1 }
  0x30   : > { %774 = vmatprep.mubr.f32.mxu0 %v5055_v8  ;;  %3881 = vmatpush3.msra.mxu1 %v629_v9  ;;  %v3370_v53 = vld [vmem:[%s7316_s1 + $0x358] sm:$0xff]  ;;  %v3385_v56 = vld [vmem:[%s7316_s1 + $0x3d0] sm:$0xff]  ;;  %v5190_v1 = vsel %vm320_vm0, %v332_v37, %v337_v55  ;;  %v3352_v4 = vld [vmem:[%s7316_s1 + $0x2c8] sm:$0xff]  ;;  %v341_v9 = vrot.slane %v260_v63, 1 }
  0x31   : > { %879 = vmatprep.mubr.f32.mxu1 %v201_v10  ;;  %775 = vmatmul.mubr.f32.vlgmr.msra.gmra.mxu0 %v5063_v12  ;;  %v5174_v59 = vld [vmem:[%s4984_s6 + $0x78] sm:$0xff]  ;;  %v3337_v61 = vld [vmem:[%s7316_s1 + $0x250] sm:$0xff]  ;;  %7358 = vst [vmem:[#allocation6_spill] sm:$0xff] %v5190_v1  ;;  %v3384_v5 = vld [vmem:[%s7316_s1 + $0x3c8] sm:$0xff] }
  0x32   : > { %880 = vmatmul.mubr.f32.vlgmr.msra.gmra.mxu1 %v200_v13  ;;  %3906 = vmatprep.subr.mxu0 %v3358_v15  ;;  %v3369_v62 = vld [vmem:[%s7316_s1 + $0x350] sm:$0xff]  ;;  %v345_v3 = vrot.slane %v5174_v59, 1  ;;  %v3336_v6 = vld [vmem:[%s7316_s1 + $0x248] sm:$0xff]  ;;  %v3351_v11 = vld [vmem:[%s7316_s1 + $0x2c0] sm:$0xff] }
  0x33   : > { %3962 = vmatprep.subr.mxu1 %v3390_v16  ;;  %3907 = vmatpush3.msra.mxu0 %v3342_v17  ;;  %v5187_v0 = vld [vmem:[%s4984_s6 + $0x70] sm:$0xff]  ;;  %v3368_v7 = vld [vmem:[%s7316_s1 + $0x348] sm:$0xff]  ;;  %v3383_v13 = vld [vmem:[%s7316_s1 + $0x3c0] sm:$0xff] }
  0x34   : > { %3963 = vmatpush3.msra.mxu1 %v3374_v18  ;;  %3908 = vmatprep.subr.mxu0 %v3357_v19  ;;  %v342_v10 = vrot.slane %v5187_v0, 1  ;;  %v265_v14 = vld [vmem:[%s4984_s6 + $0x88] sm:$0x1]  ;;  %v5218_v15 = vsel %vm320_vm0, %v344_v2, %v345_v3  ;;  %v3335_v17 = vld [vmem:[%s7316_s1 + $0x240] sm:$0xff]  ;;  %v3334_v27 = vld [vmem:[%s7316_s1 + $0x238] sm:$0xff] }
  0x35   : > { %3964 = vmatprep.subr.mxu1 %v3389_v21  ;;  %779 = vmatprep.mubr.f32.mxu0 %v5091_v24  ;;  %7359 = vst [vmem:[#allocation7_spill] sm:$0xff] %v5218_v15  ;;  %v5221_v16 = vld [vmem:[%s4984_s6 + $0x68] sm:$0xff]  ;;  %v3367_v18 = vld [vmem:[%s7316_s1 + $0x340] sm:$0xff]  ;;  %v349_v22 = vrot.slane %v265_v14, 1  ;;  %v3366_v30 = vld [vmem:[%s7316_s1 + $0x338] sm:$0xff] }
  0x36   : > { %884 = vmatprep.mubr.f32.mxu1 %v5006_v51  ;;  %3909 = vmatpush3.msra.mxu0 %v3341_v25  ;;  %v264_v19 = vld [vmem:[%s4984_s6 + $0x80] sm:$0x1]  ;;  %v5231_v20 = vsel %vm320_vm0, %v341_v9, %v342_v10  ;;  %v3350_v25 = vld [vmem:[%s7316_s1 + $0x2b8] sm:$0xff]  ;;  %v3349_v31 = vld [vmem:[%s7316_s1 + $0x2b0] sm:$0xff] }
  0x37   : > { %3965 = vmatpush3.msra.mxu1 %v3373_v26  ;;  %780 = vmatmul.mubr.f32.gmra.mxu0 %v5104_v29  ;;  %v5234_v21 = vld [vmem:[%s4984_s6 + $0x60] sm:$0xff]  ;;  %v3382_v26 = vld [vmem:[%s7316_s1 + $0x3b8] sm:$0xff]  ;;  %v5263_v36 = vsel %vm320_vm0, %v345_v3, %v349_v22  ;;  %v3333_v37 = vld [vmem:[%s7316_s1 + $0x230] sm:$0xff] }
  0x38   : > { %885 = vmatmul.mubr.f32.gmra.mxu1 %v5022_v57  ;;  %3910 = vmatprep.subr.mxu0 %v3356_v32  ;;  %v347_v32 = vrot.slane %v264_v19, 1  ;;  %v5273_v40 = vld [vmem:[%s4984_s6 + $0xa0] sm:$0xff]  ;;  %v3348_v48 = vld [vmem:[%s7316_s1 + $0x2a8] sm:$0xff]  ;;  %v271_v58 = vld [vmem:[%s4984_s6 + $0xb8] sm:$0x1] }
  0x39   : > { %3966 = vmatprep.subr.mxu1 %v3388_v33  ;;  %3911 = vmatpush3.msra.mxu0 %v3340_v34  ;;  %v3381_v33 = vld [vmem:[%s7316_s1 + $0x3b0] sm:$0xff]  ;;  %v267_v34 = vld [vmem:[%s4984_s6 + $0x98] sm:$0xfe]  ;;  %v3347_v55 = vld [vmem:[%s7316_s1 + $0x2a0] sm:$0xff] }
  0x3a   : > { %3967 = vmatpush3.msra.mxu1 %v3372_v35  ;;  %3912 = vmatprep.subr.mxu0 %v3355_v38  ;;  %v5260_v35 = vld [vmem:[%s4984_s6 + $0xa8] sm:$0xff]  ;;  %v3365_v38 = vld [vmem:[%s7316_s1 + $0x330] sm:$0xff]  ;;  %v3331_v63 = vld [vmem:[%s7316_s1 + $0x220] sm:$0xff] }
  0x3b   : > { %3968 = vmatprep.subr.mxu1 %v3387_v39  ;;  %784 = vmatprep.mubr.f32.mxu0 %v5132_v41  ;;  %v266_v39 = vld [vmem:[%s4984_s6 + $0x90] sm:$0xfe]  ;;  %v355_v45 = vrot.slane %v5260_v35, 1  ;;  %v3363_v2 = vld [vmem:[%s7316_s1 + $0x320] sm:$0xff]  ;;  %v270_v3 = vld [vmem:[%s4984_s6 + $0xb0] sm:$0x1] }
  0x3c   : > { %889 = vmatprep.mubr.f32.mxu1 %v5135_v42  ;;  %3913 = vmatpush3.msra.mxu0 %v3339_v43  ;;  %v5276_v43 = vsel %vm320_vm0, %v342_v10, %v347_v32  ;;  %v3378_v9 = vld [vmem:[%s7316_s1 + $0x398] sm:$0xff]  ;;  %v3345_v14 = vld [vmem:[%s7316_s1 + $0x290] sm:$0xff]  ;;  %v3343_v32 = vld [vmem:[%s7316_s1 + $0x280] sm:$0xff] }
  0x3d   : > { %3969 = vmatpush3.msra.mxu1 %v3371_v44  ;;  %785 = vmatmul.mubr.f32.gmra.mxu0 %v5145_v46  ;;  %v354_v44 = vrot.slane %v267_v34, 1  ;;  %v3330_v10 = vld [vmem:[%s7316_s1 + $0x218] sm:$0xff]  ;;  %v3329_v19 = vld [vmem:[%s7316_s1 + $0x210] sm:$0xff]  ;;  %v3327_v34 = vld [vmem:[%s7316_s1 + $0x200] sm:$0xff] }
  0x3e   : > { %890 = vmatmul.mubr.f32.gmra.mxu1 %v5148_v47  ;;  %3914 = vmatprep.subr.mxu0 %v3354_v49  ;;  %v3380_v49 = vld [vmem:[%s7316_s1 + $0x3a8] sm:$0xff]  ;;  %v3361_v22 = vld [vmem:[%s7316_s1 + $0x310] sm:$0xff] }
  0x3f   : > { %3970 = vmatprep.subr.mxu1 %v3386_v50  ;;  %3915 = vmatpush3.msra.mxu0 %v3338_v52  ;;  %v3332_v50 = vld [vmem:[%s7316_s1 + $0x228] sm:$0xff] }
  0x40   : > { %3971 = vmatpush3.msra.mxu1 %v3370_v53  ;;  %3916 = vmatprep.subr.mxu0 %v3353_v54  ;;  %v3364_v52 = vld [vmem:[%s7316_s1 + $0x328] sm:$0xff]  ;;  %v351_v53 = vrot.slane %v266_v39, 1  ;;  %v352_v54 = vrot.slane %v5273_v40, 1  ;;  %v3422_v39 = vld [vmem:[%s7316_s1 + $0x4f8] sm:$0xff] }
  0x41   : > { %3972 = vmatprep.subr.mxu1 %v3385_v56  ;;  %789 = vmatprep.mubr.f32.mxu0 %v5177_v60  ;;  %v3379_v56 = vld [vmem:[%s7316_s1 + $0x3a0] sm:$0xff] }
  0x42   : > { %894 = vmatprep.mubr.f32.mxu1 %v5088_v23  ;;  %3917 = vmatpush3.msra.mxu0 %v3337_v61  ;;  %v5304_v61 = vsel %vm320_vm0, %v354_v44, %v355_v45  ;;  %v3438_v44 = vld [vmem:[%s7316_s1 + $0x578] sm:$0xff] }
  0x43   : > { %3973 = vmatpush3.msra.mxu1 %v3369_v62  ;;  %790 = vmatmul.mubr.f32.gmra.mxu0 %v5190_v1  ;;  %v5307_v62 = vld [vmem:[%s4984_s6 + $0x98] sm:$0xff] }
  0x44   : > { %895 = vmatmul.mubr.f32.gmra.mxu1 %v5101_v28  ;;  %3918 = vmatprep.subr.mxu0 %v3352_v4  ;;  %v5317_v4 = vsel %vm320_vm0, %v351_v53, %v352_v54  ;;  %v3436_v53 = vld [vmem:[%s7316_s1 + $0x568] sm:$0xff] }
  0x45   : > { %3974 = vmatprep.subr.mxu1 %v3384_v5  ;;  %3919 = vmatpush3.msra.mxu0 %v3336_v6  ;;  %v5320_v5 = vld [vmem:[%s4984_s6 + $0x90] sm:$0xff]  ;;  %v359_v6 = vrot.slane %v271_v58, 1  ;;  %v3435_v58 = vld [vmem:[%s7316_s1 + $0x560] sm:$0xff] }
  0x46   : > { %3975 = vmatpush3.msra.mxu1 %v3368_v7  ;;  %3920 = vmatprep.subr.mxu0 %v3351_v11  ;;  %v3346_v7 = vld [vmem:[%s7316_s1 + $0x298] sm:$0xff] }
  0x47   : > { %3976 = vmatprep.subr.mxu1 %v3383_v13  ;;  %794 = vmatprep.mubr.f32.mxu0 %v5218_v15  ;;  %v3362_v11 = vld [vmem:[%s7316_s1 + $0x318] sm:$0xff]  ;;  %v357_v13 = vrot.slane %v270_v3, 1 }
  0x48   : > { %899 = vmatprep.mubr.f32.mxu1 %v5221_v16  ;;  %3921 = vmatpush3.msra.mxu0 %v3335_v17  ;;  %v3377_v17 = vld [vmem:[%s7316_s1 + $0x390] sm:$0xff]  ;;  %v3418_v3 = vld [vmem:[%s7316_s1 + $0x4d8] sm:$0xff] }
  0x49   : > { %3977 = vmatpush3.msra.mxu1 %v3367_v18  ;;  %795 = vmatmul.mubr.f32.gmra.mxu0 %v5231_v20  ;;  %v5345_v18 = vsel %vm320_vm0, %v355_v45, %v359_v6  ;;  %v3406_v45 = vld [vmem:[%s7316_s1 + $0x478] sm:$0xff] }
  0x4a   : > { %900 = vmatmul.mubr.f32.gmra.mxu1 %v5234_v21  ;;  %3922 = vmatprep.subr.mxu0 %v3350_v25  ;;  %v5354_v25 = vsel %vm320_vm0, %v352_v54, %v357_v13  ;;  %v3404_v54 = vld [vmem:[%s7316_s1 + $0x468] sm:$0xff]  ;;  %v3434_v6 = vld [vmem:[%s7316_s1 + $0x558] sm:$0xff] }
  0x4b   : > { %3978 = vmatprep.subr.mxu1 %v3382_v26  ;;  %3923 = vmatpush3.msra.mxu0 %v3334_v27  ;;  %v3344_v26 = vld [vmem:[%s7316_s1 + $0x288] sm:$0xff] }
  0x4c   : > { %3979 = vmatpush3.msra.mxu1 %v3366_v30  ;;  %3924 = vmatprep.subr.mxu0 %v3349_v31  ;;  %v3376_v27 = vld [vmem:[%s7316_s1 + $0x388] sm:$0xff] }
  0x4d   : > { %3980 = vmatprep.subr.mxu1 %v3381_v33  ;;  %799 = vmatprep.mubr.f32.mxu0 %v5263_v36  ;;  %v3328_v30 = vld [vmem:[%s7316_s1 + $0x208] sm:$0xff]  ;;  %v3375_v33 = vld [vmem:[%s7316_s1 + $0x380] sm:$0xff] }
  0x4e   : > { %904 = vmatprep.mubr.f32.mxu1 %v5174_v59  ;;  %3925 = vmatpush3.msra.mxu0 %v3333_v37  ;;  %v3360_v31 = vld [vmem:[%s7316_s1 + $0x308] sm:$0xff]  ;;  %v3359_v37 = vld [vmem:[%s7316_s1 + $0x300] sm:$0xff] }
  0x4f   : > { %3981 = vmatpush3.msra.mxu1 %v3365_v38  ;;  %800 = vmatmul.mubr.f32.gmra.mxu0 %v5276_v43  ;;  %v3454_v38 = vld [vmem:[%s7316_s1 + $0x5f8] sm:$0xff]  ;;  %v3416_v13 = vld [vmem:[%s7316_s1 + $0x4c8] sm:$0xff] }
  0x50   : > { %905 = vmatmul.mubr.f32.gmra.mxu1 %v5187_v0  ;;  %3926 = vmatprep.subr.mxu0 %v3348_v48  ;;  %v3421_v48 = vld [vmem:[%s7316_s1 + $0x4f0] sm:$0xff] }
  0x51   : > { %3982 = vmatprep.subr.mxu1 %v3380_v49  ;;  %3927 = vmatpush3.msra.mxu0 %v3332_v50  ;;  %v3437_v49 = vld [vmem:[%s7316_s1 + $0x570] sm:$0xff]  ;;  %v3452_v50 = vld [vmem:[%s7316_s1 + $0x5e8] sm:$0xff] }
  0x52   : > { %3983 = vmatpush3.msra.mxu1 %v3364_v52  ;;  %3928 = vmatprep.subr.mxu0 %v3347_v55  ;;  %v3420_v52 = vld [vmem:[%s7316_s1 + $0x4e8] sm:$0xff]  ;;  %v3451_v55 = vld [vmem:[%s7316_s1 + $0x5e0] sm:$0xff] }
  0x53   : > { %3984 = vmatprep.subr.mxu1 %v3379_v56  ;;  %804 = vmatprep.mubr.f32.mxu0 %v5304_v61  ;;  %v3419_v56 = vld [vmem:[%s7316_s1 + $0x4e0] sm:$0xff] }
  0x54   : > { %909 = vmatprep.mubr.f32.mxu1 %v5307_v62  ;;  %3929 = vmatpush3.msra.mxu0 %v3331_v63  ;;  %v3403_v63 = vld [vmem:[%s7316_s1 + $0x460] sm:$0xff] }
  0x55   : > { %3985 = vmatpush3.msra.mxu1 %v3363_v2  ;;  %805 = vmatmul.mubr.f32.gmra.mxu0 %v5317_v4  ;;  %v3450_v2 = vld [vmem:[%s7316_s1 + $0x5d8] sm:$0xff] }
  0x56   : > { %910 = vmatmul.mubr.f32.gmra.mxu1 %v5320_v5  ;;  %3930 = vmatprep.subr.mxu0 %v3346_v7  ;;  %v3449_v7 = vld [vmem:[%s7316_s1 + $0x5d0] sm:$0xff] }
  0x57   : > { %3986 = vmatprep.subr.mxu1 %v3378_v9  ;;  %3931 = vmatpush3.msra.mxu0 %v3330_v10  ;;  %v3417_v9 = vld [vmem:[%s7316_s1 + $0x4d0] sm:$0xff] }
  0x58   : > { %3987 = vmatpush3.msra.mxu1 %v3362_v11  ;;  %3932 = vmatprep.subr.mxu0 %v3345_v14  ;;  %v3433_v10 = vld [vmem:[%s7316_s1 + $0x550] sm:$0xff]  ;;  %v3448_v11 = vld [vmem:[%s7316_s1 + $0x5c8] sm:$0xff] }
  0x59   : > { %3988 = vmatprep.subr.mxu1 %v3377_v17  ;;  %809 = vmatprep.mubr.f32.mxu0 %v5345_v18  ;;  %v3432_v14 = vld [vmem:[%s7316_s1 + $0x548] sm:$0xff] }
  0x5a   : > { %914 = vmatprep.mubr.f32.mxu1 %v5260_v35  ;;  %3933 = vmatpush3.msra.mxu0 %v3329_v19  ;;  %v3400_v17 = vld [vmem:[%s7316_s1 + $0x448] sm:$0xff]  ;;  %v3447_v19 = vld [vmem:[%s7316_s1 + $0x5c0] sm:$0xff] }
  0x5b   : > { %3989 = vmatpush3.msra.mxu1 %v3361_v22  ;;  %810 = vmatmul.mubr.f32.gmra.mxu0 %v5354_v25  ;;  %v3415_v22 = vld [vmem:[%s7316_s1 + $0x4c0] sm:$0xff] }
  0x5c   : > { %915 = vmatmul.mubr.f32.gmra.mxu1 %v5273_v40  ;;  %3934 = vmatprep.subr.mxu0 %v3344_v26  ;;  %v3431_v26 = vld [vmem:[%s7316_s1 + $0x540] sm:$0xff] }
  0x5d   : > { %3990 = vmatprep.subr.mxu1 %v3376_v27  ;;  %3935 = vmatpush3.msra.mxu0 %v3328_v30  ;;  %v3399_v27 = vld [vmem:[%s7316_s1 + $0x440] sm:$0xff]  ;;  %v3446_v30 = vld [vmem:[%s7316_s1 + $0x5b8] sm:$0xff] }
  0x5e   : > { %3991 = vmatpush3.msra.mxu1 %v3360_v31  ;;  %3936 = vmatprep.subr.mxu0 %v3343_v32  ;;  %v3414_v31 = vld [vmem:[%s7316_s1 + $0x4b8] sm:$0xff] }
  0x5f   : > { %3992 = vmatprep.subr.mxu1 %v3375_v33  ;;  %3937 = vmatpush3.msra.mxu0 %v3327_v34  ;;  %v3430_v32 = vld [vmem:[%s7316_s1 + $0x538] sm:$0xff]  ;;  %v3445_v33 = vld [vmem:[%s7316_s1 + $0x5b0] sm:$0xff] }
  0x60   : > { %1034 = vmatprep.mubr.f32.mxu0 %v5135_v42  ;;  %3993 = vmatpush3.msra.mxu1 %v3359_v37  ;;  %v3453_v42 = vld [vmem:[%s7316_s1 + $0x5f0] sm:$0xff]  ;;  %v273_v37 = vld [vmem:[%s4984_s6 + $0xc8] sm:$0xfe] }
  0x61   : > { %1197 = vmatprep.mubr.f32.mxu1 %v5132_v41  ;;  %1035 = vmatmul.mubr.f32.vlgmr.msra.gmra.mxu0 %v5148_v47  ;;  %v3405_v47 = vld [vmem:[%s7316_s1 + $0x470] sm:$0xff] }
  0x62   : > { %1198 = vmatmul.mubr.f32.vlgmr.msra.gmra.mxu1 %v5145_v46  ;;  %4018 = vmatprep.subr.mxu0 %v3454_v38  ;;  %v3413_v34 = vld [vmem:[%s7316_s1 + $0x4b0] sm:$0xff]  ;;  %v5520_v38 = vld [vmem:[%s4984_s6 + $0xd8] sm:$0xff] }
  0x63   : > { %4074 = vmatprep.subr.mxu1 %v3422_v39  ;;  %4019 = vmatpush3.msra.mxu0 %v3438_v44  ;;  %v3429_v39 = vld [vmem:[%s7316_s1 + $0x530] sm:$0xff]  ;;  %v272_v44 = vld [vmem:[%s4984_s6 + $0xc0] sm:$0xfe] }
  0x64   : > { %4075 = vmatpush3.msra.mxu1 %v3406_v45  ;;  %4020 = vmatprep.subr.mxu0 %v3453_v42  ;;  %v5530_v45 = vld [vmem:[%s4984_s6 + $0xd0] sm:$0xff]  ;;  %v364_v42 = vrot.slane %v273_v37, 1  ;;  %v3440_v37 = vld [vmem:[%s7316_s1 + $0x588] sm:$0xff] }
  0x65   : > { %4076 = vmatprep.subr.mxu1 %v3421_v48  ;;  %1039 = vmatprep.mubr.f32.mxu0 %v5088_v23  ;;  %v365_v48 = vrot.slane %v5520_v38, 1 }
  0x66   : > { %1202 = vmatprep.mubr.f32.mxu1 %v5177_v60  ;;  %4021 = vmatpush3.msra.mxu0 %v3437_v49  ;;  %v3444_v49 = vld [vmem:[%s7316_s1 + $0x5a8] sm:$0xff] }
  0x67   : > { %4077 = vmatpush3.msra.mxu1 %v3405_v47  ;;  %1040 = vmatmul.mubr.f32.gmra.mxu0 %v5101_v28  ;;  %v3412_v47 = vld [vmem:[%s7316_s1 + $0x4a8] sm:$0xff] }
  0x68   : > { %1203 = vmatmul.mubr.f32.gmra.mxu1 %v5190_v1  ;;  %4022 = vmatprep.subr.mxu0 %v3452_v50  ;;  %v3428_v50 = vld [vmem:[%s7316_s1 + $0x528] sm:$0xff] }
  0x69   : > { %4078 = vmatprep.subr.mxu1 %v3420_v52  ;;  %4023 = vmatpush3.msra.mxu0 %v3436_v53  ;;  %v3396_v52 = vld [vmem:[%s7316_s1 + $0x428] sm:$0xff]  ;;  %v361_v53 = vrot.slane %v272_v44, 1 }
  0x6a   : > { %4079 = vmatpush3.msra.mxu1 %v3404_v54  ;;  %4024 = vmatprep.subr.mxu0 %v3451_v55  ;;  %v362_v54 = vrot.slane %v5530_v45, 1  ;;  %v3443_v55 = vld [vmem:[%s7316_s1 + $0x5a0] sm:$0xff] }
  0x6b   : > { %4080 = vmatprep.subr.mxu1 %v3419_v56  ;;  %1044 = vmatprep.mubr.f32.mxu0 %v5221_v16  ;;  %v3402_v16 = vld [vmem:[%s7316_s1 + $0x458] sm:$0xff]  ;;  %v3411_v56 = vld [vmem:[%s7316_s1 + $0x4a0] sm:$0xff] }
  0x6c   : > { %1207 = vmatprep.mubr.f32.mxu1 %v5218_v15  ;;  %4025 = vmatpush3.msra.mxu0 %v3435_v58  ;;  %v277_v58 = vld [vmem:[%s4984_s6 + $0xe8] sm:$0x1] }
  0x6d   : > { %4081 = vmatpush3.msra.mxu1 %v3403_v63  ;;  %1045 = vmatmul.mubr.f32.gmra.mxu0 %v5234_v21  ;;  %v3401_v21 = vld [vmem:[%s7316_s1 + $0x450] sm:$0xff]  ;;  %v217_v63 = vld [vmem:[%s4984_s6 + $0xc8] sm:$0xff] }
  0x6e   : > { %1208 = vmatmul.mubr.f32.gmra.mxu1 %v5231_v20  ;;  %4026 = vmatprep.subr.mxu0 %v3450_v2  ;;  %v5559_v2 = vsel %vm320_vm0, %v364_v42, %v365_v48  ;;  %v504_v42 = vrot.slane %v5022_v57, 2 }
  0x6f   : > { %4082 = vmatprep.subr.mxu1 %v3418_v3  ;;  %4027 = vmatpush3.msra.mxu0 %v3434_v6  ;;  %v3427_v3 = vld [vmem:[%s7316_s1 + $0x520] sm:$0xff] }
  0x70   : > { %4083 = vmatpush3.msra.mxu1 %v3402_v16  ;;  %4028 = vmatprep.subr.mxu0 %v3449_v7  ;;  %v3395_v6 = vld [vmem:[%s7316_s1 + $0x420] sm:$0xff] }
  0x71   : > { %4084 = vmatprep.subr.mxu1 %v3417_v9  ;;  %1049 = vmatprep.mubr.f32.mxu0 %v5174_v59  ;;  %v276_v16 = vld [vmem:[%s4984_s6 + $0xe0] sm:$0x1]  ;;  %v5570_v9 = vsel %vm320_vm0, %v361_v53, %v362_v54 }
  0x72   : > { %1212 = vmatprep.mubr.f32.mxu1 %v5263_v36  ;;  %4029 = vmatpush3.msra.mxu0 %v3433_v10  ;;  %v216_v7 = vld [vmem:[%s4984_s6 + $0xc0] sm:$0xff]  ;;  %v369_v10 = vrot.slane %v277_v58, 1  ;;  %v3518_v58 = vld [vmem:[%s7316_s1 + $0x7f8] sm:$0xff] }
  0x73   : > { %4085 = vmatpush3.msra.mxu1 %v3401_v21  ;;  %1050 = vmatmul.mubr.f32.gmra.mxu0 %v5187_v0  ;;  %v3442_v21 = vld [vmem:[%s7316_s1 + $0x598] sm:$0xff]  ;;  %v434_v53 = vld [vmem:[%s4984_s6 + $0x20] sm:$0x3] }
  0x74   : > { %1213 = vmatmul.mubr.f32.gmra.mxu1 %v5276_v43  ;;  %4030 = vmatprep.subr.mxu0 %v3448_v11  ;;  %v3410_v11 = vld [vmem:[%s7316_s1 + $0x498] sm:$0xff] }
  0x75   : > { %4086 = vmatprep.subr.mxu1 %v3416_v13  ;;  %4031 = vmatpush3.msra.mxu0 %v3432_v14  ;;  %v3426_v13 = vld [vmem:[%s7316_s1 + $0x518] sm:$0xff] }
  0x76   : > { %4087 = vmatpush3.msra.mxu1 %v3400_v17  ;;  %4032 = vmatprep.subr.mxu0 %v3447_v19  ;;  %v3394_v14 = vld [vmem:[%s7316_s1 + $0x418] sm:$0xff]  ;;  %v367_v17 = vrot.slane %v276_v16, 1  ;;  %v3441_v19 = vld [vmem:[%s7316_s1 + $0x590] sm:$0xff] }
  0x77   : > { %4088 = vmatprep.subr.mxu1 %v3415_v22  ;;  %1054 = vmatprep.mubr.f32.mxu0 %v5307_v62  ;;  %v3398_v62 = vld [vmem:[%s7316_s1 + $0x438] sm:$0xff]  ;;  %v3409_v22 = vld [vmem:[%s7316_s1 + $0x490] sm:$0xff] }
  0x78   : > { %1217 = vmatprep.mubr.f32.mxu1 %v5304_v61  ;;  %4033 = vmatpush3.msra.mxu0 %v3431_v26  ;;  %v431_v26 = vld [vmem:[%s4984_s6 + $0x8] sm:$0xfc]  ;;  %v3485_v16 = vld [vmem:[%s7316_s1 + $0x6f0] sm:$0xff] }
  0x79   : > { %4089 = vmatpush3.msra.mxu1 %v3399_v27  ;;  %1055 = vmatmul.mubr.f32.gmra.mxu0 %v5320_v5  ;;  %v3397_v5 = vld [vmem:[%s7316_s1 + $0x430] sm:$0xff]  ;;  %v5594_v27 = vsel %vm320_vm0, %v365_v48, %v369_v10  ;;  %v3439_v48 = vld [vmem:[%s7316_s1 + $0x580] sm:$0xff] }
  0x7a   : > { %1218 = vmatmul.mubr.f32.gmra.mxu1 %v5317_v4  ;;  %4034 = vmatprep.subr.mxu0 %v3446_v30  ;;  %v3425_v30 = vld [vmem:[%s7316_s1 + $0x510] sm:$0xff] }
  0x7b   : > { %4090 = vmatprep.subr.mxu1 %v3414_v31  ;;  %4035 = vmatpush3.msra.mxu0 %v3430_v32  ;;  %v3393_v31 = vld [vmem:[%s7316_s1 + $0x410] sm:$0xff]  ;;  %v430_v32 = vld [vmem:[%s4984_s6] sm:$0xfc] }
  0x7c   : > { %4091 = vmatpush3.msra.mxu1 %v3398_v62  ;;  %4036 = vmatprep.subr.mxu0 %v3445_v33  ;;  %v5604_v62 = vsel %vm320_vm0, %v362_v54, %v367_v17  ;;  %v506_v33 = vrot.slane %v431_v26, 2  ;;  %v503_v44 = vrot.slane %v430_v32, 2  ;;  %v517_v17 = vrot.slane %v5088_v23, 2  ;;  %v3468_v26 = vld [vmem:[%s7316_s1 + $0x668] sm:$0xff]  ;;  %v3515_v32 = vld [vmem:[%s7316_s1 + $0x7e0] sm:$0xff] }
  0x7d   : > { %4092 = vmatprep.subr.mxu1 %v3413_v34  ;;  %1059 = vmatprep.mubr.f32.mxu0 %v5260_v35  ;;  %v507_v34 = vrot.slane %v5006_v51, 2  ;;  %v3424_v51 = vld [vmem:[%s7316_s1 + $0x508] sm:$0xff] }
  0x7e   : > { %1222 = vmatprep.mubr.f32.mxu1 %v5345_v18  ;;  %4037 = vmatpush3.msra.mxu0 %v3429_v39  ;;  %v3408_v39 = vld [vmem:[%s7316_s1 + $0x488] sm:$0xff]  ;;  %v505_v54 = vsel %vm502_vm1, %v503_v44, %v504_v42  ;;  %v3514_v44 = vld [vmem:[%s7316_s1 + $0x7d8] sm:$0xff] }
  0x7f   : > { %4093 = vmatpush3.msra.mxu1 %v3397_v5  ;;  %1060 = vmatmul.mubr.f32.gmra.mxu0 %v5273_v40  ;;  %v3392_v5 = vld [vmem:[%s7316_s1 + $0x408] sm:$0xff]  ;;  %v508_v57 = vsel %vm502_vm1, %v506_v33, %v507_v34  ;;  %v441_v33 = vld [vmem:[%s4984_s6 + $0x58] sm:$0x3] }
  0x80   : > { %1223 = vmatmul.mubr.f32.gmra.mxu1 %v5354_v25  ;;  %4038 = vmatprep.subr.mxu0 %v3444_v49  ;;  %v3407_v49 = vld [vmem:[%s7316_s1 + $0x480] sm:$0xff]  ;;  %v3500_v23 = vld [vmem:[%s7316_s1 + $0x768] sm:$0xff] }
  0x81   : > { %4094 = vmatprep.subr.mxu1 %v3412_v47  ;;  %4039 = vmatpush3.msra.mxu0 %v3428_v50  ;;  %v435_v47 = vld [vmem:[%s4984_s6 + $0x28] sm:$0x3]  ;;  %v3423_v50 = vld [vmem:[%s7316_s1 + $0x500] sm:$0xff] }
  0x82   : > { %4095 = vmatpush3.msra.mxu1 %v3396_v52  ;;  %4040 = vmatprep.subr.mxu0 %v3443_v55  ;;  %v3391_v52 = vld [vmem:[%s7316_s1 + $0x400] sm:$0xff]  ;;  %v511_v55 = vrot.slane %v435_v47, 2  ;;  %v3481_v47 = vld [vmem:[%s7316_s1 + $0x6d0] sm:$0xff] }
  0x83   : > { %4096 = vmatprep.subr.mxu1 %v3411_v56  ;;  %1064 = vmatprep.mubr.f32.mxu0 %v217_v63  ;;  %v3486_v56 = vld [vmem:[%s7316_s1 + $0x6f8] sm:$0xff] }
  0x84   : > { %1227 = vmatprep.mubr.f32.mxu1 %v5559_v2  ;;  %4041 = vmatpush3.msra.mxu0 %v3427_v3  ;;  %v3470_v63 = vld [vmem:[%s7316_s1 + $0x678] sm:$0xff]  ;;  %v512_v10 = vsel %vm502_vm1, %v507_v34, %v511_v55  ;;  %v442_v55 = vld [vmem:[%s4984_s6 + $0x60] sm:$0xfc] }
  0x85   : > { %4097 = vmatpush3.msra.mxu1 %v3395_v6  ;;  %1065 = vmatmul.mubr.f32.gmra.mxu0 %v216_v7  ;;  %v3502_v3 = vld [vmem:[%s7316_s1 + $0x778] sm:$0xff]  ;;  %v509_v6 = vrot.slane %v434_v53, 2  ;;  %v3465_v53 = vld [vmem:[%s7316_s1 + $0x650] sm:$0xff] }
  0x86   : > { %1228 = vmatmul.mubr.f32.gmra.mxu1 %v5570_v9  ;;  %4042 = vmatprep.subr.mxu0 %v3442_v21  ;;  %v437_v7 = vld [vmem:[%s4984_s6 + $0x38] sm:$0xfc]  ;;  %v3469_v21 = vld [vmem:[%s7316_s1 + $0x670] sm:$0xff] }
  0x87   : > { %4098 = vmatprep.subr.mxu1 %v3410_v11  ;;  %4043 = vmatpush3.msra.mxu0 %v3426_v13  ;;  %v436_v11 = vld [vmem:[%s4984_s6 + $0x30] sm:$0xfc]  ;;  %v510_v13 = vsel %vm502_vm1, %v504_v42, %v509_v6  ;;  %v3466_v42 = vld [vmem:[%s7316_s1 + $0x658] sm:$0xff]  ;;  %v3512_v6 = vld [vmem:[%s7316_s1 + $0x7c8] sm:$0xff] }
  0x88   : > { %4099 = vmatpush3.msra.mxu1 %v3394_v14  ;;  %4044 = vmatprep.subr.mxu0 %v3441_v19  ;;  %v516_v14 = vrot.slane %v437_v7, 2  ;;  %v3484_v19 = vld [vmem:[%s7316_s1 + $0x6e8] sm:$0xff]  ;;  %v524_v7 = vrot.slane %v5187_v0, 2  ;;  %v3463_v0 = vld [vmem:[%s7316_s1 + $0x640] sm:$0xff] }
  0x89   : > { %4100 = vmatprep.subr.mxu1 %v3409_v22  ;;  %1069 = vmatprep.mubr.f32.mxu0 %v5520_v38  ;;  %v3516_v22 = vld [vmem:[%s7316_s1 + $0x7e8] sm:$0xff] }
  0x8a   : > { %1232 = vmatprep.mubr.f32.mxu1 %v5594_v27  ;;  %4045 = vmatpush3.msra.mxu0 %v3425_v30  ;;  %v514_v30 = vrot.slane %v5101_v28, 2  ;;  %v5694_v34 = vsel %vm502_vm1, %v516_v14, %v517_v17  ;;  %v3467_v28 = vld [vmem:[%s7316_s1 + $0x660] sm:$0xff] }
  0x8b   : > { %4101 = vmatpush3.msra.mxu1 %v3393_v31  ;;  %1070 = vmatmul.mubr.f32.gmra.mxu0 %v5530_v45  ;;  %v3483_v31 = vld [vmem:[%s7316_s1 + $0x6e0] sm:$0xff]  ;;  %7360 = vst [vmem:[#allocation8_spill] sm:$0xff] %v5694_v34 }
  0x8c   : > { %1233 = vmatmul.mubr.f32.gmra.mxu1 %v5604_v62  ;;  %4046 = vmatprep.subr.mxu0 %v3440_v37  ;;  %v440_v37 = vld [vmem:[%s4984_s6 + $0x50] sm:$0x3]  ;;  %v446_v14 = vld [vmem:[%s4984_s6 + $0x80] sm:$0x3] }
  0x8d   : > { %4102 = vmatprep.subr.mxu1 %v3408_v39  ;;  %4047 = vmatpush3.msra.mxu0 %v3424_v51  ;;  %v521_v51 = vrot.slane %v441_v33, 2  ;;  %v449_v33 = vld [vmem:[%s4984_s6 + $0x98] sm:$0xfc] }
  0x8e   : > { %4103 = vmatpush3.msra.mxu1 %v3392_v5  ;;  %4048 = vmatprep.subr.mxu0 %v3439_v48  ;;  %v3482_v5 = vld [vmem:[%s7316_s1 + $0x6d8] sm:$0xff] }
  0x8f   : > { %4104 = vmatprep.subr.mxu1 %v3407_v49  ;;  %4049 = vmatpush3.msra.mxu0 %v3423_v50  ;;  %v3498_v48 = vld [vmem:[%s7316_s1 + $0x758] sm:$0xff]  ;;  %v519_v49 = vrot.slane %v440_v37, 2  ;;  %v3513_v50 = vld [vmem:[%s7316_s1 + $0x7d0] sm:$0xff] }
  0x90   : > { %1392 = vmatprep.mubr.f32.mxu0 %v508_v57  ;;  %4105 = vmatpush3.msra.mxu1 %v3391_v52  ;;  %v443_v57 = vld [vmem:[%s4984_s6 + $0x68] sm:$0xfc]  ;;  %v5730_v52 = vsel %vm502_vm1, %v517_v17, %v521_v51  ;;  %v3493_v37 = vld [vmem:[%s7316_s1 + $0x730] sm:$0xff] }
  0x91   : > { %1497 = vmatprep.mubr.f32.mxu1 %v5055_v8  ;;  %1393 = vmatmul.mubr.f32.vlgmr.msra.gmra.mxu0 %v505_v54  ;;  %v3517_v8 = vld [vmem:[%s7316_s1 + $0x7f0] sm:$0xff]  ;;  %7362 = vst [vmem:[#allocation10_spill] sm:$0xff] %v5730_v52 }
  0x92   : > { %1498 = vmatmul.mubr.f32.vlgmr.msra.gmra.mxu1 %v5063_v12  ;;  %4130 = vmatprep.subr.mxu0 %v3486_v56  ;;  %v3501_v12 = vld [vmem:[%s7316_s1 + $0x770] sm:$0xff]  ;;  %v5740_v56 = vsel %vm502_vm1, %v514_v30, %v519_v49  ;;  %v3508_v49 = vld [vmem:[%s7316_s1 + $0x7a8] sm:$0xff] }
  0x93   : > { %4186 = vmatprep.subr.mxu1 %v3518_v58  ;;  %4131 = vmatpush3.msra.mxu0 %v3470_v63  ;;  %v3497_v54 = vld [vmem:[%s7316_s1 + $0x750] sm:$0xff]  ;;  %7363 = vst [vmem:[#allocation11_spill] sm:$0xff] %v5740_v56  ;;  %v526_v58 = vrot.slane %v443_v57, 2  ;;  %v527_v63 = vrot.slane %v5174_v59, 2  ;;  %v3496_v59 = vld [vmem:[%s7316_s1 + $0x748] sm:$0xff]  ;;  %v534_v57 = vrot.slane %v5273_v40, 2 }
  0x94   : > { %4187 = vmatpush3.msra.mxu1 %v3502_v3  ;;  %4132 = vmatprep.subr.mxu0 %v3485_v16  ;;  %v3480_v3 = vld [vmem:[%s7316_s1 + $0x6c8] sm:$0xff]  ;;  %v448_v51 = vld [vmem:[%s4984_s6 + $0x90] sm:$0xfc]  ;;  %v3459_v40 = vld [vmem:[%s7316_s1 + $0x620] sm:$0xff] }
  0x95   : > { %4188 = vmatprep.subr.mxu1 %v3517_v8  ;;  %1397 = vmatprep.mubr.f32.mxu0 %v512_v10  ;;  %v3464_v16 = vld [vmem:[%s7316_s1 + $0x648] sm:$0xff]  ;;  %v523_v8 = vrot.slane %v442_v55, 2  ;;  %v3479_v10 = vld [vmem:[%s7316_s1 + $0x6c0] sm:$0xff]  ;;  %v453_v55 = vld [vmem:[%s4984_s6 + $0xb8] sm:$0x3] }
  0x96   : > { %1502 = vmatprep.mubr.f32.mxu1 %v5091_v24  ;;  %4133 = vmatpush3.msra.mxu0 %v3469_v21  ;;  %v513_v24 = vrot.slane %v436_v11, 2  ;;  %v3511_v21 = vld [vmem:[%s7316_s1 + $0x7c0] sm:$0xff]  ;;  %v5768_v11 = vsel %vm502_vm1, %v526_v58, %v527_v63 }
  0x97   : > { %4189 = vmatpush3.msra.mxu1 %v3501_v12  ;;  %1398 = vmatmul.mubr.f32.gmra.mxu0 %v510_v13  ;;  %v447_v12 = vld [vmem:[%s4984_s6 + $0x88] sm:$0x3]  ;;  %7364 = vst [vmem:[#allocation12_spill] sm:$0xff] %v5768_v11  ;;  %v3495_v13 = vld [vmem:[%s7316_s1 + $0x740] sm:$0xff]  ;;  %v5778_v17 = vsel %vm502_vm1, %v523_v8, %v524_v7  ;;  %v3506_v8 = vld [vmem:[%s7316_s1 + $0x798] sm:$0xff] }
  0x98   : > { %1503 = vmatmul.mubr.f32.gmra.mxu1 %v5104_v29  ;;  %4134 = vmatprep.subr.mxu0 %v3484_v19  ;;  %v3499_v29 = vld [vmem:[%s7316_s1 + $0x760] sm:$0xff]  ;;  %v5704_v39 = vsel %vm502_vm1, %v513_v24, %v514_v30  ;;  %7365 = vst [vmem:[#allocation13_spill] sm:$0xff] %v5778_v17  ;;  %v531_v19 = vrot.slane %v447_v12, 2  ;;  %v3494_v24 = vld [vmem:[%s7316_s1 + $0x738] sm:$0xff]  ;;  %v529_v30 = vrot.slane %v446_v14, 2  ;;  %v3473_v12 = vld [vmem:[%s7316_s1 + $0x690] sm:$0xff] }
  0x99   : > { %4190 = vmatprep.subr.mxu1 %v3516_v22  ;;  %4135 = vmatpush3.msra.mxu0 %v3468_v26  ;;  %7361 = vst [vmem:[#allocation9_spill] sm:$0xff] %v5704_v39  ;;  %v3478_v22 = vld [vmem:[%s7316_s1 + $0x6b8] sm:$0xff]  ;;  %v3457_v14 = vld [vmem:[%s7316_s1 + $0x610] sm:$0xff] }
  0x9a   : > { %4191 = vmatpush3.msra.mxu1 %v3500_v23  ;;  %4136 = vmatprep.subr.mxu0 %v3483_v31  ;;  %v3510_v26 = vld [vmem:[%s7316_s1 + $0x7b8] sm:$0xff]  ;;  %v3477_v31 = vld [vmem:[%s7316_s1 + $0x6b0] sm:$0xff] }
  0x9b   : > { %4192 = vmatprep.subr.mxu1 %v3515_v32  ;;  %1402 = vmatprep.mubr.f32.mxu0 %v5694_v34  ;;  %v3462_v23 = vld [vmem:[%s7316_s1 + $0x638] sm:$0xff]  ;;  %v3509_v32 = vld [vmem:[%s7316_s1 + $0x7b0] sm:$0xff] }
  0x9c   : > { %1507 = vmatprep.mubr.f32.mxu1 %v5132_v41  ;;  %4137 = vmatpush3.msra.mxu0 %v3467_v28  ;;  %v5804_v28 = vsel %vm502_vm1, %v527_v63, %v531_v19  ;;  %v3491_v63 = vld [vmem:[%s7316_s1 + $0x720] sm:$0xff]  ;;  %v3489_v19 = vld [vmem:[%s7316_s1 + $0x710] sm:$0xff] }
  0x9d   : > { %4193 = vmatpush3.msra.mxu1 %v3499_v29  ;;  %1403 = vmatmul.mubr.f32.gmra.mxu0 %v5704_v39  ;;  %7366 = vst [vmem:[#allocation14_spill] sm:$0xff] %v5804_v28  ;;  %v3461_v29 = vld [vmem:[%s7316_s1 + $0x630] sm:$0xff] }
  0x9e   : > { %1508 = vmatmul.mubr.f32.gmra.mxu1 %v5145_v46  ;;  %4138 = vmatprep.subr.mxu0 %v3482_v5  ;;  %v5814_v5 = vsel %vm502_vm1, %v524_v7, %v529_v30  ;;  %v3458_v7 = vld [vmem:[%s7316_s1 + $0x618] sm:$0xff]  ;;  %v3488_v30 = vld [vmem:[%s7316_s1 + $0x708] sm:$0xff] }
  0x9f   : > { %4194 = vmatprep.subr.mxu1 %v3514_v44  ;;  %4139 = vmatpush3.msra.mxu0 %v3466_v42  ;;  %7367 = vst [vmem:[#allocation15_spill] sm:$0xff] %v5814_v5  ;;  %v536_v44 = vrot.slane %v449_v33, 2  ;;  %v537_v42 = vrot.slane %v5260_v35, 2  ;;  %v3492_v35 = vld [vmem:[%s7316_s1 + $0x728] sm:$0xff]  ;;  %v3455_v33 = vld [vmem:[%s7316_s1 + $0x600] sm:$0xff] }
  0xa0   : > { %4195 = vmatpush3.msra.mxu1 %v3498_v48  ;;  %4140 = vmatprep.subr.mxu0 %v3481_v47  ;;  %v3476_v48 = vld [vmem:[%s7316_s1 + $0x6a8] sm:$0xff] }
  0xa1   : > { %4196 = vmatprep.subr.mxu1 %v3513_v50  ;;  %1407 = vmatprep.mubr.f32.mxu0 %v5730_v52  ;;  %v3460_v47 = vld [vmem:[%s7316_s1 + $0x628] sm:$0xff]  ;;  %v533_v50 = vrot.slane %v448_v51, 2  ;;  %v5842_v58 = vsel %vm502_vm1, %v536_v44, %v537_v42  ;;  %v3550_v51 = vld [vmem:[%s7316_s1 + $0x8f8] sm:$0xff] }
  0xa2   : > { %1512 = vmatprep.mubr.f32.mxu1 %v5177_v60  ;;  %4141 = vmatpush3.msra.mxu0 %v3465_v53  ;;  %v3475_v53 = vld [vmem:[%s7316_s1 + $0x6a0] sm:$0xff]  ;;  %7368 = vst [vmem:[#allocation16_spill] sm:$0xff] %v5842_v58  ;;  %v3566_v44 = vld [vmem:[%s7316_s1 + $0x978] sm:$0xff] }
  0xa3   : > { %4197 = vmatpush3.msra.mxu1 %v3497_v54  ;;  %1408 = vmatmul.mubr.f32.gmra.mxu0 %v5740_v56  ;;  %v3507_v54 = vld [vmem:[%s7316_s1 + $0x7a0] sm:$0xff] }
  0xa4   : > { %1513 = vmatmul.mubr.f32.gmra.mxu1 %v5190_v1  ;;  %4142 = vmatprep.subr.mxu0 %v3480_v3  ;;  %v452_v3 = vld [vmem:[%s4984_s6 + $0xb0] sm:$0x3] }
  0xa5   : > { %4198 = vmatprep.subr.mxu1 %v3512_v6  ;;  %4143 = vmatpush3.msra.mxu0 %v3464_v16  ;;  %v5852_v6 = vsel %vm502_vm1, %v533_v50, %v534_v57  ;;  %v541_v16 = vrot.slane %v453_v55, 2  ;;  %v3580_v50 = vld [vmem:[%s7316_s1 + $0x9e8] sm:$0xff]  ;;  %v3579_v55 = vld [vmem:[%s7316_s1 + $0x9e0] sm:$0xff] }
  0xa6   : > { %4199 = vmatpush3.msra.mxu1 %v3496_v59  ;;  %4144 = vmatprep.subr.mxu0 %v3479_v10  ;;  %7369 = vst [vmem:[#allocation17_spill] sm:$0xff] %v5852_v6  ;;  %v3474_v59 = vld [vmem:[%s7316_s1 + $0x698] sm:$0xff] }
  0xa7   : > { %4200 = vmatprep.subr.mxu1 %v3511_v21  ;;  %1412 = vmatprep.mubr.f32.mxu0 %v5768_v11  ;;  %v3490_v10 = vld [vmem:[%s7316_s1 + $0x718] sm:$0xff]  ;;  %v539_v21 = vrot.slane %v452_v3, 2  ;;  %v3531_v3 = vld [vmem:[%s7316_s1 + $0x860] sm:$0xff] }
  0xa8   : > { %1517 = vmatprep.mubr.f32.mxu1 %v5218_v15  ;;  %4145 = vmatpush3.msra.mxu0 %v3463_v0  ;;  %v3505_v0 = vld [vmem:[%s7316_s1 + $0x790] sm:$0xff] }
  0xa9   : > { %4201 = vmatpush3.msra.mxu1 %v3495_v13  ;;  %1413 = vmatmul.mubr.f32.gmra.mxu0 %v5778_v17  ;;  %v5877_v13 = vsel %vm502_vm1, %v537_v42, %v541_v16  ;;  %v3534_v42 = vld [vmem:[%s7316_s1 + $0x878] sm:$0xff] }
  0xaa   : > { %1518 = vmatmul.mubr.f32.gmra.mxu1 %v5231_v20  ;;  %4146 = vmatprep.subr.mxu0 %v3478_v22  ;;  %7370 = vst [vmem:[#allocation18_spill] sm:$0xff] %v5877_v13  ;;  %v5886_v22 = vsel %vm502_vm1, %v534_v57, %v539_v21  ;;  %v3548_v57 = vld [vmem:[%s7316_s1 + $0x8e8] sm:$0xff]  ;;  %v3578_v16 = vld [vmem:[%s7316_s1 + $0x9d8] sm:$0xff]  ;;  %v3545_v21 = vld [vmem:[%s7316_s1 + $0x8d0] sm:$0xff] }
  0xab   : > { %4202 = vmatprep.subr.mxu1 %v3510_v26  ;;  %4147 = vmatpush3.msra.mxu0 %v3462_v23  ;;  %7371 = vst [vmem:[#allocation19_spill] sm:$0xff] %v5886_v22  ;;  %v3472_v26 = vld [vmem:[%s7316_s1 + $0x688] sm:$0xff] }
  0xac   : > { %4203 = vmatpush3.msra.mxu1 %v3494_v24  ;;  %4148 = vmatprep.subr.mxu0 %v3477_v31  ;;  %v3504_v23 = vld [vmem:[%s7316_s1 + $0x788] sm:$0xff]  ;;  %v3471_v31 = vld [vmem:[%s7316_s1 + $0x680] sm:$0xff] }
  0xad   : > { %4204 = vmatprep.subr.mxu1 %v3509_v32  ;;  %1417 = vmatprep.mubr.f32.mxu0 %v5804_v28  ;;  %v3456_v24 = vld [vmem:[%s7316_s1 + $0x608] sm:$0xff]  ;;  %v3503_v32 = vld [vmem:[%s7316_s1 + $0x780] sm:$0xff] }
  0xae   : > { %1522 = vmatprep.mubr.f32.mxu1 %v5263_v36  ;;  %4149 = vmatpush3.msra.mxu0 %v3461_v29  ;;  %v3487_v29 = vld [vmem:[%s7316_s1 + $0x700] sm:$0xff] }
  0xaf   : > { %4205 = vmatpush3.msra.mxu1 %v3493_v37  ;;  %1418 = vmatmul.mubr.f32.gmra.mxu0 %v5814_v5  ;;  %v3582_v37 = vld [vmem:[%s7316_s1 + $0x9f8] sm:$0xff] }
  0xb0   : > { %1523 = vmatmul.mubr.f32.gmra.mxu1 %v5276_v43  ;;  %4150 = vmatprep.subr.mxu0 %v3476_v48  ;;  %v3581_v48 = vld [vmem:[%s7316_s1 + $0x9f0] sm:$0xff] }
  0xb1   : > { %4206 = vmatprep.subr.mxu1 %v3508_v49  ;;  %4151 = vmatpush3.msra.mxu0 %v3460_v47  ;;  %v3549_v49 = vld [vmem:[%s7316_s1 + $0x8f0] sm:$0xff] }
  0xb2   : > { %4207 = vmatpush3.msra.mxu1 %v3492_v35  ;;  %4152 = vmatprep.subr.mxu0 %v3475_v53  ;;  %v3565_v47 = vld [vmem:[%s7316_s1 + $0x970] sm:$0xff]  ;;  %v3564_v53 = vld [vmem:[%s7316_s1 + $0x968] sm:$0xff] }
  0xb3   : > { %4208 = vmatprep.subr.mxu1 %v3507_v54  ;;  %1422 = vmatprep.mubr.f32.mxu0 %v5842_v58  ;;  %v3533_v35 = vld [vmem:[%s7316_s1 + $0x870] sm:$0xff]  ;;  %v3532_v54 = vld [vmem:[%s7316_s1 + $0x868] sm:$0xff] }
  0xb4   : > { %1527 = vmatprep.mubr.f32.mxu1 %v5304_v61  ;;  %4153 = vmatpush3.msra.mxu0 %v3459_v40  ;;  %v3547_v40 = vld [vmem:[%s7316_s1 + $0x8e0] sm:$0xff] }
  0xb5   : > { %4209 = vmatpush3.msra.mxu1 %v3491_v63  ;;  %1423 = vmatmul.mubr.f32.gmra.mxu0 %v5852_v6  ;;  %v3563_v63 = vld [vmem:[%s7316_s1 + $0x960] sm:$0xff] }
  0xb6   : > { %1528 = vmatmul.mubr.f32.gmra.mxu1 %v5317_v4  ;;  %4154 = vmatprep.subr.mxu0 %v3474_v59  ;;  %v3546_v59 = vld [vmem:[%s7316_s1 + $0x8d8] sm:$0xff] }
  0xb7   : > { %4210 = vmatprep.subr.mxu1 %v3506_v8  ;;  %4155 = vmatpush3.msra.mxu0 %v3458_v7  ;;  %v3562_v8 = vld [vmem:[%s7316_s1 + $0x958] sm:$0xff] }
  0xb8   : > { %4211 = vmatpush3.msra.mxu1 %v3490_v10  ;;  %4156 = vmatprep.subr.mxu0 %v3473_v12  ;;  %v3530_v7 = vld [vmem:[%s7316_s1 + $0x858] sm:$0xff]  ;;  %v3577_v10 = vld [vmem:[%s7316_s1 + $0x9d0] sm:$0xff] }
  0xb9   : > { %4212 = vmatprep.subr.mxu1 %v3505_v0  ;;  %1427 = vmatprep.mubr.f32.mxu0 %v5877_v13  ;;  %v3561_v12 = vld [vmem:[%s7316_s1 + $0x950] sm:$0xff] }
  0xba   : > { %1532 = vmatprep.mubr.f32.mxu1 %v5345_v18  ;;  %4157 = vmatpush3.msra.mxu0 %v3457_v14  ;;  %v3529_v0 = vld [vmem:[%s7316_s1 + $0x850] sm:$0xff]  ;;  %v3576_v14 = vld [vmem:[%s7316_s1 + $0x9c8] sm:$0xff] }
  0xbb   : > { %4213 = vmatpush3.msra.mxu1 %v3489_v19  ;;  %1428 = vmatmul.mubr.f32.gmra.mxu0 %v5886_v22  ;;  %v3544_v19 = vld [vmem:[%s7316_s1 + $0x8c8] sm:$0xff] }
  0xbc   : > { %1533 = vmatmul.mubr.f32.gmra.mxu1 %v5354_v25  ;;  %4158 = vmatprep.subr.mxu0 %v3472_v26  ;;  %v3560_v26 = vld [vmem:[%s7316_s1 + $0x948] sm:$0xff] }
  0xbd   : > { %4214 = vmatprep.subr.mxu1 %v3504_v23  ;;  %4159 = vmatpush3.msra.mxu0 %v3456_v24  ;;  %v3528_v23 = vld [vmem:[%s7316_s1 + $0x848] sm:$0xff]  ;;  %v3575_v24 = vld [vmem:[%s7316_s1 + $0x9c0] sm:$0xff] }
  0xbe   : > { %4215 = vmatpush3.msra.mxu1 %v3488_v30  ;;  %4160 = vmatprep.subr.mxu0 %v3471_v31  ;;  %v3543_v30 = vld [vmem:[%s7316_s1 + $0x8c0] sm:$0xff] }
  0xbf   : > { %4216 = vmatprep.subr.mxu1 %v3503_v32  ;;  %4161 = vmatpush3.msra.mxu0 %v3455_v33  ;;  %v3559_v31 = vld [vmem:[%s7316_s1 + $0x940] sm:$0xff]  ;;  %v3574_v33 = vld [vmem:[%s7316_s1 + $0x9b8] sm:$0xff] }
  0xc0   : > { %1635 = vmatprep.mubr.f32.mxu0 %v5132_v41  ;;  %4217 = vmatpush3.msra.mxu1 %v3487_v29  ;;  %v3527_v32 = vld [vmem:[%s7316_s1 + $0x840] sm:$0xff]  ;;  %v3542_v29 = vld [vmem:[%s7316_s1 + $0x8b8] sm:$0xff] }
  0xc1   : > { %1798 = vmatprep.mubr.f32.mxu1 %v5694_v34  ;;  %1636 = vmatmul.mubr.f32.vlgmr.msra.gmra.mxu0 %v5145_v46  ;;  %v3615_v34 = vld [vmem:[%s7316_s1 + $0xb00] sm:$0xff] }
  0xc2   : > { %1799 = vmatmul.mubr.f32.vlgmr.msra.gmra.mxu1 %v5704_v39  ;;  %4242 = vmatprep.subr.mxu0 %v3582_v37  ;;  %v3558_v37 = vld [vmem:[%s7316_s1 + $0x938] sm:$0xff]  ;;  %v3583_v39 = vld [vmem:[%s7316_s1 + $0xa00] sm:$0xff] }
  0xc3   : > { %4298 = vmatprep.subr.mxu1 %v3550_v51  ;;  %4243 = vmatpush3.msra.mxu0 %v3566_v44  ;;  %v3526_v51 = vld [vmem:[%s7316_s1 + $0x838] sm:$0xff]  ;;  %v3573_v44 = vld [vmem:[%s7316_s1 + $0x9b0] sm:$0xff] }
  0xc4   : > { %4299 = vmatpush3.msra.mxu1 %v3534_v42  ;;  %4244 = vmatprep.subr.mxu0 %v3581_v48  ;;  %v3541_v42 = vld [vmem:[%s7316_s1 + $0x8b0] sm:$0xff]  ;;  %v455_v48 = vld [vmem:[%s4984_s6 + $0xc8] sm:$0xfc] }
  0xc5   : > { %4300 = vmatprep.subr.mxu1 %v3549_v49  ;;  %1640 = vmatprep.mubr.f32.mxu0 %v5177_v60  ;;  %v3557_v49 = vld [vmem:[%s7316_s1 + $0x930] sm:$0xff] }
  0xc6   : > { %1803 = vmatprep.mubr.f32.mxu1 %v5730_v52  ;;  %4245 = vmatpush3.msra.mxu0 %v3565_v47  ;;  %v3525_v47 = vld [vmem:[%s7316_s1 + $0x830] sm:$0xff] }
  0xc7   : > { %4301 = vmatpush3.msra.mxu1 %v3533_v35  ;;  %1641 = vmatmul.mubr.f32.gmra.mxu0 %v5190_v1  ;;  %v454_v35 = vld [vmem:[%s4984_s6 + $0xc0] sm:$0xfc] }
  0xc8   : > { %1804 = vmatmul.mubr.f32.gmra.mxu1 %v5740_v56  ;;  %4246 = vmatprep.subr.mxu0 %v3580_v50  ;;  %v546_v50 = vrot.slane %v455_v48, 2  ;;  %v3567_v48 = vld [vmem:[%s7316_s1 + $0x980] sm:$0xff] }
  0xc9   : > { %4302 = vmatprep.subr.mxu1 %v3548_v57  ;;  %4247 = vmatpush3.msra.mxu0 %v3564_v53  ;;  %v547_v57 = vrot.slane %v5520_v38, 2  ;;  %v3572_v53 = vld [vmem:[%s7316_s1 + $0x9a8] sm:$0xff] }
  0xca   : > { %4303 = vmatpush3.msra.mxu1 %v3532_v54  ;;  %4248 = vmatprep.subr.mxu0 %v3579_v55  ;;  %v3540_v54 = vld [vmem:[%s7316_s1 + $0x8a8] sm:$0xff] }
  0xcb   : > { %4304 = vmatprep.subr.mxu1 %v3547_v40  ;;  %1645 = vmatprep.mubr.f32.mxu0 %v5218_v15  ;;  %v3556_v55 = vld [vmem:[%s7316_s1 + $0x928] sm:$0xff]  ;;  %v543_v40 = vrot.slane %v454_v35, 2  ;;  %v3519_v35 = vld [vmem:[%s7316_s1 + $0x800] sm:$0xff] }
  0xcc   : > { %1808 = vmatprep.mubr.f32.mxu1 %v5768_v11  ;;  %4249 = vmatpush3.msra.mxu0 %v3563_v63  ;;  %v3524_v38 = vld [vmem:[%s7316_s1 + $0x828] sm:$0xff]  ;;  %v544_v63 = vrot.slane %v5530_v45, 2  ;;  %v3555_v45 = vld [vmem:[%s7316_s1 + $0x920] sm:$0xff]  ;;  %v3617_v11 = vld [vmem:[%s7316_s1 + $0xb10] sm:$0xff] }
  0xcd   : > { %4305 = vmatpush3.msra.mxu1 %v3531_v3  ;;  %1646 = vmatmul.mubr.f32.gmra.mxu0 %v5231_v20  ;;  %v3571_v3 = vld [vmem:[%s7316_s1 + $0x9a0] sm:$0xff] }
  0xce   : > { %1809 = vmatmul.mubr.f32.gmra.mxu1 %v5778_v17  ;;  %4250 = vmatprep.subr.mxu0 %v3578_v16  ;;  %v3539_v16 = vld [vmem:[%s7316_s1 + $0x8a0] sm:$0xff]  ;;  %v3585_v17 = vld [vmem:[%s7316_s1 + $0xa10] sm:$0xff] }
  0xcf   : > { %4306 = vmatprep.subr.mxu1 %v3546_v59  ;;  %4251 = vmatpush3.msra.mxu0 %v3562_v8  ;;  %v459_v59 = vld [vmem:[%s4984_s6 + $0xe8] sm:$0x3]  ;;  %v6084_v8 = vsel %vm502_vm1, %v546_v50, %v547_v57  ;;  %v3614_v50 = vld [vmem:[%s7316_s1 + $0xaf8] sm:$0xff] }
  0xd0   : > { %4307 = vmatpush3.msra.mxu1 %v3530_v7  ;;  %4252 = vmatprep.subr.mxu0 %v3577_v10  ;;  %7372 = vst [vmem:[#allocation20_spill] sm:$0xff] %v6084_v8  ;;  %v3523_v7 = vld [vmem:[%s7316_s1 + $0x820] sm:$0xff] }
  0xd1   : > { %4308 = vmatprep.subr.mxu1 %v3545_v21  ;;  %1650 = vmatprep.mubr.f32.mxu0 %v5263_v36  ;;  %v458_v10 = vld [vmem:[%s4984_s6 + $0xe0] sm:$0x3]  ;;  %v6094_v21 = vsel %vm502_vm1, %v543_v40, %v544_v63  ;;  %v3613_v40 = vld [vmem:[%s7316_s1 + $0xaf0] sm:$0xff] }
  0xd2   : > { %1813 = vmatprep.mubr.f32.mxu1 %v5804_v28  ;;  %4253 = vmatpush3.msra.mxu0 %v3561_v12  ;;  %7373 = vst [vmem:[#allocation21_spill] sm:$0xff] %v6094_v21  ;;  %v551_v12 = vrot.slane %v459_v59, 2  ;;  %v3597_v59 = vld [vmem:[%s7316_s1 + $0xa70] sm:$0xff] }
  0xd3   : > { %4309 = vmatpush3.msra.mxu1 %v3529_v0  ;;  %1651 = vmatmul.mubr.f32.gmra.mxu0 %v5276_v43  ;;  %v3570_v0 = vld [vmem:[%s7316_s1 + $0x998] sm:$0xff] }
  0xd4   : > { %1814 = vmatmul.mubr.f32.gmra.mxu1 %v5814_v5  ;;  %4254 = vmatprep.subr.mxu0 %v3576_v14  ;;  %v3538_v14 = vld [vmem:[%s7316_s1 + $0x898] sm:$0xff] }
  0xd5   : > { %4310 = vmatprep.subr.mxu1 %v3544_v19  ;;  %4255 = vmatpush3.msra.mxu0 %v3560_v26  ;;  %v3554_v19 = vld [vmem:[%s7316_s1 + $0x918] sm:$0xff] }
  0xd6   : > { %4311 = vmatpush3.msra.mxu1 %v3528_v23  ;;  %4256 = vmatprep.subr.mxu0 %v3575_v24  ;;  %v3522_v26 = vld [vmem:[%s7316_s1 + $0x818] sm:$0xff]  ;;  %v549_v23 = vrot.slane %v458_v10, 2  ;;  %v3569_v24 = vld [vmem:[%s7316_s1 + $0x990] sm:$0xff] }
  0xd7   : > { %4312 = vmatprep.subr.mxu1 %v3543_v30  ;;  %1655 = vmatprep.mubr.f32.mxu0 %v5304_v61  ;;  %v3537_v30 = vld [vmem:[%s7316_s1 + $0x890] sm:$0xff] }
  0xd8   : > { %1818 = vmatprep.mubr.f32.mxu1 %v5842_v58  ;;  %4257 = vmatpush3.msra.mxu0 %v3559_v31  ;;  %v6119_v31 = vsel %vm502_vm1, %v547_v57, %v551_v12  ;;  %v3646_v57 = vld [vmem:[%s7316_s1 + $0xbf8] sm:$0xff]  ;;  %v4733_v12 = vld [vmem:[%s4984_s6 + $0x48] sm:$0xff] }
  0xd9   : > { %4313 = vmatpush3.msra.mxu1 %v3527_v32  ;;  %1656 = vmatmul.mubr.f32.gmra.mxu0 %v5317_v4  ;;  %7374 = vst [vmem:[#allocation22_spill] sm:$0xff] %v6119_v31  ;;  %v3553_v32 = vld [vmem:[%s7316_s1 + $0x910] sm:$0xff] }
  0xda   : > { %1819 = vmatmul.mubr.f32.gmra.mxu1 %v5852_v6  ;;  %4258 = vmatprep.subr.mxu0 %v3574_v33  ;;  %v3521_v33 = vld [vmem:[%s7316_s1 + $0x810] sm:$0xff] }
  0xdb   : > { %4314 = vmatprep.subr.mxu1 %v3542_v29  ;;  %4259 = vmatpush3.msra.mxu0 %v3558_v37  ;;  %v6128_v29 = vsel %vm502_vm1, %v544_v63, %v549_v23  ;;  %v3568_v37 = vld [vmem:[%s7316_s1 + $0x988] sm:$0xff]  ;;  %v3645_v63 = vld [vmem:[%s7316_s1 + $0xbf0] sm:$0xff]  ;;  %v4734_v23 = vld [vmem:[%s4984_s6 + $0x40] sm:$0xff] }
  0xdc   : > { %4315 = vmatpush3.msra.mxu1 %v3526_v51  ;;  %4260 = vmatprep.subr.mxu0 %v3573_v44  ;;  %7375 = vst [vmem:[#allocation23_spill] sm:$0xff] %v6128_v29  ;;  %v3536_v51 = vld [vmem:[%s7316_s1 + $0x888] sm:$0xff] }
  0xdd   : > { %4316 = vmatprep.subr.mxu1 %v3541_v42  ;;  %1660 = vmatprep.mubr.f32.mxu0 %v5345_v18  ;;  %v3552_v44 = vld [vmem:[%s7316_s1 + $0x908] sm:$0xff] }
  0xde   : > { %1823 = vmatprep.mubr.f32.mxu1 %v5877_v13  ;;  %4261 = vmatpush3.msra.mxu0 %v3557_v49  ;;  %v3520_v42 = vld [vmem:[%s7316_s1 + $0x808] sm:$0xff]  ;;  %v3535_v49 = vld [vmem:[%s7316_s1 + $0x880] sm:$0xff] }
  0xdf   : > { %4317 = vmatpush3.msra.mxu1 %v3525_v47  ;;  %1661 = vmatmul.mubr.f32.gmra.mxu0 %v5354_v25  ;;  %v3551_v47 = vld [vmem:[%s7316_s1 + $0x900] sm:$0xff] }
  0xe0   : > { %1824 = vmatmul.mubr.f32.gmra.mxu1 %v5886_v22  ;;  %4262 = vmatprep.subr.mxu0 %v3572_v53  ;;  %v4731_v53 = vld [vmem:[%s4984_s6 + $0x38] sm:$0xff]  ;;  %v3587_v22 = vld [vmem:[%s7316_s1 + $0xa20] sm:$0xff] }
  0xe1   : > { %4318 = vmatprep.subr.mxu1 %v3540_v54  ;;  %4263 = vmatpush3.msra.mxu0 %v3556_v55  ;;  %v3598_v54 = vld [vmem:[%s7316_s1 + $0xa78] sm:$0xff]  ;;  %v3619_v13 = vld [vmem:[%s7316_s1 + $0xb20] sm:$0xff] }
  0xe2   : > { %4319 = vmatpush3.msra.mxu1 %v3524_v38  ;;  %4264 = vmatprep.subr.mxu0 %v3571_v3  ;;  %v3630_v55 = vld [vmem:[%s7316_s1 + $0xb78] sm:$0xff]  ;;  %v4732_v38 = vld [vmem:[%s4984_s6 + $0x30] sm:$0xff] }
  0xe3   : > { %4320 = vmatprep.subr.mxu1 %v3539_v16  ;;  %1665 = vmatprep.mubr.f32.mxu0 %v5559_v2 }
  0xe4   : > { %1828 = vmatprep.mubr.f32.mxu1 %v6084_v8  ;;  %4265 = vmatpush3.msra.mxu0 %v3555_v45  ;;  %v3629_v45 = vld [vmem:[%s7316_s1 + $0xb70] sm:$0xff] }
  0xe5   : > { %4321 = vmatpush3.msra.mxu1 %v3523_v7  ;;  %1666 = vmatmul.mubr.f32.gmra.mxu0 %v5570_v9 }
  0xe6   : > { %1829 = vmatmul.mubr.f32.gmra.mxu1 %v6094_v21  ;;  %4266 = vmatprep.subr.mxu0 %v3570_v0  ;;  %v3612_v0 = vld [vmem:[%s7316_s1 + $0xae8] sm:$0xff] }
  0xe7   : > { %4322 = vmatprep.subr.mxu1 %v3538_v14  ;;  %4267 = vmatpush3.msra.mxu0 %v3554_v19  ;;  %v3644_v14 = vld [vmem:[%s7316_s1 + $0xbe8] sm:$0xff] }
  0xe8   : > { %4323 = vmatpush3.msra.mxu1 %v3522_v26  ;;  %4268 = vmatprep.subr.mxu0 %v3569_v24  ;;  %v3596_v19 = vld [vmem:[%s7316_s1 + $0xa68] sm:$0xff]  ;;  %v3611_v24 = vld [vmem:[%s7316_s1 + $0xae0] sm:$0xff] }
  0xe9   : > { %4324 = vmatprep.subr.mxu1 %v3537_v30  ;;  %1670 = vmatprep.mubr.f32.mxu0 %v5594_v27  ;;  %v3628_v26 = vld [vmem:[%s7316_s1 + $0xb68] sm:$0xff]  ;;  %v3643_v30 = vld [vmem:[%s7316_s1 + $0xbe0] sm:$0xff] }
  0xea   : > { %1833 = vmatprep.mubr.f32.mxu1 %v6119_v31  ;;  %4269 = vmatpush3.msra.mxu0 %v3553_v32 }
  0xeb   : > { %4325 = vmatpush3.msra.mxu1 %v3521_v33  ;;  %1671 = vmatmul.mubr.f32.gmra.mxu0 %v5604_v62 }
  0xec   : > { %1834 = vmatmul.mubr.f32.gmra.mxu1 %v6128_v29  ;;  %4270 = vmatprep.subr.mxu0 %v3568_v37  ;;  %v3595_v37 = vld [vmem:[%s7316_s1 + $0xa60] sm:$0xff] }
  0xed   : > { %4326 = vmatprep.subr.mxu1 %v3536_v51  ;;  %4271 = vmatpush3.msra.mxu0 %v3552_v44  ;;  %v3627_v51 = vld [vmem:[%s7316_s1 + $0xb60] sm:$0xff] }
  0xee   : > { %4327 = vmatpush3.msra.mxu1 %v3520_v42  ;;  %4272 = vmatprep.subr.mxu0 %v3567_v48  ;;  %v6232_v48 = vld [vmem:[%s4984_s6 + $0x68] sm:$0xff] }
  0xef   : > { %4328 = vmatprep.subr.mxu1 %v3535_v49  ;;  %4273 = vmatpush3.msra.mxu0 %v3551_v47  ;;  %v3610_v49 = vld [vmem:[%s7316_s1 + $0xad8] sm:$0xff] }
  0xf0   : > { %2068 = vmatprep.mubr.f32.mxu0 %v5132_v41  ;;  %4329 = vmatpush3.msra.mxu1 %v3519_v35  ;;  %v3642_v47 = vld [vmem:[%s7316_s1 + $0xbd8] sm:$0xff] }
  0xf1   : > { %2173 = vmatprep.mubr.f32.mxu1 %v4731_v53  ;;  %2069 = vmatmul.mubr.f32.vlgmr.msra.gmra.mxu0 %v5145_v46  ;;  %v6180_v3 = vpop.f32.mrf.mxu0  ;;  %v3594_v35 = vld [vmem:[%s7316_s1 + $0xa58] sm:$0xff]  ;;  %v3609_v53 = vld [vmem:[%s7316_s1 + $0xad0] sm:$0xff] }
  0xf2   : > { %2174 = vmatmul.mubr.f32.vlgmr.msra.gmra.mxu1 %v4732_v38  ;;  %v6182_v16 = vpop.f32.mrf.mxu1  ;;  %4354 = vmatprep.subr.mxu0 %v3614_v50  ;;  %v3626_v50 = vld [vmem:[%s7316_s1 + $0xb58] sm:$0xff] }
  0xf3   : > { %4410 = vmatprep.subr.mxu1 %v3646_v57  ;;  %4355 = vmatpush3.msra.mxu0 %v3598_v54  ;;  %v6190_v7 = vpop.f32.mrf.mxu0  ;;  %v6249_v57 = vld [vmem:[%s4984_s6 + $0x60] sm:$0xff]  ;;  %v3641_v54 = vld [vmem:[%s7316_s1 + $0xbd0] sm:$0xff] }
  0xf4   : > { %4411 = vmatpush3.msra.mxu1 %v3630_v55  ;;  %v6192_v10 = vpop.f32.mrf.mxu1  ;;  %4356 = vmatprep.subr.mxu0 %v3613_v40  ;;  %v3593_v40 = vld [vmem:[%s7316_s1 + $0xa50] sm:$0xff] }
  0xf5   : > { %4412 = vmatprep.subr.mxu1 %v3645_v63  ;;  %2073 = vmatprep.mubr.f32.mxu0 %v5177_v60  ;;  %v3625_v63 = vld [vmem:[%s7316_s1 + $0xb50] sm:$0xff] }
  0xf6   : > { %2178 = vmatprep.mubr.f32.mxu1 %v4733_v12  ;;  %4357 = vmatpush3.msra.mxu0 %v3597_v59  ;;  %v6274_v12 = vld [vmem:[%s4984_s6 + $0x78] sm:$0xff]  ;;  %v6466_v60 = vld [vmem:[%s4984_s6 + $0xd0] sm:$0xff] }
  0xf7   : > { %4413 = vmatpush3.msra.mxu1 %v3629_v45  ;;  %2074 = vmatmul.mubr.f32.gmra.mxu0 %v5190_v1  ;;  %v6216_v32 = vpop.f32.mrf.mxu0 }
  0xf8   : > { %2179 = vmatmul.mubr.f32.gmra.mxu1 %v4734_v23  ;;  %v6218_v33 = vpop.f32.mrf.mxu1  ;;  %4358 = vmatprep.subr.mxu0 %v3612_v0  ;;  %v3608_v0 = vld [vmem:[%s7316_s1 + $0xac8] sm:$0xff]  ;;  %v6291_v23 = vld [vmem:[%s4984_s6 + $0x70] sm:$0xff] }
  0xf9   : > { %4414 = vmatprep.subr.mxu1 %v3644_v14  ;;  %4359 = vmatpush3.msra.mxu0 %v3596_v19  ;;  %v6226_v44 = vpop.f32.mrf.mxu0  ;;  %v3640_v14 = vld [vmem:[%s7316_s1 + $0xbc8] sm:$0xff] }
  0xfa   : > { %4415 = vmatpush3.msra.mxu1 %v3628_v26  ;;  %v6228_v42 = vpop.f32.mrf.mxu1  ;;  %4360 = vmatprep.subr.mxu0 %v3611_v24  ;;  %v3592_v19 = vld [vmem:[%s7316_s1 + $0xa48] sm:$0xff]  ;;  %v3607_v24 = vld [vmem:[%s7316_s1 + $0xac0] sm:$0xff] }
  0xfb   : > { %4416 = vmatprep.subr.mxu1 %v3643_v30  ;;  %2078 = vmatprep.mubr.f32.mxu0 %v5218_v15  ;;  %v3624_v26 = vld [vmem:[%s7316_s1 + $0xb48] sm:$0xff]  ;;  %v3639_v30 = vld [vmem:[%s7316_s1 + $0xbc0] sm:$0xff] }
  0xfc   : > { %2183 = vmatprep.mubr.f32.mxu1 %v6232_v48  ;;  %4361 = vmatpush3.msra.mxu0 %v3595_v37 }
  0xfd   : > { %4417 = vmatpush3.msra.mxu1 %v3627_v51  ;;  %2079 = vmatmul.mubr.f32.gmra.mxu0 %v5231_v20  ;;  %v6258_v55 = vpop.f32.mrf.mxu0 }
  0xfe   : > { %2184 = vmatmul.mubr.f32.gmra.mxu1 %v6249_v57  ;;  %v6260_v38 = vpop.f32.mrf.mxu1  ;;  %4362 = vmatprep.subr.mxu0 %v3610_v49  ;;  %v3591_v49 = vld [vmem:[%s7316_s1 + $0xa40] sm:$0xff] }
  0xff   : > { %4418 = vmatprep.subr.mxu1 %v3642_v47  ;;  %4363 = vmatpush3.msra.mxu0 %v3594_v35  ;;  %v6268_v59 = vpop.f32.mrf.mxu0  ;;  %v3623_v47 = vld [vmem:[%s7316_s1 + $0xb40] sm:$0xff] }
 0x100   : > { %4419 = vmatpush3.msra.mxu1 %v3626_v50  ;;  %v6270_v45 = vpop.f32.mrf.mxu1  ;;  %4364 = vmatprep.subr.mxu0 %v3609_v53  ;;  %v6316_v53 = vld [vmem:[%s4984_s6 + $0x98] sm:$0xff] }
 0x101   : > { %4420 = vmatprep.subr.mxu1 %v3641_v54  ;;  %2083 = vmatprep.mubr.f32.mxu0 %v5263_v36  ;;  %v3606_v54 = vld [vmem:[%s7316_s1 + $0xab8] sm:$0xff] }
 0x102   : > { %2188 = vmatprep.mubr.f32.mxu1 %v6274_v12  ;;  %4365 = vmatpush3.msra.mxu0 %v3593_v40  ;;  %v3638_v40 = vld [vmem:[%s7316_s1 + $0xbb8] sm:$0xff] }
 0x103   : > { %4421 = vmatpush3.msra.mxu1 %v3625_v63  ;;  %2084 = vmatmul.mubr.f32.gmra.mxu0 %v5276_v43  ;;  %v6300_v37 = vpop.f32.mrf.mxu0  ;;  %v3590_v63 = vld [vmem:[%s7316_s1 + $0xa38] sm:$0xff] }
 0x104   : > { %2189 = vmatmul.mubr.f32.gmra.mxu1 %v6291_v23  ;;  %v6302_v51 = vpop.f32.mrf.mxu1  ;;  %4366 = vmatprep.subr.mxu0 %v3608_v0  ;;  %v3622_v0 = vld [vmem:[%s7316_s1 + $0xb38] sm:$0xff] }
 0x105   : > { %4422 = vmatprep.subr.mxu1 %v3640_v14  ;;  %4367 = vmatpush3.msra.mxu0 %v3592_v19  ;;  %v6310_v35 = vpop.f32.mrf.mxu0  ;;  %v6333_v14 = vld [vmem:[%s4984_s6 + $0x90] sm:$0xff] }
 0x106   : > { %4423 = vmatpush3.msra.mxu1 %v3624_v26  ;;  %v6312_v50 = vpop.f32.mrf.mxu1  ;;  %4368 = vmatprep.subr.mxu0 %v3607_v24  ;;  %v3605_v19 = vld [vmem:[%s7316_s1 + $0xab0] sm:$0xff] }
 0x107   : > { %4424 = vmatprep.subr.mxu1 %v3639_v30  ;;  %2088 = vmatprep.mubr.f32.mxu0 %v5304_v61  ;;  %v3637_v26 = vld [vmem:[%s7316_s1 + $0xbb0] sm:$0xff] }
 0x108   : > { %2193 = vmatprep.mubr.f32.mxu1 %v6316_v53  ;;  %4369 = vmatpush3.msra.mxu0 %v3591_v49  ;;  %v3589_v49 = vld [vmem:[%s7316_s1 + $0xa30] sm:$0xff] }
 0x109   : > { %4425 = vmatpush3.msra.mxu1 %v3623_v47  ;;  %2089 = vmatmul.mubr.f32.gmra.mxu0 %v5317_v4  ;;  %v6342_v24 = vpop.f32.mrf.mxu0  ;;  %v3621_v47 = vld [vmem:[%s7316_s1 + $0xb30] sm:$0xff] }
 0x10a   : > { %2194 = vmatmul.mubr.f32.gmra.mxu1 %v6333_v14  ;;  %v6344_v30 = vpop.f32.mrf.mxu1  ;;  %4370 = vmatprep.subr.mxu0 %v3606_v54  ;;  %v6358_v54 = vld [vmem:[%s4984_s6 + $0xa8] sm:$0xff] }
 0x10b   : > { %4426 = vmatprep.subr.mxu1 %v3638_v40  ;;  %4371 = vmatpush3.msra.mxu0 %v3590_v63  ;;  %v6352_v29 = vpop.f32.mrf.mxu0  ;;  %v3604_v40 = vld [vmem:[%s7316_s1 + $0xaa8] sm:$0xff] }
 0x10c   : > { %4427 = vmatpush3.msra.mxu1 %v3622_v0  ;;  %v6354_v31 = vpop.f32.mrf.mxu1  ;;  %4372 = vmatprep.subr.mxu0 %v3605_v19  ;;  %v3636_v63 = vld [vmem:[%s7316_s1 + $0xba8] sm:$0xff] }
 0x10d   : > { %4428 = vmatprep.subr.mxu1 %v3637_v26  ;;  %2093 = vmatprep.mubr.f32.mxu0 %v5345_v18  ;;  %v3588_v0 = vld [vmem:[%s7316_s1 + $0xa28] sm:$0xff]  ;;  %v6375_v26 = vld [vmem:[%s4984_s6 + $0xa0] sm:$0xff] }
 0x10e   : > { %2198 = vmatprep.mubr.f32.mxu1 %v6358_v54  ;;  %4373 = vmatpush3.msra.mxu0 %v3589_v49  ;;  %v3620_v19 = vld [vmem:[%s7316_s1 + $0xb28] sm:$0xff]  ;;  %v3603_v49 = vld [vmem:[%s7316_s1 + $0xaa0] sm:$0xff] }
 0x10f   : > { %4429 = vmatpush3.msra.mxu1 %v3621_v47  ;;  %2094 = vmatmul.mubr.f32.gmra.mxu0 %v5354_v25  ;;  %v3635_v47 = vld [vmem:[%s7316_s1 + $0xba0] sm:$0xff]  ;;  %v6384_v21 = vpop.f32.mrf.mxu0 }
 0x110   : > { %2199 = vmatmul.mubr.f32.gmra.mxu1 %v6375_v26  ;;  %v6386_v8 = vpop.f32.mrf.mxu1  ;;  %4374 = vmatprep.subr.mxu0 %v3604_v40  ;;  %v6400_v40 = vld [vmem:[%s4984_s6 + $0xc8] sm:$0xff] }
 0x111   : > { %4430 = vmatprep.subr.mxu1 %v3636_v63  ;;  %4375 = vmatpush3.msra.mxu0 %v3588_v0  ;;  %v6394_v6 = vpop.f32.mrf.mxu0  ;;  %v3602_v63 = vld [vmem:[%s7316_s1 + $0xa98] sm:$0xff] }
 0x112   : > { %4431 = vmatpush3.msra.mxu1 %v3620_v19  ;;  %v6396_v58 = vpop.f32.mrf.mxu1  ;;  %4376 = vmatprep.subr.mxu0 %v3603_v49  ;;  %v3634_v0 = vld [vmem:[%s7316_s1 + $0xb98] sm:$0xff] }
 0x113   : > { %4432 = vmatprep.subr.mxu1 %v3635_v47  ;;  %2098 = vmatprep.mubr.f32.mxu0 %v5559_v2  ;;  %v3586_v19 = vld [vmem:[%s7316_s1 + $0xa18] sm:$0xff]  ;;  %v6417_v47 = vld [vmem:[%s4984_s6 + $0xc0] sm:$0xff] }
 0x114   : > { %2203 = vmatprep.mubr.f32.mxu1 %v6400_v40  ;;  %4377 = vmatpush3.msra.mxu0 %v3587_v22  ;;  %v3618_v49 = vld [vmem:[%s7316_s1 + $0xb18] sm:$0xff]  ;;  %v3601_v22 = vld [vmem:[%s7316_s1 + $0xa90] sm:$0xff] }
 0x115   : > { %4433 = vmatpush3.msra.mxu1 %v3619_v13  ;;  %2099 = vmatmul.mubr.f32.gmra.mxu0 %v5570_v9  ;;  %v3633_v13 = vld [vmem:[%s7316_s1 + $0xb90] sm:$0xff]  ;;  %v6426_v5 = vpop.f32.mrf.mxu0 }
 0x116   : > { %2204 = vmatmul.mubr.f32.gmra.mxu1 %v6417_v47  ;;  %v6428_v28 = vpop.f32.mrf.mxu1  ;;  %4378 = vmatprep.subr.mxu0 %v3602_v63  ;;  %v1848_v63 = vlaneseq }
 0x117   : > { %7376 = vst [vmem:[#allocation24_spill] sm:$0xff] %v6428_v28  ;;  %4434 = vmatprep.subr.mxu1 %v3634_v0  ;;  %4379 = vmatpush3.msra.mxu0 %v3586_v19  ;;  %v6436_v1 = vpop.f32.mrf.mxu0  ;;  %v6443_v0 = vld [vmem:[%s4984_s6 + $0xd8] sm:$0xff]  ;;  %v3600_v19 = vld [vmem:[%s7316_s1 + $0xa88] sm:$0xff] }
 0x118   : > { %4435 = vmatpush3.msra.mxu1 %v3618_v49  ;;  %v6438_v56 = vpop.f32.mrf.mxu1  ;;  %4380 = vmatprep.subr.mxu0 %v3601_v22  ;;  %v3632_v49 = vld [vmem:[%s7316_s1 + $0xb88] sm:$0xff]  ;;  %v1849_v41 = vshrl.u32 %v1848_v63, 7  ;;  %v3710_v63 = vld [vmem:[%s7316_s1 + $0xdf8] sm:$0xff] }
 0x119   : > { %7377 = vst [vmem:[#allocation25_spill] sm:$0xff] %v6438_v56  ;;  %4436 = vmatprep.subr.mxu1 %v3633_v13  ;;  %2103 = vmatprep.mubr.f32.mxu0 %v5594_v27  ;;  %v3584_v22 = vld [vmem:[%s7316_s1 + $0xa08] sm:$0xff] }
 0x11a   : > { %2208 = vmatprep.mubr.f32.mxu1 %v6443_v0  ;;  %4381 = vmatpush3.msra.mxu0 %v3585_v17  ;;  %v3616_v13 = vld [vmem:[%s7316_s1 + $0xb08] sm:$0xff]  ;;  %v3631_v17 = vld [vmem:[%s7316_s1 + $0xb80] sm:$0xff] }
 0x11b   : > { %4437 = vmatpush3.msra.mxu1 %v3617_v11  ;;  %2104 = vmatmul.mubr.f32.gmra.mxu0 %v5604_v62  ;;  %v3599_v11 = vld [vmem:[%s7316_s1 + $0xa80] sm:$0xff]  ;;  %v6475_v52 = vpop.f32.mrf.mxu0 }
 0x11c   : > { %2209 = vmatmul.mubr.f32.gmra.mxu1 %v6466_v60  ;;  %v6477_v46 = vpop.f32.mrf.mxu1  ;;  %4382 = vmatprep.subr.mxu0 %v3600_v19  ;;  %v1854_v19 = vsub.s32 1, %v1849_v41 }
 0x11d   : > { %7379 = vst [vmem:[#allocation26_spill] sm:$0xff] %v6477_v46  ;;  %4438 = vmatprep.subr.mxu1 %v3632_v49  ;;  %4383 = vmatpush3.msra.mxu0 %v3584_v22  ;;  %v6485_v56 = vpop.f32.mrf.mxu0  ;;  %v3678_v49 = vld [vmem:[%s7316_s1 + $0xcf8] sm:$0xff]  ;;  %v612_v22 = vld [vmem:[%s7317_s2] sm:$0x3] }
 0x11e   : > { %4439 = vmatpush3.msra.mxu1 %v3616_v13  ;;  %v6487_v28 = vpop.f32.mrf.mxu1  ;;  %4384 = vmatprep.subr.mxu0 %v3599_v11  ;;  %v3828_v13 = vadd.f32 %v6190_v7, %v6180_v3  ;;  %v3884_v11 = vadd.f32 %v6192_v10, %v6182_v16  ;;  %v1850_v3 = vsub.s32 0, %v1849_v41  ;;  %v3693_v16 = vld [vmem:[%s7316_s1 + $0xd70] sm:$0xff]  ;;  %v3708_v41 = vld [vmem:[%s7316_s1 + $0xde8] sm:$0xff] }
 0x11f   : > { %7380 = vst [vmem:[#allocation27_spill] sm:$0xff] %v6487_v28  ;;  %4440 = vmatprep.subr.mxu1 %v3631_v17  ;;  %4385 = vmatpush3.msra.mxu0 %v3583_v39  ;;  %v3694_v39 = vld [vmem:[%s7316_s1 + $0xd78] sm:$0xff]  ;;  %v6516_v17 = vrot.slane %v612_v22, %v1854_v19  ;;  %v3661_v7 = vld [vmem:[%s7316_s1 + $0xc70] sm:$0xff] }
 0x120   : > { %2328 = vmatprep.mubr.f32.mxu0 %v6232_v48  ;;  %4441 = vmatpush3.msra.mxu1 %v3615_v34  ;;  %v3662_v48 = vld [vmem:[%s7316_s1 + $0xc78] sm:$0xff]  ;;  %v3709_v34 = vld [vmem:[%s7316_s1 + $0xdf0] sm:$0xff]  ;;  %v882_v19 = vadd.f32 %v3884_v11, %v3828_v13  ;;  %v6554_v11 = vrot.slane %v612_v22, %v1850_v3  ;;  %v3659_v22 = vld [vmem:[%s7316_s1 + $0xc60] sm:$0xff] }
 0x121   : > { %2491 = vmatprep.mubr.f32.mxu1 %v5218_v15  ;;  %2329 = vmatmul.mubr.f32.vlgmr.msra.gmra.mxu0 %v6249_v57  ;;  %v3677_v15 = vld [vmem:[%s7316_s1 + $0xcf0] sm:$0xff]  ;;  %v3938_v28 = vpop.f32.mrf.mxu0 }
 0x122   : > { %2492 = vmatmul.mubr.f32.vlgmr.msra.gmra.mxu1 %v5231_v20  ;;  %v3994_v46 = vpop.f32.mrf.mxu1  ;;  %4466 = vmatprep.subr.mxu0 %v3710_v63  ;;  %7381 = vst [vmem:[#allocation28_spill] sm:$0xff] %v6554_v11 }
 0x123   : > { %4522 = vmatprep.subr.mxu1 %v3678_v49  ;;  %4467 = vmatpush3.msra.mxu0 %v3694_v39  ;;  %v3939_v10 = vpop.f32.mrf.mxu0  ;;  %v3676_v49 = vld [vmem:[%s7316_s1 + $0xce8] sm:$0xff]  ;;  %v3831_v39 = vadd.f32 %v6226_v44, %v6216_v32  ;;  %v3707_v32 = vld [vmem:[%s7316_s1 + $0xde0] sm:$0xff] }
 0x124   : > { %4523 = vmatpush3.msra.mxu1 %v3662_v48  ;;  %v3995_v57 = vpop.f32.mrf.mxu1  ;;  %4468 = vmatprep.subr.mxu0 %v3709_v34  ;;  %v3940_v63 = vadd.f32 %v3939_v10, %v3938_v28  ;;  %v3692_v28 = vld [vmem:[%s7316_s1 + $0xd68] sm:$0xff] }
 0x125   : > { %4524 = vmatprep.subr.mxu1 %v3677_v15  ;;  %2333 = vmatprep.mubr.f32.mxu0 %v6274_v12  ;;  %v3887_v15 = vadd.f32 %v6228_v42, %v6218_v33  ;;  %v3660_v12 = vld [vmem:[%s7316_s1 + $0xc68] sm:$0xff]  ;;  %v3996_v13 = vadd.f32 %v3995_v57, %v3994_v46  ;;  %v3675_v33 = vld [vmem:[%s7316_s1 + $0xce0] sm:$0xff]  ;;  %v3706_v57 = vld [vmem:[%s7316_s1 + $0xdd8] sm:$0xff] }
 0x126   : > { %2496 = vmatprep.mubr.f32.mxu1 %v5263_v36  ;;  %4469 = vmatpush3.msra.mxu0 %v3693_v16  ;;  %v1075_v48 = vadd.f32 %v3940_v63, %v882_v19  ;;  %v3674_v19 = vld [vmem:[%s7316_s1 + $0xcd8] sm:$0xff]  ;;  %v3834_v63 = vadd.f32 %v6268_v59, %v6258_v55 }
 0x127   : > { %4525 = vmatpush3.msra.mxu1 %v3661_v7  ;;  %2334 = vmatmul.mubr.f32.gmra.mxu0 %v6291_v23  ;;  %v3941_v44 = vpop.f32.mrf.mxu0  ;;  %v3691_v23 = vld [vmem:[%s7316_s1 + $0xd60] sm:$0xff]  ;;  %v887_v16 = vadd.f32 %v3887_v15, %v3831_v39  ;;  %v3705_v15 = vld [vmem:[%s7316_s1 + $0xdd0] sm:$0xff] }
 0x128   : > { %2497 = vmatmul.mubr.f32.gmra.mxu1 %v5276_v43  ;;  %v3997_v42 = vpop.f32.mrf.mxu1  ;;  %4470 = vmatprep.subr.mxu0 %v3708_v41  ;;  %v1238_v46 = vadd.f32 %v3996_v13, %v1075_v48  ;;  %v3658_v41 = vld [vmem:[%s7316_s1 + $0xc58] sm:$0xff] }
 0x129   : > { %4526 = vmatprep.subr.mxu1 %v3676_v49  ;;  %4471 = vmatpush3.msra.mxu0 %v3692_v28  ;;  %v3942_v34 = vpop.f32.mrf.mxu0  ;;  %v3890_v49 = vadd.f32 %v6270_v45, %v6260_v38  ;;  %v3673_v28 = vld [vmem:[%s7316_s1 + $0xcd0] sm:$0xff] }
 0x12a   : > { %4527 = vmatpush3.msra.mxu1 %v3660_v12  ;;  %v3998_v3 = vpop.f32.mrf.mxu1  ;;  %4472 = vmatprep.subr.mxu0 %v3707_v32  ;;  %v1858_v7 = vadd.f32 %v6554_v11, %v1238_v46  ;;  %v3943_v10 = vadd.f32 %v3942_v34, %v3941_v44  ;;  %v3689_v45 = vld [vmem:[%s7316_s1 + $0xd50] sm:$0xff]  ;;  %v3704_v46 = vld [vmem:[%s7316_s1 + $0xdc8] sm:$0xff] }
 0x12b   : > { %4528 = vmatprep.subr.mxu1 %v3675_v33  ;;  %2338 = vmatprep.mubr.f32.mxu0 %v6316_v53  ;;  %v3690_v53 = vld [vmem:[%s7316_s1 + $0xd58] sm:$0xff]  ;;  %v3999_v39 = vadd.f32 %v3998_v3, %v3997_v42  ;;  %v892_v33 = vadd.f32 %v3890_v49, %v3834_v63  ;;  %v3656_v34 = vld [vmem:[%s7316_s1 + $0xc48] sm:$0xff]  ;;  %v3893_v3 = vadd.f32 %v6312_v50, %v6302_v51  ;;  %v3687_v50 = vld [vmem:[%s7316_s1 + $0xd40] sm:$0xff] }
 0x12c   : > { %2501 = vmatprep.mubr.f32.mxu1 %v5304_v61  ;;  %4473 = vmatpush3.msra.mxu0 %v3691_v23  ;;  %v1874_v55 = vmax.f32 %v1858_v7, 0.0  ;;  %v1076_v59 = vadd.f32 %v3943_v10, %v887_v16  ;;  %v3672_v23 = vld [vmem:[%s7316_s1 + $0xcc8] sm:$0xff] }
 0x12d   : > { %4529 = vmatpush3.msra.mxu1 %v3659_v22  ;;  %2339 = vmatmul.mubr.f32.gmra.mxu0 %v6333_v14  ;;  %v3944_v12 = vpop.f32.mrf.mxu0  ;;  %v3657_v14 = vld [vmem:[%s7316_s1 + $0xc50] sm:$0xff]  ;;  %v3837_v22 = vadd.f32 %v6310_v35, %v6300_v37  ;;  %v3703_v37 = vld [vmem:[%s7316_s1 + $0xdc0] sm:$0xff] }
 0x12e   : > { %2502 = vmatmul.mubr.f32.gmra.mxu1 %v5317_v4  ;;  %v4000_v48 = vpop.f32.mrf.mxu1  ;;  %4474 = vmatprep.subr.mxu0 %v3706_v57  ;;  %1890 = vst [vmem:[%s6585_s8] sm:$0xff] %v1874_v55  ;;  %v1239_v38 = vadd.f32 %v3999_v39, %v1076_v59  ;;  %v3671_v35 = vld [vmem:[%s7316_s1 + $0xcc0] sm:$0xff]  ;;  %v3702_v59 = vld [vmem:[%s7316_s1 + $0xdb8] sm:$0xff] }
 0x12f   : > { %4530 = vmatprep.subr.mxu1 %v3674_v19  ;;  %4475 = vmatpush3.msra.mxu0 %v3690_v53  ;;  %v3945_v13 = vpop.f32.mrf.mxu0  ;;  %v3670_v39 = vld [vmem:[%s7316_s1 + $0xcb8] sm:$0xff] }
 0x130   : > { %4531 = vmatpush3.msra.mxu1 %v3658_v41  ;;  %v4001_v32 = vpop.f32.mrf.mxu1  ;;  %4476 = vmatprep.subr.mxu0 %v3705_v15  ;;  %v1860_v44 = vadd.f32 %v6554_v11, %v1239_v38  ;;  %v3946_v42 = vadd.f32 %v3945_v13, %v3944_v12  ;;  %v897_v41 = vadd.f32 %v3893_v3, %v3837_v22  ;;  %v279_v12 = vld [vmem:[%s4984_s6 + $0xf8] sm:$0xfe]  ;;  %v6673_v13 = vld [vmem:[%s4984_s6 + $0x108] sm:$0xff] }
 0x131   : > { %4532 = vmatprep.subr.mxu1 %v3673_v28  ;;  %2343 = vmatprep.mubr.f32.mxu0 %v6358_v54  ;;  %v3688_v54 = vld [vmem:[%s7316_s1 + $0xd48] sm:$0xff]  ;;  %v4002_v10 = vadd.f32 %v4001_v32, %v4000_v48  ;;  %v3840_v15 = vadd.f32 %v6352_v29, %v6342_v24  ;;  %v3654_v28 = vld [vmem:[%s7316_s1 + $0xc38] sm:$0xff]  ;;  %v3896_v48 = vadd.f32 %v6354_v31, %v6344_v30  ;;  %v3701_v24 = vld [vmem:[%s7316_s1 + $0xdb0] sm:$0xff] }
 0x132   : > { %2506 = vmatprep.mubr.f32.mxu1 %v5345_v18  ;;  %4477 = vmatpush3.msra.mxu0 %v3689_v45  ;;  %v1876_v16 = vmax.f32 %v1860_v44, 0.0  ;;  %v1077_v7 = vadd.f32 %v3946_v42, %v892_v33  ;;  %v278_v31 = vld [vmem:[%s4984_s6 + $0xf0] sm:$0xfe]  ;;  %v6677_v30 = vld [vmem:[%s4984_s6 + $0x100] sm:$0xff] }
 0x133   : > { %4533 = vmatpush3.msra.mxu1 %v3657_v14  ;;  %2344 = vmatmul.mubr.f32.gmra.mxu0 %v6375_v26  ;;  %v3947_v57 = vpop.f32.mrf.mxu0  ;;  %v3655_v26 = vld [vmem:[%s7316_s1 + $0xc40] sm:$0xff]  ;;  %v3669_v14 = vld [vmem:[%s7316_s1 + $0xcb0] sm:$0xff] }
 0x134   : > { %2507 = vmatmul.mubr.f32.gmra.mxu1 %v5354_v25  ;;  %v4003_v19 = vpop.f32.mrf.mxu1  ;;  %4478 = vmatprep.subr.mxu0 %v3704_v46  ;;  %1892 = vst [vmem:[%s6585_s8 + $0x10] sm:$0xff] %v1876_v16  ;;  %v1240_v51 = vadd.f32 %v4002_v10, %v1077_v7  ;;  %v3685_v44 = vld [vmem:[%s7316_s1 + $0xd30] sm:$0xff]  ;;  %v374_v46 = vrot.slane %v279_v12, 1  ;;  %v3700_v7 = vld [vmem:[%s7316_s1 + $0xda8] sm:$0xff] }
 0x135   : > { %4534 = vmatprep.subr.mxu1 %v3672_v23  ;;  %4479 = vmatpush3.msra.mxu0 %v3688_v54  ;;  %v3948_v63 = vpop.f32.mrf.mxu0  ;;  %v3653_v42 = vld [vmem:[%s7316_s1 + $0xc30] sm:$0xff]  ;;  %v375_v54 = vrot.slane %v6673_v13, 1  ;;  %v3668_v10 = vld [vmem:[%s7316_s1 + $0xca8] sm:$0xff] }
 0x136   : > { %4535 = vmatpush3.msra.mxu1 %v3656_v34  ;;  %v4004_v53 = vpop.f32.mrf.mxu1  ;;  %4480 = vmatprep.subr.mxu0 %v3703_v37  ;;  %v1862_v49 = vadd.f32 %v6554_v11, %v1240_v51  ;;  %v3949_v55 = vadd.f32 %v3948_v63, %v3947_v57  ;;  %v902_v34 = vadd.f32 %v3896_v48, %v3840_v15  ;;  %v371_v37 = vrot.slane %v278_v31, 1  ;;  %v220_v12 = vld [vmem:[%s4984_s6 + $0xf0] sm:$0xff]  ;;  %v3682_v31 = vld [vmem:[%s7316_s1 + $0xd18] sm:$0xff] }
 0x137   : > { %4536 = vmatprep.subr.mxu1 %v3671_v35  ;;  %2348 = vmatprep.mubr.f32.mxu0 %v6400_v40  ;;  %v3686_v40 = vld [vmem:[%s7316_s1 + $0xd38] sm:$0xff]  ;;  %v4005_v29 = vadd.f32 %v4004_v53, %v4003_v19  ;;  %v372_v35 = vrot.slane %v6677_v30, 1  ;;  %v3843_v57 = vadd.f32 %v6394_v6, %v6384_v21  ;;  %v3652_v19 = vld [vmem:[%s7316_s1 + $0xc28] sm:$0xff]  ;;  %v3899_v51 = vadd.f32 %v6396_v58, %v6386_v8  ;;  %v3699_v6 = vld [vmem:[%s7316_s1 + $0xda0] sm:$0xff] }
 0x138   : > { %2511 = vmatprep.mubr.f32.mxu1 %v5559_v2  ;;  %4481 = vmatpush3.msra.mxu0 %v3687_v50  ;;  %v1878_v38 = vmax.f32 %v1862_v49, 0.0  ;;  %v1078_v45 = vadd.f32 %v3949_v55, %v897_v41  ;;  %v3667_v21 = vld [vmem:[%s7316_s1 + $0xca0] sm:$0xff]  ;;  %v283_v53 = vld [vmem:[%s4984_s6 + $0x118] sm:$0x1]  ;;  %v282_v8 = vld [vmem:[%s4984_s6 + $0x110] sm:$0x1] }
 0x139   : > { %4537 = vmatpush3.msra.mxu1 %v3655_v26  ;;  %2349 = vmatmul.mubr.f32.gmra.mxu0 %v6417_v47  ;;  %v3950_v32 = vpop.f32.mrf.mxu0  ;;  %v221_v58 = vld [vmem:[%s4984_s6 + $0xf8] sm:$0xff]  ;;  %v6733_v15 = vsel %vm320_vm0, %v371_v37, %v372_v35  ;;  %v379_v48 = vrot.slane %v283_v53, 1  ;;  %v3681_v37 = vld [vmem:[%s7316_s1 + $0xd10] sm:$0xff]  ;;  %v3648_v53 = vld [vmem:[%s7316_s1 + $0xc08] sm:$0xff] }
 0x13a   : > { %2512 = vmatmul.mubr.f32.gmra.mxu1 %v5570_v9  ;;  %v4006_v33 = vpop.f32.mrf.mxu1  ;;  %4482 = vmatprep.subr.mxu0 %v3702_v59  ;;  %1894 = vst [vmem:[%s6585_s8 + $0x40] sm:$0xff] %v1878_v38  ;;  %v1241_v47 = vadd.f32 %v4005_v29, %v1078_v45  ;;  %v3683_v59 = vld [vmem:[%s7316_s1 + $0xd20] sm:$0xff]  ;;  %v907_v38 = vadd.f32 %v3899_v51, %v3843_v57  ;;  %v3649_v57 = vld [vmem:[%s7316_s1 + $0xc10] sm:$0xff] }
 0x13b   : > { %4538 = vmatprep.subr.mxu1 %v3670_v39  ;;  %4483 = vmatpush3.msra.mxu0 %v3686_v40  ;;  %v3951_v23 = vpop.f32.mrf.mxu0  ;;  %v3651_v39 = vld [vmem:[%s7316_s1 + $0xc20] sm:$0xff] }
 0x13c   : > { %4539 = vmatpush3.msra.mxu1 %v3654_v28  ;;  %v4007_v22 = vpop.f32.mrf.mxu1  ;;  %4484 = vmatprep.subr.mxu0 %v3701_v24  ;;  %v1864_v3 = vadd.f32 %v6554_v11, %v1241_v47  ;;  %v3952_v16 = vadd.f32 %v3951_v23, %v3950_v32  ;;  %v3698_v24 = vld [vmem:[%s7316_s1 + $0xd98] sm:$0xff]  ;;  %v377_v32 = vrot.slane %v282_v8, 1 }
 0x13d   : > { %4540 = vmatprep.subr.mxu1 %v3669_v14  ;;  %2353 = vmatprep.mubr.f32.mxu0 %v6443_v0  ;;  %v3684_v0 = vld [vmem:[%s7316_s1 + $0xd28] sm:$0xff]  ;;  %v4008_v63 = vadd.f32 %v4007_v22, %v4006_v33  ;;  %v3666_v14 = vld [vmem:[%s7316_s1 + $0xc98] sm:$0xff]  ;;  %v3846_v33 = vadd.f32 %v6436_v1, %v6426_v5  ;;  %v3697_v1 = vld [vmem:[%s7316_s1 + $0xd90] sm:$0xff] }
 0x13e   : > { %2516 = vmatprep.mubr.f32.mxu1 %v5594_v27  ;;  %4485 = vmatpush3.msra.mxu0 %v3685_v44  ;;  %v1880_v50 = vmax.f32 %v1864_v3, 0.0  ;;  %v1079_v26 = vadd.f32 %v3952_v16, %v902_v34  ;;  %v3650_v47 = vld [vmem:[%s7316_s1 + $0xc18] sm:$0xff]  ;;  %v7382_v44 = vld [vmem:[#allocation24_spill] sm:$0xff]  ;;  %v3665_v5 = vld [vmem:[%s7316_s1 + $0xc90] sm:$0xff] }
 0x13f   : > { %4541 = vmatpush3.msra.mxu1 %v3653_v42  ;;  %2354 = vmatmul.mubr.f32.gmra.mxu0 %v6466_v60  ;;  %v3953_v41 = vpop.f32.mrf.mxu0  ;;  %v6720_v60 = vsel %vm320_vm0, %v374_v46, %v375_v54  ;;  %v7383_v42 = vld [vmem:[#allocation25_spill] sm:$0xff] }
 0x140   : > { %2517 = vmatmul.mubr.f32.gmra.mxu1 %v5604_v62  ;;  %v4009_v49 = vpop.f32.mrf.mxu1  ;;  %4486 = vmatprep.subr.mxu0 %v3700_v7  ;;  %1896 = vst [vmem:[%s6585_s8 + $0x50] sm:$0xff] %v1880_v50  ;;  %v1242_v55 = vadd.f32 %v4008_v63, %v1079_v26  ;;  %v3902_v46 = vadd.f32 %v7383_v42, %v7382_v44  ;;  %v3696_v63 = vld [vmem:[%s7316_s1 + $0xd88] sm:$0xff]  ;;  %v3726_v44 = vld [vmem:[%s7316_s1 + $0xe78] sm:$0xff] }
 0x141   : > { %4542 = vmatprep.subr.mxu1 %v3668_v10  ;;  %4487 = vmatpush3.msra.mxu0 %v3684_v0  ;;  %v3954_v40 = vpop.f32.mrf.mxu0  ;;  %v6764_v7 = vsel %vm320_vm0, %v375_v54, %v379_v48  ;;  %v6776_v0 = vsel %vm320_vm0, %v372_v35, %v377_v32  ;;  %v3664_v35 = vld [vmem:[%s7316_s1 + $0xc88] sm:$0xff]  ;;  %v3647_v48 = vld [vmem:[%s7316_s1 + $0xc00] sm:$0xff]  ;;  %v3758_v42 = vld [vmem:[%s7316_s1 + $0xf78] sm:$0xff] }
 0x142   : > { %4543 = vmatpush3.msra.mxu1 %v3652_v19  ;;  %v4010_v28 = vpop.f32.mrf.mxu1  ;;  %4488 = vmatprep.subr.mxu0 %v3699_v6  ;;  %v1866_v45 = vadd.f32 %v6554_v11, %v1242_v55  ;;  %v3955_v29 = vadd.f32 %v3954_v40, %v3953_v41  ;;  %v912_v51 = vadd.f32 %v3902_v46, %v3846_v33  ;;  %v7384_v41 = vld [vmem:[#allocation26_spill] sm:$0xff]  ;;  %v7386_v32 = vld [vmem:[#allocation8_spill] sm:$0xff] }
 0x143   : > { %4544 = vmatprep.subr.mxu1 %v3667_v21  ;;  %2358 = vmatprep.mubr.f32.mxu0 %v221_v58  ;;  %v4011_v34 = vadd.f32 %v4010_v28, %v4009_v49  ;;  %v3849_v6 = vadd.f32 %v6485_v56, %v6475_v52  ;;  %v3680_v21 = vld [vmem:[%s7316_s1 + $0xd08] sm:$0xff]  ;;  %v7385_v49 = vld [vmem:[#allocation27_spill] sm:$0xff]  ;;  %v3742_v33 = vld [vmem:[%s7316_s1 + $0xef8] sm:$0xff] }
 0x144   : > { %2521 = vmatprep.mubr.f32.mxu1 %v6720_v60  ;;  %4489 = vmatpush3.msra.mxu0 %v3683_v59  ;;  %v1882_v23 = vmax.f32 %v1866_v45, 0.0  ;;  %v1080_v22 = vadd.f32 %v3955_v29, %v907_v38  ;;  %v3905_v58 = vadd.f32 %v7385_v49, %v7384_v41  ;;  %v3695_v52 = vld [vmem:[%s7316_s1 + $0xd80] sm:$0xff] }
 0x145   : > { %4545 = vmatpush3.msra.mxu1 %v3651_v39  ;;  %2359 = vmatmul.mubr.f32.gmra.mxu0 %v220_v12  ;;  %v3956_v3 = vpop.f32.mrf.mxu0  ;;  %v3663_v56 = vld [vmem:[%s7316_s1 + $0xc80] sm:$0xff] }
 0x146   : > { %2522 = vmatmul.mubr.f32.gmra.mxu1 %v6733_v15  ;;  %v4012_v16 = vpop.f32.mrf.mxu1  ;;  %4490 = vmatprep.subr.mxu0 %v3698_v24  ;;  %1898 = vst [vmem:[%s6585_s8 + $0x80] sm:$0xff] %v1882_v23  ;;  %v1243_v10 = vadd.f32 %v4011_v34, %v1080_v22  ;;  %v3679_v28 = vld [vmem:[%s7316_s1 + $0xd00] sm:$0xff]  ;;  %v917_v29 = vadd.f32 %v3905_v58, %v3849_v6  ;;  %v7388_v34 = vld [vmem:[#allocation9_spill] sm:$0xff]  ;;  %v3724_v6 = vld [vmem:[%s7316_s1 + $0xe68] sm:$0xff] }
 0x147   : > { %4546 = vmatprep.subr.mxu1 %v3666_v14  ;;  %4491 = vmatpush3.msra.mxu0 %v3682_v31  ;;  %v3957_v19 = vpop.f32.mrf.mxu0  ;;  %v3774_v31 = vld [vmem:[%s7316_s1 + $0xff8] sm:$0xff]  ;;  %v3739_v41 = vld [vmem:[%s7316_s1 + $0xee0] sm:$0xff] }
 0x148   : > { %4547 = vmatpush3.msra.mxu1 %v3650_v47  ;;  %v4013_v54 = vpop.f32.mrf.mxu1  ;;  %4492 = vmatprep.subr.mxu0 %v3697_v1  ;;  %v1868_v50 = vadd.f32 %v6554_v11, %v1243_v10  ;;  %v3958_v26 = vadd.f32 %v3957_v19, %v3956_v3  ;;  %v7387_v47 = vld [vmem:[#allocation3_spill] sm:$0xff]  ;;  %v7389_v1 = vld [vmem:[#allocation4_spill] sm:$0xff]  ;;  %v3725_v10 = vld [vmem:[%s7316_s1 + $0xe70] sm:$0xff] }
 0x149   : > { %4548 = vmatprep.subr.mxu1 %v3665_v5  ;;  %2363 = vmatprep.mubr.f32.mxu0 %v6673_v13  ;;  %v4014_v59 = vadd.f32 %v4013_v54, %v4012_v16  ;;  %v3741_v5 = vld [vmem:[%s7316_s1 + $0xef0] sm:$0xff]  ;;  %v7393_v58 = vld [vmem:[#allocation6_spill] sm:$0xff] }
 0x14a   : > { %2526 = vmatprep.mubr.f32.mxu1 %v6764_v7  ;;  %4493 = vmatpush3.msra.mxu0 %v3681_v37  ;;  %v1884_v8 = vmax.f32 %v1868_v50, 0.0  ;;  %v1081_v55 = vadd.f32 %v3958_v26, %v912_v51  ;;  %v7390_v51 = vld [vmem:[#allocation10_spill] sm:$0xff]  ;;  %v3740_v50 = vld [vmem:[%s7316_s1 + $0xee8] sm:$0xff] }
 0x14b   : > { %4549 = vmatpush3.msra.mxu1 %v3649_v57  ;;  %2364 = vmatmul.mubr.f32.gmra.mxu0 %v6677_v30  ;;  %v3959_v39 = vpop.f32.mrf.mxu0  ;;  %v3773_v57 = vld [vmem:[%s7316_s1 + $0xff0] sm:$0xff] }
 0x14c   : > { %2527 = vmatmul.mubr.f32.gmra.mxu1 %v6776_v0  ;;  %v4015_v40 = vpop.f32.mrf.mxu1  ;;  %4494 = vmatprep.subr.mxu0 %v3696_v63  ;;  %1900 = vst [vmem:[%s6585_s8 + $0x90] sm:$0xff] %v1884_v8  ;;  %v1244_v12 = vadd.f32 %v4014_v59, %v1081_v55  ;;  %v7391_v63 = vld [vmem:[#allocation5_spill] sm:$0xff]  ;;  %v3756_v8 = vld [vmem:[%s7316_s1 + $0xf68] sm:$0xff] }
 0x14d   : > { %4550 = vmatprep.subr.mxu1 %v3664_v35  ;;  %4495 = vmatpush3.msra.mxu0 %v3680_v21  ;;  %v3960_v38 = vpop.f32.mrf.mxu0  ;;  %v3757_v35 = vld [vmem:[%s7316_s1 + $0xf70] sm:$0xff]  ;;  %v7392_v21 = vld [vmem:[#allocation11_spill] sm:$0xff] }
 0x14e   : > { %4551 = vmatpush3.msra.mxu1 %v3648_v53  ;;  %v4016_v45 = vpop.f32.mrf.mxu1  ;;  %4496 = vmatprep.subr.mxu0 %v3695_v52  ;;  %v1870_v24 = vadd.f32 %v6554_v11, %v1244_v12  ;;  %v3961_v14 = vadd.f32 %v3960_v38, %v3959_v39  ;;  %v3772_v53 = vld [vmem:[%s7316_s1 + $0xfe8] sm:$0xff]  ;;  %v3723_v52 = vld [vmem:[%s7316_s1 + $0xe60] sm:$0xff]  ;;  %v3738_v12 = vld [vmem:[%s7316_s1 + $0xed8] sm:$0xff] }
 0x14f   : > { %4552 = vmatprep.subr.mxu1 %v3663_v56  ;;  %4497 = vmatpush3.msra.mxu0 %v3679_v28  ;;  %v4017_v22 = vadd.f32 %v4016_v45, %v4015_v40  ;;  %v3771_v56 = vld [vmem:[%s7316_s1 + $0xfe0] sm:$0xff]  ;;  %v7394_v28 = vld [vmem:[#allocation12_spill] sm:$0xff]  ;;  %v3722_v45 = vld [vmem:[%s7316_s1 + $0xe58] sm:$0xff] }
 0x150   : > { %2686 = vmatprep.mubr.f32.mxu0 %v7386_v32  ;;  %4553 = vmatpush3.msra.mxu1 %v3647_v48  ;;  %v1886_v46 = vmax.f32 %v1870_v24, 0.0  ;;  %v1082_v23 = vadd.f32 %v3961_v14, %v917_v29  ;;  %v7395_v48 = vld [vmem:[#allocation7_spill] sm:$0xff]  ;;  %v7396_v29 = vld [vmem:[#allocation13_spill] sm:$0xff]  ;;  %v3770_v24 = vld [vmem:[%s7316_s1 + $0xfd8] sm:$0xff] }
 0x151   : > { %2791 = vmatprep.mubr.f32.mxu1 %v7387_v47  ;;  %2687 = vmatmul.mubr.f32.vlgmr.msra.gmra.mxu0 %v7388_v34  ;;  %v6832_v3 = vpop.f32.mrf.mxu0  ;;  %v3755_v38 = vld [vmem:[%s7316_s1 + $0xf60] sm:$0xff]  ;;  %v3737_v14 = vld [vmem:[%s7316_s1 + $0xed0] sm:$0xff]  ;;  %v3754_v32 = vld [vmem:[%s7316_s1 + $0xf58] sm:$0xff] }
 0x152   : > { %2792 = vmatmul.mubr.f32.vlgmr.msra.gmra.mxu1 %v7389_v1  ;;  %v6834_v16 = vpop.f32.mrf.mxu1  ;;  %4578 = vmatprep.subr.mxu0 %v3742_v33  ;;  %1902 = vst [vmem:[%s6585_s8 + $0xc0] sm:$0xff] %v1886_v46  ;;  %v1245_v37 = vadd.f32 %v4017_v22, %v1082_v23  ;;  %v3721_v47 = vld [vmem:[%s7316_s1 + $0xe50] sm:$0xff]  ;;  %v7397_v23 = vld [vmem:[#allocation14_spill] sm:$0xff]  ;;  %v3736_v22 = vld [vmem:[%s7316_s1 + $0xec8] sm:$0xff] }
 0x153   : > { %4634 = vmatprep.subr.mxu1 %v3774_v31  ;;  %4579 = vmatpush3.msra.mxu0 %v3726_v44  ;;  %v6843_v19 = vpop.f32.mrf.mxu0  ;;  %v3769_v44 = vld [vmem:[%s7316_s1 + $0xfd0] sm:$0xff]  ;;  %v3720_v1 = vld [vmem:[%s7316_s1 + $0xe48] sm:$0xff] }
 0x154   : > { %4635 = vmatpush3.msra.mxu1 %v3758_v42  ;;  %v6845_v54 = vpop.f32.mrf.mxu1  ;;  %4580 = vmatprep.subr.mxu0 %v3741_v5  ;;  %v1872_v26 = vadd.f32 %v6554_v11, %v1245_v37  ;;  %v3753_v34 = vld [vmem:[%s7316_s1 + $0xf50] sm:$0xff]  ;;  %v7398_v5 = vld [vmem:[#allocation15_spill] sm:$0xff] }
 0x155   : > { %2691 = vmatprep.mubr.f32.mxu0 %v7390_v51  ;;  %2796 = vmatprep.mubr.f32.mxu1 %v7391_v63  ;;  %v3735_v37 = vld [vmem:[%s7316_s1 + $0xec0] sm:$0xff] }
 0x156   : > { %4581 = vmatpush3.msra.mxu0 %v3725_v10  ;;  %4636 = vmatprep.subr.mxu1 %v3773_v57  ;;  %v1888_v49 = vmax.f32 %v1872_v26, 0.0  ;;  %v3768_v10 = vld [vmem:[%s7316_s1 + $0xfc8] sm:$0xff]  ;;  %v3719_v26 = vld [vmem:[%s7316_s1 + $0xe40] sm:$0xff] }
 0x157   : > { %2692 = vmatmul.mubr.f32.gmra.mxu0 %v7392_v21  ;;  %2797 = vmatmul.mubr.f32.gmra.mxu1 %v7393_v58  ;;  %v6870_v55 = vpop.f32.mrf.mxu0  ;;  %v3752_v57 = vld [vmem:[%s7316_s1 + $0xf48] sm:$0xff]  ;;  %v3767_v63 = vld [vmem:[%s7316_s1 + $0xfc0] sm:$0xff]  ;;  %v7400_v58 = vld [vmem:[#allocation17_spill] sm:$0xff] }
 0x158   : > { %4582 = vmatprep.subr.mxu0 %v3740_v50  ;;  %v6872_v59 = vpop.f32.mrf.mxu1  ;;  %4637 = vmatpush3.msra.mxu1 %v3757_v35  ;;  %1904 = vst [vmem:[%s6585_s8 + $0xd0] sm:$0xff] %v1888_v49  ;;  %v7399_v21 = vld [vmem:[#allocation16_spill] sm:$0xff]  ;;  %v3718_v49 = vld [vmem:[%s7316_s1 + $0xe38] sm:$0xff] }
 0x159   : > { %4583 = vmatpush3.msra.mxu0 %v3724_v6  ;;  %4638 = vmatprep.subr.mxu1 %v3772_v53  ;;  %v6881_v39 = vpop.f32.mrf.mxu0  ;;  %v3734_v53 = vld [vmem:[%s7316_s1 + $0xeb8] sm:$0xff] }
 0x15a   : > { %4584 = vmatprep.subr.mxu0 %v3739_v41  ;;  %v6883_v40 = vpop.f32.mrf.mxu1  ;;  %4639 = vmatpush3.msra.mxu1 %v3756_v8  ;;  %v3751_v41 = vld [vmem:[%s7316_s1 + $0xf40] sm:$0xff]  ;;  %v3766_v8 = vld [vmem:[%s7316_s1 + $0xfb8] sm:$0xff] }
 0x15b   : > { %2696 = vmatprep.mubr.f32.mxu0 %v7394_v28  ;;  %2801 = vmatprep.mubr.f32.mxu1 %v7395_v48 }
 0x15c   : > { %4585 = vmatpush3.msra.mxu0 %v3723_v52  ;;  %4640 = vmatprep.subr.mxu1 %v3771_v56  ;;  %v3733_v52 = vld [vmem:[%s7316_s1 + $0xeb0] sm:$0xff]  ;;  %v3750_v56 = vld [vmem:[%s7316_s1 + $0xf38] sm:$0xff] }
 0x15d   : > { %2697 = vmatmul.mubr.f32.gmra.mxu0 %v7396_v29  ;;  %2802 = vmatmul.mubr.f32.gmra.mxu1 %v5231_v20  ;;  %v6907_v33 = vpop.f32.mrf.mxu0 }
 0x15e   : > { %4586 = vmatprep.subr.mxu0 %v3738_v12  ;;  %v6909_v31 = vpop.f32.mrf.mxu1  ;;  %4641 = vmatpush3.msra.mxu1 %v3755_v38 }
 0x15f   : > { %4587 = vmatpush3.msra.mxu0 %v3722_v45  ;;  %4642 = vmatprep.subr.mxu1 %v3770_v24  ;;  %v6917_v42 = vpop.f32.mrf.mxu0  ;;  %v3717_v45 = vld [vmem:[%s7316_s1 + $0xe30] sm:$0xff] }
 0x160   : > { %4588 = vmatprep.subr.mxu0 %v3737_v14  ;;  %v6919_v46 = vpop.f32.mrf.mxu1  ;;  %4643 = vmatpush3.msra.mxu1 %v3754_v32  ;;  %v3765_v24 = vld [vmem:[%s7316_s1 + $0xfb0] sm:$0xff] }
 0x161   : > { %2701 = vmatprep.mubr.f32.mxu0 %v7397_v23  ;;  %2806 = vmatprep.mubr.f32.mxu1 %v5263_v36 }
 0x162   : > { %4589 = vmatpush3.msra.mxu0 %v3721_v47  ;;  %4644 = vmatprep.subr.mxu1 %v3769_v44  ;;  %v7401_v47 = vld [vmem:[#allocation18_spill] sm:$0xff]  ;;  %v3732_v44 = vld [vmem:[%s7316_s1 + $0xea8] sm:$0xff] }
 0x163   : > { %2702 = vmatmul.mubr.f32.gmra.mxu0 %v7398_v5  ;;  %2807 = vmatmul.mubr.f32.gmra.mxu1 %v5276_v43  ;;  %v6943_v51 = vpop.f32.mrf.mxu0 }
 0x164   : > { %4590 = vmatprep.subr.mxu0 %v3736_v22  ;;  %v6945_v50 = vpop.f32.mrf.mxu1  ;;  %4645 = vmatpush3.msra.mxu1 %v3753_v34  ;;  %v3749_v22 = vld [vmem:[%s7316_s1 + $0xf30] sm:$0xff]  ;;  %v3716_v34 = vld [vmem:[%s7316_s1 + $0xe28] sm:$0xff] }
 0x165   : > { %4591 = vmatpush3.msra.mxu0 %v3720_v1  ;;  %4646 = vmatprep.subr.mxu1 %v3768_v10  ;;  %v6953_v35 = vpop.f32.mrf.mxu0  ;;  %v7402_v1 = vld [vmem:[#allocation19_spill] sm:$0xff]  ;;  %v3764_v10 = vld [vmem:[%s7316_s1 + $0xfa8] sm:$0xff] }
 0x166   : > { %4592 = vmatprep.subr.mxu0 %v3735_v37  ;;  %v6955_v6 = vpop.f32.mrf.mxu1  ;;  %4647 = vmatpush3.msra.mxu1 %v3752_v57  ;;  %v3731_v37 = vld [vmem:[%s7316_s1 + $0xea0] sm:$0xff]  ;;  %v3748_v57 = vld [vmem:[%s7316_s1 + $0xf28] sm:$0xff] }
 0x167   : > { %2706 = vmatprep.mubr.f32.mxu0 %v7399_v21  ;;  %2811 = vmatprep.mubr.f32.mxu1 %v5304_v61 }
 0x168   : > { %4593 = vmatpush3.msra.mxu0 %v3719_v26  ;;  %4648 = vmatprep.subr.mxu1 %v3767_v63 }
 0x169   : > { %2707 = vmatmul.mubr.f32.gmra.mxu0 %v7400_v58  ;;  %2812 = vmatmul.mubr.f32.gmra.mxu1 %v5317_v4  ;;  %v6979_v12 = vpop.f32.mrf.mxu0 }
 0x16a   : > { %4594 = vmatprep.subr.mxu0 %v3734_v53  ;;  %v6981_v38 = vpop.f32.mrf.mxu1  ;;  %4649 = vmatpush3.msra.mxu1 %v3751_v41  ;;  %v3715_v53 = vld [vmem:[%s7316_s1 + $0xe20] sm:$0xff] }
 0x16b   : > { %4595 = vmatpush3.msra.mxu0 %v3718_v49  ;;  %4650 = vmatprep.subr.mxu1 %v3766_v8  ;;  %v6989_v14 = vpop.f32.mrf.mxu0  ;;  %v3763_v41 = vld [vmem:[%s7316_s1 + $0xfa0] sm:$0xff] }
 0x16c   : > { %4596 = vmatprep.subr.mxu0 %v3733_v52  ;;  %v6991_v32 = vpop.f32.mrf.mxu1  ;;  %4651 = vmatpush3.msra.mxu1 %v3750_v56  ;;  %v7406_v52 = vld [vmem:[#allocation20_spill] sm:$0xff]  ;;  %v3730_v56 = vld [vmem:[%s7316_s1 + $0xe98] sm:$0xff] }
 0x16d   : > { %2711 = vmatprep.mubr.f32.mxu0 %v7401_v47  ;;  %2816 = vmatprep.mubr.f32.mxu1 %v5345_v18 }
 0x16e   : > { %4597 = vmatpush3.msra.mxu0 %v3717_v45  ;;  %4652 = vmatprep.subr.mxu1 %v3765_v24  ;;  %v3747_v45 = vld [vmem:[%s7316_s1 + $0xf20] sm:$0xff]  ;;  %v3714_v24 = vld [vmem:[%s7316_s1 + $0xe18] sm:$0xff] }
 0x16f   : > { %2712 = vmatmul.mubr.f32.gmra.mxu0 %v7402_v1  ;;  %2817 = vmatmul.mubr.f32.gmra.mxu1 %v5354_v25  ;;  %v7015_v26 = vpop.f32.mrf.mxu0 }
 0x170   : > { %4598 = vmatprep.subr.mxu0 %v3732_v44  ;;  %v7017_v63 = vpop.f32.mrf.mxu1  ;;  %4653 = vmatpush3.msra.mxu1 %v3749_v22  ;;  %v7407_v44 = vld [vmem:[#allocation21_spill] sm:$0xff]  ;;  %v3762_v22 = vld [vmem:[%s7316_s1 + $0xf98] sm:$0xff] }
 0x171   : > { %7403 = vst [vmem:[#allocation24_spill] sm:$0xff] %v7017_v63  ;;  %4599 = vmatpush3.msra.mxu0 %v3716_v34  ;;  %4654 = vmatprep.subr.mxu1 %v3764_v10  ;;  %v7025_v49 = vpop.f32.mrf.mxu0  ;;  %v3729_v34 = vld [vmem:[%s7316_s1 + $0xe90] sm:$0xff]  ;;  %v3746_v10 = vld [vmem:[%s7316_s1 + $0xf18] sm:$0xff] }
 0x172   : > { %4600 = vmatprep.subr.mxu0 %v3731_v37  ;;  %7404 = vst [vmem:[#allocation25_spill] sm:$0xff] %v7025_v49  ;;  %v7027_v8 = vpop.f32.mrf.mxu1  ;;  %4655 = vmatpush3.msra.mxu1 %v3748_v57 }
 0x173   : > { %7405 = vst [vmem:[#allocation26_spill] sm:$0xff] %v7027_v8  ;;  %2716 = vmatprep.mubr.f32.mxu0 %v7406_v52  ;;  %2821 = vmatprep.mubr.f32.mxu1 %v5559_v2  ;;  %v3759_v8 = vld [vmem:[%s7316_s1 + $0xf80] sm:$0xff] }
 0x174   : > { %4601 = vmatpush3.msra.mxu0 %v3715_v53  ;;  %4656 = vmatprep.subr.mxu1 %v3763_v41  ;;  %v3713_v53 = vld [vmem:[%s7316_s1 + $0xe10] sm:$0xff] }
 0x175   : > { %2717 = vmatmul.mubr.f32.gmra.mxu0 %v7407_v44  ;;  %2822 = vmatmul.mubr.f32.gmra.mxu1 %v5570_v9  ;;  %v7051_v37 = vpop.f32.mrf.mxu0  ;;  %v3761_v41 = vld [vmem:[%s7316_s1 + $0xf90] sm:$0xff] }
 0x176   : > { %4602 = vmatprep.subr.mxu0 %v3730_v56  ;;  %7408 = vst [vmem:[#allocation27_spill] sm:$0xff] %v7051_v37  ;;  %v7053_v57 = vpop.f32.mrf.mxu1  ;;  %4657 = vmatpush3.msra.mxu1 %v3747_v45  ;;  %v7412_v37 = vld [vmem:[#allocation22_spill] sm:$0xff]  ;;  %v3728_v45 = vld [vmem:[%s7316_s1 + $0xe88] sm:$0xff] }
 0x177   : > { %7409 = vst [vmem:[#allocation8_spill] sm:$0xff] %v7053_v57  ;;  %4603 = vmatpush3.msra.mxu0 %v3714_v24  ;;  %4658 = vmatprep.subr.mxu1 %v3762_v22  ;;  %v7061_v56 = vpop.f32.mrf.mxu0  ;;  %v3745_v24 = vld [vmem:[%s7316_s1 + $0xf10] sm:$0xff]  ;;  %v3712_v22 = vld [vmem:[%s7316_s1 + $0xe08] sm:$0xff] }
 0x178   : > { %4604 = vmatprep.subr.mxu0 %v3729_v34  ;;  %7410 = vst [vmem:[#allocation3_spill] sm:$0xff] %v7061_v56  ;;  %v7063_v11 = vpop.f32.mrf.mxu1  ;;  %4659 = vmatpush3.msra.mxu1 %v3746_v10  ;;  %v7413_v34 = vld [vmem:[#allocation23_spill] sm:$0xff]  ;;  %v3760_v10 = vld [vmem:[%s7316_s1 + $0xf88] sm:$0xff] }
 0x179   : > { %7411 = vst [vmem:[#allocation9_spill] sm:$0xff] %v7063_v11  ;;  %2721 = vmatprep.mubr.f32.mxu0 %v7412_v37  ;;  %2826 = vmatprep.mubr.f32.mxu1 %v5594_v27  ;;  %v3727_v11 = vld [vmem:[%s7316_s1 + $0xe80] sm:$0xff] }
 0x17a   : > { %4605 = vmatpush3.msra.mxu0 %v3713_v53  ;;  %4660 = vmatprep.subr.mxu1 %v3761_v41  ;;  %v3744_v53 = vld [vmem:[%s7316_s1 + $0xf08] sm:$0xff]  ;;  %v3711_v41 = vld [vmem:[%s7316_s1 + $0xe00] sm:$0xff] }
 0x17b   : > { %2722 = vmatmul.mubr.f32.gmra.mxu0 %v7413_v34  ;;  %2827 = vmatmul.mubr.f32.gmra.mxu1 %v5604_v62  ;;  %v7090_v57 = vpop.f32.mrf.mxu0 }
 0x17c   : > { %4606 = vmatprep.subr.mxu0 %v3728_v45  ;;  %v7092_v56 = vpop.f32.mrf.mxu1  ;;  %4661 = vmatpush3.msra.mxu1 %v3745_v24  ;;  %v3743_v45 = vld [vmem:[%s7316_s1 + $0xf00] sm:$0xff]  ;;  %v4052_v24 = vadd.f32 %v6843_v19, %v6832_v3  ;;  %v4055_v3 = vadd.f32 %v6881_v39, %v6870_v55 }
 0x17d   : > { %4607 = vmatpush3.msra.mxu0 %v3712_v22  ;;  %4662 = vmatprep.subr.mxu1 %v3760_v10  ;;  %v7100_v63 = vpop.f32.mrf.mxu0 }
 0x17e   : > { %4608 = vmatprep.subr.mxu0 %v3727_v11  ;;  %v7102_v49 = vpop.f32.mrf.mxu1  ;;  %4663 = vmatpush3.msra.mxu1 %v3744_v53  ;;  %v4108_v11 = vadd.f32 %v6845_v54, %v6834_v16 }
 0x17f   : > { %4609 = vmatpush3.msra.mxu0 %v3711_v41  ;;  %2929 = vmatprep.mubr.f32.mxu0 %v7395_v48 }
 0x180   : > { %4664 = vmatprep.subr.mxu1 %v3759_v8  ;;  %2930 = vmatmul.mubr.f32.vlgmr.msra.gmra.mxu0 %v5231_v20  ;;  %v1500_v20 = vadd.f32 %v4108_v11, %v4052_v24 }
 0x181   : > { %4665 = vmatpush3.msra.mxu1 %v3743_v45  ;;  %3092 = vmatprep.mubr.f32.mxu1 %v7394_v28  ;;  %v4162_v22 = vpop.f32.mrf.mxu0  ;;  %v465_v45 = vld [vmem:[%s4984_s6 + $0x118] sm:$0x3] }
 0x182   : > { %2934 = vmatprep.mubr.f32.mxu0 %v5263_v36  ;;  %v4218_v10 = vpop.f32.mrf.mxu1  ;;  %3093 = vmatmul.mubr.f32.vlgmr.msra.gmra.mxu1 %v7396_v29  ;;  %v4111_v36 = vadd.f32 %v6883_v40, %v6872_v59  ;;  %v4058_v40 = vadd.f32 %v6917_v42, %v6907_v33 }
 0x183   : > { %3097 = vmatprep.mubr.f32.mxu1 %v7397_v23  ;;  %v4163_v48 = vpop.f32.mrf.mxu0 }
 0x184   : > { %v4219_v8 = vpop.f32.mrf.mxu1  ;;  %2935 = vmatmul.mubr.f32.gmra.mxu0 %v5276_v43  ;;  %v4164_v53 = vadd.f32 %v4163_v48, %v4162_v22  ;;  %v1505_v55 = vadd.f32 %v4111_v36, %v4055_v3  ;;  %v554_v48 = vrot.slane %v6677_v30, 2 }
 0x185   : > { %2939 = vmatprep.mubr.f32.mxu0 %v5304_v61  ;;  %v4220_v19 = vadd.f32 %v4219_v8, %v4218_v10  ;;  %v561_v8 = vrot.slane %v465_v45, 2  ;;  %v7420_v45 = vld [vmem:[#allocation9_spill] sm:$0xff] }
 0x186   : > { %3098 = vmatmul.mubr.f32.gmra.mxu1 %v7398_v5  ;;  %v1676_v16 = vadd.f32 %v4164_v53, %v1500_v20 }
 0x187   : > { %3102 = vmatprep.mubr.f32.mxu1 %v7399_v21  ;;  %v4165_v54 = vpop.f32.mrf.mxu0 }
 0x188   : > { %v4221_v28 = vpop.f32.mrf.mxu1  ;;  %2940 = vmatmul.mubr.f32.gmra.mxu0 %v5317_v4  ;;  %v1839_v43 = vadd.f32 %v4220_v19, %v1676_v16  ;;  %v461_v4 = vld [vmem:[%s4984_s6 + $0xf8] sm:$0xfc]  ;;  %v4064_v16 = vadd.f32 %v6989_v14, %v6979_v12 }
 0x189   : > { %2944 = vmatprep.mubr.f32.mxu0 %v5345_v18  ;;  %v4166_v61 = vpop.f32.mrf.mxu0  ;;  %v4114_v18 = vadd.f32 %v6919_v46, %v6909_v31  ;;  %v557_v31 = vrot.slane %v6673_v13, 2  ;;  %v460_v46 = vld [vmem:[%s4984_s6 + $0xf0] sm:$0xfc] }
 0x18a   : > { %v4222_v29 = vpop.f32.mrf.mxu1  ;;  %3103 = vmatmul.mubr.f32.gmra.mxu1 %v7400_v58  ;;  %v1859_v59 = vadd.f32 %v6516_v17, %v1839_v43  ;;  %v4167_v39 = vadd.f32 %v4166_v61, %v4165_v54  ;;  %v553_v10 = vrot.slane %v460_v46, 2  ;;  %v7419_v46 = vld [vmem:[#allocation8_spill] sm:$0xff] }
 0x18b   : > { %3107 = vmatprep.mubr.f32.mxu1 %v7401_v47  ;;  %v4223_v21 = vadd.f32 %v4222_v29, %v4221_v28  ;;  %v1510_v24 = vadd.f32 %v4114_v18, %v4058_v40 }
 0x18c   : > { %2945 = vmatmul.mubr.f32.gmra.mxu0 %v5354_v25  ;;  %v1875_v23 = vmax.f32 %v1859_v59, 0.0  ;;  %v1677_v5 = vadd.f32 %v4167_v39, %v1505_v55  ;;  %v556_v25 = vrot.slane %v461_v4, 2  ;;  %v555_v3 = vsel %vm502_vm1, %v553_v10, %v554_v48  ;;  %v7414_v55 = vld [vmem:[#allocation25_spill] sm:$0xff]  ;;  %v7415_v59 = vld [vmem:[#allocation24_spill] sm:$0xff]  ;;  %v7416_v39 = vld [vmem:[#allocation26_spill] sm:$0xff] }
 0x18d   : > { %2949 = vmatprep.mubr.f32.mxu0 %v5559_v2  ;;  %v4168_v58 = vpop.f32.mrf.mxu0  ;;  %v4123_v40 = vadd.f32 %v7416_v39, %v7415_v59 }
 0x18e   : > { %v4224_v41 = vpop.f32.mrf.mxu1  ;;  %3108 = vmatmul.mubr.f32.gmra.mxu1 %v7402_v1  ;;  %1891 = vst [vmem:[%s6585_s8 + $0x8] sm:$0xff] %v1875_v23  ;;  %v1840_v47 = vadd.f32 %v4223_v21, %v1677_v5  ;;  %v4061_v1 = vadd.f32 %v6953_v35, %v6943_v51  ;;  %v558_v51 = vsel %vm502_vm1, %v556_v25, %v557_v31  ;;  %v464_v35 = vld [vmem:[%s4984_s6 + $0x110] sm:$0x3] }
 0x18f   : > { %3112 = vmatprep.mubr.f32.mxu1 %v7406_v52  ;;  %v4169_v33 = vpop.f32.mrf.mxu0  ;;  %v559_v36 = vrot.slane %v464_v35, 2 }
 0x190   : > { %v4225_v42 = vpop.f32.mrf.mxu1  ;;  %2950 = vmatmul.mubr.f32.gmra.mxu0 %v5570_v9  ;;  %v1861_v2 = vadd.f32 %v6516_v17, %v1840_v47  ;;  %v4170_v11 = vadd.f32 %v4169_v33, %v4168_v58  ;;  %v4117_v9 = vadd.f32 %v6955_v6, %v6945_v50 }
 0x191   : > { %2954 = vmatprep.mubr.f32.mxu0 %v5594_v27  ;;  %v4226_v22 = vadd.f32 %v4225_v42, %v4224_v41  ;;  %v560_v29 = vsel %vm502_vm1, %v554_v48, %v559_v36  ;;  %v7417_v42 = vld [vmem:[#allocation27_spill] sm:$0xff] }
 0x192   : > { %3113 = vmatmul.mubr.f32.gmra.mxu1 %v7407_v44  ;;  %v1877_v52 = vmax.f32 %v1861_v2, 0.0  ;;  %v1678_v13 = vadd.f32 %v4170_v11, %v1510_v24  ;;  %v4126_v24 = vadd.f32 %v7420_v45, %v7419_v46 }
 0x193   : > { %3117 = vmatprep.mubr.f32.mxu1 %v7412_v37  ;;  %v4171_v20 = vpop.f32.mrf.mxu0  ;;  %v1515_v37 = vadd.f32 %v4117_v9, %v4061_v1 }
 0x194   : > { %v4227_v27 = vpop.f32.mrf.mxu1  ;;  %2955 = vmatmul.mubr.f32.gmra.mxu0 %v5604_v62  ;;  %1893 = vst [vmem:[%s6585_s8 + $0x18] sm:$0xff] %v1877_v52  ;;  %v1841_v44 = vadd.f32 %v4226_v22, %v1678_v13  ;;  %v562_v62 = vsel %vm502_vm1, %v557_v31, %v561_v8 }
 0x195   : > { %2959 = vmatprep.mubr.f32.mxu0 %v6720_v60  ;;  %v4172_v50 = vpop.f32.mrf.mxu0  ;;  %v4120_v60 = vadd.f32 %v6991_v32, %v6981_v38 }
 0x196   : > { %v4228_v6 = vpop.f32.mrf.mxu1  ;;  %3118 = vmatmul.mubr.f32.gmra.mxu1 %v7413_v34  ;;  %v1863_v53 = vadd.f32 %v6516_v17, %v1841_v44  ;;  %v4173_v30 = vadd.f32 %v4172_v50, %v4171_v20 }
 0x197   : > { %3122 = vmatprep.mubr.f32.mxu1 %v558_v51  ;;  %v4229_v54 = vadd.f32 %v4228_v6, %v4227_v27  ;;  %v4073_v27 = vadd.f32 %v7100_v63, %v7090_v57  ;;  %v4129_v51 = vadd.f32 %v7102_v49, %v7092_v56 }
 0x198   : > { %2960 = vmatmul.mubr.f32.gmra.mxu0 %v6733_v15  ;;  %v1879_v34 = vmax.f32 %v1863_v53, 0.0  ;;  %v1679_v19 = vadd.f32 %v4173_v30, %v1515_v37  ;;  %v1520_v15 = vadd.f32 %v4120_v60, %v4064_v16 }
 0x199   : > { %2964 = vmatprep.mubr.f32.mxu0 %v6764_v7  ;;  %v4174_v28 = vpop.f32.mrf.mxu0  ;;  %v4067_v7 = vadd.f32 %v7414_v55, %v7015_v26  ;;  %v7418_v26 = vld [vmem:[#allocation3_spill] sm:$0xff] }
 0x19a   : > { %v4230_v43 = vpop.f32.mrf.mxu1  ;;  %3123 = vmatmul.mubr.f32.gmra.mxu1 %v555_v3  ;;  %1895 = vst [vmem:[%s6585_s8 + $0x48] sm:$0xff] %v1879_v34  ;;  %v1842_v61 = vadd.f32 %v4229_v54, %v1679_v19  ;;  %v4070_v31 = vadd.f32 %v7418_v26, %v7417_v42 }
 0x19b   : > { %3127 = vmatprep.mubr.f32.mxu1 %v562_v62  ;;  %v4175_v12 = vpop.f32.mrf.mxu0  ;;  %v1525_v47 = vadd.f32 %v4123_v40, %v4067_v7  ;;  %v1535_v62 = vadd.f32 %v4129_v51, %v4073_v27 }
 0x19c   : > { %v4231_v14 = vpop.f32.mrf.mxu1  ;;  %2965 = vmatmul.mubr.f32.gmra.mxu0 %v6776_v0  ;;  %v1865_v38 = vadd.f32 %v6516_v17, %v1842_v61  ;;  %v4176_v32 = vadd.f32 %v4175_v12, %v4174_v28  ;;  %v1530_v48 = vadd.f32 %v4126_v24, %v4070_v31 }
 0x19d   : > { %v4232_v23 = vadd.f32 %v4231_v14, %v4230_v43 }
 0x19e   : > { %3128 = vmatmul.mubr.f32.gmra.mxu1 %v560_v29  ;;  %v1881_v4 = vmax.f32 %v1865_v38, 0.0  ;;  %v1680_v18 = vadd.f32 %v4176_v32, %v1520_v15 }
 0x19f   : > { %v4177_v5 = vpop.f32.mrf.mxu0 }
 0x1a0   : > { %v4233_v21 = vpop.f32.mrf.mxu1  ;;  %1897 = vst [vmem:[%s6585_s8 + $0x58] sm:$0xff] %v1881_v4  ;;  %v1843_v58 = vadd.f32 %v4232_v23, %v1680_v18 }
 0x1a1   : > { %v4178_v0 = vpop.f32.mrf.mxu0 }
 0x1a2   : > { %v4234_v41 = vpop.f32.mrf.mxu1  ;;  %v1867_v25 = vadd.f32 %v6516_v17, %v1843_v58  ;;  %v4179_v33 = vadd.f32 %v4178_v0, %v4177_v5 }
 0x1a3   : > { %v4235_v1 = vadd.f32 %v4234_v41, %v4233_v21 }
 0x1a4   : > { %v1883_v2 = vmax.f32 %v1867_v25, 0.0  ;;  %v1681_v11 = vadd.f32 %v4179_v33, %v1525_v47 }
 0x1a5   : > { %v4180_v9 = vpop.f32.mrf.mxu0 }
 0x1a6   : > { %v4236_v52 = vpop.f32.mrf.mxu1  ;;  %1899 = vst [vmem:[%s6585_s8 + $0x88] sm:$0xff] %v1883_v2  ;;  %v1844_v13 = vadd.f32 %v4235_v1, %v1681_v11 }
 0x1a7   : > { %v4181_v22 = vpop.f32.mrf.mxu0 }
 0x1a8   : > { %v4237_v10 = vpop.f32.mrf.mxu1  ;;  %v1869_v8 = vadd.f32 %v6516_v17, %v1844_v13  ;;  %v4182_v20 = vadd.f32 %v4181_v22, %v4180_v9 }
 0x1a9   : > { %v4238_v50 = vadd.f32 %v4237_v10, %v4236_v52 }
 0x1aa   : > { %v1885_v35 = vmax.f32 %v1869_v8, 0.0  ;;  %v1682_v44 = vadd.f32 %v4182_v20, %v1530_v48 }
 0x1ab   : > { %v4183_v6 = vpop.f32.mrf.mxu0 }
 0x1ac   : > { %v4239_v37 = vpop.f32.mrf.mxu1  ;;  %1901 = vst [vmem:[%s6585_s8 + $0x98] sm:$0xff] %v1885_v35  ;;  %v1845_v53 = vadd.f32 %v4238_v50, %v1682_v44 }
 0x1ad   : > { %v4184_v30 = vpop.f32.mrf.mxu0 }
 0x1ae   : > { %v4240_v3 = vpop.f32.mrf.mxu1  ;;  %v1871_v36 = vadd.f32 %v6516_v17, %v1845_v53  ;;  %v4185_v16 = vadd.f32 %v4184_v30, %v4183_v6 }
 0x1af   : > { %v4241_v57 = vadd.f32 %v4240_v3, %v4239_v37  ;;  %v7421_v37 = vld [vmem:[#allocation28_spill] sm:$0xff] }
 0x1b0   : > { %v1887_v60 = vmax.f32 %v1871_v36, 0.0  ;;  %v1683_v63 = vadd.f32 %v4185_v16, %v1535_v62 }
 0x1b1   : > { %v4274_v34 = vpop.f32.mrf.mxu0 }
 0x1b2   : > { %v4330_v49 = vpop.f32.mrf.mxu1  ;;  %1903 = vst [vmem:[%s6585_s8 + $0xc8] sm:$0xff] %v1887_v60  ;;  %v1846_v56 = vadd.f32 %v4241_v57, %v1683_v63 }
 0x1b3   : > { %v4275_v19 = vpop.f32.mrf.mxu0 }
 0x1b4   : > { %v4331_v54 = vpop.f32.mrf.mxu1  ;;  %v1873_v28 = vadd.f32 %v6516_v17, %v1846_v56  ;;  %v4276_v24 = vadd.f32 %v4275_v19, %v4274_v34 }
 0x1b5   : > { %v4332_v2 = vadd.f32 %v4331_v54, %v4330_v49 }
 0x1b6   : > { %v1889_v43 = vmax.f32 %v1873_v28, 0.0 }
 0x1b7   : > { %v4277_v61 = vpop.f32.mrf.mxu0  ;;  %v2176_v13 = vadd.f32 %v4332_v2, %v4276_v24 }
 0x1b8   : > { %v4333_v29 = vpop.f32.mrf.mxu1  ;;  %1905 = vst [vmem:[%s6585_s8 + $0xd8] sm:$0xff] %v1889_v43 }
 0x1b9   : > { %v4278_v12 = vpop.f32.mrf.mxu0 }
 0x1ba   : > { %v4334_v14 = vpop.f32.mrf.mxu1  ;;  %v4279_v10 = vadd.f32 %v4278_v12, %v4277_v61 }
 0x1bb   : > { %v4335_v48 = vadd.f32 %v4334_v14, %v4333_v29 }
 0x1bd   : > { %v4280_v15 = vpop.f32.mrf.mxu0  ;;  %v2181_v6 = vadd.f32 %v4335_v48, %v4279_v10 }
 0x1be   : > { %v4336_v38 = vpop.f32.mrf.mxu1 }
 0x1bf   : > { %v4281_v32 = vpop.f32.mrf.mxu0 }
 0x1c0   : > { %v4337_v55 = vpop.f32.mrf.mxu1  ;;  %v4282_v3 = vadd.f32 %v4281_v32, %v4280_v15 }
 0x1c1   : > { %v4338_v62 = vadd.f32 %v4337_v55, %v4336_v38 }
 0x1c3   : > { %v4283_v7 = vpop.f32.mrf.mxu0  ;;  %v2186_v19 = vadd.f32 %v4338_v62, %v4282_v3 }
 0x1c4   : > { %v4339_v59 = vpop.f32.mrf.mxu1 }
 0x1c5   : > { %v4284_v39 = vpop.f32.mrf.mxu0 }
 0x1c6   : > { %v4340_v40 = vpop.f32.mrf.mxu1  ;;  %v4285_v43 = vadd.f32 %v4284_v39, %v4283_v7 }
 0x1c7   : > { %v4341_v61 = vadd.f32 %v4340_v40, %v4339_v59 }
 0x1c9   : > { %v7190_v4 = vpop.f32.mrf.mxu0  ;;  %v2191_v2 = vadd.f32 %v4341_v61, %v4285_v43 }
 0x1ca   : > { %v7192_v18 = vpop.f32.mrf.mxu1 }
 0x1cb   : > { %v4287_v23 = vpop.f32.mrf.mxu0 }
 0x1cc   : > { %v4343_v5 = vpop.f32.mrf.mxu1 }
 0x1cf   : > { %v7194_v21 = vpop.f32.mrf.mxu0 }
 0x1d0   : > { %v7196_v58 = vpop.f32.mrf.mxu1 }
 0x1d1   : > { %v7198_v0 = vpop.f32.mrf.mxu0 }
 0x1d2   : > { %v7200_v41 = vpop.f32.mrf.mxu1 }
 0x1d5   : > { %v7202_v47 = vpop.f32.mrf.mxu0 }
 0x1d6   : > { %v7204_v25 = vpop.f32.mrf.mxu1 }
 0x1d7   : > { %v7206_v33 = vpop.f32.mrf.mxu0 }
 0x1d8   : > { %v7208_v42 = vpop.f32.mrf.mxu1 }
 0x1db   : > { %v7210_v26 = vpop.f32.mrf.mxu0 }
 0x1dc   : > { %v7212_v31 = vpop.f32.mrf.mxu1 }
 0x1dd   : > { %v7214_v46 = vpop.f32.mrf.mxu0 }
 0x1de   : > { %v7216_v45 = vpop.f32.mrf.mxu1 }
 0x1e1   : > { %v4386_v11 = vpop.f32.mrf.mxu0 }
 0x1e2   : > { %v4442_v1 = vpop.f32.mrf.mxu1 }
 0x1e3   : > { %v4387_v9 = vpop.f32.mrf.mxu0 }
 0x1e4   : > { %v4443_v52 = vpop.f32.mrf.mxu1  ;;  %v4388_v22 = vadd.f32 %v4387_v9, %v4386_v11  ;;  %v4288_v9 = vadd.f32 %v4287_v23, %v7190_v4  ;;  %v4347_v4 = vadd.f32 %v7200_v41, %v7196_v58  ;;  %v4350_v58 = vadd.f32 %v7208_v42, %v7204_v25 }
 0x1e5   : > { %v4444_v20 = vadd.f32 %v4443_v52, %v4442_v1  ;;  %v4344_v52 = vadd.f32 %v4343_v5, %v7192_v18  ;;  %v4353_v25 = vadd.f32 %v7216_v45, %v7212_v31 }
 0x1e6   : > { %v2369_v8 = vadd.f32 %v4388_v22, %v2176_v13 }
 0x1e7   : > { %v4389_v27 = vpop.f32.mrf.mxu0 }
 0x1e8   : > { %v4445_v51 = vpop.f32.mrf.mxu1  ;;  %v2532_v35 = vadd.f32 %v4444_v20, %v2369_v8  ;;  %v2196_v8 = vadd.f32 %v4344_v52, %v4288_v9 }
 0x1e9   : > { %v4390_v44 = vpop.f32.mrf.mxu0 }
 0x1ea   : > { %v4446_v50 = vpop.f32.mrf.mxu1  ;;  %v3141_v53 = vadd.f32 %v2532_v35, %v7421_v37  ;;  %v4391_v30 = vadd.f32 %v4390_v44, %v4389_v27 }
 0x1eb   : > { %v4447_v60 = vadd.f32 %v4446_v50, %v4445_v51  ;;  %v4291_v51 = vadd.f32 %v7198_v0, %v7194_v21  ;;  %v4294_v21 = vadd.f32 %v7206_v33, %v7202_v47  ;;  %v4297_v47 = vadd.f32 %v7214_v46, %v7210_v26 }
 0x1ec   : > { %v3157_v36 = vmax.f32 %v3141_v53, 0.0  ;;  %v2370_v16 = vadd.f32 %v4391_v30, %v2181_v6 }
 0x1ed   : > { %v4392_v63 = vpop.f32.mrf.mxu0  ;;  %v2201_v30 = vadd.f32 %v4347_v4, %v4291_v51 }
 0x1ee   : > { %v4448_v57 = vpop.f32.mrf.mxu1  ;;  %3775 = vst [vmem:[%s6585_s8 + $0x20] sm:$0xff] %v3157_v36  ;;  %v2533_v34 = vadd.f32 %v4447_v60, %v2370_v16 }
 0x1ef   : > { %v4393_v49 = vpop.f32.mrf.mxu0 }
 0x1f0   : > { %v4449_v56 = vpop.f32.mrf.mxu1  ;;  %v3143_v54 = vadd.f32 %v2533_v34, %v7421_v37  ;;  %v4394_v28 = vadd.f32 %v4393_v49, %v4392_v63  ;;  %v2206_v49 = vadd.f32 %v4350_v58, %v4294_v21 }
 0x1f1   : > { %v4450_v14 = vadd.f32 %v4449_v56, %v4448_v57 }
 0x1f2   : > { %v3159_v29 = vmax.f32 %v3143_v54, 0.0  ;;  %v2371_v12 = vadd.f32 %v4394_v28, %v2186_v19 }
 0x1f3   : > { %v4395_v15 = vpop.f32.mrf.mxu0 }
 0x1f4   : > { %v4451_v38 = vpop.f32.mrf.mxu1  ;;  %3777 = vst [vmem:[%s6585_s8 + $0x30] sm:$0xff] %v3159_v29  ;;  %v2534_v32 = vadd.f32 %v4450_v14, %v2371_v12  ;;  %v2211_v14 = vadd.f32 %v4353_v25, %v4297_v47 }
 0x1f5   : > { %v4396_v55 = vpop.f32.mrf.mxu0 }
 0x1f6   : > { %v4452_v24 = vpop.f32.mrf.mxu1  ;;  %v3145_v11 = vadd.f32 %v2534_v32, %v7421_v37  ;;  %v4397_v1 = vadd.f32 %v4396_v55, %v4395_v15 }
 0x1f7   : > { %v4453_v39 = vadd.f32 %v4452_v24, %v4451_v38 }
 0x1f8   : > { %v3161_v7 = vmax.f32 %v3145_v11, 0.0  ;;  %v2372_v59 = vadd.f32 %v4397_v1, %v2191_v2 }
 0x1f9   : > { %v4398_v40 = vpop.f32.mrf.mxu0 }
 0x1fa   : > { %v4454_v13 = vpop.f32.mrf.mxu1  ;;  %3779 = vst [vmem:[%s6585_s8 + $0x60] sm:$0xff] %v3161_v7  ;;  %v2535_v22 = vadd.f32 %v4453_v39, %v2372_v59 }
 0x1fb   : > { %v4399_v10 = vpop.f32.mrf.mxu0 }
 0x1fc   : > { %v4455_v48 = vpop.f32.mrf.mxu1  ;;  %v3147_v20 = vadd.f32 %v2535_v22, %v7421_v37  ;;  %v4400_v27 = vadd.f32 %v4399_v10, %v4398_v40 }
 0x1fd   : > { %v4456_v5 = vadd.f32 %v4455_v48, %v4454_v13 }
 0x1fe   : > { %v3163_v18 = vmax.f32 %v3147_v20, 0.0  ;;  %v2373_v23 = vadd.f32 %v4400_v27, %v2196_v8 }
 0x1ff   : > { %v4401_v35 = vpop.f32.mrf.mxu0 }
 0x200   : > { %v4457_v44 = vpop.f32.mrf.mxu1  ;;  %3781 = vst [vmem:[%s6585_s8 + $0x70] sm:$0xff] %v3163_v18  ;;  %v2536_v50 = vadd.f32 %v4456_v5, %v2373_v23 }
 0x201   : > { %v4402_v6 = vpop.f32.mrf.mxu0 }
 0x202   : > { %v4458_v53 = vpop.f32.mrf.mxu1  ;;  %v3149_v3 = vadd.f32 %v2536_v50, %v7421_v37  ;;  %v4403_v62 = vadd.f32 %v4402_v6, %v4401_v35 }
 0x203   : > { %v4459_v36 = vadd.f32 %v4458_v53, %v4457_v44 }
 0x204   : > { %v3165_v0 = vmax.f32 %v3149_v3, 0.0  ;;  %v2374_v41 = vadd.f32 %v4403_v62, %v2201_v30 }
 0x205   : > { %v4404_v16 = vpop.f32.mrf.mxu0 }
 0x206   : > { %v4460_v60 = vpop.f32.mrf.mxu1  ;;  %3783 = vst [vmem:[%s6585_s8 + $0xa0] sm:$0xff] %v3165_v0  ;;  %v2537_v63 = vadd.f32 %v4459_v36, %v2374_v41 }
 0x207   : > { %v4405_v57 = vpop.f32.mrf.mxu0 }
 0x208   : > { %v4461_v34 = vpop.f32.mrf.mxu1  ;;  %v3151_v56 = vadd.f32 %v2537_v63, %v7421_v37  ;;  %v4406_v19 = vadd.f32 %v4405_v57, %v4404_v16 }
 0x209   : > { %v4462_v54 = vadd.f32 %v4461_v34, %v4460_v60 }
 0x20a   : > { %v3167_v33 = vmax.f32 %v3151_v56, 0.0  ;;  %v2375_v42 = vadd.f32 %v4406_v19, %v2206_v49 }
 0x20b   : > { %v4407_v28 = vpop.f32.mrf.mxu0 }
 0x20c   : > { %v4463_v43 = vpop.f32.mrf.mxu1  ;;  %3785 = vst [vmem:[%s6585_s8 + $0xb0] sm:$0xff] %v3167_v33  ;;  %v2538_v61 = vadd.f32 %v4462_v54, %v2375_v42 }
 0x20d   : > { %v4408_v29 = vpop.f32.mrf.mxu0 }
 0x20e   : > { %v4464_v12 = vpop.f32.mrf.mxu1  ;;  %v3153_v15 = vadd.f32 %v2538_v61, %v7421_v37  ;;  %v4409_v38 = vadd.f32 %v4408_v29, %v4407_v28 }
 0x20f   : > { %v4465_v46 = vadd.f32 %v4464_v12, %v4463_v43 }
 0x210   : > { %v3169_v32 = vmax.f32 %v3153_v15, 0.0  ;;  %v2376_v26 = vadd.f32 %v4409_v38, %v2211_v14 }
 0x211   : > { %v4498_v55 = vpop.f32.mrf.mxu0 }
 0x212   : > { %v4554_v31 = vpop.f32.mrf.mxu1  ;;  %3787 = vst [vmem:[%s6585_s8 + $0xe0] sm:$0xff] %v3169_v32  ;;  %v2539_v45 = vadd.f32 %v4465_v46, %v2376_v26 }
 0x213   : > { %v4499_v24 = vpop.f32.mrf.mxu0 }
 0x214   : > { %v4555_v2 = vpop.f32.mrf.mxu1  ;;  %v3155_v11 = vadd.f32 %v2539_v45, %v7421_v37  ;;  %v4500_v58 = vadd.f32 %v4499_v24, %v4498_v55 }
 0x215   : > { %v4556_v0 = vadd.f32 %v4555_v2, %v4554_v31 }
 0x216   : > { %v3171_v1 = vmax.f32 %v3155_v11, 0.0 }
 0x217   : > { %v4501_v9 = vpop.f32.mrf.mxu0  ;;  %v4557_v52 = vpop.f32.mrf.mxu1  ;;  %v2794_v60 = vadd.f32 %v4556_v0, %v4500_v58 }
 0x218   : > { %3789 = vst [vmem:[%s6585_s8 + $0xf0] sm:$0xff] %v3171_v1 }
 0x219   : > { %v4502_v7 = vpop.f32.mrf.mxu0  ;;  %v4558_v59 = vpop.f32.mrf.mxu1 }
 0x21a   : > { %v4503_v63 = vadd.f32 %v4502_v7, %v4501_v9  ;;  %v4559_v57 = vadd.f32 %v4558_v59, %v4557_v52 }
 0x21c   : > { %v2799_v28 = vadd.f32 %v4559_v57, %v4503_v63 }
 0x21d   : > { %v4504_v39 = vpop.f32.mrf.mxu0  ;;  %v4560_v40 = vpop.f32.mrf.mxu1 }
 0x21f   : > { %v4505_v13 = vpop.f32.mrf.mxu0  ;;  %v4561_v22 = vpop.f32.mrf.mxu1 }
 0x220   : > { %v4506_v25 = vadd.f32 %v4505_v13, %v4504_v39  ;;  %v4562_v33 = vadd.f32 %v4561_v22, %v4560_v40 }
 0x222   : > { %v2804_v32 = vadd.f32 %v4562_v33, %v4506_v25 }
 0x223   : > { %v4507_v10 = vpop.f32.mrf.mxu0  ;;  %v4563_v48 = vpop.f32.mrf.mxu1 }
 0x225   : > { %v4508_v8 = vpop.f32.mrf.mxu0  ;;  %v4564_v20 = vpop.f32.mrf.mxu1 }
 0x226   : > { %v4509_v26 = vadd.f32 %v4508_v8, %v4507_v10  ;;  %v4565_v31 = vadd.f32 %v4564_v20, %v4563_v48 }
 0x228   : > { %v2809_v22 = vadd.f32 %v4565_v31, %v4509_v26 }
 0x229   : > { %v4510_v27 = vpop.f32.mrf.mxu0  ;;  %v4566_v51 = vpop.f32.mrf.mxu1 }
 0x22b   : > { %v4511_v4 = vpop.f32.mrf.mxu0  ;;  %v4567_v18 = vpop.f32.mrf.mxu1 }
 0x22c   : > { %v4512_v59 = vadd.f32 %v4511_v4, %v4510_v27  ;;  %v4568_v39 = vadd.f32 %v4567_v18, %v4566_v51 }
 0x22f   : > { %v7248_v23 = vpop.f32.mrf.mxu0  ;;  %v7250_v37 = vpop.f32.mrf.mxu1 }
 0x231   : > { %v7252_v5 = vpop.f32.mrf.mxu0  ;;  %v7254_v35 = vpop.f32.mrf.mxu1 }
 0x232   : > { %v4571_v4 = vadd.f32 %v7254_v35, %v7250_v37 }
 0x235   : > { %v7256_v44 = vpop.f32.mrf.mxu0  ;;  %v7258_v50 = vpop.f32.mrf.mxu1 }
 0x237   : > { %v7260_v6 = vpop.f32.mrf.mxu0  ;;  %v7262_v53 = vpop.f32.mrf.mxu1 }
 0x238   : > { %v4518_v25 = vadd.f32 %v7260_v6, %v7256_v44 }
 0x23b   : > { %v7264_v30 = vpop.f32.mrf.mxu0  ;;  %v7266_v3 = vpop.f32.mrf.mxu1 }
 0x23d   : > { %v7268_v62 = vpop.f32.mrf.mxu0  ;;  %v7270_v21 = vpop.f32.mrf.mxu1 }
 0x23e   : > { %v4521_v44 = vadd.f32 %v7268_v62, %v7264_v30 }
 0x240   : > { %v4610_v41 = vpop.f32.mrf.mxu0 }
 0x242   : > { %v4666_v36 = vpop.f32.mrf.mxu1  ;;  %v4611_v16 = vpop.f32.mrf.mxu0 }
 0x243   : > { %v4612_v34 = vadd.f32 %v4611_v16, %v4610_v41  ;;  %v2814_v16 = vadd.f32 %v4568_v39, %v4512_v59 }
 0x244   : > { %v4667_v49 = vpop.f32.mrf.mxu1  ;;  %v4613_v56 = vpop.f32.mrf.mxu0 }
 0x245   : > { %v2970_v19 = vadd.f32 %v4612_v34, %v2794_v60  ;;  %v4668_v47 = vadd.f32 %v4667_v49, %v4666_v36  ;;  %v4515_v60 = vadd.f32 %v7252_v5, %v7248_v23  ;;  %v4574_v23 = vadd.f32 %v7262_v53, %v7258_v50 }
 0x246   : > { %v4669_v42 = vpop.f32.mrf.mxu1  ;;  %v4614_v54 = vpop.f32.mrf.mxu0  ;;  %v4577_v53 = vadd.f32 %v7270_v21, %v7266_v3 }
 0x247   : > { %v3133_v43 = vadd.f32 %v4668_v47, %v2970_v19  ;;  %v4615_v61 = vadd.f32 %v4614_v54, %v4613_v56  ;;  %v2819_v37 = vadd.f32 %v4571_v4, %v4515_v60 }
 0x248   : > { %v4670_v29 = vpop.f32.mrf.mxu1  ;;  %v4616_v12 = vpop.f32.mrf.mxu0  ;;  %v2829_v62 = vadd.f32 %v4577_v53, %v4521_v44 }
 0x249   : > { %v3142_v14 = vadd.f32 %v3133_v43, %v6516_v17  ;;  %v2971_v15 = vadd.f32 %v4615_v61, %v2799_v28  ;;  %v4671_v38 = vadd.f32 %v4670_v29, %v4669_v42 }
 0x24a   : > { %v4672_v46 = vpop.f32.mrf.mxu1  ;;  %v4617_v55 = vpop.f32.mrf.mxu0 }
 0x24b   : > { %v3158_v45 = vmax.f32 %v3142_v14, 0.0  ;;  %v3134_v24 = vadd.f32 %v4671_v38, %v2971_v15  ;;  %v4618_v2 = vadd.f32 %v4617_v55, %v4616_v12  ;;  %v2824_v14 = vadd.f32 %v4574_v23, %v4518_v25 }
 0x24c   : > { %v4673_v11 = vpop.f32.mrf.mxu1  ;;  %v4619_v1 = vpop.f32.mrf.mxu0 }
 0x24d   : > { %3776 = vst [vmem:[%s6585_s8 + $0x28] sm:$0xff] %v3158_v45  ;;  %v3144_v9 = vadd.f32 %v3134_v24, %v6516_v17  ;;  %v2972_v52 = vadd.f32 %v4618_v2, %v2804_v32  ;;  %v4674_v7 = vadd.f32 %v4673_v11, %v4672_v46 }
 0x24e   : > { %v4675_v40 = vpop.f32.mrf.mxu1  ;;  %v4620_v13 = vpop.f32.mrf.mxu0 }
 0x24f   : > { %v3160_v10 = vmax.f32 %v3144_v9, 0.0  ;;  %v3135_v8 = vadd.f32 %v4674_v7, %v2972_v52  ;;  %v4621_v58 = vadd.f32 %v4620_v13, %v4619_v1 }
 0x250   : > { %v4676_v48 = vpop.f32.mrf.mxu1  ;;  %v4622_v20 = vpop.f32.mrf.mxu0 }
 0x251   : > { %3778 = vst [vmem:[%s6585_s8 + $0x38] sm:$0xff] %v3160_v10  ;;  %v3146_v0 = vadd.f32 %v3135_v8, %v6516_v17  ;;  %v2973_v41 = vadd.f32 %v4621_v58, %v2809_v22  ;;  %v4677_v36 = vadd.f32 %v4676_v48, %v4675_v40 }
 0x252   : > { %v4678_v27 = vpop.f32.mrf.mxu1  ;;  %v4623_v51 = vpop.f32.mrf.mxu0 }
 0x253   : > { %v3162_v18 = vmax.f32 %v3146_v0, 0.0  ;;  %v3136_v63 = vadd.f32 %v4677_v36, %v2973_v41  ;;  %v4624_v57 = vadd.f32 %v4623_v51, %v4622_v20 }
 0x254   : > { %v4679_v34 = vpop.f32.mrf.mxu1  ;;  %v4625_v49 = vpop.f32.mrf.mxu0 }
 0x255   : > { %3780 = vst [vmem:[%s6585_s8 + $0x68] sm:$0xff] %v3162_v18  ;;  %v3148_v56 = vadd.f32 %v3136_v63, %v6516_v17  ;;  %v2974_v19 = vadd.f32 %v4624_v57, %v2814_v16  ;;  %v4680_v47 = vadd.f32 %v4679_v34, %v4678_v27 }
 0x256   : > { %v4681_v5 = vpop.f32.mrf.mxu1  ;;  %v4626_v33 = vpop.f32.mrf.mxu0 }
 0x257   : > { %v3164_v35 = vmax.f32 %v3148_v56, 0.0  ;;  %v3137_v42 = vadd.f32 %v4680_v47, %v2974_v19  ;;  %v4627_v54 = vadd.f32 %v4626_v33, %v4625_v49 }
 0x258   : > { %v4682_v28 = vpop.f32.mrf.mxu1  ;;  %v4628_v43 = vpop.f32.mrf.mxu0 }
 0x259   : > { %3782 = vst [vmem:[%s6585_s8 + $0x78] sm:$0xff] %v3164_v35  ;;  %v3150_v61 = vadd.f32 %v3137_v42, %v6516_v17  ;;  %v2975_v29 = vadd.f32 %v4627_v54, %v2819_v37  ;;  %v4683_v12 = vadd.f32 %v4682_v28, %v4681_v5 }
 0x25a   : > { %v4684_v6 = vpop.f32.mrf.mxu1  ;;  %v4629_v50 = vpop.f32.mrf.mxu0 }
 0x25b   : > { %v3166_v15 = vmax.f32 %v3150_v61, 0.0  ;;  %v3138_v38 = vadd.f32 %v4683_v12, %v2975_v29  ;;  %v4630_v32 = vadd.f32 %v4629_v50, %v4628_v43 }
 0x25c   : > { %v4685_v26 = vpop.f32.mrf.mxu1  ;;  %v4631_v46 = vpop.f32.mrf.mxu0 }
 0x25d   : > { %3784 = vst [vmem:[%s6585_s8 + $0xa8] sm:$0xff] %v3166_v15  ;;  %v3152_v55 = vadd.f32 %v3138_v38, %v6516_v17  ;;  %v2976_v31 = vadd.f32 %v4630_v32, %v2824_v14  ;;  %v4686_v45 = vadd.f32 %v4685_v26, %v4684_v6 }
 0x25e   : > { %v4687_v24 = vpop.f32.mrf.mxu1  ;;  %v4632_v30 = vpop.f32.mrf.mxu0 }
 0x25f   : > { %v3168_v2 = vmax.f32 %v3152_v55, 0.0  ;;  %v3139_v11 = vadd.f32 %v4686_v45, %v2976_v31  ;;  %v4633_v1 = vadd.f32 %v4632_v30, %v4631_v46 }
 0x260   : > { %v4688_v3 = vpop.f32.mrf.mxu1 }
 0x261   : > { %3786 = vst [vmem:[%s6585_s8 + $0xb8] sm:$0xff] %v3168_v2  ;;  %v3154_v21 = vadd.f32 %v3139_v11, %v6516_v17  ;;  %v2977_v9 = vadd.f32 %v4633_v1, %v2829_v62  ;;  %v4689_v52 = vadd.f32 %v4688_v3, %v4687_v24 }
 0x263   : > { %v3170_v7 = vmax.f32 %v3154_v21, 0.0  ;;  %v3140_v59 = vadd.f32 %v4689_v52, %v2977_v9 }
 0x265   : > { %3788 = vst [vmem:[%s6585_s8 + $0xe8] sm:$0xff] %v3170_v7  ;;  %v3156_v39 = vadd.f32 %v3140_v59, %v6516_v17 }
 0x267   : > { %v3172_v40 = vmax.f32 %v3156_v39, 0.0 }
 0x269   : > { %3790 = vst [vmem:[%s6585_s8 + $0xf8] sm:$0xff] %v3172_v40 }
 0x26a PF: > { %s13_s16 = sadd.s32 1, %s4785_s16   ;;  %s7422_s12 = smov %s4777_s14 }
 0x26b   : > { %p10_p7 = scmp.ge.s32.totalorder %s13_s16, 10   ;;  %s7423_s13 = smov %s4781_s15 }
 0x26c   : > { %s7424_s14 = smov %s7427_s17  ;;  %s7425_s15 = smov %s7431_s18 }
 0x26d   :  { %12 = sbr.rel (!%p10_p7) target bundleno = 3 (0x3), region = 87 }

// kernel: deconvnet_forward.5
= control target key start
LH: loop header
LB: loop body
LE: loop exit
PB: predicated region body
PF: predicated region fallthrough
CT: control target
= control target key end

     0   :  { %s4505_s12 = smov 0   ;;  %s4507_s13 = smov 0   ;;  %s5909_s0 = inlined_call_operand.vmem [shape: f32[2,34,34,128], index: 0, kind: input, shape index: {}]   ;;  %s5910_s1 = inlined_call_operand.vmem [shape: f32[2,3,2,128,6], index: 1, kind: input, shape index: {}]   ;;  %s5911_s2 = inlined_call_operand.vmem [shape: f32[1,6], index: 2, kind: input, shape index: {}]   ;;  %s5912_s3 = inlined_call_operand.vmem [shape: f32[2,32,2,32,6], index: 3, kind: output, shape index: {}]  }
   0x1   :  { %s4509_s14 = smov 0   ;;  %s4511_s15 = smov 0  }
   0x2   :  { %s4513_s16 = smov 0  }
   0x3 LB: > { %s22_s17 = sadd.s32 1, %s4475_s14  ;;  %s25_s18 = sadd.s32 1, %s4479_s15  ;;  %s4483_s16 = sphi %s4513_s16, %s13_s16   ;;  %s4479_s15 = sphi %s4511_s15, %s5936_s15   ;;  %s4475_s14 = sphi %s4509_s14, %s5935_s14   ;;  %s4471_s13 = sphi %s4507_s13, %s5934_s13   ;;  %s4467_s12 = sphi %s4505_s12, %s5933_s12  }
   0x4   : > { %p23_p0 = scmp.ge.s32.totalorder %s22_s17, 8  ;;  %p2975_p1 = scmp.ge.s32.totalorder %s4483_s16, 1 }
   0x5   : > { %p151_p2 = scmp.lt.s32.totalorder %s4483_s16, 17 }
   0x6   : > { %s5938_s17 = smov (%p23_p0, %s22_s17), 0  ;;  %s5940_s18 = smov (!%p23_p0, %s25_s18), %s4479_s15 }
   0x7   : > { %p152_p3 = pnand %p2975_p1, %p151_p2  ;;  %p27_p4 = scmp.ge.s32.totalorder %s5940_s18, 2 }
   0x9   : > { %s5942_s18 = smov (%p27_p4, %s5940_s18), 0  ;;  %155 = sbr.rel (%p152_p3) target bundleno = 551 (0x227), region = 32 }
   0xe   : > { %v2998_v0 = vld [vmem:[%s5910_s1 + $0x178] sm:$0xff]  ;;  %v2997_v2 = vld [vmem:[%s5910_s1 + $0x170] sm:$0xff]  ;;  %v2996_v4 = vld [vmem:[%s5910_s1 + $0x168] sm:$0xff]  ;;  %p180_p5 = scmp.lt.s32.totalorder %s4471_s13, 1  ;;  %s2982_s5 = smul.u32 160, %s4467_s12  ;;  %vm1598_vm0 = vcmask 48128  }
   0xf   : > { %v377_v1 = vld [vmem:[%s5910_s1 + $0x78] sm:$0xff]  ;;  %3594 = vmatprep.subr.mxu0 %v2998_v0  ;;  %v376_v3 = vld [vmem:[%s5910_s1 + $0x70] sm:$0xff]  ;;  %v375_v5 = vld [vmem:[%s5910_s1 + $0x68] sm:$0xff]  ;;  %s2977_s27 = sshll.u32 %s4467_s12, 2 }
  0x10   : > { %3650 = vmatprep.subr.mxu1 %v377_v1  ;;  %3595 = vmatpush3.msra.mxu0 %v2998_v0  ;;  %v2995_v6 = vld [vmem:[%s5910_s1 + $0x160] sm:$0xff]  ;;  %v2994_v8 = vld [vmem:[%s5910_s1 + $0x158] sm:$0xff]  ;;  %v2993_v10 = vld [vmem:[%s5910_s1 + $0x150] sm:$0xff]  ;;  %s5944_s13 = smov (!%p180_p5, %s4471_s13), 1  ;;  %p188_p6 = scmp.lt.s32.totalorder %s2977_s27, 31 }
  0x11   : > { %3651 = vmatpush3.msra.mxu1 %v377_v1  ;;  %3596 = vmatprep.subr.mxu0 %v2997_v2  ;;  %v374_v7 = vld [vmem:[%s5910_s1 + $0x60] sm:$0xff]  ;;  %v373_v9 = vld [vmem:[%s5910_s1 + $0x58] sm:$0xff]  ;;  %v372_v11 = vld [vmem:[%s5910_s1 + $0x50] sm:$0xff]  ;;  %s4266_s23 = smul.u32 1360, %s5944_s13  ;;  %s2979_s28 = sshll.u32 %s5944_s13, 8 }
  0x12   : > { %3652 = vmatprep.subr.mxu1 %v376_v3  ;;  %3597 = vmatpush3.msra.mxu0 %v2997_v2  ;;  %v2992_v12 = vld [vmem:[%s5910_s1 + $0x148] sm:$0xff]  ;;  %v2991_v14 = vld [vmem:[%s5910_s1 + $0x140] sm:$0xff]  ;;  %v2990_v16 = vld [vmem:[%s5910_s1 + $0x138] sm:$0xff]  ;;  %s5946_s27 = smov (!%p188_p6, %s2977_s27), 31 }
  0x13   : > { %3653 = vmatpush3.msra.mxu1 %v376_v3  ;;  %3598 = vmatprep.subr.mxu0 %v2996_v4  ;;  %v371_v13 = vld [vmem:[%s5910_s1 + $0x48] sm:$0xff]  ;;  %v370_v15 = vld [vmem:[%s5910_s1 + $0x40] sm:$0xff]  ;;  %v369_v17 = vld [vmem:[%s5910_s1 + $0x38] sm:$0xff]  ;;  %s184_s8 = scalar_lea.vmem %s5909_s0, %s4266_s23  ;;  %s2978_s12 = sshll.u32 %s5946_s27, 3 }
  0x14   : > { %3654 = vmatprep.subr.mxu1 %v375_v5  ;;  %3599 = vmatpush3.msra.mxu0 %v2996_v4  ;;  %v2989_v18 = vld [vmem:[%s5910_s1 + $0x130] sm:$0xff]  ;;  %v2988_v20 = vld [vmem:[%s5910_s1 + $0x128] sm:$0xff]  ;;  %v2987_v22 = vld [vmem:[%s5910_s1 + $0x120] sm:$0xff]  ;;  %s4638_s24 = scalar_lea.vmem %s184_s8, %s2982_s5  ;;  %s5636_s29 = sadd.s32 %s2979_s28, %s2978_s12 }
  0x15   : > { %3655 = vmatpush3.msra.mxu1 %v375_v5  ;;  %3600 = vmatprep.subr.mxu0 %v2995_v6  ;;  %v368_v19 = vld [vmem:[%s5910_s1 + $0x30] sm:$0xff]  ;;  %v367_v21 = vld [vmem:[%s5910_s1 + $0x28] sm:$0xff]  ;;  %v366_v23 = vld [vmem:[%s5910_s1 + $0x20] sm:$0xff]  ;;  %s2980_s13 = sshll.u32 %s5636_s29, 3 }
  0x16   : > { %3656 = vmatprep.subr.mxu1 %v374_v7  ;;  %3601 = vmatpush3.msra.mxu0 %v2995_v6  ;;  %v2986_v24 = vld [vmem:[%s5910_s1 + $0x118] sm:$0xff]  ;;  %v2985_v26 = vld [vmem:[%s5910_s1 + $0x110] sm:$0xff]  ;;  %v2984_v28 = vld [vmem:[%s5910_s1 + $0x108] sm:$0xff]  ;;  %s5653_s5 = scalar_lea.vmem %s5912_s3, %s2980_s13 }
  0x17   : > { %3657 = vmatpush3.msra.mxu1 %v374_v7  ;;  %3602 = vmatprep.subr.mxu0 %v2994_v8  ;;  %v365_v25 = vld [vmem:[%s5910_s1 + $0x18] sm:$0xff]  ;;  %v364_v27 = vld [vmem:[%s5910_s1 + $0x10] sm:$0xff]  ;;  %v363_v29 = vld [vmem:[%s5910_s1 + $0x8] sm:$0xff] }
  0x18   : > { %3658 = vmatprep.subr.mxu1 %v373_v9  ;;  %3603 = vmatpush3.msra.mxu0 %v2994_v8  ;;  %v2983_v30 = vld [vmem:[%s5910_s1 + $0x100] sm:$0xff]  ;;  %v248_v34 = vld [vmem:[%s4638_s24 + $0x9] sm:$0xff]  ;;  %v3014_v36 = vld [vmem:[%s5910_s1 + $0x278] sm:$0xff] }
  0x19   : > { %3659 = vmatpush3.msra.mxu1 %v373_v9  ;;  %3604 = vmatprep.subr.mxu0 %v2993_v10  ;;  %v362_v31 = vld [vmem:[%s5910_s1] sm:$0xff]  ;;  %v200_v35 = vld [vmem:[%s4638_s24 + $0x8] sm:$0xff]  ;;  %v3030_v37 = vld [vmem:[%s5910_s1 + $0xf8] sm:$0xff] }
  0x1a   : > { %3660 = vmatprep.subr.mxu1 %v372_v11  ;;  %3605 = vmatpush3.msra.mxu0 %v2993_v10  ;;  %v247_v32 = vld [vmem:[%s4638_s24 + $0x1] sm:$0xff]  ;;  %v3013_v38 = vld [vmem:[%s5910_s1 + $0x270] sm:$0xff]  ;;  %v250_v42 = vld [vmem:[%s4638_s24 + $0x19] sm:$0xff] }
  0x1b   : > { %3661 = vmatpush3.msra.mxu1 %v372_v11  ;;  %3606 = vmatprep.subr.mxu0 %v2992_v12  ;;  %v199_v33 = vld [vmem:[%s4638_s24] sm:$0xff]  ;;  %v3029_v39 = vld [vmem:[%s5910_s1 + $0xf0] sm:$0xff]  ;;  %v202_v43 = vld [vmem:[%s4638_s24 + $0x18] sm:$0xff] }
  0x1c   : > { %3662 = vmatprep.subr.mxu1 %v371_v13  ;;  %3607 = vmatpush3.msra.mxu0 %v2992_v12  ;;  %v249_v40 = vld [vmem:[%s4638_s24 + $0x11] sm:$0xff]  ;;  %v3012_v44 = vld [vmem:[%s5910_s1 + $0x268] sm:$0xff]  ;;  %v3011_v46 = vld [vmem:[%s5910_s1 + $0x260] sm:$0xff] }
  0x1d   : > { %3663 = vmatpush3.msra.mxu1 %v371_v13  ;;  %3608 = vmatprep.subr.mxu0 %v2991_v14  ;;  %v201_v41 = vld [vmem:[%s4638_s24 + $0x10] sm:$0xff]  ;;  %v3028_v45 = vld [vmem:[%s5910_s1 + $0xe8] sm:$0xff]  ;;  %v3027_v47 = vld [vmem:[%s5910_s1 + $0xe0] sm:$0xff] }
  0x1e   : > { %3664 = vmatprep.subr.mxu1 %v370_v15  ;;  %3609 = vmatpush3.msra.mxu0 %v2991_v14  ;;  %v4679_v48 = vld [vmem:[%s4638_s24 + $0x29] sm:$0xff]  ;;  %v4685_v50 = vld [vmem:[%s4638_s24 + $0x31] sm:$0xff]  ;;  %v4707_v56 = vld [vmem:[%s4638_s24 + $0x39] sm:$0xff] }
  0x1f   : > { %3665 = vmatpush3.msra.mxu1 %v370_v15  ;;  %3610 = vmatprep.subr.mxu0 %v2990_v16  ;;  %v4682_v49 = vld [vmem:[%s4638_s24 + $0x28] sm:$0xff]  ;;  %v4688_v51 = vld [vmem:[%s4638_s24 + $0x30] sm:$0xff]  ;;  %v3010_v52 = vld [vmem:[%s5910_s1 + $0x258] sm:$0xff] }
  0x20   : > { %3666 = vmatprep.subr.mxu1 %v369_v17  ;;  %3611 = vmatpush3.msra.mxu0 %v2990_v16  ;;  %v3026_v53 = vld [vmem:[%s5910_s1 + $0xd8] sm:$0xff]  ;;  %v3009_v54 = vld [vmem:[%s5910_s1 + $0x250] sm:$0xff]  ;;  %v4713_v58 = vld [vmem:[%s4638_s24 + $0x41] sm:$0xff] }
  0x21   : > { %3667 = vmatpush3.msra.mxu1 %v369_v17  ;;  %3612 = vmatprep.subr.mxu0 %v2989_v18  ;;  %v3025_v55 = vld [vmem:[%s5910_s1 + $0xd0] sm:$0xff]  ;;  %v4710_v57 = vld [vmem:[%s4638_s24 + $0x38] sm:$0xff]  ;;  %v4716_v59 = vld [vmem:[%s4638_s24 + $0x40] sm:$0xff] }
  0x22   : > { %3668 = vmatprep.subr.mxu1 %v368_v19  ;;  %3613 = vmatpush3.msra.mxu0 %v2989_v18  ;;  %v3008_v60 = vld [vmem:[%s5910_s1 + $0x248] sm:$0xff]  ;;  %v3007_v62 = vld [vmem:[%s5910_s1 + $0x240] sm:$0xff]  ;;  %v4735_v0 = vld [vmem:[%s4638_s24 + $0x51] sm:$0xff] }
  0x23   : > { %3669 = vmatpush3.msra.mxu1 %v368_v19  ;;  %3614 = vmatprep.subr.mxu0 %v2988_v20  ;;  %v3024_v61 = vld [vmem:[%s5910_s1 + $0xc8] sm:$0xff]  ;;  %v3023_v63 = vld [vmem:[%s5910_s1 + $0xc0] sm:$0xff]  ;;  %v4738_v1 = vld [vmem:[%s4638_s24 + $0x50] sm:$0xff] }
  0x24   : > { %3670 = vmatprep.subr.mxu1 %v367_v21  ;;  %3615 = vmatpush3.msra.mxu0 %v2988_v20  ;;  %v4741_v2 = vld [vmem:[%s4638_s24 + $0x59] sm:$0xff]  ;;  %v3005_v6 = vld [vmem:[%s5910_s1 + $0x230] sm:$0xff]  ;;  %v4763_v8 = vld [vmem:[%s4638_s24 + $0x61] sm:$0xff] }
  0x25   : > { %3671 = vmatpush3.msra.mxu1 %v367_v21  ;;  %3616 = vmatprep.subr.mxu0 %v2987_v22  ;;  %v4744_v3 = vld [vmem:[%s4638_s24 + $0x58] sm:$0xff]  ;;  %v3021_v7 = vld [vmem:[%s5910_s1 + $0xb0] sm:$0xff]  ;;  %v4766_v9 = vld [vmem:[%s4638_s24 + $0x60] sm:$0xff] }
  0x26   : > { %3672 = vmatprep.subr.mxu1 %v366_v23  ;;  %3617 = vmatpush3.msra.mxu0 %v2987_v22  ;;  %v3006_v4 = vld [vmem:[%s5910_s1 + $0x238] sm:$0xff]  ;;  %v4769_v10 = vld [vmem:[%s4638_s24 + $0x69] sm:$0xff]  ;;  %v3003_v14 = vld [vmem:[%s5910_s1 + $0x220] sm:$0xff] }
  0x27   : > { %3673 = vmatpush3.msra.mxu1 %v366_v23  ;;  %3618 = vmatprep.subr.mxu0 %v2986_v24  ;;  %v3022_v5 = vld [vmem:[%s5910_s1 + $0xb8] sm:$0xff]  ;;  %v4772_v11 = vld [vmem:[%s4638_s24 + $0x68] sm:$0xff]  ;;  %v3019_v15 = vld [vmem:[%s5910_s1 + $0xa0] sm:$0xff] }
  0x28   : > { %3674 = vmatprep.subr.mxu1 %v365_v25  ;;  %3619 = vmatpush3.msra.mxu0 %v2986_v24  ;;  %v3004_v12 = vld [vmem:[%s5910_s1 + $0x228] sm:$0xff]  ;;  %v4791_v16 = vld [vmem:[%s4638_s24 + $0x79] sm:$0xff]  ;;  %v3001_v22 = vld [vmem:[%s5910_s1 + $0x210] sm:$0xff] }
  0x29   : > { %3675 = vmatpush3.msra.mxu1 %v365_v25  ;;  %3620 = vmatprep.subr.mxu0 %v2985_v26  ;;  %v3020_v13 = vld [vmem:[%s5910_s1 + $0xa8] sm:$0xff]  ;;  %v4794_v17 = vld [vmem:[%s4638_s24 + $0x78] sm:$0xff]  ;;  %v4800_v19 = vld [vmem:[%s4638_s24 + $0x80] sm:$0xff] }
  0x2a   : > { %3676 = vmatprep.subr.mxu1 %v364_v27  ;;  %3621 = vmatpush3.msra.mxu0 %v2985_v26  ;;  %v4797_v18 = vld [vmem:[%s4638_s24 + $0x81] sm:$0xff]  ;;  %v3002_v20 = vld [vmem:[%s5910_s1 + $0x218] sm:$0xff]  ;;  %v3017_v23 = vld [vmem:[%s5910_s1 + $0x90] sm:$0xff] }
  0x2b   : > { %3677 = vmatpush3.msra.mxu1 %v364_v27  ;;  %3622 = vmatprep.subr.mxu0 %v2984_v28  ;;  %v3018_v21 = vld [vmem:[%s5910_s1 + $0x98] sm:$0xff]  ;;  %v4819_v24 = vld [vmem:[%s4638_s24 + $0x89] sm:$0xff] }
  0x2c   : > { %3678 = vmatprep.subr.mxu1 %v363_v29  ;;  %3623 = vmatpush3.msra.mxu0 %v2984_v28  ;;  %v4822_v25 = vld [vmem:[%s4638_s24 + $0x88] sm:$0xff]  ;;  %v4825_v26 = vld [vmem:[%s4638_s24 + $0x91] sm:$0xff] }
  0x2d   : > { %3679 = vmatpush3.msra.mxu1 %v363_v29  ;;  %3624 = vmatprep.subr.mxu0 %v2983_v30  ;;  %v4828_v27 = vld [vmem:[%s4638_s24 + $0x90] sm:$0xff]  ;;  %v3000_v28 = vld [vmem:[%s5910_s1 + $0x208] sm:$0xff] }
  0x2e   : > { %3680 = vmatprep.subr.mxu1 %v362_v31  ;;  %3625 = vmatpush3.msra.mxu0 %v2983_v30  ;;  %v3016_v29 = vld [vmem:[%s5910_s1 + $0x88] sm:$0xff]  ;;  %v2999_v30 = vld [vmem:[%s5910_s1 + $0x200] sm:$0xff] }
  0x2f   : > { %3626 = vmatprep.mubr.f32.mxu0 %v247_v32  ;;  %3681 = vmatpush3.msra.mxu1 %v362_v31  ;;  %v3015_v31 = vld [vmem:[%s5910_s1 + $0x80] sm:$0xff] }
  0x30   : > { %3682 = vmatprep.mubr.f32.mxu1 %v199_v33  ;;  %3627 = vmatmul.mubr.f32.vlgmr.msra.gmra.mxu0 %v248_v34  ;;  %v296_v32 = vld [vmem:[%s4638_s24 + $0x2] sm:$0xff]  ;;  %v297_v33 = vld [vmem:[%s4638_s24 + $0xa] sm:$0xff]  ;;  %v3046_v34 = vld [vmem:[%s5910_s1 + $0x1f8] sm:$0xff] }
  0x31   : > { %3683 = vmatmul.mubr.f32.vlgmr.msra.gmra.mxu1 %v200_v35  ;;  %3706 = vmatprep.subr.mxu0 %v3014_v36  ;;  %v3062_v35 = vld [vmem:[%s5910_s1 + $0x2f8] sm:$0xff] }
  0x32   : > { %3762 = vmatprep.subr.mxu1 %v3030_v37  ;;  %3707 = vmatpush3.msra.mxu0 %v3014_v36  ;;  %v3045_v36 = vld [vmem:[%s5910_s1 + $0x1f0] sm:$0xff] }
  0x33   : > { %3763 = vmatpush3.msra.mxu1 %v3030_v37  ;;  %3708 = vmatprep.subr.mxu0 %v3013_v38  ;;  %v3061_v37 = vld [vmem:[%s5910_s1 + $0x2f0] sm:$0xff] }
  0x34   : > { %3764 = vmatprep.subr.mxu1 %v3029_v39  ;;  %3629 = vmatprep.mubr.f32.mxu0 %v249_v40  ;;  %v3044_v40 = vld [vmem:[%s5910_s1 + $0x1e8] sm:$0xff] }
  0x35   : > { %3685 = vmatprep.mubr.f32.mxu1 %v201_v41  ;;  %3709 = vmatpush3.msra.mxu0 %v3013_v38  ;;  %v298_v38 = vld [vmem:[%s4638_s24 + $0x12] sm:$0xff]  ;;  %v3060_v41 = vld [vmem:[%s5910_s1 + $0x2e8] sm:$0xff] }
  0x36   : > { %3765 = vmatpush3.msra.mxu1 %v3029_v39  ;;  %3630 = vmatmul.mubr.f32.gmra.mxu0 %v250_v42  ;;  %v299_v39 = vld [vmem:[%s4638_s24 + $0x1a] sm:$0xff] }
  0x37   : > { %3686 = vmatmul.mubr.f32.gmra.mxu1 %v202_v43  ;;  %3710 = vmatprep.subr.mxu0 %v3012_v44  ;;  %v3043_v42 = vld [vmem:[%s5910_s1 + $0x1e0] sm:$0xff] }
  0x38   : > { %3766 = vmatprep.subr.mxu1 %v3028_v45  ;;  %3711 = vmatpush3.msra.mxu0 %v3012_v44  ;;  %v3059_v43 = vld [vmem:[%s5910_s1 + $0x2e0] sm:$0xff]  ;;  %v4879_v44 = vld [vmem:[%s4638_s24 + $0x2a] sm:$0xff] }
  0x39   : > { %3767 = vmatpush3.msra.mxu1 %v3028_v45  ;;  %3712 = vmatprep.subr.mxu0 %v3011_v46  ;;  %v4882_v45 = vld [vmem:[%s4638_s24 + $0x32] sm:$0xff] }
  0x3a   : > { %3768 = vmatprep.subr.mxu1 %v3027_v47  ;;  %3632 = vmatprep.mubr.f32.mxu0 %v4679_v48 }
  0x3b   : > { %3688 = vmatprep.mubr.f32.mxu1 %v4682_v49  ;;  %3713 = vmatpush3.msra.mxu0 %v3011_v46  ;;  %v3042_v46 = vld [vmem:[%s5910_s1 + $0x1d8] sm:$0xff] }
  0x3c   : > { %3769 = vmatpush3.msra.mxu1 %v3027_v47  ;;  %3633 = vmatmul.mubr.f32.gmra.mxu0 %v4685_v50  ;;  %v3058_v47 = vld [vmem:[%s5910_s1 + $0x2d8] sm:$0xff] }
  0x3d   : > { %3689 = vmatmul.mubr.f32.gmra.mxu1 %v4688_v51  ;;  %3714 = vmatprep.subr.mxu0 %v3010_v52 }
  0x3e   : > { %3770 = vmatprep.subr.mxu1 %v3026_v53  ;;  %3715 = vmatpush3.msra.mxu0 %v3010_v52  ;;  %v3041_v52 = vld [vmem:[%s5910_s1 + $0x1d0] sm:$0xff] }
  0x3f   : > { %3771 = vmatpush3.msra.mxu1 %v3026_v53  ;;  %3716 = vmatprep.subr.mxu0 %v3009_v54  ;;  %v3057_v53 = vld [vmem:[%s5910_s1 + $0x2d0] sm:$0xff] }
  0x40   : > { %3772 = vmatprep.subr.mxu1 %v3025_v55  ;;  %3635 = vmatprep.mubr.f32.mxu0 %v4707_v56 }
  0x41   : > { %3691 = vmatprep.mubr.f32.mxu1 %v4710_v57  ;;  %3717 = vmatpush3.msra.mxu0 %v3009_v54  ;;  %v4901_v54 = vld [vmem:[%s4638_s24 + $0x3a] sm:$0xff] }
  0x42   : > { %3773 = vmatpush3.msra.mxu1 %v3025_v55  ;;  %3636 = vmatmul.mubr.f32.gmra.mxu0 %v4713_v58  ;;  %v4904_v55 = vld [vmem:[%s4638_s24 + $0x42] sm:$0xff] }
  0x43   : > { %3692 = vmatmul.mubr.f32.gmra.mxu1 %v4716_v59  ;;  %3718 = vmatprep.subr.mxu0 %v3008_v60 }
  0x44   : > { %3774 = vmatprep.subr.mxu1 %v3024_v61  ;;  %3719 = vmatpush3.msra.mxu0 %v3008_v60  ;;  %v3040_v60 = vld [vmem:[%s5910_s1 + $0x1c8] sm:$0xff] }
  0x45   : > { %3775 = vmatpush3.msra.mxu1 %v3024_v61  ;;  %3720 = vmatprep.subr.mxu0 %v3007_v62  ;;  %v3056_v61 = vld [vmem:[%s5910_s1 + $0x2c8] sm:$0xff] }
  0x46   : > { %3776 = vmatprep.subr.mxu1 %v3023_v63  ;;  %3638 = vmatprep.mubr.f32.mxu0 %v4735_v0 }
  0x47   : > { %3694 = vmatprep.mubr.f32.mxu1 %v4738_v1  ;;  %3721 = vmatpush3.msra.mxu0 %v3007_v62  ;;  %v3039_v62 = vld [vmem:[%s5910_s1 + $0x1c0] sm:$0xff] }
  0x48   : > { %3777 = vmatpush3.msra.mxu1 %v3023_v63  ;;  %3639 = vmatmul.mubr.f32.gmra.mxu0 %v4741_v2  ;;  %v3055_v63 = vld [vmem:[%s5910_s1 + $0x2c0] sm:$0xff] }
  0x49   : > { %3695 = vmatmul.mubr.f32.gmra.mxu1 %v4744_v3  ;;  %3722 = vmatprep.subr.mxu0 %v3006_v4 }
  0x4a   : > { %3778 = vmatprep.subr.mxu1 %v3022_v5  ;;  %3723 = vmatpush3.msra.mxu0 %v3006_v4  ;;  %v4923_v4 = vld [vmem:[%s4638_s24 + $0x52] sm:$0xff] }
  0x4b   : > { %3779 = vmatpush3.msra.mxu1 %v3022_v5  ;;  %3724 = vmatprep.subr.mxu0 %v3005_v6  ;;  %v4926_v5 = vld [vmem:[%s4638_s24 + $0x5a] sm:$0xff] }
  0x4c   : > { %3780 = vmatprep.subr.mxu1 %v3021_v7  ;;  %3641 = vmatprep.mubr.f32.mxu0 %v4763_v8 }
  0x4d   : > { %3697 = vmatprep.mubr.f32.mxu1 %v4766_v9  ;;  %3725 = vmatpush3.msra.mxu0 %v3005_v6  ;;  %v3038_v6 = vld [vmem:[%s5910_s1 + $0x1b8] sm:$0xff] }
  0x4e   : > { %3781 = vmatpush3.msra.mxu1 %v3021_v7  ;;  %3642 = vmatmul.mubr.f32.gmra.mxu0 %v4769_v10  ;;  %v3054_v7 = vld [vmem:[%s5910_s1 + $0x2b8] sm:$0xff] }
  0x4f   : > { %3698 = vmatmul.mubr.f32.gmra.mxu1 %v4772_v11  ;;  %3726 = vmatprep.subr.mxu0 %v3004_v12 }
  0x50   : > { %3782 = vmatprep.subr.mxu1 %v3020_v13  ;;  %3727 = vmatpush3.msra.mxu0 %v3004_v12  ;;  %v3037_v12 = vld [vmem:[%s5910_s1 + $0x1b0] sm:$0xff] }
  0x51   : > { %3783 = vmatpush3.msra.mxu1 %v3020_v13  ;;  %3728 = vmatprep.subr.mxu0 %v3003_v14  ;;  %v3053_v13 = vld [vmem:[%s5910_s1 + $0x2b0] sm:$0xff] }
  0x52   : > { %3784 = vmatprep.subr.mxu1 %v3019_v15  ;;  %3644 = vmatprep.mubr.f32.mxu0 %v4791_v16 }
  0x53   : > { %3700 = vmatprep.mubr.f32.mxu1 %v4794_v17  ;;  %3729 = vmatpush3.msra.mxu0 %v3003_v14  ;;  %v4945_v14 = vld [vmem:[%s4638_s24 + $0x62] sm:$0xff] }
  0x54   : > { %3785 = vmatpush3.msra.mxu1 %v3019_v15  ;;  %3645 = vmatmul.mubr.f32.gmra.mxu0 %v4797_v18  ;;  %v4948_v15 = vld [vmem:[%s4638_s24 + $0x6a] sm:$0xff] }
  0x55   : > { %3701 = vmatmul.mubr.f32.gmra.mxu1 %v4800_v19  ;;  %3730 = vmatprep.subr.mxu0 %v3002_v20 }
  0x56   : > { %3786 = vmatprep.subr.mxu1 %v3018_v21  ;;  %3731 = vmatpush3.msra.mxu0 %v3002_v20  ;;  %v3036_v20 = vld [vmem:[%s5910_s1 + $0x1a8] sm:$0xff] }
  0x57   : > { %3787 = vmatpush3.msra.mxu1 %v3018_v21  ;;  %3732 = vmatprep.subr.mxu0 %v3001_v22  ;;  %v3052_v21 = vld [vmem:[%s5910_s1 + $0x2a8] sm:$0xff] }
  0x58   : > { %3788 = vmatprep.subr.mxu1 %v3017_v23  ;;  %3647 = vmatprep.mubr.f32.mxu0 %v4819_v24 }
  0x59   : > { %3703 = vmatprep.mubr.f32.mxu1 %v4822_v25  ;;  %3733 = vmatpush3.msra.mxu0 %v3001_v22  ;;  %v3035_v22 = vld [vmem:[%s5910_s1 + $0x1a0] sm:$0xff] }
  0x5a   : > { %3789 = vmatpush3.msra.mxu1 %v3017_v23  ;;  %3648 = vmatmul.mubr.f32.gmra.mxu0 %v4825_v26  ;;  %v3051_v23 = vld [vmem:[%s5910_s1 + $0x2a0] sm:$0xff] }
  0x5b   : > { %3704 = vmatmul.mubr.f32.gmra.mxu1 %v4828_v27  ;;  %3734 = vmatprep.subr.mxu0 %v3000_v28 }
  0x5c   : > { %3790 = vmatprep.subr.mxu1 %v3016_v29  ;;  %3735 = vmatpush3.msra.mxu0 %v3000_v28  ;;  %v4967_v28 = vld [vmem:[%s4638_s24 + $0x7a] sm:$0xff] }
  0x5d   : > { %3791 = vmatpush3.msra.mxu1 %v3016_v29  ;;  %3736 = vmatprep.subr.mxu0 %v2999_v30  ;;  %v4970_v29 = vld [vmem:[%s4638_s24 + $0xa0] sm:$0xff] }
  0x5e   : > { %3792 = vmatprep.subr.mxu1 %v3015_v31  ;;  %3737 = vmatpush3.msra.mxu0 %v2999_v30  ;;  %v4973_v30 = vld [vmem:[%s4638_s24 + $0x82] sm:$0xff] }
  0x5f   : > { %3738 = vmatprep.mubr.f32.mxu0 %v296_v32  ;;  %3793 = vmatpush3.msra.mxu1 %v3015_v31  ;;  %v4976_v31 = vld [vmem:[%s4638_s24 + $0xa8] sm:$0xff]  ;;  %v3034_v32 = vld [vmem:[%s5910_s1 + $0x198] sm:$0xff] }
  0x60   : > { %3794 = vmatprep.mubr.f32.mxu1 %v4682_v49  ;;  %3739 = vmatmul.mubr.f32.vlgmr.msra.gmra.mxu0 %v297_v33  ;;  %v3050_v33 = vld [vmem:[%s5910_s1 + $0x298] sm:$0xff] }
  0x61   : > { %3795 = vmatmul.mubr.f32.vlgmr.msra.gmra.mxu1 %v4688_v51  ;;  %3818 = vmatprep.subr.mxu0 %v3046_v34 }
  0x62   : > { %3874 = vmatprep.subr.mxu1 %v3062_v35  ;;  %3819 = vmatpush3.msra.mxu0 %v3046_v34  ;;  %v3033_v34 = vld [vmem:[%s5910_s1 + $0x190] sm:$0xff] }
  0x63   : > { %3875 = vmatpush3.msra.mxu1 %v3062_v35  ;;  %3820 = vmatprep.subr.mxu0 %v3045_v36  ;;  %v3049_v35 = vld [vmem:[%s5910_s1 + $0x290] sm:$0xff] }
  0x64   : > { %3876 = vmatprep.subr.mxu1 %v3061_v37  ;;  %3741 = vmatprep.mubr.f32.mxu0 %v298_v38  ;;  %v5001_v38 = vld [vmem:[%s4638_s24 + $0x92] sm:$0xff] }
  0x65   : > { %3797 = vmatprep.mubr.f32.mxu1 %v4710_v57  ;;  %3821 = vmatpush3.msra.mxu0 %v3045_v36  ;;  %v4995_v36 = vld [vmem:[%s4638_s24 + $0x8a] sm:$0xff] }
  0x66   : > { %3877 = vmatpush3.msra.mxu1 %v3061_v37  ;;  %3742 = vmatmul.mubr.f32.gmra.mxu0 %v299_v39  ;;  %v4998_v37 = vld [vmem:[%s4638_s24 + $0xb0] sm:$0xff]  ;;  %v5004_v39 = vld [vmem:[%s4638_s24 + $0xb8] sm:$0xff] }
  0x67   : > { %3798 = vmatmul.mubr.f32.gmra.mxu1 %v4716_v59  ;;  %3822 = vmatprep.subr.mxu0 %v3044_v40 }
  0x68   : > { %3878 = vmatprep.subr.mxu1 %v3060_v41  ;;  %3823 = vmatpush3.msra.mxu0 %v3044_v40  ;;  %v3032_v40 = vld [vmem:[%s5910_s1 + $0x188] sm:$0xff] }
  0x69   : > { %3879 = vmatpush3.msra.mxu1 %v3060_v41  ;;  %3824 = vmatprep.subr.mxu0 %v3043_v42  ;;  %v3048_v41 = vld [vmem:[%s5910_s1 + $0x288] sm:$0xff] }
  0x6a   : > { %3880 = vmatprep.subr.mxu1 %v3059_v43  ;;  %3744 = vmatprep.mubr.f32.mxu0 %v4879_v44 }
  0x6b   : > { %3800 = vmatprep.mubr.f32.mxu1 %v4738_v1  ;;  %3825 = vmatpush3.msra.mxu0 %v3043_v42  ;;  %v3031_v42 = vld [vmem:[%s5910_s1 + $0x180] sm:$0xff] }
  0x6c   : > { %3881 = vmatpush3.msra.mxu1 %v3059_v43  ;;  %3745 = vmatmul.mubr.f32.gmra.mxu0 %v4882_v45  ;;  %v3047_v43 = vld [vmem:[%s5910_s1 + $0x280] sm:$0xff] }
  0x6d   : > { %3801 = vmatmul.mubr.f32.gmra.mxu1 %v4744_v3  ;;  %3826 = vmatprep.subr.mxu0 %v3042_v46 }
  0x6e   : > { %3882 = vmatprep.subr.mxu1 %v3058_v47  ;;  %3827 = vmatpush3.msra.mxu0 %v3042_v46  ;;  %v3111_v46 = vld [vmem:[%s5910_s1 + $0x478] sm:$0xff] }
  0x6f   : > { %3883 = vmatpush3.msra.mxu1 %v3058_v47  ;;  %3828 = vmatprep.subr.mxu0 %v3041_v52  ;;  %v3095_v47 = vld [vmem:[%s5910_s1 + $0x378] sm:$0xff] }
  0x70   : > { %3884 = vmatprep.subr.mxu1 %v3057_v53  ;;  %3747 = vmatprep.mubr.f32.mxu0 %v4901_v54 }
  0x71   : > { %3803 = vmatprep.mubr.f32.mxu1 %v4766_v9  ;;  %3829 = vmatpush3.msra.mxu0 %v3041_v52  ;;  %v3110_v52 = vld [vmem:[%s5910_s1 + $0x470] sm:$0xff] }
  0x72   : > { %3885 = vmatpush3.msra.mxu1 %v3057_v53  ;;  %3748 = vmatmul.mubr.f32.gmra.mxu0 %v4904_v55  ;;  %v3094_v53 = vld [vmem:[%s5910_s1 + $0x370] sm:$0xff] }
  0x73   : > { %3804 = vmatmul.mubr.f32.gmra.mxu1 %v4772_v11  ;;  %3830 = vmatprep.subr.mxu0 %v3040_v60 }
  0x74   : > { %3886 = vmatprep.subr.mxu1 %v3056_v61  ;;  %3831 = vmatpush3.msra.mxu0 %v3040_v60  ;;  %v3109_v60 = vld [vmem:[%s5910_s1 + $0x468] sm:$0xff] }
  0x75   : > { %3887 = vmatpush3.msra.mxu1 %v3056_v61  ;;  %3832 = vmatprep.subr.mxu0 %v3039_v62  ;;  %v3093_v61 = vld [vmem:[%s5910_s1 + $0x368] sm:$0xff] }
  0x76   : > { %3888 = vmatprep.subr.mxu1 %v3055_v63  ;;  %3750 = vmatprep.mubr.f32.mxu0 %v4923_v4 }
  0x77   : > { %3806 = vmatprep.mubr.f32.mxu1 %v4794_v17  ;;  %3833 = vmatpush3.msra.mxu0 %v3039_v62  ;;  %v3108_v62 = vld [vmem:[%s5910_s1 + $0x460] sm:$0xff] }
  0x78   : > { %3889 = vmatpush3.msra.mxu1 %v3055_v63  ;;  %3751 = vmatmul.mubr.f32.gmra.mxu0 %v4926_v5  ;;  %v3092_v63 = vld [vmem:[%s5910_s1 + $0x360] sm:$0xff] }
  0x79   : > { %3807 = vmatmul.mubr.f32.gmra.mxu1 %v4800_v19  ;;  %3834 = vmatprep.subr.mxu0 %v3038_v6 }
  0x7a   : > { %3890 = vmatprep.subr.mxu1 %v3054_v7  ;;  %3835 = vmatpush3.msra.mxu0 %v3038_v6  ;;  %v3107_v6 = vld [vmem:[%s5910_s1 + $0x458] sm:$0xff] }
  0x7b   : > { %3891 = vmatpush3.msra.mxu1 %v3054_v7  ;;  %3836 = vmatprep.subr.mxu0 %v3037_v12  ;;  %v3091_v7 = vld [vmem:[%s5910_s1 + $0x358] sm:$0xff] }
  0x7c   : > { %3892 = vmatprep.subr.mxu1 %v3053_v13  ;;  %3753 = vmatprep.mubr.f32.mxu0 %v4945_v14 }
  0x7d   : > { %3809 = vmatprep.mubr.f32.mxu1 %v4822_v25  ;;  %3837 = vmatpush3.msra.mxu0 %v3037_v12  ;;  %v3106_v12 = vld [vmem:[%s5910_s1 + $0x450] sm:$0xff] }
  0x7e   : > { %3893 = vmatpush3.msra.mxu1 %v3053_v13  ;;  %3754 = vmatmul.mubr.f32.gmra.mxu0 %v4948_v15  ;;  %v3090_v13 = vld [vmem:[%s5910_s1 + $0x350] sm:$0xff] }
  0x7f   : > { %3810 = vmatmul.mubr.f32.gmra.mxu1 %v4828_v27  ;;  %3838 = vmatprep.subr.mxu0 %v3036_v20 }
  0x80   : > { %3894 = vmatprep.subr.mxu1 %v3052_v21  ;;  %3839 = vmatpush3.msra.mxu0 %v3036_v20  ;;  %v3105_v20 = vld [vmem:[%s5910_s1 + $0x448] sm:$0xff] }
  0x81   : > { %3895 = vmatpush3.msra.mxu1 %v3052_v21  ;;  %3840 = vmatprep.subr.mxu0 %v3035_v22  ;;  %v3089_v21 = vld [vmem:[%s5910_s1 + $0x348] sm:$0xff] }
  0x82   : > { %3896 = vmatprep.subr.mxu1 %v3051_v23  ;;  %3756 = vmatprep.mubr.f32.mxu0 %v4967_v28 }
  0x83   : > { %3812 = vmatprep.mubr.f32.mxu1 %v4970_v29  ;;  %3841 = vmatpush3.msra.mxu0 %v3035_v22  ;;  %v3104_v22 = vld [vmem:[%s5910_s1 + $0x440] sm:$0xff] }
  0x84   : > { %3897 = vmatpush3.msra.mxu1 %v3051_v23  ;;  %3757 = vmatmul.mubr.f32.gmra.mxu0 %v4973_v30  ;;  %v3088_v23 = vld [vmem:[%s5910_s1 + $0x340] sm:$0xff] }
  0x85   : > { %3813 = vmatmul.mubr.f32.gmra.mxu1 %v4976_v31  ;;  %3842 = vmatprep.subr.mxu0 %v3034_v32 }
  0x86   : > { %3898 = vmatprep.subr.mxu1 %v3050_v33  ;;  %3843 = vmatpush3.msra.mxu0 %v3034_v32  ;;  %v3103_v32 = vld [vmem:[%s5910_s1 + $0x438] sm:$0xff] }
  0x87   : > { %3899 = vmatpush3.msra.mxu1 %v3050_v33  ;;  %3844 = vmatprep.subr.mxu0 %v3033_v34  ;;  %v3087_v33 = vld [vmem:[%s5910_s1 + $0x338] sm:$0xff] }
  0x88   : > { %3900 = vmatprep.subr.mxu1 %v3049_v35  ;;  %3759 = vmatprep.mubr.f32.mxu0 %v4995_v36 }
  0x89   : > { %3815 = vmatprep.mubr.f32.mxu1 %v4998_v37  ;;  %3845 = vmatpush3.msra.mxu0 %v3033_v34  ;;  %v3102_v34 = vld [vmem:[%s5910_s1 + $0x430] sm:$0xff] }
  0x8a   : > { %3901 = vmatpush3.msra.mxu1 %v3049_v35  ;;  %3760 = vmatmul.mubr.f32.gmra.mxu0 %v5001_v38  ;;  %v3086_v35 = vld [vmem:[%s5910_s1 + $0x330] sm:$0xff] }
  0x8b   : > { %3816 = vmatmul.mubr.f32.gmra.mxu1 %v5004_v39  ;;  %3846 = vmatprep.subr.mxu0 %v3032_v40 }
  0x8c   : > { %3902 = vmatprep.subr.mxu1 %v3048_v41  ;;  %3847 = vmatpush3.msra.mxu0 %v3032_v40  ;;  %v3101_v40 = vld [vmem:[%s5910_s1 + $0x428] sm:$0xff] }
  0x8d   : > { %3903 = vmatpush3.msra.mxu1 %v3048_v41  ;;  %3848 = vmatprep.subr.mxu0 %v3031_v42  ;;  %v3085_v41 = vld [vmem:[%s5910_s1 + $0x328] sm:$0xff] }
  0x8e   : > { %3904 = vmatprep.subr.mxu1 %v3047_v43  ;;  %3849 = vmatpush3.msra.mxu0 %v3031_v42  ;;  %v3100_v42 = vld [vmem:[%s5910_s1 + $0x420] sm:$0xff] }
  0x8f   : > { %3850 = vmatprep.mubr.f32.mxu0 %v4679_v48  ;;  %3905 = vmatpush3.msra.mxu1 %v3047_v43  ;;  %v3084_v43 = vld [vmem:[%s5910_s1 + $0x320] sm:$0xff] }
  0x90   : > { %3906 = vmatprep.mubr.f32.mxu1 %v4879_v44  ;;  %3851 = vmatmul.mubr.f32.vlgmr.msra.gmra.mxu0 %v4685_v50 }
  0x91   : > { %3907 = vmatmul.mubr.f32.vlgmr.msra.gmra.mxu1 %v4882_v45  ;;  %3930 = vmatprep.subr.mxu0 %v3111_v46 }
  0x92   : > { %3986 = vmatprep.subr.mxu1 %v3095_v47  ;;  %3931 = vmatpush3.msra.mxu0 %v3111_v46  ;;  %v5119_v46 = vld [vmem:[%s4638_s24 + $0xa1] sm:$0xff] }
  0x93   : > { %3987 = vmatpush3.msra.mxu1 %v3095_v47  ;;  %3932 = vmatprep.subr.mxu0 %v3110_v52  ;;  %v5122_v47 = vld [vmem:[%s4638_s24 + $0xa2] sm:$0xff] }
  0x94   : > { %3988 = vmatprep.subr.mxu1 %v3094_v53  ;;  %3853 = vmatprep.mubr.f32.mxu0 %v4707_v56 }
  0x95   : > { %3909 = vmatprep.mubr.f32.mxu1 %v4901_v54  ;;  %3933 = vmatpush3.msra.mxu0 %v3110_v52  ;;  %v5125_v52 = vld [vmem:[%s4638_s24 + $0xa9] sm:$0xff] }
  0x96   : > { %3989 = vmatpush3.msra.mxu1 %v3094_v53  ;;  %3854 = vmatmul.mubr.f32.gmra.mxu0 %v4713_v58  ;;  %v5128_v53 = vld [vmem:[%s4638_s24 + $0xaa] sm:$0xff] }
  0x97   : > { %3910 = vmatmul.mubr.f32.gmra.mxu1 %v4904_v55  ;;  %3934 = vmatprep.subr.mxu0 %v3109_v60 }
  0x98   : > { %3990 = vmatprep.subr.mxu1 %v3093_v61  ;;  %3935 = vmatpush3.msra.mxu0 %v3109_v60  ;;  %v3099_v60 = vld [vmem:[%s5910_s1 + $0x418] sm:$0xff] }
  0x99   : > { %3991 = vmatpush3.msra.mxu1 %v3093_v61  ;;  %3936 = vmatprep.subr.mxu0 %v3108_v62  ;;  %v3083_v61 = vld [vmem:[%s5910_s1 + $0x318] sm:$0xff] }
  0x9a   : > { %3992 = vmatprep.subr.mxu1 %v3092_v63  ;;  %3856 = vmatprep.mubr.f32.mxu0 %v4735_v0 }
  0x9b   : > { %3912 = vmatprep.mubr.f32.mxu1 %v4923_v4  ;;  %3937 = vmatpush3.msra.mxu0 %v3108_v62  ;;  %v3098_v62 = vld [vmem:[%s5910_s1 + $0x410] sm:$0xff] }
  0x9c   : > { %3993 = vmatpush3.msra.mxu1 %v3092_v63  ;;  %3857 = vmatmul.mubr.f32.gmra.mxu0 %v4741_v2  ;;  %v3082_v63 = vld [vmem:[%s5910_s1 + $0x310] sm:$0xff] }
  0x9d   : > { %3913 = vmatmul.mubr.f32.gmra.mxu1 %v4926_v5  ;;  %3938 = vmatprep.subr.mxu0 %v3107_v6 }
  0x9e   : > { %3994 = vmatprep.subr.mxu1 %v3091_v7  ;;  %3939 = vmatpush3.msra.mxu0 %v3107_v6  ;;  %v5147_v6 = vld [vmem:[%s4638_s24 + $0xb1] sm:$0xff] }
  0x9f   : > { %3995 = vmatpush3.msra.mxu1 %v3091_v7  ;;  %3940 = vmatprep.subr.mxu0 %v3106_v12  ;;  %v5150_v7 = vld [vmem:[%s4638_s24 + $0xb2] sm:$0xff] }
  0xa0   : > { %3996 = vmatprep.subr.mxu1 %v3090_v13  ;;  %3859 = vmatprep.mubr.f32.mxu0 %v4763_v8 }
  0xa1   : > { %3915 = vmatprep.mubr.f32.mxu1 %v4945_v14  ;;  %3941 = vmatpush3.msra.mxu0 %v3106_v12  ;;  %v5153_v12 = vld [vmem:[%s4638_s24 + $0xb9] sm:$0xff] }
  0xa2   : > { %3997 = vmatpush3.msra.mxu1 %v3090_v13  ;;  %3860 = vmatmul.mubr.f32.gmra.mxu0 %v4769_v10  ;;  %v5156_v13 = vld [vmem:[%s4638_s24 + $0xba] sm:$0xff] }
  0xa3   : > { %3916 = vmatmul.mubr.f32.gmra.mxu1 %v4948_v15  ;;  %3942 = vmatprep.subr.mxu0 %v3105_v20 }
  0xa4   : > { %3998 = vmatprep.subr.mxu1 %v3089_v21  ;;  %3943 = vmatpush3.msra.mxu0 %v3105_v20  ;;  %v3097_v20 = vld [vmem:[%s5910_s1 + $0x408] sm:$0xff] }
  0xa5   : > { %3999 = vmatpush3.msra.mxu1 %v3089_v21  ;;  %3944 = vmatprep.subr.mxu0 %v3104_v22  ;;  %v3081_v21 = vld [vmem:[%s5910_s1 + $0x308] sm:$0xff] }
  0xa6   : > { %4000 = vmatprep.subr.mxu1 %v3088_v23  ;;  %3862 = vmatprep.mubr.f32.mxu0 %v4791_v16 }
  0xa7   : > { %3918 = vmatprep.mubr.f32.mxu1 %v4967_v28  ;;  %3945 = vmatpush3.msra.mxu0 %v3104_v22  ;;  %v3096_v22 = vld [vmem:[%s5910_s1 + $0x400] sm:$0xff] }
  0xa8   : > { %4001 = vmatpush3.msra.mxu1 %v3088_v23  ;;  %3863 = vmatmul.mubr.f32.gmra.mxu0 %v4797_v18  ;;  %v3080_v23 = vld [vmem:[%s5910_s1 + $0x300] sm:$0xff] }
  0xa9   : > { %3919 = vmatmul.mubr.f32.gmra.mxu1 %v4973_v30  ;;  %3946 = vmatprep.subr.mxu0 %v3103_v32 }
  0xaa   : > { %4002 = vmatprep.subr.mxu1 %v3087_v33  ;;  %3947 = vmatpush3.msra.mxu0 %v3103_v32  ;;  %v3127_v32 = vld [vmem:[%s5910_s1 + $0x578] sm:$0xff] }
  0xab   : > { %4003 = vmatpush3.msra.mxu1 %v3087_v33  ;;  %3948 = vmatprep.subr.mxu0 %v3102_v34  ;;  %v3143_v33 = vld [vmem:[%s5910_s1 + $0x3f8] sm:$0xff] }
  0xac   : > { %4004 = vmatprep.subr.mxu1 %v3086_v35  ;;  %3865 = vmatprep.mubr.f32.mxu0 %v4819_v24 }
  0xad   : > { %3921 = vmatprep.mubr.f32.mxu1 %v4995_v36  ;;  %3949 = vmatpush3.msra.mxu0 %v3102_v34  ;;  %v3126_v34 = vld [vmem:[%s5910_s1 + $0x570] sm:$0xff] }
  0xae   : > { %4005 = vmatpush3.msra.mxu1 %v3086_v35  ;;  %3866 = vmatmul.mubr.f32.gmra.mxu0 %v4825_v26  ;;  %v3137_v35 = vld [vmem:[%s5910_s1 + $0x3c8] sm:$0xff] }
  0xaf   : > { %3922 = vmatmul.mubr.f32.gmra.mxu1 %v5001_v38  ;;  %3950 = vmatprep.subr.mxu0 %v3101_v40 }
  0xb0   : > { %4006 = vmatprep.subr.mxu1 %v3085_v41  ;;  %3951 = vmatpush3.msra.mxu0 %v3101_v40  ;;  %v3120_v40 = vld [vmem:[%s5910_s1 + $0x540] sm:$0xff] }
  0xb1   : > { %4007 = vmatpush3.msra.mxu1 %v3085_v41  ;;  %3952 = vmatprep.subr.mxu0 %v3100_v42  ;;  %v3135_v41 = vld [vmem:[%s5910_s1 + $0x3b8] sm:$0xff] }
  0xb2   : > { %4008 = vmatprep.subr.mxu1 %v3084_v43  ;;  %3868 = vmatprep.mubr.f32.mxu0 %v5119_v46 }
  0xb3   : > { %3924 = vmatprep.mubr.f32.mxu1 %v5122_v47  ;;  %3953 = vmatpush3.msra.mxu0 %v3100_v42  ;;  %v3118_v42 = vld [vmem:[%s5910_s1 + $0x530] sm:$0xff] }
  0xb4   : > { %4009 = vmatpush3.msra.mxu1 %v3084_v43  ;;  %3869 = vmatmul.mubr.f32.gmra.mxu0 %v5125_v52  ;;  %v3133_v43 = vld [vmem:[%s5910_s1 + $0x3a8] sm:$0xff] }
  0xb5   : > { %3925 = vmatmul.mubr.f32.gmra.mxu1 %v5128_v53  ;;  %3954 = vmatprep.subr.mxu0 %v3099_v60 }
  0xb6   : > { %4010 = vmatprep.subr.mxu1 %v3083_v61  ;;  %3955 = vmatpush3.msra.mxu0 %v3099_v60  ;;  %v3116_v60 = vld [vmem:[%s5910_s1 + $0x520] sm:$0xff] }
  0xb7   : > { %4011 = vmatpush3.msra.mxu1 %v3083_v61  ;;  %3956 = vmatprep.subr.mxu0 %v3098_v62  ;;  %v3131_v61 = vld [vmem:[%s5910_s1 + $0x398] sm:$0xff] }
  0xb8   : > { %4012 = vmatprep.subr.mxu1 %v3082_v63  ;;  %3871 = vmatprep.mubr.f32.mxu0 %v5147_v6 }
  0xb9   : > { %3927 = vmatprep.mubr.f32.mxu1 %v5150_v7  ;;  %3957 = vmatpush3.msra.mxu0 %v3098_v62  ;;  %v3114_v62 = vld [vmem:[%s5910_s1 + $0x510] sm:$0xff] }
  0xba   : > { %4013 = vmatpush3.msra.mxu1 %v3082_v63  ;;  %3872 = vmatmul.mubr.f32.gmra.mxu0 %v5153_v12  ;;  %v3130_v63 = vld [vmem:[%s5910_s1 + $0x390] sm:$0xff] }
  0xbb   : > { %3928 = vmatmul.mubr.f32.gmra.mxu1 %v5156_v13  ;;  %3958 = vmatprep.subr.mxu0 %v3097_v20 }
  0xbc   : > { %4014 = vmatprep.subr.mxu1 %v3081_v21  ;;  %3959 = vmatpush3.msra.mxu0 %v3097_v20  ;;  %v3113_v20 = vld [vmem:[%s5910_s1 + $0x508] sm:$0xff] }
  0xbd   : > { %4015 = vmatpush3.msra.mxu1 %v3081_v21  ;;  %3960 = vmatprep.subr.mxu0 %v3096_v22  ;;  %v3129_v21 = vld [vmem:[%s5910_s1 + $0x388] sm:$0xff] }
  0xbe   : > { %4016 = vmatprep.subr.mxu1 %v3080_v23  ;;  %3961 = vmatpush3.msra.mxu0 %v3096_v22  ;;  %v3112_v22 = vld [vmem:[%s5910_s1 + $0x500] sm:$0xff] }
  0xbf   : > { %3962 = vmatprep.mubr.f32.mxu0 %v4679_v48  ;;  %4017 = vmatpush3.msra.mxu1 %v3080_v23  ;;  %v3142_v48 = vld [vmem:[%s5910_s1 + $0x3f0] sm:$0xff]  ;;  %v3128_v23 = vld [vmem:[%s5910_s1 + $0x380] sm:$0xff] }
  0xc0   : > { %4018 = vmatprep.mubr.f32.mxu1 %v4682_v49  ;;  %3963 = vmatmul.mubr.f32.vlgmr.msra.gmra.mxu0 %v4685_v50  ;;  %v3125_v49 = vld [vmem:[%s5910_s1 + $0x568] sm:$0xff] }
  0xc1   : > { %4019 = vmatmul.mubr.f32.vlgmr.msra.gmra.mxu1 %v4688_v51  ;;  %4042 = vmatprep.subr.mxu0 %v3127_v32  ;;  %v3141_v50 = vld [vmem:[%s5910_s1 + $0x3e8] sm:$0xff]  ;;  %v3124_v51 = vld [vmem:[%s5910_s1 + $0x560] sm:$0xff] }
  0xc2   : > { %4098 = vmatprep.subr.mxu1 %v3143_v33  ;;  %4043 = vmatpush3.msra.mxu0 %v3127_v32  ;;  %v3159_v32 = vld [vmem:[%s5910_s1 + $0x4f8] sm:$0xff] }
  0xc3   : > { %4099 = vmatpush3.msra.mxu1 %v3143_v33  ;;  %4044 = vmatprep.subr.mxu0 %v3126_v34  ;;  %v3175_v33 = vld [vmem:[%s5910_s1 + $0x5f8] sm:$0xff] }
  0xc4   : > { %3965 = vmatprep.mubr.f32.mxu0 %v4707_v56  ;;  %4021 = vmatprep.mubr.f32.mxu1 %v4710_v57  ;;  %v3140_v56 = vld [vmem:[%s5910_s1 + $0x3e0] sm:$0xff]  ;;  %v3123_v57 = vld [vmem:[%s5910_s1 + $0x558] sm:$0xff] }
  0xc5   : > { %4045 = vmatpush3.msra.mxu0 %v3126_v34  ;;  %4100 = vmatprep.subr.mxu1 %v3142_v48  ;;  %v3158_v34 = vld [vmem:[%s5910_s1 + $0x4f0] sm:$0xff] }
  0xc6   : > { %3966 = vmatmul.mubr.f32.gmra.mxu0 %v4713_v58  ;;  %4022 = vmatmul.mubr.f32.gmra.mxu1 %v4716_v59  ;;  %v3139_v58 = vld [vmem:[%s5910_s1 + $0x3d8] sm:$0xff]  ;;  %v3122_v59 = vld [vmem:[%s5910_s1 + $0x550] sm:$0xff] }
  0xc7   : > { %4046 = vmatprep.subr.mxu0 %v3125_v49  ;;  %4101 = vmatpush3.msra.mxu1 %v3142_v48 }
  0xc8   : > { %4047 = vmatpush3.msra.mxu0 %v3125_v49  ;;  %4102 = vmatprep.subr.mxu1 %v3141_v50 }
  0xc9   : > { %4048 = vmatprep.subr.mxu0 %v3124_v51  ;;  %4103 = vmatpush3.msra.mxu1 %v3141_v50 }
  0xca   : > { %3968 = vmatprep.mubr.f32.mxu0 %v4735_v0  ;;  %4024 = vmatprep.mubr.f32.mxu1 %v4738_v1  ;;  %v3138_v0 = vld [vmem:[%s5910_s1 + $0x3d0] sm:$0xff] }
  0xcb   : > { %4049 = vmatpush3.msra.mxu0 %v3124_v51  ;;  %4104 = vmatprep.subr.mxu1 %v3140_v56  ;;  %v3156_v51 = vld [vmem:[%s5910_s1 + $0x4e0] sm:$0xff] }
  0xcc   : > { %3969 = vmatmul.mubr.f32.gmra.mxu0 %v4741_v2  ;;  %4025 = vmatmul.mubr.f32.gmra.mxu1 %v4744_v3  ;;  %v3121_v2 = vld [vmem:[%s5910_s1 + $0x548] sm:$0xff] }
  0xcd   : > { %4050 = vmatprep.subr.mxu0 %v3123_v57  ;;  %4105 = vmatpush3.msra.mxu1 %v3140_v56 }
  0xce   : > { %4051 = vmatpush3.msra.mxu0 %v3123_v57  ;;  %4106 = vmatprep.subr.mxu1 %v3139_v58 }
  0xcf   : > { %4052 = vmatprep.subr.mxu0 %v3122_v59  ;;  %4107 = vmatpush3.msra.mxu1 %v3139_v58  ;;  %v3155_v58 = vld [vmem:[%s5910_s1 + $0x4d8] sm:$0xff] }
  0xd0   : > { %3971 = vmatprep.mubr.f32.mxu0 %v4763_v8  ;;  %4027 = vmatprep.mubr.f32.mxu1 %v4766_v9  ;;  %v3136_v8 = vld [vmem:[%s5910_s1 + $0x3c0] sm:$0xff] }
  0xd1   : > { %4053 = vmatpush3.msra.mxu0 %v3122_v59  ;;  %4108 = vmatprep.subr.mxu1 %v3138_v0  ;;  %v3154_v59 = vld [vmem:[%s5910_s1 + $0x4d0] sm:$0xff] }
  0xd2   : > { %3972 = vmatmul.mubr.f32.gmra.mxu0 %v4769_v10  ;;  %4028 = vmatmul.mubr.f32.gmra.mxu1 %v4772_v11  ;;  %v3119_v10 = vld [vmem:[%s5910_s1 + $0x538] sm:$0xff] }
  0xd3   : > { %4054 = vmatprep.subr.mxu0 %v3121_v2  ;;  %4109 = vmatpush3.msra.mxu1 %v3138_v0 }
  0xd4   : > { %4055 = vmatpush3.msra.mxu0 %v3121_v2  ;;  %4110 = vmatprep.subr.mxu1 %v3137_v35 }
  0xd5   : > { %4056 = vmatprep.subr.mxu0 %v3120_v40  ;;  %4111 = vmatpush3.msra.mxu1 %v3137_v35  ;;  %v3153_v35 = vld [vmem:[%s5910_s1 + $0x4c8] sm:$0xff] }
  0xd6   : > { %3974 = vmatprep.mubr.f32.mxu0 %v4791_v16  ;;  %4030 = vmatprep.mubr.f32.mxu1 %v4794_v17  ;;  %v3134_v16 = vld [vmem:[%s5910_s1 + $0x3b0] sm:$0xff] }
  0xd7   : > { %4057 = vmatpush3.msra.mxu0 %v3120_v40  ;;  %4112 = vmatprep.subr.mxu1 %v3136_v8  ;;  %v3152_v40 = vld [vmem:[%s5910_s1 + $0x4c0] sm:$0xff] }
  0xd8   : > { %3975 = vmatmul.mubr.f32.gmra.mxu0 %v4797_v18  ;;  %4031 = vmatmul.mubr.f32.gmra.mxu1 %v4800_v19  ;;  %v3117_v18 = vld [vmem:[%s5910_s1 + $0x528] sm:$0xff] }
  0xd9   : > { %4058 = vmatprep.subr.mxu0 %v3119_v10  ;;  %4113 = vmatpush3.msra.mxu1 %v3136_v8 }
  0xda   : > { %4059 = vmatpush3.msra.mxu0 %v3119_v10  ;;  %4114 = vmatprep.subr.mxu1 %v3135_v41 }
  0xdb   : > { %4060 = vmatprep.subr.mxu0 %v3118_v42  ;;  %4115 = vmatpush3.msra.mxu1 %v3135_v41 }
  0xdc   : > { %3977 = vmatprep.mubr.f32.mxu0 %v4819_v24  ;;  %4033 = vmatprep.mubr.f32.mxu1 %v4822_v25  ;;  %v3132_v24 = vld [vmem:[%s5910_s1 + $0x3a0] sm:$0xff] }
  0xdd   : > { %4061 = vmatpush3.msra.mxu0 %v3118_v42  ;;  %4116 = vmatprep.subr.mxu1 %v3134_v16 }
  0xde   : > { %3978 = vmatmul.mubr.f32.gmra.mxu0 %v4825_v26  ;;  %4034 = vmatmul.mubr.f32.gmra.mxu1 %v4828_v27  ;;  %v3115_v26 = vld [vmem:[%s5910_s1 + $0x518] sm:$0xff] }
  0xdf   : > { %4062 = vmatprep.subr.mxu0 %v3117_v18  ;;  %4117 = vmatpush3.msra.mxu1 %v3134_v16  ;;  %v3151_v16 = vld [vmem:[%s5910_s1 + $0x4b8] sm:$0xff] }
  0xe0   : > { %4063 = vmatpush3.msra.mxu0 %v3117_v18  ;;  %4118 = vmatprep.subr.mxu1 %v3133_v43  ;;  %v3150_v18 = vld [vmem:[%s5910_s1 + $0x4b0] sm:$0xff] }
  0xe1   : > { %4064 = vmatprep.subr.mxu0 %v3116_v60  ;;  %4119 = vmatpush3.msra.mxu1 %v3133_v43 }
  0xe2   : > { %3980 = vmatprep.mubr.f32.mxu0 %v5119_v46  ;;  %4036 = vmatprep.mubr.f32.mxu1 %v4970_v29 }
  0xe3   : > { %4065 = vmatpush3.msra.mxu0 %v3116_v60  ;;  %4120 = vmatprep.subr.mxu1 %v3132_v24 }
  0xe4   : > { %3981 = vmatmul.mubr.f32.gmra.mxu0 %v5125_v52  ;;  %4037 = vmatmul.mubr.f32.gmra.mxu1 %v4976_v31 }
  0xe5   : > { %4066 = vmatprep.subr.mxu0 %v3115_v26  ;;  %4121 = vmatpush3.msra.mxu1 %v3132_v24  ;;  %v3166_v24 = vld [vmem:[%s5910_s1 + $0x5b0] sm:$0xff] }
  0xe6   : > { %4067 = vmatpush3.msra.mxu0 %v3115_v26  ;;  %4122 = vmatprep.subr.mxu1 %v3131_v61 }
  0xe7   : > { %4068 = vmatprep.subr.mxu0 %v3114_v62  ;;  %4123 = vmatpush3.msra.mxu1 %v3131_v61 }
  0xe8   : > { %3983 = vmatprep.mubr.f32.mxu0 %v5147_v6  ;;  %4039 = vmatprep.mubr.f32.mxu1 %v4998_v37 }
  0xe9   : > { %4069 = vmatpush3.msra.mxu0 %v3114_v62  ;;  %4124 = vmatprep.subr.mxu1 %v3130_v63  ;;  %v3149_v62 = vld [vmem:[%s5910_s1 + $0x4a8] sm:$0xff] }
  0xea   : > { %3984 = vmatmul.mubr.f32.gmra.mxu0 %v5153_v12  ;;  %4040 = vmatmul.mubr.f32.gmra.mxu1 %v5004_v39 }
  0xeb   : > { %4070 = vmatprep.subr.mxu0 %v3113_v20  ;;  %4125 = vmatpush3.msra.mxu1 %v3130_v63 }
  0xec   : > { %4071 = vmatpush3.msra.mxu0 %v3113_v20  ;;  %4126 = vmatprep.subr.mxu1 %v3129_v21  ;;  %v3148_v20 = vld [vmem:[%s5910_s1 + $0x4a0] sm:$0xff] }
  0xed   : > { %4072 = vmatprep.subr.mxu0 %v3112_v22  ;;  %4127 = vmatpush3.msra.mxu1 %v3129_v21 }
  0xee   : > { %4073 = vmatpush3.msra.mxu0 %v3112_v22  ;;  %4074 = vmatprep.mubr.f32.mxu0 %v4879_v44  ;;  %v3174_v44 = vld [vmem:[%s5910_s1 + $0x5f0] sm:$0xff] }
  0xef   : > { %4128 = vmatprep.subr.mxu1 %v3128_v23  ;;  %4075 = vmatmul.mubr.f32.vlgmr.msra.gmra.mxu0 %v4882_v45 }
  0xf0   : > { %4129 = vmatpush3.msra.mxu1 %v3128_v23  ;;  %4130 = vmatprep.mubr.f32.mxu1 %v4738_v1  ;;  %v5314_v48 = vpop.f32.mrf.mxu0  ;;  %v3157_v1 = vld [vmem:[%s5910_s1 + $0x4e8] sm:$0xff] }
  0xf1   : > { %4154 = vmatprep.subr.mxu0 %v3159_v32  ;;  %v5316_v49 = vpop.f32.mrf.mxu1  ;;  %4131 = vmatmul.mubr.f32.vlgmr.msra.gmra.mxu1 %v4744_v3  ;;  %v3173_v3 = vld [vmem:[%s5910_s1 + $0x5e8] sm:$0xff] }
  0xf2   : > { %4155 = vmatpush3.msra.mxu0 %v3159_v32  ;;  %4210 = vmatprep.subr.mxu1 %v3175_v33  ;;  %v5322_v45 = vpop.f32.mrf.mxu0  ;;  %v219_v32 = vld [vmem:[%s4638_s24 + $0xc8] sm:$0xff] }
  0xf3   : > { %4156 = vmatprep.subr.mxu0 %v3158_v34  ;;  %v5324_v50 = vpop.f32.mrf.mxu1  ;;  %4211 = vmatpush3.msra.mxu1 %v3175_v33 }
  0xf4   : > { %4077 = vmatprep.mubr.f32.mxu0 %v4901_v54  ;;  %4157 = vmatpush3.msra.mxu0 %v3158_v34 }
  0xf5   : > { %4212 = vmatprep.subr.mxu1 %v3174_v44  ;;  %4078 = vmatmul.mubr.f32.gmra.mxu0 %v4904_v55 }
  0xf6   : > { %4133 = vmatprep.mubr.f32.mxu1 %v4766_v9  ;;  %4158 = vmatprep.subr.mxu0 %v3157_v1  ;;  %v5338_v54 = vpop.f32.mrf.mxu0  ;;  %v3172_v9 = vld [vmem:[%s5910_s1 + $0x5e0] sm:$0xff] }
  0xf7   : > { %4213 = vmatpush3.msra.mxu1 %v3174_v44  ;;  %v5340_v56 = vpop.f32.mrf.mxu1  ;;  %4159 = vmatpush3.msra.mxu0 %v3157_v1  ;;  %v3147_v44 = vld [vmem:[%s5910_s1 + $0x498] sm:$0xff]  ;;  %v220_v1 = vld [vmem:[%s4638_s24 + $0xd0] sm:$0xff] }
  0xf8   : > { %4134 = vmatmul.mubr.f32.gmra.mxu1 %v4772_v11  ;;  %4214 = vmatprep.subr.mxu1 %v3173_v3  ;;  %v5346_v55 = vpop.f32.mrf.mxu0  ;;  %v3171_v11 = vld [vmem:[%s5910_s1 + $0x5d8] sm:$0xff] }
  0xf9   : > { %4160 = vmatprep.subr.mxu0 %v3156_v51  ;;  %v5348_v57 = vpop.f32.mrf.mxu1  ;;  %4215 = vmatpush3.msra.mxu1 %v3173_v3  ;;  %v3163_v3 = vld [vmem:[%s5910_s1 + $0x598] sm:$0xff] }
  0xfa   : > { %4080 = vmatprep.mubr.f32.mxu0 %v4923_v4  ;;  %4161 = vmatpush3.msra.mxu0 %v3156_v51  ;;  %v3146_v51 = vld [vmem:[%s5910_s1 + $0x490] sm:$0xff] }
  0xfb   : > { %4216 = vmatprep.subr.mxu1 %v3172_v9  ;;  %4081 = vmatmul.mubr.f32.gmra.mxu0 %v4926_v5 }
  0xfc   : > { %4136 = vmatprep.mubr.f32.mxu1 %v4794_v17  ;;  %4162 = vmatprep.subr.mxu0 %v3155_v58  ;;  %v5362_v4 = vpop.f32.mrf.mxu0  ;;  %v3170_v17 = vld [vmem:[%s5910_s1 + $0x5d0] sm:$0xff] }
  0xfd   : > { %4217 = vmatpush3.msra.mxu1 %v3172_v9  ;;  %v5364_v0 = vpop.f32.mrf.mxu1  ;;  %4163 = vmatpush3.msra.mxu0 %v3155_v58 }
  0xfe   : > { %4137 = vmatmul.mubr.f32.gmra.mxu1 %v4800_v19  ;;  %4218 = vmatprep.subr.mxu1 %v3171_v11  ;;  %v5370_v5 = vpop.f32.mrf.mxu0  ;;  %v3169_v19 = vld [vmem:[%s5910_s1 + $0x5c8] sm:$0xff] }
  0xff   : > { %4164 = vmatprep.subr.mxu0 %v3154_v59  ;;  %v5372_v2 = vpop.f32.mrf.mxu1  ;;  %4219 = vmatpush3.msra.mxu1 %v3171_v11  ;;  %v3162_v11 = vld [vmem:[%s5910_s1 + $0x590] sm:$0xff] }
 0x100   : > { %4083 = vmatprep.mubr.f32.mxu0 %v4945_v14  ;;  %4165 = vmatpush3.msra.mxu0 %v3154_v59 }
 0x101   : > { %4220 = vmatprep.subr.mxu1 %v3170_v17  ;;  %4084 = vmatmul.mubr.f32.gmra.mxu0 %v4948_v15 }
 0x102   : > { %4139 = vmatprep.mubr.f32.mxu1 %v4822_v25  ;;  %4166 = vmatprep.subr.mxu0 %v3153_v35  ;;  %v5386_v8 = vpop.f32.mrf.mxu0  ;;  %v3168_v25 = vld [vmem:[%s5910_s1 + $0x5c0] sm:$0xff] }
 0x103   : > { %4221 = vmatpush3.msra.mxu1 %v3170_v17  ;;  %v5388_v10 = vpop.f32.mrf.mxu1  ;;  %4167 = vmatpush3.msra.mxu0 %v3153_v35  ;;  %v221_v17 = vld [vmem:[%s4638_s24 + $0xd8] sm:$0xff] }
 0x104   : > { %4140 = vmatmul.mubr.f32.gmra.mxu1 %v4828_v27  ;;  %4222 = vmatprep.subr.mxu1 %v3169_v19  ;;  %v5394_v41 = vpop.f32.mrf.mxu0  ;;  %v3167_v27 = vld [vmem:[%s5910_s1 + $0x5b8] sm:$0xff] }
 0x105   : > { %4168 = vmatprep.subr.mxu0 %v3152_v40  ;;  %v5396_v42 = vpop.f32.mrf.mxu1  ;;  %4223 = vmatpush3.msra.mxu1 %v3169_v19 }
 0x106   : > { %4086 = vmatprep.mubr.f32.mxu0 %v4967_v28  ;;  %4169 = vmatpush3.msra.mxu0 %v3152_v40  ;;  %v3145_v40 = vld [vmem:[%s5910_s1 + $0x488] sm:$0xff] }
 0x107   : > { %4224 = vmatprep.subr.mxu1 %v3168_v25  ;;  %4087 = vmatmul.mubr.f32.gmra.mxu0 %v4973_v30 }
 0x108   : > { %4142 = vmatprep.mubr.f32.mxu1 %v4970_v29  ;;  %4170 = vmatprep.subr.mxu0 %v3151_v16  ;;  %v3640_v43 = vpop.f32.mrf.mxu0 }
 0x109   : > { %4225 = vmatpush3.msra.mxu1 %v3168_v25  ;;  %v3696_v60 = vpop.f32.mrf.mxu1  ;;  %4171 = vmatpush3.msra.mxu0 %v3151_v16  ;;  %v222_v16 = vld [vmem:[%s4638_s24 + $0xe0] sm:$0xff] }
 0x10a   : > { %4143 = vmatmul.mubr.f32.gmra.mxu1 %v4976_v31  ;;  %v5414_v29 = vadd.f32 %v3696_v60, %v3640_v43  ;;  %4226 = vmatprep.subr.mxu1 %v3167_v27  ;;  %v517_v26 = vpop.f32.mrf.mxu0  ;;  %v3165_v31 = vld [vmem:[%s5910_s1 + $0x5a8] sm:$0xff] }
 0x10b   : > { %4172 = vmatprep.subr.mxu0 %v3150_v18  ;;  %v662_v61 = vpop.f32.mrf.mxu1  ;;  %4227 = vmatpush3.msra.mxu1 %v3167_v27  ;;  %v3161_v27 = vld [vmem:[%s5910_s1 + $0x588] sm:$0xff] }
 0x10c   : > { %4089 = vmatprep.mubr.f32.mxu0 %v4995_v36  ;;  %v5420_v63 = vadd.f32 %v662_v61, %v517_v26  ;;  %4173 = vmatpush3.msra.mxu0 %v3150_v18  ;;  %v3144_v18 = vld [vmem:[%s5910_s1 + $0x480] sm:$0xff] }
 0x10d   : > { %4228 = vmatprep.subr.mxu1 %v3166_v24  ;;  %4090 = vmatmul.mubr.f32.gmra.mxu0 %v5001_v38 }
 0x10e   : > { %4145 = vmatprep.mubr.f32.mxu1 %v4998_v37  ;;  %4174 = vmatprep.subr.mxu0 %v3149_v62  ;;  %v3643_v21 = vpop.f32.mrf.mxu0  ;;  %v3164_v37 = vld [vmem:[%s5910_s1 + $0x5a0] sm:$0xff] }
 0x10f   : > { %4229 = vmatpush3.msra.mxu1 %v3166_v24  ;;  %v3699_v22 = vpop.f32.mrf.mxu1  ;;  %4175 = vmatpush3.msra.mxu0 %v3149_v62  ;;  %v3160_v24 = vld [vmem:[%s5910_s1 + $0x580] sm:$0xff] }
 0x110   : > { %4146 = vmatmul.mubr.f32.gmra.mxu1 %v5004_v39  ;;  %v5434_v23 = vadd.f32 %v3699_v22, %v3643_v21  ;;  %4230 = vmatprep.subr.mxu1 %v3165_v31  ;;  %v527_v33 = vpop.f32.mrf.mxu0  ;;  %v4436_v21 = vld [vmem:[%s4638_s24 + $0x59] sm:$0xff] }
 0x111   : > { %4176 = vmatprep.subr.mxu0 %v3148_v20  ;;  %v672_v34 = vpop.f32.mrf.mxu1  ;;  %4231 = vmatpush3.msra.mxu1 %v3165_v31  ;;  %v4437_v22 = vld [vmem:[%s4638_s24 + $0x52] sm:$0xff] }
 0x112   : > { %4092 = vmatprep.mubr.f32.mxu0 %v5122_v47  ;;  %v5441_v39 = vadd.f32 %v672_v34, %v527_v33  ;;  %4177 = vmatpush3.msra.mxu0 %v3148_v20  ;;  %v4435_v20 = vld [vmem:[%s4638_s24 + $0x51] sm:$0xff]  ;;  %v4439_v34 = vld [vmem:[%s4638_s24 + $0x5a] sm:$0xff] }
 0x113   : > { %4232 = vmatprep.subr.mxu1 %v3164_v37  ;;  %4093 = vmatmul.mubr.f32.gmra.mxu0 %v5128_v53 }
 0x114   : > { %4148 = vmatprep.mubr.f32.mxu1 %v219_v32  ;;  %4178 = vmatprep.subr.mxu0 %v3147_v44  ;;  %v3646_v9 = vpop.f32.mrf.mxu0 }
 0x115   : > { %4233 = vmatpush3.msra.mxu1 %v3164_v37  ;;  %v3702_v58 = vpop.f32.mrf.mxu1  ;;  %4179 = vmatpush3.msra.mxu0 %v3147_v44  ;;  %v4438_v37 = vld [vmem:[%s4638_s24 + $0x61] sm:$0xff] }
 0x116   : > { %4149 = vmatmul.mubr.f32.gmra.mxu1 %v220_v1  ;;  %v5454_v59 = vadd.f32 %v3702_v58, %v3646_v9  ;;  %4234 = vmatprep.subr.mxu1 %v3163_v3  ;;  %v537_v35 = vpop.f32.mrf.mxu0 }
 0x117   : > { %4180 = vmatprep.subr.mxu0 %v3146_v51  ;;  %v682_v19 = vpop.f32.mrf.mxu1  ;;  %4235 = vmatpush3.msra.mxu1 %v3163_v3  ;;  %v4440_v3 = vld [vmem:[%s4638_s24 + $0x69] sm:$0xff] }
 0x118   : > { %4095 = vmatprep.mubr.f32.mxu0 %v5150_v7  ;;  %v5461_v25 = vadd.f32 %v682_v19, %v537_v35  ;;  %4181 = vmatpush3.msra.mxu0 %v3146_v51  ;;  %v4441_v51 = vld [vmem:[%s4638_s24 + $0x79] sm:$0xff] }
 0x119   : > { %4236 = vmatprep.subr.mxu1 %v3162_v11  ;;  %4096 = vmatmul.mubr.f32.gmra.mxu0 %v5156_v13 }
 0x11a   : > { %4151 = vmatprep.mubr.f32.mxu1 %v221_v17  ;;  %4182 = vmatprep.subr.mxu0 %v3145_v40  ;;  %v3649_v43 = vpop.f32.mrf.mxu0 }
 0x11b   : > { %4237 = vmatpush3.msra.mxu1 %v3162_v11  ;;  %v3705_v60 = vpop.f32.mrf.mxu1  ;;  %4183 = vmatpush3.msra.mxu0 %v3145_v40  ;;  %v4442_v11 = vld [vmem:[%s4638_s24 + $0x81] sm:$0xff] }
 0x11c   : > { %4152 = vmatmul.mubr.f32.gmra.mxu1 %v222_v16  ;;  %v5474_v26 = vadd.f32 %v3705_v60, %v3649_v43  ;;  %4238 = vmatprep.subr.mxu1 %v3161_v27  ;;  %v547_v61 = vpop.f32.mrf.mxu0  ;;  %v319_v60 = vld [vmem:[%s4638_s24 + $0xe2] sm:$0xff] }
 0x11d   : > { %4184 = vmatprep.subr.mxu0 %v3144_v18  ;;  %v692_v62 = vpop.f32.mrf.mxu1  ;;  %4239 = vmatpush3.msra.mxu1 %v3161_v27  ;;  %v318_v27 = vld [vmem:[%s4638_s24 + $0xda] sm:$0xff] }
 0x11e   : > { %4185 = vmatpush3.msra.mxu0 %v3144_v18  ;;  %v5476_v31 = vadd.f32 %v692_v62, %v547_v61  ;;  %4186 = vmatprep.mubr.f32.mxu0 %v4435_v20  ;;  %v270_v18 = vld [vmem:[%s4638_s24 + $0xe1] sm:$0xff] }
 0x11f   : > { %4240 = vmatprep.subr.mxu1 %v3160_v24  ;;  %4187 = vmatmul.mubr.f32.vlgmr.msra.gmra.mxu0 %v4436_v21 }
 0x120   : > { %4241 = vmatpush3.msra.mxu1 %v3160_v24  ;;  %4242 = vmatprep.mubr.f32.mxu1 %v4437_v22  ;;  %v5482_v32 = vpop.f32.mrf.mxu0 }
 0x121   : > { %4189 = vmatprep.mubr.f32.mxu0 %v4438_v37  ;;  %v5484_v33 = vpop.f32.mrf.mxu1  ;;  %4243 = vmatmul.mubr.f32.vlgmr.msra.gmra.mxu1 %v4439_v34 }
 0x122   : > { %4245 = vmatprep.mubr.f32.mxu1 %v4945_v14  ;;  %v5488_v44 = vpop.f32.mrf.mxu0  ;;  %v4443_v14 = vld [vmem:[%s4638_s24 + $0x89] sm:$0xff] }
 0x123   : > { %v5490_v1 = vpop.f32.mrf.mxu1  ;;  %4190 = vmatmul.mubr.f32.gmra.mxu0 %v4440_v3 }
 0x124   : > { %4192 = vmatprep.mubr.f32.mxu0 %v4441_v51  ;;  %v628_v51 = vadd.f32 %v5316_v49, %v5314_v48  ;;  %v633_v49 = vadd.f32 %v5348_v57, %v5346_v55  ;;  %v648_v55 = vadd.f32 %v5364_v0, %v5362_v4 }
 0x125   : > { %4246 = vmatmul.mubr.f32.gmra.mxu1 %v4948_v15  ;;  %v4444_v15 = vld [vmem:[%s4638_s24 + $0x91] sm:$0xff] }
 0x126   : > { %4248 = vmatprep.mubr.f32.mxu1 %v4967_v28  ;;  %v5496_v9 = vpop.f32.mrf.mxu0 }
 0x127   : > { %v5498_v58 = vpop.f32.mrf.mxu1  ;;  %4193 = vmatmul.mubr.f32.gmra.mxu0 %v4442_v11 }
 0x128   : > { %4195 = vmatprep.mubr.f32.mxu0 %v4443_v14  ;;  %v5502_v17 = vpop.f32.mrf.mxu0 }
 0x129   : > { %v5504_v35 = vpop.f32.mrf.mxu1  ;;  %4249 = vmatmul.mubr.f32.gmra.mxu1 %v4973_v30 }
 0x12a   : > { %4251 = vmatprep.mubr.f32.mxu1 %v4995_v36  ;;  %v267_v36 = vld [vmem:[%s4638_s24 + $0xc9] sm:$0xff] }
 0x12b   : > { %4196 = vmatmul.mubr.f32.gmra.mxu0 %v4444_v15  ;;  %v623_v15 = vadd.f32 %v5324_v50, %v5322_v45 }
 0x12c   : > { %4198 = vmatprep.mubr.f32.mxu0 %v5119_v46  ;;  %v5510_v28 = vpop.f32.mrf.mxu0 }
 0x12d   : > { %v5512_v19 = vpop.f32.mrf.mxu1  ;;  %4252 = vmatmul.mubr.f32.gmra.mxu1 %v5001_v38 }
 0x12e   : > { %4254 = vmatprep.mubr.f32.mxu1 %v5122_v47  ;;  %v5516_v40 = vpop.f32.mrf.mxu0  ;;  %v316_v47 = vld [vmem:[%s4638_s24 + $0xca] sm:$0xff] }
 0x12f   : > { %v5518_v30 = vpop.f32.mrf.mxu1  ;;  %4199 = vmatmul.mubr.f32.gmra.mxu0 %v5125_v52  ;;  %v268_v52 = vld [vmem:[%s4638_s24 + $0xd1] sm:$0xff] }
 0x130   : > { %4201 = vmatprep.mubr.f32.mxu0 %v5147_v6 }
 0x131   : > { %4255 = vmatmul.mubr.f32.gmra.mxu1 %v5128_v53  ;;  %v269_v53 = vld [vmem:[%s4638_s24 + $0xd9] sm:$0xff] }
 0x132   : > { %4257 = vmatprep.mubr.f32.mxu1 %v5150_v7  ;;  %v5525_v38 = vpop.f32.mrf.mxu0  ;;  %v317_v7 = vld [vmem:[%s4638_s24 + $0xd2] sm:$0xff] }
 0x133   : > { %v5527_v46 = vpop.f32.mrf.mxu1  ;;  %4202 = vmatmul.mubr.f32.gmra.mxu0 %v5153_v12 }
 0x134   : > { %4204 = vmatprep.mubr.f32.mxu0 %v267_v36  ;;  %v5532_v16 = vpop.f32.mrf.mxu0  ;;  %v880_v36 = vadd.f32 %v5482_v32, %v628_v51 }
 0x135   : > { %v5534_v6 = vpop.f32.mrf.mxu1  ;;  %4258 = vmatmul.mubr.f32.gmra.mxu1 %v5156_v13 }
 0x136   : > { %4260 = vmatprep.mubr.f32.mxu1 %v316_v47  ;;  %v1075_v48 = vadd.f32 %v5484_v33, %v880_v36 }
 0x137   : > { %4205 = vmatmul.mubr.f32.gmra.mxu0 %v268_v52 }
 0x138   : > { %4207 = vmatprep.mubr.f32.mxu0 %v269_v53  ;;  %v5541_v43 = vpop.f32.mrf.mxu0  ;;  %v879_v53 = vadd.f32 %v5488_v44, %v623_v15  ;;  %v5591_v44 = vld [vmem:[%s5911_s2] ss:$0 sm:$0xff] }
 0x139   : > { %v5543_v12 = vpop.f32.mrf.mxu1  ;;  %4261 = vmatmul.mubr.f32.gmra.mxu1 %v317_v7  ;;  %v638_v7 = vadd.f32 %v5340_v56, %v5338_v54 }
 0x13a   : > { %4263 = vmatprep.mubr.f32.mxu1 %v318_v27  ;;  %v5546_v24 = vpop.f32.mrf.mxu0  ;;  %v1074_v45 = vadd.f32 %v5490_v1, %v879_v53 }
 0x13b   : > { %v5548_v61 = vpop.f32.mrf.mxu1  ;;  %4208 = vmatmul.mubr.f32.gmra.mxu0 %v270_v18  ;;  %v882_v50 = vadd.f32 %v5496_v9, %v638_v7  ;;  %v884_v7 = vadd.f32 %v5510_v28, %v648_v55 }
 0x13d   : > { %4264 = vmatmul.mubr.f32.gmra.mxu1 %v319_v60  ;;  %v881_v60 = vadd.f32 %v5502_v17, %v633_v49  ;;  %v1077_v57 = vadd.f32 %v5498_v58, %v882_v50  ;;  %v643_v17 = vadd.f32 %v5372_v2, %v5370_v5  ;;  %v658_v5 = vadd.f32 %v5388_v10, %v5386_v8 }
 0x13e   : > { %v5550_v13 = vpop.f32.mrf.mxu0  ;;  %v1079_v2 = vadd.f32 %v5512_v19, %v884_v7  ;;  %v888_v7 = vadd.f32 %v5541_v43, %v5414_v29 }
 0x13f   : > { %v5552_v62 = vpop.f32.mrf.mxu1  ;;  %v1076_v15 = vadd.f32 %v5504_v35, %v881_v60  ;;  %v883_v4 = vadd.f32 %v5516_v40, %v643_v17 }
 0x140   : > { %v5554_v20 = vpop.f32.mrf.mxu0  ;;  %v1083_v43 = vadd.f32 %v5543_v12, %v888_v7 }
 0x141   : > { %v5556_v21 = vpop.f32.mrf.mxu1  ;;  %v1078_v40 = vadd.f32 %v5518_v30, %v883_v4 }
 0x144   : > { %v5558_v22 = vpop.f32.mrf.mxu0 }
 0x145   : > { %v5560_v37 = vpop.f32.mrf.mxu1 }
 0x146   : > { %v5562_v34 = vpop.f32.mrf.mxu0 }
 0x147   : > { %v5564_v3 = vpop.f32.mrf.mxu1 }
 0x14a   : > { %v5568_v11 = vpop.f32.mrf.mxu0 }
 0x14b   : > { %v5570_v14 = vpop.f32.mrf.mxu1 }
 0x14c   : > { %v5575_v47 = vpop.f32.mrf.mxu0 }
 0x14d   : > { %v5577_v52 = vpop.f32.mrf.mxu1 }
 0x150   : > { %v3852_v27 = vpop.f32.mrf.mxu0 }
 0x151   : > { %v3908_v18 = vpop.f32.mrf.mxu1  ;;  %v1270_v32 = vadd.f32 %v3852_v27, %v1075_v48 }
 0x152   : > { %v1190_v54 = vpop.f32.mrf.mxu0 }
 0x153   : > { %v1385_v56 = vpop.f32.mrf.mxu1  ;;  %v1465_v33 = vadd.f32 %v3908_v18, %v1270_v32  ;;  %v1269_v51 = vadd.f32 %v1190_v54, %v1074_v45  ;;  %v653_v32 = vadd.f32 %v5396_v42, %v5394_v41 }
 0x155   : > { %v1487_v1 = vadd.f32 %v5591_v44, %v1465_v33  ;;  %v1464_v9 = vadd.f32 %v1385_v56, %v1269_v51  ;;  %v886_v56 = vadd.f32 %v5525_v38, %v658_v5  ;;  %v885_v10 = vadd.f32 %v5532_v16, %v653_v32 }
 0x156   : > { %v3855_v36 = vpop.f32.mrf.mxu0  ;;  %v889_v32 = vadd.f32 %v5554_v20, %v5441_v39 }
 0x157   : > { %v3911_v53 = vpop.f32.mrf.mxu1  ;;  %v3065_v48 = vmul.f32 -1.442695, %v1487_v1  ;;  %v1486_v49 = vadd.f32 %v5591_v44, %v1464_v9  ;;  %v1272_v27 = vadd.f32 %v3855_v36, %v1077_v57  ;;  %v1081_v41 = vadd.f32 %v5527_v46, %v886_v56 }
 0x158   : > { %v1200_v0 = vpop.f32.mrf.mxu0 }
 0x159   : > { %v1395_v58 = vpop.f32.mrf.mxu1  ;;  %4307 = vpow2.f32 %v3065_v48  ;;  %v3064_v18 = vmul.f32 -1.442695, %v1486_v49  ;;  %v1467_v45 = vadd.f32 %v3911_v53, %v1272_v27  ;;  %v1271_v50 = vadd.f32 %v1200_v0, %v1076_v15 }
 0x15a   : > { %v1080_v15 = vadd.f32 %v5534_v6, %v885_v10  ;;  %v887_v48 = vadd.f32 %v5546_v24, %v5420_v63  ;;  %v890_v24 = vadd.f32 %v5550_v13, %v5434_v23  ;;  %v1084_v10 = vadd.f32 %v5556_v21, %v889_v32 }
 0x15b   : > { %4309 = vpow2.f32 %v3064_v18  ;;  %v1489_v35 = vadd.f32 %v5591_v44, %v1467_v45  ;;  %v1466_v28 = vadd.f32 %v1395_v58, %v1271_v50 }
 0x15c   : > { %v3858_v60 = vpop.f32.mrf.mxu0  ;;  %v1082_v63 = vadd.f32 %v5548_v61, %v887_v48  ;;  %v1085_v13 = vadd.f32 %v5552_v62, %v890_v24  ;;  %v892_v62 = vadd.f32 %v5558_v22, %v5454_v59  ;;  %v894_v22 = vadd.f32 %v5568_v11, %v5474_v26 }
 0x15d   : > { %v3914_v54 = vpop.f32.mrf.mxu1  ;;  %v3067_v33 = vmul.f32 -1.442695, %v1489_v35  ;;  %v1488_v51 = vadd.f32 %v5591_v44, %v1466_v28  ;;  %v1274_v8 = vadd.f32 %v3858_v60, %v1079_v2  ;;  %v893_v26 = vadd.f32 %v5575_v47, %v5476_v31 }
 0x15e   : > { %v1210_v19 = vpop.f32.mrf.mxu0  ;;  %v1087_v59 = vadd.f32 %v5560_v37, %v892_v62 }
 0x15f   : > { %v1405_v55 = vpop.f32.mrf.mxu1  ;;  %4311 = vpow2.f32 %v3067_v33  ;;  %v3066_v57 = vmul.f32 -1.442695, %v1488_v51  ;;  %v1469_v1 = vadd.f32 %v3914_v54, %v1274_v8  ;;  %v1273_v9 = vadd.f32 %v1210_v19, %v1078_v40 }
 0x161   : > { %4313 = vpow2.f32 %v3066_v57  ;;  %v1491_v42 = vadd.f32 %v5591_v44, %v1469_v1  ;;  %v1468_v30 = vadd.f32 %v1405_v55, %v1273_v9  ;;  %v891_v9 = vadd.f32 %v5562_v34, %v5461_v25 }
 0x162   : > { %v3861_v38 = vpop.f32.mrf.mxu0 }
 0x163   : > { %v3917_v17 = vpop.f32.mrf.mxu1  ;;  %v3069_v36 = vmul.f32 -1.442695, %v1491_v42  ;;  %v1490_v16 = vadd.f32 %v5591_v44, %v1468_v30  ;;  %v1276_v53 = vadd.f32 %v3861_v38, %v1081_v41  ;;  %v1086_v25 = vadd.f32 %v5564_v3, %v891_v9 }
 0x164   : > { %v1220_v46 = vpop.f32.mrf.mxu0 }
 0x165   : > { %v1415_v49 = vpop.f32.mrf.mxu1  ;;  %4315 = vpow2.f32 %v3069_v36  ;;  %v3068_v27 = vmul.f32 -1.442695, %v1490_v16  ;;  %v1471_v4 = vadd.f32 %v3917_v17, %v1276_v53  ;;  %v1275_v0 = vadd.f32 %v1220_v46, %v1080_v15 }
 0x166   : > { %v4308_v58 = vpop.eup %4307 }
 0x167   : > { %v1551_v6 = vadd.f32 1.0, %v4308_v58  ;;  %4317 = vpow2.f32 %v3068_v27  ;;  %v1493_v18 = vadd.f32 %v5591_v44, %v1471_v4  ;;  %v1470_v45 = vadd.f32 %v1415_v49, %v1275_v0 }
 0x168   : > { %v4310_v29 = vpop.eup %4309  ;;  %v3864_v50 = vpop.f32.mrf.mxu0 }
 0x169   : > { %v3920_v5 = vpop.f32.mrf.mxu1  ;;  %4319 = vrcp.f32 %v1551_v6  ;;  %v1550_v2 = vadd.f32 1.0, %v4310_v29  ;;  %v3071_v35 = vmul.f32 -1.442695, %v1493_v18  ;;  %v1492_v28 = vadd.f32 %v5591_v44, %v1470_v45 }
 0x16a   : > { %v1278_v40 = vadd.f32 %v3864_v50, %v1083_v43  ;;  %v1230_v60 = vpop.f32.mrf.mxu0  ;;  %v1089_v29 = vadd.f32 %v5570_v14, %v894_v22 }
 0x16b   : > { %v1425_v54 = vpop.f32.mrf.mxu1  ;;  %4321 = vrcp.f32 %v1550_v2  ;;  %v3070_v12 = vmul.f32 -1.442695, %v1492_v28  ;;  %v1277_v61 = vadd.f32 %v1230_v60, %v1082_v63 }
 0x16c   : > { %v4312_v56 = vpop.eup %4311  ;;  %4323 = vpow2.f32 %v3071_v35  ;;  %v1473_v23 = vadd.f32 %v3920_v5, %v1278_v40  ;;  %v1088_v5 = vadd.f32 %v5577_v52, %v893_v26 }
 0x16d   : > { %v1553_v33 = vadd.f32 1.0, %v4312_v56  ;;  %4325 = vpow2.f32 %v3070_v12  ;;  %v1472_v51 = vadd.f32 %v1425_v54, %v1277_v61 }
 0x16e   : > { %v4314_v8 = vpop.eup %4313  ;;  %v1495_v39 = vadd.f32 %v5591_v44, %v1473_v23  ;;  %v3867_v20 = vpop.f32.mrf.mxu0 }
 0x16f   : > { %v3923_v19 = vpop.f32.mrf.mxu1  ;;  %4327 = vrcp.f32 %v1553_v33  ;;  %v1552_v55 = vadd.f32 1.0, %v4314_v8  ;;  %v1494_v57 = vadd.f32 %v5591_v44, %v1472_v51  ;;  %v1280_v1 = vadd.f32 %v3867_v20, %v1085_v13 }
 0x170   : > { %v3073_v41 = vmul.f32 -1.442695, %v1495_v39  ;;  %v1240_v21 = vpop.f32.mrf.mxu0 }
 0x171   : > { %v1435_v42 = vpop.f32.mrf.mxu1  ;;  %4329 = vrcp.f32 %v1552_v55  ;;  %v3072_v30 = vmul.f32 -1.442695, %v1494_v57  ;;  %v1475_v38 = vadd.f32 %v3923_v19, %v1280_v1  ;;  %v1279_v17 = vadd.f32 %v1240_v21, %v1084_v10 }
 0x172   : > { %v4316_v15 = vpop.eup %4315  ;;  %4331 = vpow2.f32 %v3073_v41 }
 0x173   : > { %v1555_v36 = vadd.f32 1.0, %v4316_v15  ;;  %4333 = vpow2.f32 %v3072_v30  ;;  %v1497_v16 = vadd.f32 %v5591_v44, %v1475_v38  ;;  %v1474_v53 = vadd.f32 %v1435_v42, %v1279_v17 }
 0x174   : > { %v4318_v7 = vpop.eup %4317  ;;  %v3870_v34 = vpop.f32.mrf.mxu0 }
 0x175   : > { %v3926_v48 = vpop.f32.mrf.mxu1  ;;  %4335 = vrcp.f32 %v1555_v36  ;;  %v1554_v46 = vadd.f32 1.0, %v4318_v7  ;;  %v3075_v49 = vmul.f32 -1.442695, %v1497_v16  ;;  %v1496_v37 = vadd.f32 %v5591_v44, %v1474_v53 }
 0x176   : > { %v4320_v27 = vpop.eup %4319  ;;  %v1282_v3 = vadd.f32 %v3870_v34, %v1087_v59  ;;  %v1250_v4 = vpop.f32.mrf.mxu0 }
 0x177   : > { %v1445_v0 = vpop.f32.mrf.mxu1  ;;  %1600 = vst.msk [vmem:[%s5653_s5 + $0x8] sm:$0xff] %vm1598_vm0, %v4320_v27  ;;  %4337 = vrcp.f32 %v1554_v46  ;;  %v3074_v11 = vmul.f32 -1.442695, %v1496_v37  ;;  %v1281_v58 = vadd.f32 %v1250_v4, %v1086_v25 }
 0x178   : > { %v4322_v6 = vpop.eup %4321  ;;  %4339 = vpow2.f32 %v3075_v49  ;;  %v1477_v18 = vadd.f32 %v3926_v48, %v1282_v3 }
 0x179   : > { %v4324_v45 = vpop.eup %4323  ;;  %1599 = vst.msk [vmem:[%s5653_s5] sm:$0xff] %vm1598_vm0, %v4322_v6  ;;  %4341 = vpow2.f32 %v3074_v11  ;;  %v1476_v43 = vadd.f32 %v1445_v0, %v1281_v58 }
 0x17a   : > { %v4326_v63 = vpop.eup %4325  ;;  %v1557_v24 = vadd.f32 1.0, %v4324_v45  ;;  %v1499_v31 = vadd.f32 %v5591_v44, %v1477_v18  ;;  %v3873_v47 = vpop.f32.mrf.mxu0 }
 0x17b   : > { %v3929_v50 = vpop.f32.mrf.mxu1  ;;  %v1556_v2 = vadd.f32 1.0, %v4326_v63  ;;  %v1498_v35 = vadd.f32 %v5591_v44, %v1476_v43  ;;  %v1284_v28 = vadd.f32 %v3873_v47, %v1089_v29 }
 0x17c   : > { %v4328_v32 = vpop.eup %4327  ;;  %4343 = vrcp.f32 %v1557_v24  ;;  %v3077_v14 = vmul.f32 -1.442695, %v1499_v31  ;;  %v1260_v40 = vpop.f32.mrf.mxu0 }
 0x17d   : > { %v1455_v60 = vpop.f32.mrf.mxu1  ;;  %1602 = vst.msk [vmem:[%s5653_s5 + $0x18] sm:$0xff] %vm1598_vm0, %v4328_v32  ;;  %4345 = vrcp.f32 %v1556_v2  ;;  %v3076_v54 = vmul.f32 -1.442695, %v1498_v35  ;;  %v1479_v12 = vadd.f32 %v3929_v50, %v1284_v28  ;;  %v1283_v61 = vadd.f32 %v1260_v40, %v1088_v5 }
 0x17e   : > { %v4330_v56 = vpop.eup %4329  ;;  %4347 = vpow2.f32 %v3077_v14 }
 0x17f   : > { %v4332_v23 = vpop.eup %4331  ;;  %1601 = vst.msk [vmem:[%s5653_s5 + $0x10] sm:$0xff] %vm1598_vm0, %v4330_v56  ;;  %4349 = vpow2.f32 %v3076_v54  ;;  %v1501_v52 = vadd.f32 %v5591_v44, %v1479_v12  ;;  %v1478_v13 = vadd.f32 %v1455_v60, %v1283_v61 }
 0x180   : > { %v4334_v33 = vpop.eup %4333  ;;  %v1559_v51 = vadd.f32 1.0, %v4332_v23  ;;  %v5671_v8 = vpop.f32.mrf.mxu0 }
 0x181   : > { %v5673_v10 = vpop.f32.mrf.mxu1  ;;  %v1558_v39 = vadd.f32 1.0, %v4334_v33  ;;  %v3079_v20 = vmul.f32 -1.442695, %v1501_v52  ;;  %v1500_v19 = vadd.f32 %v5591_v44, %v1478_v13 }
 0x182   : > { %v4336_v55 = vpop.eup %4335  ;;  %4351 = vrcp.f32 %v1559_v51  ;;  %v5676_v57 = vpop.f32.mrf.mxu0 }
 0x183   : > { %v5678_v1 = vpop.f32.mrf.mxu1  ;;  %1604 = vst.msk [vmem:[%s5653_s5 + $0x48] sm:$0xff] %vm1598_vm0, %v4336_v55  ;;  %4353 = vrcp.f32 %v1558_v39  ;;  %v3078_v62 = vmul.f32 -1.442695, %v1500_v19 }
 0x184   : > { %v4338_v9 = vpop.eup %4337  ;;  %4355 = vpow2.f32 %v3079_v20 }
 0x185   : > { %v4340_v41 = vpop.eup %4339  ;;  %1603 = vst.msk [vmem:[%s5653_s5 + $0x40] sm:$0xff] %vm1598_vm0, %v4338_v9  ;;  %4357 = vpow2.f32 %v3078_v62 }
 0x186   : > { %v5684_v21 = vpop.f32.mrf.mxu0  ;;  %v4342_v42 = vpop.eup %4341  ;;  %v1561_v30 = vadd.f32 1.0, %v4340_v41 }
 0x187   : > { %v5686_v38 = vpop.f32.mrf.mxu1  ;;  %v1560_v17 = vadd.f32 1.0, %v4342_v42 }
 0x188   : > { %v5688_v15 = vpop.f32.mrf.mxu0  ;;  %4359 = vrcp.f32 %v1561_v30 }
 0x189   : > { %v5690_v36 = vpop.f32.mrf.mxu1  ;;  %v4344_v16 = vpop.eup %4343  ;;  %4361 = vrcp.f32 %v1560_v17 }
 0x18a   : > { %v4346_v53 = vpop.eup %4345  ;;  %1606 = vst.msk [vmem:[%s5653_s5 + $0x58] sm:$0xff] %vm1598_vm0, %v4344_v16 }
 0x18b   : > { %v4348_v7 = vpop.eup %4347  ;;  %1605 = vst.msk [vmem:[%s5653_s5 + $0x50] sm:$0xff] %vm1598_vm0, %v4346_v53 }
 0x18c   : > { %v5696_v59 = vpop.f32.mrf.mxu0  ;;  %v4350_v25 = vpop.eup %4349  ;;  %v1563_v22 = vadd.f32 1.0, %v4348_v7 }
 0x18d   : > { %v5698_v34 = vpop.f32.mrf.mxu1  ;;  %v1562_v48 = vadd.f32 1.0, %v4350_v25 }
 0x18e   : > { %v5700_v46 = vpop.f32.mrf.mxu0  ;;  %4363 = vrcp.f32 %v1563_v22 }
 0x18f   : > { %v5702_v49 = vpop.f32.mrf.mxu1  ;;  %v4352_v37 = vpop.eup %4351  ;;  %4365 = vrcp.f32 %v1562_v48 }
 0x190   : > { %v4354_v27 = vpop.eup %4353  ;;  %1608 = vst.msk [vmem:[%s5653_s5 + $0x88] sm:$0xff] %vm1598_vm0, %v4352_v37 }
 0x191   : > { %v4356_v3 = vpop.eup %4355  ;;  %1607 = vst.msk [vmem:[%s5653_s5 + $0x80] sm:$0xff] %vm1598_vm0, %v4354_v27 }
 0x192   : > { %v5708_v4 = vpop.f32.mrf.mxu0  ;;  %v4358_v0 = vpop.eup %4357  ;;  %v1565_v26 = vadd.f32 1.0, %v4356_v3 }
 0x193   : > { %v5710_v11 = vpop.f32.mrf.mxu1  ;;  %v1564_v58 = vadd.f32 1.0, %v4358_v0 }
 0x194   : > { %v5712_v6 = vpop.f32.mrf.mxu0  ;;  %4367 = vrcp.f32 %v1565_v26 }
 0x195   : > { %v5714_v18 = vpop.f32.mrf.mxu1  ;;  %v4360_v45 = vpop.eup %4359  ;;  %4369 = vrcp.f32 %v1564_v58 }
 0x196   : > { %v4362_v29 = vpop.eup %4361  ;;  %1610 = vst.msk [vmem:[%s5653_s5 + $0x98] sm:$0xff] %vm1598_vm0, %v4360_v45 }
 0x197   : > { %1609 = vst.msk [vmem:[%s5653_s5 + $0x90] sm:$0xff] %vm1598_vm0, %v4362_v29 }
 0x198   : > { %v5720_v43 = vpop.f32.mrf.mxu0  ;;  %v5722_v63 = vpop.f32.mrf.mxu1 }
 0x19a   : > { %v5724_v24 = vpop.f32.mrf.mxu0  ;;  %v5726_v31 = vpop.f32.mrf.mxu1 }
 0x19b   : > { %v4364_v47 = vpop.eup %4363 }
 0x19c   : > { %v4366_v50 = vpop.eup %4365  ;;  %1612 = vst.msk [vmem:[%s5653_s5 + $0xc8] sm:$0xff] %vm1598_vm0, %v4364_v47 }
 0x19d   : > { %1611 = vst.msk [vmem:[%s5653_s5 + $0xc0] sm:$0xff] %vm1598_vm0, %v4366_v50  ;;  %v1898_v50 = vadd.f32 %v5673_v10, %v5671_v8 }
 0x19e   : > { %v5732_v5 = vpop.f32.mrf.mxu0  ;;  %v5734_v2 = vpop.f32.mrf.mxu1 }
 0x1a0   : > { %v5736_v35 = vpop.f32.mrf.mxu0  ;;  %v5738_v28 = vpop.f32.mrf.mxu1 }
 0x1a1   : > { %v4368_v32 = vpop.eup %4367 }
 0x1a2   : > { %v4370_v14 = vpop.eup %4369  ;;  %1614 = vst.msk [vmem:[%s5653_s5 + $0xd8] sm:$0xff] %vm1598_vm0, %v4368_v32 }
 0x1a3   : > { %1613 = vst.msk [vmem:[%s5653_s5 + $0xd0] sm:$0xff] %vm1598_vm0, %v4370_v14  ;;  %v1893_v14 = vadd.f32 %v5678_v1, %v5676_v57  ;;  %v1918_v1 = vadd.f32 %v5698_v34, %v5696_v59  ;;  %v1923_v34 = vadd.f32 %v5714_v18, %v5712_v6 }
 0x1a4   : > { %v5744_v40 = vpop.f32.mrf.mxu0  ;;  %v5746_v60 = vpop.f32.mrf.mxu1 }
 0x1a6   : > { %v5748_v54 = vpop.f32.mrf.mxu0  ;;  %v5750_v12 = vpop.f32.mrf.mxu1 }
 0x1aa   : > { %v5752_v61 = vpop.f32.mrf.mxu0  ;;  %v5754_v56 = vpop.f32.mrf.mxu1 }
 0x1ab   : > { %5913 = vst [vmem:[#allocation3_spill] sm:$0xff] %v5752_v61  ;;  %5914 = vst [vmem:[#allocation4_spill] sm:$0xff] %v5754_v56 }
 0x1ac   : > { %v5756_v23 = vpop.f32.mrf.mxu0  ;;  %v5758_v52 = vpop.f32.mrf.mxu1 }
 0x1ad   : > { %5915 = vst [vmem:[#allocation5_spill] sm:$0xff] %v5756_v23  ;;  %5916 = vst [vmem:[#allocation6_spill] sm:$0xff] %v5758_v52 }
 0x1af   : > { %v4076_v13 = vpop.f32.mrf.mxu0 }
 0x1b0   : > { %v2150_v52 = vadd.f32 %v4076_v13, %v1898_v50  ;;  %v1913_v13 = vadd.f32 %v5702_v49, %v5700_v46 }
 0x1b1   : > { %v4132_v33 = vpop.f32.mrf.mxu1  ;;  %v2070_v51 = vpop.f32.mrf.mxu0 }
 0x1b2   : > { %v2149_v56 = vadd.f32 %v2070_v51, %v1893_v14  ;;  %v2345_v8 = vadd.f32 %v4132_v33, %v2150_v52 }
 0x1b3   : > { %v2265_v39 = vpop.f32.mrf.mxu1 }
 0x1b4   : > { %v2344_v61 = vadd.f32 %v2265_v39, %v2149_v56 }
 0x1b5   : > { %v4079_v20 = vpop.f32.mrf.mxu0 }
 0x1b7   : > { %v2080_v55 = vpop.f32.mrf.mxu0 }
 0x1b8   : > { %v4135_v19 = vpop.f32.mrf.mxu1 }
 0x1ba   : > { %v2275_v62 = vpop.f32.mrf.mxu1 }
 0x1bb   : > { %v4082_v9 = vpop.f32.mrf.mxu0 }
 0x1bd   : > { %v2090_v42 = vpop.f32.mrf.mxu0 }
 0x1be   : > { %v4138_v41 = vpop.f32.mrf.mxu1  ;;  %v2153_v52 = vadd.f32 %v2090_v42, %v1913_v13 }
 0x1c0   : > { %v2285_v30 = vpop.f32.mrf.mxu1 }
 0x1c1   : > { %v4085_v17 = vpop.f32.mrf.mxu0 }
 0x1c3   : > { %v2100_v53 = vpop.f32.mrf.mxu0 }
 0x1c4   : > { %v5760_v16 = vpop.f32.mrf.mxu1  ;;  %v2155_v42 = vadd.f32 %v2100_v53, %v1923_v34  ;;  %v1948_v53 = vadd.f32 %v5734_v2, %v5732_v5 }
 0x1c6   : > { %v5762_v7 = vpop.f32.mrf.mxu1 }
 0x1c7   : > { %v5764_v25 = vpop.f32.mrf.mxu0 }
 0x1c9   : > { %v5768_v48 = vpop.f32.mrf.mxu0 }
 0x1ca   : > { %v5766_v22 = vpop.f32.mrf.mxu1 }
 0x1cc   : > { %v5770_v37 = vpop.f32.mrf.mxu1 }
 0x1cd   : > { %v5772_v27 = vpop.f32.mrf.mxu0 }
 0x1cf   : > { %v5776_v0 = vpop.f32.mrf.mxu0 }
 0x1d0   : > { %v5774_v3 = vpop.f32.mrf.mxu1 }
 0x1d2   : > { %v5778_v26 = vpop.f32.mrf.mxu1 }
 0x1d3   : > { %5917 = vst [vmem:[#allocation7_spill] sm:$0xff] %v5778_v26  ;;  %v5780_v58 = vpop.f32.mrf.mxu0 }
 0x1d4   : > { %5918 = vst [vmem:[#allocation8_spill] sm:$0xff] %v5780_v58 }
 0x1d5   : > { %v5784_v29 = vpop.f32.mrf.mxu0 }
 0x1d6   : > { %v5782_v45 = vpop.f32.mrf.mxu1  ;;  %5920 = vst [vmem:[#allocation10_spill] sm:$0xff] %v5784_v29 }
 0x1d7   : > { %5919 = vst [vmem:[#allocation9_spill] sm:$0xff] %v5782_v45  ;;  %v1908_v45 = vadd.f32 %v5686_v38, %v5684_v21 }
 0x1d8   : > { %v5786_v47 = vpop.f32.mrf.mxu1 }
 0x1d9   : > { %5921 = vst [vmem:[#allocation11_spill] sm:$0xff] %v5786_v47  ;;  %v5790_v32 = vpop.f32.mrf.mxu0  ;;  %v1903_v47 = vadd.f32 %v5690_v36, %v5688_v15  ;;  %v2152_v10 = vadd.f32 %v4079_v20, %v1908_v45  ;;  %v1928_v15 = vadd.f32 %v5710_v11, %v5708_v4  ;;  %v2154_v36 = vadd.f32 %v4082_v9, %v1918_v1 }
 0x1da   : > { %5922 = vst [vmem:[#allocation12_spill] sm:$0xff] %v5790_v32  ;;  %v1938_v11 = vadd.f32 %v5722_v63, %v5720_v43 }
 0x1db   : > { %v5796_v26 = vpop.f32.mrf.mxu0  ;;  %v2151_v58 = vadd.f32 %v2080_v55, %v1903_v47  ;;  %v2347_v38 = vadd.f32 %v4135_v19, %v2152_v10  ;;  %v2156_v46 = vadd.f32 %v4085_v17, %v1928_v15  ;;  %v2349_v9 = vadd.f32 %v4138_v41, %v2154_v36 }
 0x1dc   : > { %v5794_v23 = vpop.f32.mrf.mxu1  ;;  %v1933_v17 = vadd.f32 %v5726_v31, %v5724_v24  ;;  %v2160_v36 = vadd.f32 %v5772_v27, %v1948_v53 }
 0x1dd   : > { %v2346_v39 = vadd.f32 %v2275_v62, %v2151_v58  ;;  %v2348_v62 = vadd.f32 %v2285_v30, %v2153_v52  ;;  %v2351_v10 = vadd.f32 %v5760_v16, %v2156_v46 }
 0x1de   : > { %v5800_v29 = vpop.f32.mrf.mxu1  ;;  %v2355_v46 = vadd.f32 %v5774_v3, %v2160_v36 }
 0x1df   : > { %v4188_v32 = vpop.f32.mrf.mxu0 }
 0x1e0   : > { %v2540_v57 = vadd.f32 %v4188_v32, %v2345_v8 }
 0x1e1   : > { %v4244_v50 = vpop.f32.mrf.mxu1  ;;  %v2460_v21 = vpop.f32.mrf.mxu0 }
 0x1e2   : > { %v2735_v51 = vadd.f32 %v4244_v50, %v2540_v57  ;;  %v2539_v14 = vadd.f32 %v2460_v21, %v2344_v61  ;;  %v2158_v57 = vadd.f32 %v5764_v25, %v1938_v11  ;;  %v2350_v50 = vadd.f32 %v5762_v7, %v2155_v42  ;;  %v5926_v11 = vld [vmem:[#allocation5_spill] sm:$0xff]  ;;  %v5928_v42 = vld [vmem:[#allocation10_spill] sm:$0xff] }
 0x1e3   : > { %v2655_v33 = vpop.f32.mrf.mxu1  ;;  %v4191_v56 = vpop.f32.mrf.mxu0  ;;  %v2157_v21 = vadd.f32 %v5768_v48, %v1933_v17 }
 0x1e4   : > { %v2751_v20 = vadd.f32 %v5591_v44, %v2735_v51  ;;  %v2734_v55 = vadd.f32 %v2655_v33, %v2539_v14  ;;  %v2542_v59 = vadd.f32 %v4191_v56, %v2347_v38  ;;  %v1943_v14 = vadd.f32 %v5738_v28, %v5736_v35 }
 0x1e5   : > { %v4247_v49 = vpop.f32.mrf.mxu1  ;;  %v2470_v19 = vpop.f32.mrf.mxu0  ;;  %v2353_v15 = vadd.f32 %v5766_v22, %v2158_v57  ;;  %v1958_v56 = vadd.f32 %v5746_v60, %v5744_v40  ;;  %v2352_v35 = vadd.f32 %v5770_v37, %v2157_v21 }
 0x1e6   : > { %v3177_v45 = vmul.f32 -1.442695, %v2751_v20  ;;  %v2750_v61 = vadd.f32 %v5591_v44, %v2734_v55  ;;  %v2737_v47 = vadd.f32 %v4247_v49, %v2542_v59  ;;  %v2541_v4 = vadd.f32 %v2470_v19, %v2346_v39  ;;  %v5923_v19 = vld [vmem:[#allocation8_spill] sm:$0xff] }
 0x1e7   : > { %v2665_v58 = vpop.f32.mrf.mxu1  ;;  %v4194_v32 = vpop.f32.mrf.mxu0  ;;  %v1953_v39 = vadd.f32 %v5750_v12, %v5748_v54  ;;  %v2159_v49 = vadd.f32 %v5776_v0, %v1943_v14 }
 0x1e8   : > { %4371 = vpow2.f32 %v3177_v45  ;;  %v3176_v8 = vmul.f32 -1.442695, %v2750_v61  ;;  %v2753_v6 = vadd.f32 %v5591_v44, %v2737_v47  ;;  %v2736_v18 = vadd.f32 %v2665_v58, %v2541_v4  ;;  %v5924_v61 = vld [vmem:[#allocation3_spill] sm:$0xff]  ;;  %v5925_v47 = vld [vmem:[#allocation4_spill] sm:$0xff] }
 0x1e9   : > { %v2544_v1 = vadd.f32 %v4194_v32, %v2349_v9  ;;  %v4250_v13 = vpop.f32.mrf.mxu1  ;;  %v2480_v43 = vpop.f32.mrf.mxu0  ;;  %v2162_v45 = vadd.f32 %v5923_v19, %v1958_v56  ;;  %v1968_v4 = vadd.f32 %v5925_v47, %v5924_v61  ;;  %v5927_v9 = vld [vmem:[#allocation6_spill] sm:$0xff]  ;;  %v2161_v3 = vadd.f32 %v5928_v42, %v1953_v39 }
 0x1ea   : > { %4373 = vpow2.f32 %v3176_v8  ;;  %v3179_v63 = vmul.f32 -1.442695, %v2753_v6  ;;  %v2752_v41 = vadd.f32 %v5591_v44, %v2736_v18  ;;  %v2543_v30 = vadd.f32 %v2480_v43, %v2348_v62  ;;  %v5931_v43 = vld [vmem:[#allocation12_spill] sm:$0xff] }
 0x1eb   : > { %v2739_v24 = vadd.f32 %v4250_v13, %v2544_v1  ;;  %v2675_v31 = vpop.f32.mrf.mxu1  ;;  %v4197_v16 = vpop.f32.mrf.mxu0  ;;  %v1963_v62 = vadd.f32 %v5927_v9, %v5926_v11  ;;  %v5930_v1 = vld [vmem:[#allocation9_spill] sm:$0xff] }
 0x1ec   : > { %4375 = vpow2.f32 %v3179_v63  ;;  %v3178_v25 = vmul.f32 -1.442695, %v2752_v41  ;;  %v2738_v38 = vadd.f32 %v2675_v31, %v2543_v30  ;;  %v2546_v51 = vadd.f32 %v4197_v16, %v2351_v10  ;;  %v5929_v10 = vld [vmem:[#allocation7_spill] sm:$0xff] }
 0x1ed   : > { %v2755_v5 = vadd.f32 %v5591_v44, %v2739_v24  ;;  %v4253_v2 = vpop.f32.mrf.mxu1  ;;  %v2490_v7 = vpop.f32.mrf.mxu0  ;;  %v2354_v57 = vadd.f32 %v5929_v10, %v2159_v49  ;;  %v2357_v13 = vadd.f32 %v5930_v1, %v2162_v45  ;;  %v2164_v63 = vadd.f32 %v5931_v43, %v1968_v4  ;;  %v5932_v16 = vld [vmem:[#allocation11_spill] sm:$0xff] }
 0x1ee   : > { %4377 = vpow2.f32 %v3178_v25  ;;  %v2754_v48 = vadd.f32 %v5591_v44, %v2738_v38  ;;  %v2741_v52 = vadd.f32 %v4253_v2, %v2546_v51  ;;  %v2545_v33 = vadd.f32 %v2490_v7, %v2350_v50 }
 0x1ef   : > { %v3181_v28 = vmul.f32 -1.442695, %v2755_v5  ;;  %v2685_v22 = vpop.f32.mrf.mxu1  ;;  %v4200_v27 = vpop.f32.mrf.mxu0  ;;  %v2356_v25 = vadd.f32 %v5932_v16, %v2161_v3  ;;  %v2163_v38 = vadd.f32 %v5796_v26, %v1963_v62 }
 0x1f0   : > { %v3180_v20 = vmul.f32 -1.442695, %v2754_v48  ;;  %v2757_v55 = vadd.f32 %v5591_v44, %v2741_v52  ;;  %v2740_v59 = vadd.f32 %v2685_v22, %v2545_v33  ;;  %v2548_v34 = vadd.f32 %v4200_v27, %v2353_v15 }
 0x1f1   : > { %4379 = vpow2.f32 %v3181_v28  ;;  %v4256_v40 = vpop.f32.mrf.mxu1  ;;  %v2500_v60 = vpop.f32.mrf.mxu0  ;;  %v2359_v52 = vadd.f32 %v5794_v23, %v2164_v63 }
 0x1f2   : > { %4381 = vpow2.f32 %v3180_v20  ;;  %v3183_v54 = vmul.f32 -1.442695, %v2757_v55  ;;  %v2756_v12 = vadd.f32 %v5591_v44, %v2740_v59  ;;  %v2743_v37 = vadd.f32 %v4256_v40, %v2548_v34 }
 0x1f3   : > { %v2547_v58 = vadd.f32 %v2500_v60, %v2352_v35  ;;  %v2695_v0 = vpop.f32.mrf.mxu1  ;;  %v4203_v32 = vpop.f32.mrf.mxu0  ;;  %v2358_v20 = vadd.f32 %v5800_v29, %v2163_v38 }
 0x1f4   : > { %4383 = vpow2.f32 %v3183_v54  ;;  %v3182_v8 = vmul.f32 -1.442695, %v2756_v12  ;;  %v2759_v6 = vadd.f32 %v5591_v44, %v2743_v37  ;;  %v2550_v18 = vadd.f32 %v4203_v32, %v2355_v46 }
 0x1f5   : > { %v4372_v17 = vpop.eup %4371  ;;  %v2742_v41 = vadd.f32 %v2695_v0, %v2547_v58  ;;  %v4259_v30 = vpop.f32.mrf.mxu1 }
 0x1f6   : > { %v2510_v53 = vpop.f32.mrf.mxu0  ;;  %v2815_v50 = vadd.f32 1.0, %v4372_v17  ;;  %4385 = vpow2.f32 %v3182_v8  ;;  %v3185_v21 = vmul.f32 -1.442695, %v2759_v6  ;;  %v2745_v24 = vadd.f32 %v4259_v30, %v2550_v18 }
 0x1f7   : > { %v4374_v31 = vpop.eup %4373  ;;  %v2758_v51 = vadd.f32 %v5591_v44, %v2742_v41  ;;  %v2549_v14 = vadd.f32 %v2510_v53, %v2354_v57  ;;  %v2705_v15 = vpop.f32.mrf.mxu1 }
 0x1f8   : > { %v4206_v36 = vpop.f32.mrf.mxu0  ;;  %4387 = vrcp.f32 %v2815_v50  ;;  %v2814_v5 = vadd.f32 1.0, %v4374_v31  ;;  %v2761_v2 = vadd.f32 %v5591_v44, %v2745_v24 }
 0x1f9   : > { %v2552_v7 = vadd.f32 %v4206_v36, %v2357_v13  ;;  %v4376_v48 = vpop.eup %4375  ;;  %4389 = vpow2.f32 %v3185_v21  ;;  %v3184_v33 = vmul.f32 -1.442695, %v2758_v51  ;;  %v2744_v56 = vadd.f32 %v2705_v15, %v2549_v14  ;;  %v4262_v39 = vpop.f32.mrf.mxu1 }
 0x1fa   : > { %v2520_v35 = vpop.f32.mrf.mxu0  ;;  %4391 = vrcp.f32 %v2814_v5  ;;  %v2817_v26 = vadd.f32 1.0, %v4376_v48  ;;  %v3187_v28 = vmul.f32 -1.442695, %v2761_v2 }
 0x1fb   : > { %v2747_v22 = vadd.f32 %v4262_v39, %v2552_v7  ;;  %v4378_v27 = vpop.eup %4377  ;;  %4393 = vpow2.f32 %v3184_v33  ;;  %v2760_v55 = vadd.f32 %v5591_v44, %v2744_v56  ;;  %v2551_v59 = vadd.f32 %v2520_v35, %v2356_v25  ;;  %v2715_v34 = vpop.f32.mrf.mxu1 }
 0x1fc   : > { %v4209_v46 = vpop.f32.mrf.mxu0  ;;  %4395 = vrcp.f32 %v2817_v26  ;;  %v2816_v23 = vadd.f32 1.0, %v4378_v27 }
 0x1fd   : > { %v2763_v49 = vadd.f32 %v5591_v44, %v2747_v22  ;;  %v2554_v19 = vadd.f32 %v4209_v46, %v2359_v52  ;;  %4397 = vpow2.f32 %v3187_v28  ;;  %v3186_v45 = vmul.f32 -1.442695, %v2760_v55  ;;  %v4265_v60 = vpop.f32.mrf.mxu1 }
 0x1fe   : > { %v2746_v40 = vadd.f32 %v2715_v34, %v2551_v59  ;;  %v2530_v54 = vpop.f32.mrf.mxu0  ;;  %v4380_v12 = vpop.eup %4379  ;;  %4399 = vrcp.f32 %v2816_v23 }
 0x1ff   : > { %v3189_v37 = vmul.f32 -1.442695, %v2763_v49  ;;  %v2749_v29 = vadd.f32 %v4265_v60, %v2554_v19  ;;  %v2553_v61 = vadd.f32 %v2530_v54, %v2358_v20  ;;  %v4382_v47 = vpop.eup %4381  ;;  %v2819_v4 = vadd.f32 1.0, %v4380_v12  ;;  %v2725_v9 = vpop.f32.mrf.mxu1 }
 0x200   : > { %4401 = vpow2.f32 %v3186_v45  ;;  %v2762_v11 = vadd.f32 %v5591_v44, %v2746_v40  ;;  %v2818_v62 = vadd.f32 1.0, %v4382_v47 }
 0x201   : > { %4403 = vpow2.f32 %v3189_v37  ;;  %v2765_v42 = vadd.f32 %v5591_v44, %v2749_v29  ;;  %v2748_v3 = vadd.f32 %v2725_v9, %v2553_v61  ;;  %v4384_v58 = vpop.eup %4383 }
 0x202   : > { %4405 = vrcp.f32 %v2819_v4  ;;  %v3188_v0 = vmul.f32 -1.442695, %v2762_v11  ;;  %v2821_v32 = vadd.f32 1.0, %v4384_v58 }
 0x203   : > { %4407 = vrcp.f32 %v2818_v62  ;;  %v3191_v8 = vmul.f32 -1.442695, %v2765_v42  ;;  %v2764_v6 = vadd.f32 %v5591_v44, %v2748_v3  ;;  %v4386_v18 = vpop.eup %4385 }
 0x204   : > { %4409 = vpow2.f32 %v3188_v0  ;;  %v2820_v17 = vadd.f32 1.0, %v4386_v18 }
 0x205   : > { %4411 = vrcp.f32 %v2821_v32  ;;  %v3190_v10 = vmul.f32 -1.442695, %v2764_v6  ;;  %v4388_v57 = vpop.eup %4387 }
 0x206   : > { %4413 = vpow2.f32 %v3191_v8  ;;  %v4390_v1 = vpop.eup %4389  ;;  %3193 = vst.msk [vmem:[%s5653_s5 + $0x28] sm:$0xff] %vm1598_vm0, %v4388_v57 }
 0x207   : > { %4415 = vrcp.f32 %v2820_v17  ;;  %v4392_v13 = vpop.eup %4391  ;;  %v2823_v43 = vadd.f32 1.0, %v4390_v1 }
 0x208   : > { %4417 = vpow2.f32 %v3190_v10  ;;  %v4394_v63 = vpop.eup %4393  ;;  %3192 = vst.msk [vmem:[%s5653_s5 + $0x20] sm:$0xff] %vm1598_vm0, %v4392_v13 }
 0x209   : > { %v4396_v44 = vpop.eup %4395  ;;  %4419 = vrcp.f32 %v2823_v43  ;;  %v2822_v41 = vadd.f32 1.0, %v4394_v63 }
 0x20a   : > { %v4398_v30 = vpop.eup %4397  ;;  %3195 = vst.msk [vmem:[%s5653_s5 + $0x38] sm:$0xff] %vm1598_vm0, %v4396_v44 }
 0x20b   : > { %v4400_v53 = vpop.eup %4399  ;;  %4421 = vrcp.f32 %v2822_v41  ;;  %v2825_v50 = vadd.f32 1.0, %v4398_v30 }
 0x20c   : > { %3194 = vst.msk [vmem:[%s5653_s5 + $0x30] sm:$0xff] %vm1598_vm0, %v4400_v53 }
 0x20d   : > { %v4402_v21 = vpop.eup %4401  ;;  %4423 = vrcp.f32 %v2825_v50 }
 0x20e   : > { %v4404_v24 = vpop.eup %4403  ;;  %v2824_v31 = vadd.f32 1.0, %v4402_v21 }
 0x20f   : > { %v4406_v16 = vpop.eup %4405  ;;  %v2827_v25 = vadd.f32 1.0, %v4404_v24 }
 0x210   : > { %v4408_v38 = vpop.eup %4407  ;;  %3197 = vst.msk [vmem:[%s5653_s5 + $0x68] sm:$0xff] %vm1598_vm0, %v4406_v16  ;;  %4425 = vrcp.f32 %v2824_v31 }
 0x211   : > { %v4410_v51 = vpop.eup %4409  ;;  %3196 = vst.msk [vmem:[%s5653_s5 + $0x60] sm:$0xff] %vm1598_vm0, %v4408_v38  ;;  %4427 = vrcp.f32 %v2827_v25 }
 0x212   : > { %v4412_v14 = vpop.eup %4411  ;;  %v2826_v15 = vadd.f32 1.0, %v4410_v51 }
 0x213   : > { %v4414_v36 = vpop.eup %4413  ;;  %3199 = vst.msk [vmem:[%s5653_s5 + $0x78] sm:$0xff] %vm1598_vm0, %v4412_v14 }
 0x214   : > { %v4416_v5 = vpop.eup %4415  ;;  %4429 = vrcp.f32 %v2826_v15  ;;  %v2829_v2 = vadd.f32 1.0, %v4414_v36 }
 0x215   : > { %v4418_v7 = vpop.eup %4417  ;;  %3198 = vst.msk [vmem:[%s5653_s5 + $0x70] sm:$0xff] %vm1598_vm0, %v4416_v5 }
 0x216   : > { %4431 = vrcp.f32 %v2829_v2  ;;  %v2828_v48 = vadd.f32 1.0, %v4418_v7  ;;  %v4420_v52 = vpop.eup %4419 }
 0x217   : > { %3201 = vst.msk [vmem:[%s5653_s5 + $0xa8] sm:$0xff] %vm1598_vm0, %v4420_v52 }
 0x218   : > { %4433 = vrcp.f32 %v2828_v48  ;;  %v4422_v33 = vpop.eup %4421 }
 0x219   : > { %3200 = vst.msk [vmem:[%s5653_s5 + $0xa0] sm:$0xff] %vm1598_vm0, %v4422_v33 }
 0x21a   : > { %v4424_v56 = vpop.eup %4423 }
 0x21b   : > { %3203 = vst.msk [vmem:[%s5653_s5 + $0xb8] sm:$0xff] %vm1598_vm0, %v4424_v56 }
 0x21d   : > { %v4426_v39 = vpop.eup %4425 }
 0x21e   : > { %v4428_v35 = vpop.eup %4427  ;;  %3202 = vst.msk [vmem:[%s5653_s5 + $0xb0] sm:$0xff] %vm1598_vm0, %v4426_v39 }
 0x21f   : > { %3205 = vst.msk [vmem:[%s5653_s5 + $0xe8] sm:$0xff] %vm1598_vm0, %v4428_v35 }
 0x221   : > { %v4430_v26 = vpop.eup %4429 }
 0x222   : > { %3204 = vst.msk [vmem:[%s5653_s5 + $0xe0] sm:$0xff] %vm1598_vm0, %v4430_v26 }
 0x223   : > { %v4432_v28 = vpop.eup %4431 }
 0x224   : > { %3207 = vst.msk [vmem:[%s5653_s5 + $0xf8] sm:$0xff] %vm1598_vm0, %v4432_v28 }
 0x225   : > { %v4434_v22 = vpop.eup %4433 }
 0x226   : > { %3206 = vst.msk [vmem:[%s5653_s5 + $0xf0] sm:$0xff] %vm1598_vm0, %v4434_v22 }
 0x227 PF: > { %s13_s16 = sadd.s32 1, %s4483_s16   ;;  %s5933_s12 = smov %s4475_s14 }
 0x228   : > { %p10_p7 = scmp.ge.s32.totalorder %s13_s16, 18   ;;  %s5934_s13 = smov %s4479_s15 }
 0x229   : > { %s5935_s14 = smov %s5938_s17  ;;  %s5936_s15 = smov %s5942_s18 }
 0x22a   :  { %12 = sbr.rel (!%p10_p7) target bundleno = 3 (0x3), region = 83 }

</bundles_post_ra>
